<compile_context>
chip_gen: v7x
topology: tpu7x:2x2x1
jax: 0.10.0
libtpu: 0.0.40
codegen_flags: <defaults>
</compile_context>

<pallas_src>
import math

import jax
import jax.numpy as jnp
from jax.experimental import pallas as pl
from jax.experimental.pallas import tpu as pltpu

# ---------------- model hyper-parameters (small, consistent with the module) --------------
B, T, F = 2, 8, 12          # batch, seq len, in_channels
D = 32                      # latent_dim (d_model)
H = 4                       # n_heads
DH = D // H                 # head dim
L = 2                       # n_layers
FF = 4 * D                  # dim_feedforward
C = 5                       # n_classes
EPS = 1e-5                  # LayerNorm eps (PyTorch default)

N = B * T                   # rows after collapsing (batch, time) -> 2-D activations
HB = H * B                  # fused (head, batch) count for batched attention matmuls
QKVB = 3 * HB               # q, k, v stacked along the leading (batch) axis
WLANE = 128                 # lane width of the packed weight slab and the fused output

# ---------------- packed weight-slab row layout (all static Python ints) ------------------
R_PEB = 0                        # (N, D)   positional encoding + input-proj bias, pre-tiled
R_WI = R_PEB + N                 # (F, D)   input projection
R_WOUT = 32                      # (D, 128) [ I_D | classifier W | 0 ]   (lane-dense output)
R_BOUT = R_WOUT + D              # (1, 128) [ 0   | classifier b | 0 ]
R_LAYER0 = R_BOUT + 8            # per-layer sections start here
LV_LN1W, LV_LN1B, LV_LN2W, LV_LN2B, LV_BO, LV_B2, LV_B1 = 0, 1, 2, 3, 4, 5, 6
LV_W1 = 8                        # (D, FF)
LV_W2 = LV_W1 + D                # (FF, D)
LAYER_ROWS = LV_W2 + FF
TOTAL_ROWS = R_LAYER0 + L * LAYER_ROWS
assert R_WI + F <= R_WOUT and R_BOUT + 1 <= R_LAYER0


def _layernorm(x2, w, b):
    """x2: (rows, D); w, b: (1, D). PyTorch LayerNorm semantics (biased variance)."""
    mu = jnp.mean(x2, axis=-1, keepdims=True)
    xc = x2 - mu
    var = jnp.mean(xc * xc, axis=-1, keepdims=True)
    return xc * jax.lax.rsqrt(var + EPS) * w + b


def _encoder_kernel(x_ref, slab_ref, wqkvh_ref, bqkvh_ref, woh_ref, out_ref):
    f32 = jnp.float32
    x2d = x_ref[...]                                             # (N, F)

    # ---- input projection + (positional encoding + input bias): one 2-D MXU dot ----
    wi = slab_ref[R_WI:R_WI + F, 0:D]                            # (F, D)
    peb = slab_ref[R_PEB:R_PEB + N, 0:D]                         # (N, D)
    h = jnp.dot(x2d, wi, preferred_element_type=f32) + peb       # (N, D)

    for l in range(L):                                           # L is static -> unrolled
        base = R_LAYER0 + l * LAYER_ROWS
        ln1w = slab_ref[base + LV_LN1W:base + LV_LN1W + 1, 0:D]
        ln1b = slab_ref[base + LV_LN1B:base + LV_LN1B + 1, 0:D]
        ln2w = slab_ref[base + LV_LN2W:base + LV_LN2W + 1, 0:D]
        ln2b = slab_ref[base + LV_LN2B:base + LV_LN2B + 1, 0:D]
        bo = slab_ref[base + LV_BO:base + LV_BO + 1, 0:D]
        b2 = slab_ref[base + LV_B2:base + LV_B2 + 1, 0:D]
        b1 = slab_ref[base + LV_B1:base + LV_B1 + 1, 0:FF]
        w1 = slab_ref[base + LV_W1:base + LV_W1 + D, 0:FF]       # (D, FF)
        w2 = slab_ref[base + LV_W2:base + LV_W2 + FF, 0:D]       # (FF, D)

        # ---------------- self-attention block (pre-norm), all heads fused ----------------
        hn = _layernorm(h, ln1w, ln1b)                           # (N, D)
        hrep = jnp.broadcast_to(hn.reshape(1, B, T, D),
                                (3 * H, B, T, D)).reshape(QKVB, T, D)
        wqkv = wqkvh_ref[l * QKVB:(l + 1) * QKVB, :, :]          # (QKVB, DH, D)
        bqkv = bqkvh_ref[l * QKVB:(l + 1) * QKVB, :, :]          # (QKVB, 1, DH)
        # (head, batch)-batched QKV projection; 1/sqrt(DH) already folded into the Q block.
        qkv = jnp.einsum('xtd,xkd->xtk', hrep, wqkv,
                         preferred_element_type=f32) + bqkv      # (QKVB, T, DH)
        q = qkv[0:HB]                                            # leading-axis slices only,
        k = qkv[HB:2 * HB]                                       # no lane-axis head slicing
        v = qkv[2 * HB:3 * HB]

        s = jnp.einsum('xtd,xsd->xts', q, k,
                       preferred_element_type=f32)               # (HB, T, T)
        s = s - jnp.max(s, axis=-1, keepdims=True)
        p = jnp.exp(s)
        # NOTE: exact f32 inverse kept (instead of pl.reciprocal(approx=True)) so the kernel
        # stays bit-tight against the f32 reference; negligible at these shapes.
        p = p * (1.0 / jnp.sum(p, axis=-1, keepdims=True))
        ctx = jnp.einsum('xts,xsd->xtd', p, v,
                         preferred_element_type=f32)             # (HB, T, DH)

        wo = woh_ref[l * HB:(l + 1) * HB, :, :]                  # (HB, DH, D)
        proj = jnp.einsum('xtk,xkd->xtd', ctx, wo,
                          preferred_element_type=f32)            # (HB, T, D)
        attn = proj[0:B]                                         # merge heads: sum of
        for hh in range(1, H):                                   # leading-axis slices
            attn = attn + proj[hh * B:(hh + 1) * B]
        h = h + attn.reshape(N, D) + bo                          # residual + out-proj bias

        # ---------------- feed-forward block (pre-norm), plain 2-D dots -------------------
        hn2 = _layernorm(h, ln2w, ln2b)
        ff = jnp.dot(hn2, w1, preferred_element_type=f32) + b1   # (N, FF)
        ff = jnp.maximum(ff, 0.0)                                # default activation = relu
        ff = jnp.dot(ff, w2, preferred_element_type=f32) + b2    # (N, D)
        h = h + ff

    # Mean-pool over time, then a fused [identity | classifier] projection so the single
    # output slab is 128 lanes wide (unmasked stores). Wrapper slices latent / logits.
    latent = jnp.mean(h.reshape(B, T, D), axis=1)                # (B, D)
    w_out = slab_ref[R_WOUT:R_WOUT + D, :]                       # (D, 128)
    b_out = slab_ref[R_BOUT:R_BOUT + 1, :]                       # (1, 128)
    out_ref[...] = jnp.dot(latent, w_out, preferred_element_type=f32) + b_out


def transformer_encoder_pallas(x, packed, return_logits=False):
    """x: (B, T, F) float32. Entire forward runs inside one grid-less Pallas call (VMEM)."""
    slab, wqkvh, bqkvh, woh = packed
    inputs = (x.reshape(N, F).astype(jnp.float32), slab, wqkvh, bqkvh, woh)
    vmem = pl.BlockSpec(memory_space=pltpu.MemorySpace.VMEM)
    out = pl.pallas_call(
        _encoder_kernel,
        out_shape=jax.ShapeDtypeStruct((B, WLANE), jnp.float32),
        in_specs=[vmem] * len(inputs),   # built from the same tuple -> counts always match
        out_specs=vmem,
    )(*inputs)
    latent = out[:, 0:D]
    logits = out[:, D:D + C]
    return (latent, logits) if return_logits else latent


# --------------------------- host-side parameter construction ----------------------------
def make_positional_encoding():
    pos = jnp.arange(T, dtype=jnp.float32)[:, None]
    div = jnp.exp(jnp.arange(0, D, 2, dtype=jnp.float32) * (-math.log(10000.0) / D))
    pe = jnp.zeros((T, D), jnp.float32)
    pe = pe.at[:, 0::2].set(jnp.sin(pos * div))
    pe = pe.at[:, 1::2].set(jnp.cos(pos * div))
    return pe


def make_params(key):
    """Deterministic synthetic parameters in 'math layout' (already W^T vs. PyTorch)."""
    ks = jax.random.split(key, 16)
    s = 0.05
    wi = s * jax.random.normal(ks[0], (F, D), jnp.float32)        # input_proj
    bi = s * jax.random.normal(ks[1], (1, D), jnp.float32)
    ln1w = 1.0 + s * jax.random.normal(ks[2], (L, 1, D), jnp.float32)
    ln1b = s * jax.random.normal(ks[3], (L, 1, D), jnp.float32)
    wqkv = s * jax.random.normal(ks[4], (L, D, 3 * D), jnp.float32)   # in_proj_weight^T
    bqkv = s * jax.random.normal(ks[5], (L, 1, 3 * D), jnp.float32)
    wo = s * jax.random.normal(ks[6], (L, D, D), jnp.float32)         # out_proj^T
    bo = s * jax.random.normal(ks[7], (L, 1, D), jnp.float32)
    ln2w = 1.0 + s * jax.random.normal(ks[8], (L, 1, D), jnp.float32)
    ln2b = s * jax.random.normal(ks[9], (L, 1, D), jnp.float32)
    w1 = s * jax.random.normal(ks[10], (L, D, FF), jnp.float32)       # linear1^T
    b1 = s * jax.random.normal(ks[11], (L, 1, FF), jnp.float32)
    w2 = s * jax.random.normal(ks[12], (L, FF, D), jnp.float32)       # linear2^T
    b2 = s * jax.random.normal(ks[13], (L, 1, D), jnp.float32)
    wc = s * jax.random.normal(ks[14], (D, C), jnp.float32)           # classifier^T
    bc = s * jax.random.normal(ks[15], (1, C), jnp.float32)
    return (wi, bi, ln1w, ln1b, wqkv, bqkv, wo, bo,
            ln2w, ln2b, w1, b1, w2, b2, wc, bc)


def pack_params(pe, params):
    """Repack raw parameters into: one 128-lane slab + three head-major stacks."""
    (wi, bi, ln1w, ln1b, wqkv, bqkv, wo, bo,
     ln2w, ln2b, w1, b1, w2, b2, wc, bc) = params
    scale = 1.0 / math.sqrt(DH)

    # ---- flat 2-D weight slab (single DMA) ----
    slab = jnp.zeros((TOTAL_ROWS, WLANE), jnp.float32)
    peb = jnp.tile(pe + bi, (B, 1))                               # (N, D): PE + input bias
    slab = slab.at[R_PEB:R_PEB + N, 0:D].set(peb)
    slab = slab.at[R_WI:R_WI + F, 0:D].set(wi)
    w_out = jnp.zeros((D, WLANE), jnp.float32)
    w_out = w_out.at[:, 0:D].set(jnp.eye(D, dtype=jnp.float32))   # latent pass-through
    w_out = w_out.at[:, D:D + C].set(wc)                          # classifier
    slab = slab.at[R_WOUT:R_WOUT + D, :].set(w_out)
    b_out = jnp.zeros((1, WLANE), jnp.float32).at[:, D:D + C].set(bc)
    slab = slab.at[R_BOUT:R_BOUT + 1, :].set(b_out)
    for l in range(L):
        base = R_LAYER0 + l * LAYER_ROWS
        slab = slab.at[base + LV_LN1W, 0:D].set(ln1w[l, 0])
        slab = slab.at[base + LV_LN1B, 0:D].set(ln1b[l, 0])
        slab = slab.at[base + LV_LN2W, 0:D].set(ln2w[l, 0])
        slab = slab.at[base + LV_LN2B, 0:D].set(ln2b[l, 0])
        slab = slab.at[base + LV_BO, 0:D].set(bo[l, 0])
        slab = slab.at[base + LV_B2, 0:D].set(b2[l, 0])
        slab = slab.at[base + LV_B1, 0:FF].set(b1[l, 0])
        slab = slab.at[base + LV_W1:base + LV_W1 + D, 0:FF].set(w1[l])
        slab = slab.at[base + LV_W2:base + LV_W2 + FF, 0:D].set(w2[l])

    # ---- head-major attention weights; batch index x = part*H*B + head*B + batch ----
    wqkvh = jnp.zeros((L * QKVB, DH, D), jnp.float32)
    bqkvh = jnp.zeros((L * QKVB, 1, DH), jnp.float32)
    woh = jnp.zeros((L * HB, DH, D), jnp.float32)
    for l in range(L):
        for part in range(3):                                     # 0=q (scaled), 1=k, 2=v
            fac = scale if part == 0 else 1.0
            for hd in range(H):
                col0 = part * D + hd * DH
                w_sl = (wqkv[l][:, col0:col0 + DH] * fac).T       # (DH, D)
                b_sl = (bqkv[l][0, col0:col0 + DH] * fac)[None, :]
                for bb in range(B):
                    xi = l * QKVB + part * HB + hd * B + bb
                    wqkvh = wqkvh.at[xi].set(w_sl)
                    bqkvh = bqkvh.at[xi].set(b_sl)
        for hd in range(H):
            w_sl = wo[l][hd * DH:(hd + 1) * DH, :]                # (DH, D)
            for bb in range(B):
                woh = woh.at[l * HB + hd * B + bb].set(w_sl)
    return slab, wqkvh, bqkvh, woh


# --------------------------------- pure-JAX reference -------------------------------------
def _reference_forward(x, pe, params):
    (wi, bi, ln1w, ln1b, wqkv, bqkv, wo, bo,
     ln2w, ln2b, w1, b1, w2, b2, wc, bc) = params

    def ln(z, w, b):
        mu = jnp.mean(z, axis=-1, keepdims=True)
        var = jnp.mean((z - mu) ** 2, axis=-1, keepdims=True)
        return (z - mu) * jax.lax.rsqrt(var + EPS) * w + b

    h = jnp.einsum('btf,fd->btd', x, wi) + bi + pe[None, :, :]
    scale = 1.0 / math.sqrt(DH)
    for l in range(L):
        hn = ln(h, ln1w[l], ln1b[l])
        qkv = jnp.einsum('btd,de->bte', hn, wqkv[l]) + bqkv[l]
        q, k, v = qkv[..., 0:D], qkv[..., D:2 * D], qkv[..., 2 * D:3 * D]
        heads = []
        for hh in range(H):
            sl = slice(hh * DH, (hh + 1) * DH)
            s = jnp.einsum('btd,bsd->bts', q[..., sl], k[..., sl]) * scale
            p = jax.nn.softmax(s, axis=-1)
            heads.append(jnp.einsum('bts,bsd->btd', p, v[..., sl]))
        attn = jnp.concatenate(heads, axis=-1)
        h = h + jnp.einsum('btd,de->bte', attn, wo[l]) + bo[l]
        hn2 = ln(h, ln2w[l], ln2b[l])
        ff = jax.nn.relu(jnp.einsum('btd,df->btf', hn2, w1[l]) + b1[l])
        h = h + jnp.einsum('btf,fd->btd', ff, w2[l]) + b2[l]
    latent = jnp.mean(h, axis=1)
    logits = latent @ wc + bc
    return latent, logits


if __name__ == "__main__":
    # Keep f32 matmul precision so kernel and reference agree tightly under validation.
    jax.config.update("jax_default_matmul_precision", "highest")

    key = jax.random.PRNGKey(0)
    kx, kp = jax.random.split(key)
    x = jax.random.normal(kx, (B, T, F), jnp.float32)
    pe = make_positional_encoding()
    params = make_params(kp)
    packed = pack_params(pe, params)

    # TODO(synk): dropout is omitted (inference / eval-mode semantics).
    latent, logits = transformer_encoder_pallas(x, packed, return_logits=True)
    latent = jax.block_until_ready(latent)
    logits = jax.block_until_ready(logits)

    ref_latent, ref_logits = _reference_forward(x, pe, params)
    assert latent.shape == (B, D) and logits.shape == (B, C)
    assert jnp.allclose(latent, ref_latent, atol=2e-3, rtol=2e-3), \
        float(jnp.max(jnp.abs(latent - ref_latent)))
    assert jnp.allclose(logits, ref_logits, atol=2e-3, rtol=2e-3), \
        float(jnp.max(jnp.abs(logits - ref_logits)))
    print("KERNEL_OK")
</pallas_src>

<mosaic_0001>
module attributes {stable_mosaic.version = 11 : i64} {
  func.func @_encoder_kernel(%arg0: memref<16x12xf32, #tpu.memory_space<vmem>>, %arg1: memref<408x128xf32, #tpu.memory_space<vmem>>, %arg2: memref<48x8x32xf32, #tpu.memory_space<vmem>>, %arg3: memref<48x1x8xf32, #tpu.memory_space<vmem>>, %arg4: memref<16x8x32xf32, #tpu.memory_space<vmem>>, %arg5: memref<2x128xf32, #tpu.memory_space<vmem>>) attributes {dimension_semantics = [], scalar_prefetch = 0 : i64, scratch_operands = 0 : i64, tpu.core_type = #tpu.core_type<tc>} {
    %c0 = arith.constant 0 : index
    %c0_0 = arith.constant 0 : index
    %0 = vector.load %arg0[%c0, %c0_0] : memref<16x12xf32, #tpu.memory_space<vmem>>, vector<16x12xf32>
    %c16 = arith.constant 16 : index
    %c0_1 = arith.constant 0 : index
    %1 = vector.load %arg1[%c16, %c0_1] : memref<408x128xf32, #tpu.memory_space<vmem>>, vector<12x32xf32>
    %c0_2 = arith.constant 0 : index
    %c0_3 = arith.constant 0 : index
    %2 = vector.load %arg1[%c0_2, %c0_3] : memref<408x128xf32, #tpu.memory_space<vmem>>, vector<16x32xf32>
    %cst = arith.constant dense<0.000000e+00> : vector<16x32xf32>
    %3 = tpu.matmul %0, %1, %cst {dimension_numbers = #tpu.dot_dimension_numbers<[1], [0], [0], [1], [0, 0, 1, 1], [], []>, precision = #tpu.contract_precision<fp32>} : vector<16x12xf32>, vector<12x32xf32>, vector<16x32xf32> -> vector<16x32xf32>
    %4 = arith.addf %3, %2 : vector<16x32xf32>
    %c72 = arith.constant 72 : index
    %c0_4 = arith.constant 0 : index
    %5 = vector.load %arg1[%c72, %c0_4] : memref<408x128xf32, #tpu.memory_space<vmem>>, vector<1x32xf32>
    %c73 = arith.constant 73 : index
    %c0_5 = arith.constant 0 : index
    %6 = vector.load %arg1[%c73, %c0_5] : memref<408x128xf32, #tpu.memory_space<vmem>>, vector<1x32xf32>
    %c74 = arith.constant 74 : index
    %c0_6 = arith.constant 0 : index
    %7 = vector.load %arg1[%c74, %c0_6] : memref<408x128xf32, #tpu.memory_space<vmem>>, vector<1x32xf32>
    %c75 = arith.constant 75 : index
    %c0_7 = arith.constant 0 : index
    %8 = vector.load %arg1[%c75, %c0_7] : memref<408x128xf32, #tpu.memory_space<vmem>>, vector<1x32xf32>
    %c76 = arith.constant 76 : index
    %c0_8 = arith.constant 0 : index
    %9 = vector.load %arg1[%c76, %c0_8] : memref<408x128xf32, #tpu.memory_space<vmem>>, vector<1x32xf32>
    %c77 = arith.constant 77 : index
    %c0_9 = arith.constant 0 : index
    %10 = vector.load %arg1[%c77, %c0_9] : memref<408x128xf32, #tpu.memory_space<vmem>>, vector<1x32xf32>
    %c78 = arith.constant 78 : index
    %c0_10 = arith.constant 0 : index
    %11 = vector.load %arg1[%c78, %c0_10] : memref<408x128xf32, #tpu.memory_space<vmem>>, vector<1x128xf32>
    %c80 = arith.constant 80 : index
    %c0_11 = arith.constant 0 : index
    %12 = vector.load %arg1[%c80, %c0_11] : memref<408x128xf32, #tpu.memory_space<vmem>>, vector<32x128xf32>
    %c112 = arith.constant 112 : index
    %c0_12 = arith.constant 0 : index
    %13 = vector.load %arg1[%c112, %c0_12] : memref<408x128xf32, #tpu.memory_space<vmem>>, vector<128x32xf32>
    %cst_13 = arith.constant dense<0.000000e+00> : vector<16xf32>
    %14 = vector.multi_reduction <add>, %4, %cst_13 [1] : vector<16x32xf32> to vector<16xf32>
    %15 = vector.shape_cast %14 : vector<16xf32> to vector<16x1xf32>
    %cst_14 = arith.constant 3.200000e+01 : f32
    %16 = vector.broadcast %cst_14 : f32 to vector<16x1xf32>
    %17 = arith.divf %15, %16 : vector<16x1xf32>
    %18 = vector.broadcast %17 : vector<16x1xf32> to vector<16x32xf32>
    %19 = arith.subf %4, %18 : vector<16x32xf32>
    %20 = arith.mulf %19, %19 : vector<16x32xf32>
    %cst_15 = arith.constant dense<0.000000e+00> : vector<16xf32>
    %21 = vector.multi_reduction <add>, %20, %cst_15 [1] : vector<16x32xf32> to vector<16xf32>
    %22 = vector.shape_cast %21 : vector<16xf32> to vector<16x1xf32>
    %cst_16 = arith.constant 3.200000e+01 : f32
    %23 = vector.broadcast %cst_16 : f32 to vector<16x1xf32>
    %24 = arith.divf %22, %23 : vector<16x1xf32>
    %cst_17 = arith.constant 9.99999974E-6 : f32
    %25 = vector.broadcast %cst_17 : f32 to vector<16x1xf32>
    %26 = arith.addf %24, %25 : vector<16x1xf32>
    %27 = math.rsqrt %26 : vector<16x1xf32>
    %28 = vector.broadcast %27 : vector<16x1xf32> to vector<16x32xf32>
    %29 = arith.mulf %19, %28 : vector<16x32xf32>
    %30 = vector.broadcast %5 : vector<1x32xf32> to vector<16x32xf32>
    %31 = arith.mulf %29, %30 : vector<16x32xf32>
    %32 = vector.broadcast %6 : vector<1x32xf32> to vector<16x32xf32>
    %33 = arith.addf %31, %32 : vector<16x32xf32>
    %34 = vector.shape_cast %33 : vector<16x32xf32> to vector<1x2x8x32xf32>
    %35 = vector.shape_cast %34 : vector<1x2x8x32xf32> to vector<1x2x8x32xf32>
    %36 = vector.broadcast %35 : vector<1x2x8x32xf32> to vector<12x2x8x32xf32>
    %37 = vector.shape_cast %36 : vector<12x2x8x32xf32> to vector<24x8x32xf32>
    %c0_18 = arith.constant 0 : index
    %c0_19 = arith.constant 0 : index
    %c0_20 = arith.constant 0 : index
    %38 = vector.load %arg2[%c0_18, %c0_19, %c0_20] : memref<48x8x32xf32, #tpu.memory_space<vmem>>, vector<24x8x32xf32>
    %c0_21 = arith.constant 0 : index
    %c0_22 = arith.constant 0 : index
    %c0_23 = arith.constant 0 : index
    %39 = vector.load %arg3[%c0_21, %c0_22, %c0_23] : memref<48x1x8xf32, #tpu.memory_space<vmem>>, vector<24x1x8xf32>
    "tpu.trace_start"() <{level = 10 : i32, message = "xtd,xkd->xtk"}> : () -> ()
    %cst_24 = arith.constant dense<0.000000e+00> : vector<24x8x8xf32>
    %40 = tpu.matmul %37, %38, %cst_24 {dimension_numbers = #tpu.dot_dimension_numbers<[2], [2], [1], [1], [0, 0, 0, 1, 1, 1], [0], [0]>, precision = #tpu.contract_precision<fp32>} : vector<24x8x32xf32>, vector<24x8x32xf32>, vector<24x8x8xf32> -> vector<24x8x8xf32>
    "tpu.trace_stop"() : () -> ()
    %41 = vector.broadcast %39 : vector<24x1x8xf32> to vector<24x8x8xf32>
    %42 = arith.addf %40, %41 : vector<24x8x8xf32>
    %43 = vector.extract_strided_slice %42 {offsets = [0, 0, 0], sizes = [8, 8, 8], strides = [1, 1, 1]} : vector<24x8x8xf32> to vector<8x8x8xf32>
    %44 = vector.extract_strided_slice %42 {offsets = [8, 0, 0], sizes = [8, 8, 8], strides = [1, 1, 1]} : vector<24x8x8xf32> to vector<8x8x8xf32>
    %45 = vector.extract_strided_slice %42 {offsets = [16, 0, 0], sizes = [8, 8, 8], strides = [1, 1, 1]} : vector<24x8x8xf32> to vector<8x8x8xf32>
    "tpu.trace_start"() <{level = 10 : i32, message = "xtd,xsd->xts"}> : () -> ()
    %cst_25 = arith.constant dense<0.000000e+00> : vector<8x8x8xf32>
    %46 = tpu.matmul %43, %44, %cst_25 {dimension_numbers = #tpu.dot_dimension_numbers<[2], [2], [1], [1], [0, 0, 0, 1, 1, 1], [0], [0]>, precision = #tpu.contract_precision<fp32>} : vector<8x8x8xf32>, vector<8x8x8xf32>, vector<8x8x8xf32> -> vector<8x8x8xf32>
    "tpu.trace_stop"() : () -> ()
    %cst_26 = arith.constant dense<0xFF800000> : vector<8x8xf32>
    %47 = vector.multi_reduction <maximumf>, %46, %cst_26 [2] : vector<8x8x8xf32> to vector<8x8xf32>
    %48 = vector.shape_cast %47 : vector<8x8xf32> to vector<8x8x1xf32>
    %49 = vector.broadcast %48 : vector<8x8x1xf32> to vector<8x8x8xf32>
    %50 = arith.subf %46, %49 : vector<8x8x8xf32>
    %51 = math.exp %50 : vector<8x8x8xf32>
    %cst_27 = arith.constant dense<0.000000e+00> : vector<8x8xf32>
    %52 = vector.multi_reduction <add>, %51, %cst_27 [2] : vector<8x8x8xf32> to vector<8x8xf32>
    %53 = vector.shape_cast %52 : vector<8x8xf32> to vector<8x8x1xf32>
    %cst_28 = arith.constant 1.000000e+00 : f32
    %54 = vector.broadcast %cst_28 : f32 to vector<8x8x1xf32>
    %55 = arith.divf %54, %53 : vector<8x8x1xf32>
    %56 = vector.broadcast %55 : vector<8x8x1xf32> to vector<8x8x8xf32>
    %57 = arith.mulf %51, %56 : vector<8x8x8xf32>
    "tpu.trace_start"() <{level = 10 : i32, message = "xts,xsd->xtd"}> : () -> ()
    %cst_29 = arith.constant dense<0.000000e+00> : vector<8x8x8xf32>
    %58 = tpu.matmul %57, %45, %cst_29 {dimension_numbers = #tpu.dot_dimension_numbers<[2], [1], [1], [2], [0, 0, 0, 1, 1, 2], [0], [0]>, precision = #tpu.contract_precision<fp32>} : vector<8x8x8xf32>, vector<8x8x8xf32>, vector<8x8x8xf32> -> vector<8x8x8xf32>
    "tpu.trace_stop"() : () -> ()
    %c0_30 = arith.constant 0 : index
    %c0_31 = arith.constant 0 : index
    %c0_32 = arith.constant 0 : index
    %59 = vector.load %arg4[%c0_30, %c0_31, %c0_32] : memref<16x8x32xf32, #tpu.memory_space<vmem>>, vector<8x8x32xf32>
    "tpu.trace_start"() <{level = 10 : i32, message = "xtk,xkd->xtd"}> : () -> ()
    %cst_33 = arith.constant dense<0.000000e+00> : vector<8x8x32xf32>
    %60 = tpu.matmul %58, %59, %cst_33 {dimension_numbers = #tpu.dot_dimension_numbers<[2], [1], [1], [2], [0, 0, 0, 1, 1, 2], [0], [0]>, precision = #tpu.contract_precision<fp32>} : vector<8x8x8xf32>, vector<8x8x32xf32>, vector<8x8x32xf32> -> vector<8x8x32xf32>
    "tpu.trace_stop"() : () -> ()
    %61 = vector.extract_strided_slice %60 {offsets = [0, 0, 0], sizes = [2, 8, 32], strides = [1, 1, 1]} : vector<8x8x32xf32> to vector<2x8x32xf32>
    %62 = vector.extract_strided_slice %60 {offsets = [2, 0, 0], sizes = [2, 8, 32], strides = [1, 1, 1]} : vector<8x8x32xf32> to vector<2x8x32xf32>
    %63 = arith.addf %61, %62 : vector<2x8x32xf32>
    %64 = vector.extract_strided_slice %60 {offsets = [4, 0, 0], sizes = [2, 8, 32], strides = [1, 1, 1]} : vector<8x8x32xf32> to vector<2x8x32xf32>
    %65 = arith.addf %63, %64 : vector<2x8x32xf32>
    %66 = vector.extract_strided_slice %60 {offsets = [6, 0, 0], sizes = [2, 8, 32], strides = [1, 1, 1]} : vector<8x8x32xf32> to vector<2x8x32xf32>
    %67 = arith.addf %65, %66 : vector<2x8x32xf32>
    %68 = vector.shape_cast %67 : vector<2x8x32xf32> to vector<16x32xf32>
    %69 = arith.addf %4, %68 : vector<16x32xf32>
    %70 = vector.broadcast %9 : vector<1x32xf32> to vector<16x32xf32>
    %71 = arith.addf %69, %70 : vector<16x32xf32>
    %cst_34 = arith.constant dense<0.000000e+00> : vector<16xf32>
    %72 = vector.multi_reduction <add>, %71, %cst_34 [1] : vector<16x32xf32> to vector<16xf32>
    %73 = vector.shape_cast %72 : vector<16xf32> to vector<16x1xf32>
    %cst_35 = arith.constant 3.200000e+01 : f32
    %74 = vector.broadcast %cst_35 : f32 to vector<16x1xf32>
    %75 = arith.divf %73, %74 : vector<16x1xf32>
    %76 = vector.broadcast %75 : vector<16x1xf32> to vector<16x32xf32>
    %77 = arith.subf %71, %76 : vector<16x32xf32>
    %78 = arith.mulf %77, %77 : vector<16x32xf32>
    %cst_36 = arith.constant dense<0.000000e+00> : vector<16xf32>
    %79 = vector.multi_reduction <add>, %78, %cst_36 [1] : vector<16x32xf32> to vector<16xf32>
    %80 = vector.shape_cast %79 : vector<16xf32> to vector<16x1xf32>
    %cst_37 = arith.constant 3.200000e+01 : f32
    %81 = vector.broadcast %cst_37 : f32 to vector<16x1xf32>
    %82 = arith.divf %80, %81 : vector<16x1xf32>
    %cst_38 = arith.constant 9.99999974E-6 : f32
    %83 = vector.broadcast %cst_38 : f32 to vector<16x1xf32>
    %84 = arith.addf %82, %83 : vector<16x1xf32>
    %85 = math.rsqrt %84 : vector<16x1xf32>
    %86 = vector.broadcast %85 : vector<16x1xf32> to vector<16x32xf32>
    %87 = arith.mulf %77, %86 : vector<16x32xf32>
    %88 = vector.broadcast %7 : vector<1x32xf32> to vector<16x32xf32>
    %89 = arith.mulf %87, %88 : vector<16x32xf32>
    %90 = vector.broadcast %8 : vector<1x32xf32> to vector<16x32xf32>
    %91 = arith.addf %89, %90 : vector<16x32xf32>
    %cst_39 = arith.constant dense<0.000000e+00> : vector<16x128xf32>
    %92 = tpu.matmul %91, %12, %cst_39 {dimension_numbers = #tpu.dot_dimension_numbers<[1], [0], [0], [1], [0, 0, 1, 1], [], []>, precision = #tpu.contract_precision<fp32>} : vector<16x32xf32>, vector<32x128xf32>, vector<16x128xf32> -> vector<16x128xf32>
    %93 = vector.broadcast %11 : vector<1x128xf32> to vector<16x128xf32>
    %94 = arith.addf %92, %93 : vector<16x128xf32>
    %cst_40 = arith.constant 0.000000e+00 : f32
    %95 = vector.broadcast %cst_40 : f32 to vector<16x128xf32>
    %96 = arith.maximumf %94, %95 : vector<16x128xf32>
    %cst_41 = arith.constant dense<0.000000e+00> : vector<16x32xf32>
    %97 = tpu.matmul %96, %13, %cst_41 {dimension_numbers = #tpu.dot_dimension_numbers<[1], [0], [0], [1], [0, 0, 1, 1], [], []>, precision = #tpu.contract_precision<fp32>} : vector<16x128xf32>, vector<128x32xf32>, vector<16x32xf32> -> vector<16x32xf32>
    %98 = vector.broadcast %10 : vector<1x32xf32> to vector<16x32xf32>
    %99 = arith.addf %97, %98 : vector<16x32xf32>
    %100 = arith.addf %71, %99 : vector<16x32xf32>
    %c240 = arith.constant 240 : index
    %c0_42 = arith.constant 0 : index
    %101 = vector.load %arg1[%c240, %c0_42] : memref<408x128xf32, #tpu.memory_space<vmem>>, vector<1x32xf32>
    %c241 = arith.constant 241 : index
    %c0_43 = arith.constant 0 : index
    %102 = vector.load %arg1[%c241, %c0_43] : memref<408x128xf32, #tpu.memory_space<vmem>>, vector<1x32xf32>
    %c242 = arith.constant 242 : index
    %c0_44 = arith.constant 0 : index
    %103 = vector.load %arg1[%c242, %c0_44] : memref<408x128xf32, #tpu.memory_space<vmem>>, vector<1x32xf32>
    %c243 = arith.constant 243 : index
    %c0_45 = arith.constant 0 : index
    %104 = vector.load %arg1[%c243, %c0_45] : memref<408x128xf32, #tpu.memory_space<vmem>>, vector<1x32xf32>
    %c244 = arith.constant 244 : index
    %c0_46 = arith.constant 0 : index
    %105 = vector.load %arg1[%c244, %c0_46] : memref<408x128xf32, #tpu.memory_space<vmem>>, vector<1x32xf32>
    %c245 = arith.constant 245 : index
    %c0_47 = arith.constant 0 : index
    %106 = vector.load %arg1[%c245, %c0_47] : memref<408x128xf32, #tpu.memory_space<vmem>>, vector<1x32xf32>
    %c246 = arith.constant 246 : index
    %c0_48 = arith.constant 0 : index
    %107 = vector.load %arg1[%c246, %c0_48] : memref<408x128xf32, #tpu.memory_space<vmem>>, vector<1x128xf32>
    %c248 = arith.constant 248 : index
    %c0_49 = arith.constant 0 : index
    %108 = vector.load %arg1[%c248, %c0_49] : memref<408x128xf32, #tpu.memory_space<vmem>>, vector<32x128xf32>
    %c280 = arith.constant 280 : index
    %c0_50 = arith.constant 0 : index
    %109 = vector.load %arg1[%c280, %c0_50] : memref<408x128xf32, #tpu.memory_space<vmem>>, vector<128x32xf32>
    %cst_51 = arith.constant dense<0.000000e+00> : vector<16xf32>
    %110 = vector.multi_reduction <add>, %100, %cst_51 [1] : vector<16x32xf32> to vector<16xf32>
    %111 = vector.shape_cast %110 : vector<16xf32> to vector<16x1xf32>
    %cst_52 = arith.constant 3.200000e+01 : f32
    %112 = vector.broadcast %cst_52 : f32 to vector<16x1xf32>
    %113 = arith.divf %111, %112 : vector<16x1xf32>
    %114 = vector.broadcast %113 : vector<16x1xf32> to vector<16x32xf32>
    %115 = arith.subf %100, %114 : vector<16x32xf32>
    %116 = arith.mulf %115, %115 : vector<16x32xf32>
    %cst_53 = arith.constant dense<0.000000e+00> : vector<16xf32>
    %117 = vector.multi_reduction <add>, %116, %cst_53 [1] : vector<16x32xf32> to vector<16xf32>
    %118 = vector.shape_cast %117 : vector<16xf32> to vector<16x1xf32>
    %cst_54 = arith.constant 3.200000e+01 : f32
    %119 = vector.broadcast %cst_54 : f32 to vector<16x1xf32>
    %120 = arith.divf %118, %119 : vector<16x1xf32>
    %cst_55 = arith.constant 9.99999974E-6 : f32
    %121 = vector.broadcast %cst_55 : f32 to vector<16x1xf32>
    %122 = arith.addf %120, %121 : vector<16x1xf32>
    %123 = math.rsqrt %122 : vector<16x1xf32>
    %124 = vector.broadcast %123 : vector<16x1xf32> to vector<16x32xf32>
    %125 = arith.mulf %115, %124 : vector<16x32xf32>
    %126 = vector.broadcast %101 : vector<1x32xf32> to vector<16x32xf32>
    %127 = arith.mulf %125, %126 : vector<16x32xf32>
    %128 = vector.broadcast %102 : vector<1x32xf32> to vector<16x32xf32>
    %129 = arith.addf %127, %128 : vector<16x32xf32>
    %130 = vector.shape_cast %129 : vector<16x32xf32> to vector<1x2x8x32xf32>
    %131 = vector.shape_cast %130 : vector<1x2x8x32xf32> to vector<1x2x8x32xf32>
    %132 = vector.broadcast %131 : vector<1x2x8x32xf32> to vector<12x2x8x32xf32>
    %133 = vector.shape_cast %132 : vector<12x2x8x32xf32> to vector<24x8x32xf32>
    %c24 = arith.constant 24 : index
    %c0_56 = arith.constant 0 : index
    %c0_57 = arith.constant 0 : index
    %134 = vector.load %arg2[%c24, %c0_56, %c0_57] : memref<48x8x32xf32, #tpu.memory_space<vmem>>, vector<24x8x32xf32>
    %c24_58 = arith.constant 24 : index
    %c0_59 = arith.constant 0 : index
    %c0_60 = arith.constant 0 : index
    %135 = vector.load %arg3[%c24_58, %c0_59, %c0_60] : memref<48x1x8xf32, #tpu.memory_space<vmem>>, vector<24x1x8xf32>
    "tpu.trace_start"() <{level = 10 : i32, message = "xtd,xkd->xtk"}> : () -> ()
    %cst_61 = arith.constant dense<0.000000e+00> : vector<24x8x8xf32>
    %136 = tpu.matmul %133, %134, %cst_61 {dimension_numbers = #tpu.dot_dimension_numbers<[2], [2], [1], [1], [0, 0, 0, 1, 1, 1], [0], [0]>, precision = #tpu.contract_precision<fp32>} : vector<24x8x32xf32>, vector<24x8x32xf32>, vector<24x8x8xf32> -> vector<24x8x8xf32>
    "tpu.trace_stop"() : () -> ()
    %137 = vector.broadcast %135 : vector<24x1x8xf32> to vector<24x8x8xf32>
    %138 = arith.addf %136, %137 : vector<24x8x8xf32>
    %139 = vector.extract_strided_slice %138 {offsets = [0, 0, 0], sizes = [8, 8, 8], strides = [1, 1, 1]} : vector<24x8x8xf32> to vector<8x8x8xf32>
    %140 = vector.extract_strided_slice %138 {offsets = [8, 0, 0], sizes = [8, 8, 8], strides = [1, 1, 1]} : vector<24x8x8xf32> to vector<8x8x8xf32>
    %141 = vector.extract_strided_slice %138 {offsets = [16, 0, 0], sizes = [8, 8, 8], strides = [1, 1, 1]} : vector<24x8x8xf32> to vector<8x8x8xf32>
    "tpu.trace_start"() <{level = 10 : i32, message = "xtd,xsd->xts"}> : () -> ()
    %cst_62 = arith.constant dense<0.000000e+00> : vector<8x8x8xf32>
    %142 = tpu.matmul %139, %140, %cst_62 {dimension_numbers = #tpu.dot_dimension_numbers<[2], [2], [1], [1], [0, 0, 0, 1, 1, 1], [0], [0]>, precision = #tpu.contract_precision<fp32>} : vector<8x8x8xf32>, vector<8x8x8xf32>, vector<8x8x8xf32> -> vector<8x8x8xf32>
    "tpu.trace_stop"() : () -> ()
    %cst_63 = arith.constant dense<0xFF800000> : vector<8x8xf32>
    %143 = vector.multi_reduction <maximumf>, %142, %cst_63 [2] : vector<8x8x8xf32> to vector<8x8xf32>
    %144 = vector.shape_cast %143 : vector<8x8xf32> to vector<8x8x1xf32>
    %145 = vector.broadcast %144 : vector<8x8x1xf32> to vector<8x8x8xf32>
    %146 = arith.subf %142, %145 : vector<8x8x8xf32>
    %147 = math.exp %146 : vector<8x8x8xf32>
    %cst_64 = arith.constant dense<0.000000e+00> : vector<8x8xf32>
    %148 = vector.multi_reduction <add>, %147, %cst_64 [2] : vector<8x8x8xf32> to vector<8x8xf32>
    %149 = vector.shape_cast %148 : vector<8x8xf32> to vector<8x8x1xf32>
    %cst_65 = arith.constant 1.000000e+00 : f32
    %150 = vector.broadcast %cst_65 : f32 to vector<8x8x1xf32>
    %151 = arith.divf %150, %149 : vector<8x8x1xf32>
    %152 = vector.broadcast %151 : vector<8x8x1xf32> to vector<8x8x8xf32>
    %153 = arith.mulf %147, %152 : vector<8x8x8xf32>
    "tpu.trace_start"() <{level = 10 : i32, message = "xts,xsd->xtd"}> : () -> ()
    %cst_66 = arith.constant dense<0.000000e+00> : vector<8x8x8xf32>
    %154 = tpu.matmul %153, %141, %cst_66 {dimension_numbers = #tpu.dot_dimension_numbers<[2], [1], [1], [2], [0, 0, 0, 1, 1, 2], [0], [0]>, precision = #tpu.contract_precision<fp32>} : vector<8x8x8xf32>, vector<8x8x8xf32>, vector<8x8x8xf32> -> vector<8x8x8xf32>
    "tpu.trace_stop"() : () -> ()
    %c8 = arith.constant 8 : index
    %c0_67 = arith.constant 0 : index
    %c0_68 = arith.constant 0 : index
    %155 = vector.load %arg4[%c8, %c0_67, %c0_68] : memref<16x8x32xf32, #tpu.memory_space<vmem>>, vector<8x8x32xf32>
    "tpu.trace_start"() <{level = 10 : i32, message = "xtk,xkd->xtd"}> : () -> ()
    %cst_69 = arith.constant dense<0.000000e+00> : vector<8x8x32xf32>
    %156 = tpu.matmul %154, %155, %cst_69 {dimension_numbers = #tpu.dot_dimension_numbers<[2], [1], [1], [2], [0, 0, 0, 1, 1, 2], [0], [0]>, precision = #tpu.contract_precision<fp32>} : vector<8x8x8xf32>, vector<8x8x32xf32>, vector<8x8x32xf32> -> vector<8x8x32xf32>
    "tpu.trace_stop"() : () -> ()
    %157 = vector.extract_strided_slice %156 {offsets = [0, 0, 0], sizes = [2, 8, 32], strides = [1, 1, 1]} : vector<8x8x32xf32> to vector<2x8x32xf32>
    %158 = vector.extract_strided_slice %156 {offsets = [2, 0, 0], sizes = [2, 8, 32], strides = [1, 1, 1]} : vector<8x8x32xf32> to vector<2x8x32xf32>
    %159 = arith.addf %157, %158 : vector<2x8x32xf32>
    %160 = vector.extract_strided_slice %156 {offsets = [4, 0, 0], sizes = [2, 8, 32], strides = [1, 1, 1]} : vector<8x8x32xf32> to vector<2x8x32xf32>
    %161 = arith.addf %159, %160 : vector<2x8x32xf32>
    %162 = vector.extract_strided_slice %156 {offsets = [6, 0, 0], sizes = [2, 8, 32], strides = [1, 1, 1]} : vector<8x8x32xf32> to vector<2x8x32xf32>
    %163 = arith.addf %161, %162 : vector<2x8x32xf32>
    %164 = vector.shape_cast %163 : vector<2x8x32xf32> to vector<16x32xf32>
    %165 = arith.addf %100, %164 : vector<16x32xf32>
    %166 = vector.broadcast %105 : vector<1x32xf32> to vector<16x32xf32>
    %167 = arith.addf %165, %166 : vector<16x32xf32>
    %cst_70 = arith.constant dense<0.000000e+00> : vector<16xf32>
    %168 = vector.multi_reduction <add>, %167, %cst_70 [1] : vector<16x32xf32> to vector<16xf32>
    %169 = vector.shape_cast %168 : vector<16xf32> to vector<16x1xf32>
    %cst_71 = arith.constant 3.200000e+01 : f32
    %170 = vector.broadcast %cst_71 : f32 to vector<16x1xf32>
    %171 = arith.divf %169, %170 : vector<16x1xf32>
    %172 = vector.broadcast %171 : vector<16x1xf32> to vector<16x32xf32>
    %173 = arith.subf %167, %172 : vector<16x32xf32>
    %174 = arith.mulf %173, %173 : vector<16x32xf32>
    %cst_72 = arith.constant dense<0.000000e+00> : vector<16xf32>
    %175 = vector.multi_reduction <add>, %174, %cst_72 [1] : vector<16x32xf32> to vector<16xf32>
    %176 = vector.shape_cast %175 : vector<16xf32> to vector<16x1xf32>
    %cst_73 = arith.constant 3.200000e+01 : f32
    %177 = vector.broadcast %cst_73 : f32 to vector<16x1xf32>
    %178 = arith.divf %176, %177 : vector<16x1xf32>
    %cst_74 = arith.constant 9.99999974E-6 : f32
    %179 = vector.broadcast %cst_74 : f32 to vector<16x1xf32>
    %180 = arith.addf %178, %179 : vector<16x1xf32>
    %181 = math.rsqrt %180 : vector<16x1xf32>
    %182 = vector.broadcast %181 : vector<16x1xf32> to vector<16x32xf32>
    %183 = arith.mulf %173, %182 : vector<16x32xf32>
    %184 = vector.broadcast %103 : vector<1x32xf32> to vector<16x32xf32>
    %185 = arith.mulf %183, %184 : vector<16x32xf32>
    %186 = vector.broadcast %104 : vector<1x32xf32> to vector<16x32xf32>
    %187 = arith.addf %185, %186 : vector<16x32xf32>
    %cst_75 = arith.constant dense<0.000000e+00> : vector<16x128xf32>
    %188 = tpu.matmul %187, %108, %cst_75 {dimension_numbers = #tpu.dot_dimension_numbers<[1], [0], [0], [1], [0, 0, 1, 1], [], []>, precision = #tpu.contract_precision<fp32>} : vector<16x32xf32>, vector<32x128xf32>, vector<16x128xf32> -> vector<16x128xf32>
    %189 = vector.broadcast %107 : vector<1x128xf32> to vector<16x128xf32>
    %190 = arith.addf %188, %189 : vector<16x128xf32>
    %cst_76 = arith.constant 0.000000e+00 : f32
    %191 = vector.broadcast %cst_76 : f32 to vector<16x128xf32>
    %192 = arith.maximumf %190, %191 : vector<16x128xf32>
    %cst_77 = arith.constant dense<0.000000e+00> : vector<16x32xf32>
    %193 = tpu.matmul %192, %109, %cst_77 {dimension_numbers = #tpu.dot_dimension_numbers<[1], [0], [0], [1], [0, 0, 1, 1], [], []>, precision = #tpu.contract_precision<fp32>} : vector<16x128xf32>, vector<128x32xf32>, vector<16x32xf32> -> vector<16x32xf32>
    %194 = vector.broadcast %106 : vector<1x32xf32> to vector<16x32xf32>
    %195 = arith.addf %193, %194 : vector<16x32xf32>
    %196 = arith.addf %167, %195 : vector<16x32xf32>
    %197 = vector.shape_cast %196 : vector<16x32xf32> to vector<2x8x32xf32>
    %cst_78 = arith.constant dense<0.000000e+00> : vector<2x32xf32>
    %198 = vector.multi_reduction <add>, %197, %cst_78 [1] : vector<2x8x32xf32> to vector<2x32xf32>
    %cst_79 = arith.constant 8.000000e+00 : f32
    %199 = vector.broadcast %cst_79 : f32 to vector<2x32xf32>
    %200 = arith.divf %198, %199 : vector<2x32xf32>
    %c32 = arith.constant 32 : index
    %c0_80 = arith.constant 0 : index
    %201 = vector.load %arg1[%c32, %c0_80] : memref<408x128xf32, #tpu.memory_space<vmem>>, vector<32x128xf32>
    %c64 = arith.constant 64 : index
    %c0_81 = arith.constant 0 : index
    %202 = vector.load %arg1[%c64, %c0_81] : memref<408x128xf32, #tpu.memory_space<vmem>>, vector<1x128xf32>
    %cst_82 = arith.constant dense<0.000000e+00> : vector<2x128xf32>
    %203 = tpu.matmul %200, %201, %cst_82 {dimension_numbers = #tpu.dot_dimension_numbers<[1], [0], [0], [1], [0, 0, 1, 1], [], []>, precision = #tpu.contract_precision<fp32>} : vector<2x32xf32>, vector<32x128xf32>, vector<2x128xf32> -> vector<2x128xf32>
    %204 = vector.broadcast %202 : vector<1x128xf32> to vector<2x128xf32>
    %205 = arith.addf %203, %204 : vector<2x128xf32>
    %c0_83 = arith.constant 0 : index
    %c0_84 = arith.constant 0 : index
    %206 = vector.load %arg5[%c0_83, %c0_84] : memref<2x128xf32, #tpu.memory_space<vmem>>, vector<2x128xf32>
    tpu.vector_store %arg5[%c0_83, %c0_84], %205 {strides = array<i32>} : memref<2x128xf32, #tpu.memory_space<vmem>>, vector<2x128xf32>,
    return
  }
}

</mosaic_0001>

<bundles_post_ra>
// kernel: tpu_custom_call.1
= control target key start
LH: loop header
LB: loop body
LE: loop exit
PB: predicated region body
PF: predicated region fallthrough
CT: control target
= control target key end

     0   :  { %vm34_vm0 = vcmask 1043456   ;;  %vm27_vm1 = vcmask 97280   ;;  %s58974_s0 = inlined_call_operand.vmem [shape: f32[16,12], index: 0, kind: input, shape index: {}]   ;;  %s58975_s1 = inlined_call_operand.vmem [shape: f32[408,128], index: 1, kind: input, shape index: {}]   ;;  %s58976_s2 = inlined_call_operand.vmem [shape: f32[48,8,32], index: 2, kind: input, shape index: {}]   ;;  %s58977_s3 = inlined_call_operand.vmem [shape: f32[48,1,8], index: 3, kind: input, shape index: {}]   ;;  %s58978_s4 = inlined_call_operand.vmem [shape: f32[16,8,32], index: 4, kind: input, shape index: {}]   ;;  %s58979_s5 = inlined_call_operand.hbm [shape: f32[2,128], index: 5, kind: output, shape index: {}]  }
   0x1   :  { %v23_v0 = vld [vmem:[%s58975_s1 + $0x10] sm:$0xff]  ;;  %v24_v1 = vld [vmem:[%s58975_s1 + $0x18] sm:$0xf]  ;;  %v21_v2 = vld [vmem:[%s58974_s0] sm:$0xff] }
   0x2   :  { %v36_v3 = vsel %vm34_vm0, %v24_v1, 0  ;;  %v39_v4 = vand.u32 4294901760, %v23_v0  ;;  %v22_v5 = vld [vmem:[%s58974_s0 + $0x8] sm:$0xff]  ;;  %v29_v6 = vsel %vm27_vm1, %v21_v2, 0 }
   0x3   :  { %v42_v7 = vand.u32 4294901760, %v36_v3  ;;  %v32_v8 = vsel %vm27_vm1, %v22_v5, 0  ;;  %v105_v9 = vand.u32 4294901760, %v29_v6 }
   0x4   :  { %10 = vsyncpa [#allocation3], 0  ;;  %v115_v10 = vand.u32 4294901760, %v32_v8  ;;  %v127_v11 = vsub.f32 %v23_v0, %v39_v4  ;;  %v25_v31 = vld [vmem:[%s58975_s1] sm:$0xff]  ;;  %v26_v33 = vld [vmem:[%s58975_s1 + $0x8] sm:$0xff]  ;;  %vm567_vm2 = vcmask 261120  }
   0x5   :  { %v52681_v12 = vpack.c.bf16 %v42_v7, %v39_v4  ;;  %v106_v13 = vsub.f32 %v29_v6, %v105_v9  ;;  %v134_v14 = vsub.f32 %v36_v3, %v42_v7  ;;  %v607_v49 = vld [vmem:[%s58976_s2] sm:$0xff]  ;;  %v58980_v54 = vmov 0.0   ;;  %v609_v61 = vld [vmem:[%s58976_s2 + $0x10] sm:$0xff]  ;;  %v47528_v63 = vld [vmem:[%s58975_s1 + $0x48] ss:$0 sm:$0xff]  ;;  %s54250_s24 = smov [#allocation2]  }
   0x6   :  { %v116_v15 = vsub.f32 %v32_v8, %v115_v10  ;;  %v128_v16 = vand.u32 4294901760, %v127_v11  ;;  %v803_v50 = vsel %vm567_vm2, %v607_v49, 0  ;;  %49203 = vmatprep.subr.mxu1 %v58980_v54  ;;  %vm54248_vm3 = vmmov 0   ;;  %v47529_v2 = vld [vmem:[%s58975_s1 + $0x49] ss:$0 sm:$0xff]  ;;  %s47520_s25 = sshll.u32 %s54250_s24, 4  ;;  %s47521_s25 = int_to_ptr.vmem [resolvable:$true] %s47520_s25 }
   0x7   :  { %52682 = vmatprep.subr.bf16.mxu0 %v52681_v12  ;;  %v107_v17 = vand.u32 4294901760, %v106_v13  ;;  %v135_v18 = vand.u32 4294901760, %v134_v14  ;;  %v52689_v29 = vpack.c.bf16 %v134_v14, %v127_v11  ;;  %v54315_v51 = vand.u32 4294901760, %v803_v50  ;;  %49205 = vmatprep.mubr.msk.f32.mxu1 %vm54248_vm3, %v58980_v54  ;;  %s54223_s0 = scalar_lea.vmem %s47521_s25, 32  ;;  %p54228_p1 = scmp.lt.s32.totalorder %s47521_s25, %s47521_s25 }
   0x8   :  { %52684 = vmatpush3.bf16.msra.mxu0 %v52681_v12  ;;  %v117_v19 = vand.u32 4294901760, %v116_v15  ;;  %v129_v20 = vsub.f32 %v127_v11, %v128_v16  ;;  %v1704_v0 = vsel %vm567_vm2, %v609_v61, 0  ;;  %vm11581_vm4 = vcmask 64512   ;;  %p54224_p0 = scmp.ne.s32.totalorder %s47521_s25, %s54223_s0  ;;  %p54229_p2 = scmp.lt.s32.totalorder %s54223_s0, %s54223_s0 }
   0x9   :  { %v108_v21 = vsub.f32 %v106_v13, %v107_v17  ;;  %v136_v22 = vsub.f32 %v134_v14, %v135_v18  ;;  %v52697_v30 = vpack.c.bf16 %v135_v18, %v128_v16  ;;  %v54318_v52 = vsub.f32 %v803_v50, %v54315_v51  ;;  %v613_v50 = vld [vmem:[%s58976_s2 + $0x30] sm:$0xff] }
   0xa   :  { %v118_v23 = vsub.f32 %v116_v15, %v117_v19  ;;  %v130_v24 = vand.u32 4294901760, %v129_v20  ;;  %v54340_v4 = vand.u32 4294901760, %v1704_v0  ;;  %vm47024_vm5 = vcmask 1041409   ;;  %p54230_p3 = por %p54229_p2, %p54228_p1 }
   0xb   :  { %v109_v25 = vand.u32 4294901760, %v108_v21  ;;  %v137_v26 = vand.u32 4294901760, %v136_v22  ;;  %v884_v53 = vand.u32 4294901760, %v54318_v52  ;;  %v608_v22 = vld [vmem:[%s58976_s2 + $0x8] sm:$0xff] }
   0xc   :  { %v119_v27 = vand.u32 4294901760, %v118_v23  ;;  %v54344_v7 = vsub.f32 %v1704_v0, %v54340_v4  ;;  %v1255_v23 = vsel %vm567_vm2, %v608_v22, 0  ;;  %p54231_p4 = pnand %p54230_p3, %p54224_p0 }
   0xd   :  { %49145 = vmatprep.mubr.f32.mxu0 %v109_v25  ;;  %v52685_v28 = vpack.c.bf16 %v137_v26, %v130_v24  ;;  %49204 = vmatpush3.xpose.msra.mxu1 %v884_v53  ;;  %v885_v11 = vsub.f32 %v54318_v52, %v884_v53  ;;  %v54388_v25 = vand.u32 4294901760, %v1255_v23 }
   0xe   :  { %49146 = vmatmul.mubr.f32.vlgmr.msra.gmra.mrb[0].mxu0 %v119_v27  ;;  %49208 = vmatprep.subr.mxu1 %v58980_v54 }
   0xf   :  { %52686 = vmatprep.subr.bf16.mxu0 %v52685_v28  ;;  %49152 = vmatprep.mubr.f32.mxu0 %v105_v9  ;;  %v886_v16 = vand.u32 4294901760, %v885_v11  ;;  %v1335_v27 = vsub.f32 %v1255_v23, %v54388_v25  ;;  %v614_v11 = vld [vmem:[%s58976_s2 + $0x38] sm:$0xff] }
  0x10   :  { %52688 = vmatpush3.bf16.msra.mxu0 %v52685_v28 }
  0x11   :  { %52690 = vmatprep.subr.bf16.mxu0 %v52689_v29 }
  0x16   :  { %49153 = vmatmul.mubr.f32.vlgmr.msra.gmra.mrb[0].mxu0 %v115_v10 }
  0x17   :  { %52692 = vmatpush3.bf16.msra.mxu0 %v52689_v29  ;;  %49159 = vmatprep.mubr.f32.mxu0 %v106_v13  ;;  %v1336_v29 = vand.u32 4294901760, %v1335_v27 }
  0x18   :  { %52694 = vmatprep.subr.bf16.mxu0 %v52681_v12 }
  0x1e   :  { %49160 = vmatmul.mubr.f32.vlgmr.msra.gmra.mrb[0].mxu0 %v116_v15 }
  0x1f   :  { %52696 = vmatpush3.bf16.msra.mxu0 %v52681_v12  ;;  %49166 = vmatprep.mubr.f32.mxu0 %v107_v17 }
  0x20   :  { %52698 = vmatprep.subr.bf16.mxu0 %v52697_v30 }
  0x26   :  { %49167 = vmatmul.mubr.f32.vlgmr.msra.gmra.mrb[0].mxu0 %v117_v19 }
  0x27   :  { %52700 = vmatpush3.bf16.msra.mxu0 %v52697_v30  ;;  %49173 = vmatprep.mubr.f32.mxu0 %v105_v9 }
  0x28   :  { %52702 = vmatprep.subr.bf16.mxu0 %v52681_v12 }
  0x2e   :  { %49174 = vmatmul.mubr.f32.vlgmr.msra.gmra.mrb[0].mxu0 %v115_v10 }
  0x2f   :  { %52704 = vmatpush3.bf16.msra.mxu0 %v52681_v12  ;;  %49180 = vmatprep.mubr.f32.mxu0 %v105_v9  ;;  %v1785_v12 = vand.u32 4294901760, %v54344_v7 }
  0x30   :  { %49183 = vmatprep.subr.mxu0 %v58980_v54 }
  0x31   :  { %v1786_v17 = vsub.f32 %v54344_v7, %v1785_v12 }
  0x33   :  { %v1787_v20 = vand.u32 4294901760, %v1786_v17 }
  0x36   :  { %49181 = vmatmul.mubr.f32.vlgmr.msra.gmra.mrb[0].mxu0 %v115_v10 }
  0x37   :  { %49185 = vmatprep.mubr.msk.f32.mxu0 %vm54248_vm3, %v58980_v54 }
  0x38   :  { %49184 = vmatpush3.xpose.msra.mxu0 %v54315_v51 }
  0x39   :  { %49188 = vmatprep.subr.mxu0 %v58980_v54 }
 0x109   :  { %v49182_v32 = vpop.f32.mrb[0].mxu0 }
 0x10a   :  { %v530_v34 = vpop.f32.mrb[1].mxu0  ;;  %v54301_v36 = vadd.f32 %v49182_v32, %v26_v33  ;;  %v611_v33 = vld [vmem:[%s58976_s2 + $0x20] sm:$0xff] }
 0x10b   :  { %v54299_v35 = vadd.f32 %v530_v34, %v25_v31  ;;  %v1337_v31 = vsub.f32 %v1335_v27, %v1336_v29 }
 0x10c   :  { %v571_v38 = vsel %vm567_vm2, %v54301_v36, 0.0 }
 0x10d   :  { %v568_v37 = vsel %vm567_vm2, %v54299_v35, 0.0  ;;  %v1338_v34 = vand.u32 4294901760, %v1337_v31 }
 0x10e   :  { %569 = vadd.xlane.f32.xlu0 %v568_v37 }
 0x112   :  { %572 = vadd.xlane.f32.xlu0 %v571_v38  ;;  %v2602_v38 = vsel %vm567_vm2, %v611_v33, 0 }
 0x19b   :  { %v570_v39 = vpop.xlane.xlu0 %569 }
 0x19c   :  { %v575_v40 = vmul.f32 0.03125, %v570_v39  ;;  %v54430_v39 = vand.u32 4294901760, %v2602_v38 }
 0x19e   :  { %v577_v41 = vsub.f32 %v54299_v35, %v575_v40  ;;  %v2682_v40 = vsub.f32 %v2602_v38, %v54430_v39 }
 0x19f   :  { %v573_v42 = vpop.xlane.xlu0 %572 }
 0x1a0   :  { %v576_v43 = vmul.f32 0.03125, %v573_v42  ;;  %v579_v44 = vmul.f32 %v577_v41, %v577_v41 }
 0x1a2   :  { %v578_v45 = vsub.f32 %v54301_v36, %v576_v43  ;;  %v581_v46 = vsel %vm567_vm2, %v579_v44, 0.0  ;;  %v610_v44 = vld [vmem:[%s58976_s2 + $0x18] sm:$0xff] }
 0x1a3   :  { %582 = vadd.xlane.f32.xlu1 %v581_v46 }
 0x1a4   :  { %v580_v47 = vmul.f32 %v578_v45, %v578_v45 }
 0x1a6   :  { %v584_v48 = vsel %vm567_vm2, %v580_v47, 0.0 }
 0x1a7   :  { %585 = vadd.xlane.f32.xlu1 %v584_v48 }
 0x230   :  { %v583_v55 = vpop.xlane.xlu1 %582 }
 0x231   :  { %v587_v56 = vmul.f32 0.03125, %v583_v55 }
 0x233   :  { %v589_v57 = vadd.f32 1e-05, %v587_v56 }
 0x234   :  { %v586_v58 = vpop.xlane.xlu1 %585 }
 0x235   :  { %54143 = vrsqrt.f32 %v589_v57  ;;  %v588_v59 = vmul.f32 0.03125, %v586_v58 }
 0x237   :  { %v590_v60 = vadd.f32 1e-05, %v588_v59  ;;  %v612_v59 = vld [vmem:[%s58976_s2 + $0x28] sm:$0xff] }
 0x239   :  { %54145 = vrsqrt.f32 %v590_v60  ;;  %v3051_v60 = vsel %vm567_vm2, %v612_v59, 0 }
 0x23a   :  { %v54537_v61 = vand.u32 4294901760, %v3051_v60 }
 0x23f   :  { %v54144_v62 = vpop.eup %54143 }
 0x240   :  { %v593_v1 = vmul.f32 %v54144_v62, %v577_v41  ;;  %v2683_v41 = vand.u32 4294901760, %v2682_v40  ;;  %v3131_v62 = vsub.f32 %v3051_v60, %v54537_v61 }
 0x242   :  { %v599_v3 = vmul.f32 %v47528_v63, %v593_v1  ;;  %v2684_v42 = vsub.f32 %v2682_v40, %v2683_v41  ;;  %v615_v1 = vld [vmem:[%s58976_s2 + $0x40] sm:$0xff] }
 0x243   :  { %v54146_v9 = vpop.eup %54145 }
 0x244   :  { %v605_v5 = vadd.f32 %v47529_v2, %v599_v3  ;;  %v594_v14 = vmul.f32 %v54146_v9, %v578_v45  ;;  %v2685_v43 = vand.u32 4294901760, %v2684_v42  ;;  %v2153_v45 = vsel %vm567_vm2, %v610_v44, 0 }
 0x245   :  { %v54469_v46 = vand.u32 4294901760, %v2153_v45  ;;  %v4398_v3 = vsel %vm567_vm2, %v615_v1, 0 }
 0x246   :  { %v800_v6 = vsel %vm567_vm2, %v605_v5, 0  ;;  %v600_v19 = vmul.f32 %v47528_v63, %v594_v14  ;;  %v3132_v63 = vand.u32 4294901760, %v3131_v62 }
 0x247   :  { %v54346_v8 = vand.u32 4294901760, %v800_v6  ;;  %v2233_v47 = vsub.f32 %v2153_v45, %v54469_v46 }
 0x248   :  { %v606_v21 = vadd.f32 %v47529_v2, %v600_v19  ;;  %v3133_v0 = vsub.f32 %v3131_v62, %v3132_v63  ;;  %v617_v19 = vld [vmem:[%s58976_s2 + $0x50] sm:$0xff] }
 0x249   :  { %v54349_v10 = vsub.f32 %v800_v6, %v54346_v8  ;;  %49206 = vmatmul.mubr.f32.vlgmr.msra.gmra.mrb[0].mxu1 %v54346_v8  ;;  %v2234_v48 = vand.u32 4294901760, %v2233_v47 }
 0x24a   :  { %49209 = vmatpush3.xpose.msra.mxu1 %v54315_v51  ;;  %49210 = vmatprep.mubr.msk.f32.mxu1 %vm54248_vm3, %v58980_v54  ;;  %v1252_v24 = vsel %vm567_vm2, %v606_v21, 0  ;;  %v3134_v2 = vand.u32 4294901760, %v3133_v0  ;;  %v5296_v21 = vsel %vm567_vm2, %v617_v19, 0  ;;  %v623_v19 = vld [vmem:[%s58976_s2 + $0x80] sm:$0xff] }
 0x24b   :  { %v54358_v13 = vand.u32 4294901760, %v54349_v10  ;;  %49243 = vmatprep.subr.mxu1 %v58980_v54  ;;  %v54390_v26 = vand.u32 4294901760, %v1252_v24  ;;  %v2235_v49 = vsub.f32 %v2233_v47, %v2234_v48  ;;  %v54634_v22 = vand.u32 4294901760, %v5296_v21 }
 0x24d   :  { %v874_v15 = vsub.f32 %v54349_v10, %v54358_v13  ;;  %v54399_v28 = vsub.f32 %v1252_v24, %v54390_v26  ;;  %v5376_v23 = vsub.f32 %v5296_v21, %v54634_v22  ;;  %v7990_v21 = vsel %vm567_vm2, %v623_v19, 0 }
 0x24f   :  { %v54364_v18 = vand.u32 4294901760, %v874_v15  ;;  %v54407_v30 = vand.u32 4294901760, %v54399_v28  ;;  %v5377_v24 = vand.u32 4294901760, %v5376_v23 }
 0x251   :  { %49186 = vmatmul.mubr.f32.vlgmr.msra.gmra.mrb[2].mxu0 %v54364_v18  ;;  %49211 = vmatmul.mubr.f32.vlgmr.msra.gmra.mrb[0].mxu1 %v54346_v8  ;;  %v1326_v32 = vsub.f32 %v54399_v28, %v54407_v30 }
 0x252   :  { %49244 = vmatpush3.xpose.msra.mxu1 %v54340_v4  ;;  %49189 = vmatpush3.xpose.msra.mxu0 %v886_v16 }
 0x253   :  { %49245 = vmatprep.mubr.msk.f32.mxu1 %vm54248_vm3, %v58980_v54  ;;  %49190 = vmatprep.mubr.msk.f32.mxu0 %vm54248_vm3, %v58980_v54  ;;  %v54424_v37 = vand.u32 4294901760, %v1326_v32 }
 0x254   :  { %49248 = vmatprep.subr.mxu1 %v58980_v54  ;;  %49193 = vmatprep.subr.mxu0 %v58980_v54 }
 0x255   :  { %49246 = vmatmul.mubr.f32.vlgmr.msra.gmra.mrb[2].mxu1 %v54364_v18 }
 0x256   :  { %49249 = vmatpush3.xpose.msra.mxu1 %v1787_v20  ;;  %49250 = vmatprep.mubr.msk.f32.mxu1 %vm54248_vm3, %v58980_v54 }
 0x257   :  { %49253 = vmatprep.subr.mxu1 %v58980_v54 }
 0x259   :  { %49191 = vmatmul.mubr.f32.vlgmr.msra.gmra.mrb[2].mxu0 %v54346_v8 }
 0x25a   :  { %49194 = vmatpush3.xpose.msra.mxu0 %v54318_v52  ;;  %49195 = vmatprep.mubr.msk.f32.mxu0 %vm54248_vm3, %v58980_v54  ;;  %v3500_v52 = vsel %vm567_vm2, %v613_v50, 0 }
 0x25b   :  { %49198 = vmatprep.subr.mxu0 %v58980_v54  ;;  %v54498_v53 = vand.u32 4294901760, %v3500_v52 }
 0x25d   :  { %49251 = vmatmul.mubr.f32.vlgmr.msra.gmra.mrb[2].mxu1 %v54346_v8  ;;  %v3580_v55 = vsub.f32 %v3500_v52, %v54498_v53  ;;  %v47530_v52 = vld [vmem:[%s58977_s3] ss:$0 sm:$0xff] }
 0x25e   :  { %49254 = vmatpush3.xpose.msra.mxu1 %v54344_v7  ;;  %49255 = vmatprep.mubr.msk.f32.mxu1 %vm54248_vm3, %v58980_v54 }
 0x25f   :  { %49258 = vmatprep.subr.mxu1 %v58980_v54  ;;  %v3581_v56 = vand.u32 4294901760, %v3580_v55 }
 0x261   :  { %49196 = vmatmul.mubr.f32.vlgmr.msra.gmra.mrb[2].mxu0 %v54349_v10  ;;  %v3582_v57 = vsub.f32 %v3580_v55, %v3581_v56 }
 0x262   :  { %49199 = vmatpush3.xpose.msra.mxu0 %v54315_v51  ;;  %49200 = vmatprep.mubr.msk.f32.mxu0 %vm54248_vm3, %v58980_v54  ;;  %v2236_v51 = vand.u32 4294901760, %v2235_v49  ;;  %v618_v49 = vld [vmem:[%s58976_s2 + $0x58] sm:$0xff] }
 0x263   :  { %49213 = vmatprep.subr.mxu0 %v58980_v54  ;;  %v3583_v58 = vand.u32 4294901760, %v3582_v57  ;;  %v5745_v50 = vsel %vm567_vm2, %v618_v49, 0 }
 0x265   :  { %49256 = vmatmul.mubr.f32.vlgmr.msra.gmra.mrb[2].mxu1 %v54349_v10 }
 0x266   :  { %49259 = vmatpush3.xpose.msra.mxu1 %v54340_v4  ;;  %49260 = vmatprep.mubr.msk.f32.mxu1 %vm54248_vm3, %v58980_v54 }
 0x267   :  { %49263 = vmatprep.subr.mxu1 %v58980_v54 }
 0x269   :  { %49201 = vmatmul.mubr.f32.vlgmr.msra.gmra.mrb[2].mxu0 %v54358_v13 }
 0x26a   :  { %49214 = vmatpush3.xpose.msra.mxu0 %v54388_v25  ;;  %49215 = vmatprep.mubr.msk.f32.mxu0 %vm54248_vm3, %v58980_v54 }
 0x26b   :  { %49218 = vmatprep.subr.mxu0 %v58980_v54 }
 0x26d   :  { %49216 = vmatmul.mubr.f32.vlgmr.msra.gmra.mrb[4].mxu0 %v54424_v37  ;;  %49261 = vmatmul.mubr.f32.vlgmr.msra.gmra.mrb[2].mxu1 %v54358_v13 }
 0x26e   :  { %49219 = vmatpush3.xpose.msra.mxu0 %v1338_v34  ;;  %49264 = vmatpush3.xpose.msra.mxu1 %v1785_v12  ;;  %v3949_v12 = vsel %vm567_vm2, %v614_v11, 0 }
 0x26f   :  { %49220 = vmatprep.mubr.msk.f32.mxu0 %vm54248_vm3, %v58980_v54  ;;  %49265 = vmatprep.mubr.msk.f32.mxu1 %vm54248_vm3, %v58980_v54  ;;  %v54605_v14 = vand.u32 4294901760, %v3949_v12 }
 0x270   :  { %49223 = vmatprep.subr.mxu0 %v58980_v54  ;;  %49268 = vmatprep.subr.mxu1 %v58980_v54 }
 0x271   :  { %v4029_v15 = vsub.f32 %v3949_v12, %v54605_v14 }
 0x273   :  { %v4030_v16 = vand.u32 4294901760, %v4029_v15 }
 0x275   :  { %49221 = vmatmul.mubr.f32.vlgmr.msra.gmra.mrb[4].mxu0 %v54390_v26  ;;  %49266 = vmatmul.mubr.f32.vlgmr.msra.gmra.mrb[2].mxu1 %v54346_v8  ;;  %v4031_v17 = vsub.f32 %v4029_v15, %v4030_v16 }
 0x276   :  { %49224 = vmatpush3.xpose.msra.mxu0 %v1335_v27  ;;  %49269 = vmatpush3.xpose.msra.mxu1 %v54340_v4  ;;  %v54566_v4 = vand.u32 4294901760, %v4398_v3 }
 0x277   :  { %49225 = vmatprep.mubr.msk.f32.mxu0 %vm54248_vm3, %v58980_v54  ;;  %49270 = vmatprep.mubr.msk.f32.mxu1 %vm54248_vm3, %v58980_v54  ;;  %v4032_v20 = vand.u32 4294901760, %v4031_v17 }
 0x278   :  { %49303 = vmatprep.subr.mxu1 %v58980_v54  ;;  %49228 = vmatprep.subr.mxu0 %v58980_v54  ;;  %v4478_v5 = vsub.f32 %v4398_v3, %v54566_v4 }
 0x27a   :  { %v4479_v6 = vand.u32 4294901760, %v4478_v5 }
 0x27c   :  { %v4480_v7 = vsub.f32 %v4478_v5, %v4479_v6 }
 0x27d   :  { %49226 = vmatmul.mubr.f32.vlgmr.msra.gmra.mrb[4].mxu0 %v54399_v28  ;;  %49271 = vmatmul.mubr.f32.vlgmr.msra.gmra.mrb[2].mxu1 %v54346_v8 }
 0x27e   :  { %49304 = vmatpush3.xpose.msra.mxu1 %v54430_v39  ;;  %49229 = vmatpush3.xpose.msra.mxu0 %v54388_v25  ;;  %v4481_v9 = vand.u32 4294901760, %v4480_v7  ;;  %v620_v7 = vld [vmem:[%s58976_s2 + $0x68] sm:$0xff] }
 0x27f   :  { %49305 = vmatprep.mubr.msk.f32.mxu1 %vm54248_vm3, %v58980_v54  ;;  %49230 = vmatprep.mubr.msk.f32.mxu0 %vm54248_vm3, %v58980_v54 }
 0x280   :  { %49308 = vmatprep.subr.mxu1 %v58980_v54  ;;  %49233 = vmatprep.subr.mxu0 %v58980_v54 }
 0x281   :  { %49306 = vmatmul.mubr.f32.vlgmr.msra.gmra.mrb[4].mxu1 %v54364_v18 }
 0x282   :  { %49309 = vmatpush3.xpose.msra.mxu1 %v2685_v43  ;;  %49310 = vmatprep.mubr.msk.f32.mxu1 %vm54248_vm3, %v58980_v54 }
 0x283   :  { %49313 = vmatprep.subr.mxu1 %v58980_v54 }
 0x285   :  { %49231 = vmatmul.mubr.f32.vlgmr.msra.gmra.mrb[4].mxu0 %v54407_v30 }
 0x286   :  { %49234 = vmatpush3.xpose.msra.mxu0 %v1336_v29  ;;  %49235 = vmatprep.mubr.msk.f32.mxu0 %vm54248_vm3, %v58980_v54  ;;  %v616_v29 = vld [vmem:[%s58976_s2 + $0x48] sm:$0xff] }
 0x287   :  { %49238 = vmatprep.subr.mxu0 %v58980_v54  ;;  %v4847_v31 = vsel %vm567_vm2, %v616_v29, 0 }
 0x288   :  { %v54673_v32 = vand.u32 4294901760, %v4847_v31 }
 0x289   :  { %49311 = vmatmul.mubr.f32.vlgmr.msra.gmra.mrb[4].mxu1 %v54346_v8 }
 0x28a   :  { %49314 = vmatpush3.xpose.msra.mxu1 %v2682_v40  ;;  %49315 = vmatprep.mubr.msk.f32.mxu1 %vm54248_vm3, %v58980_v54  ;;  %v4927_v33 = vsub.f32 %v4847_v31, %v54673_v32 }
 0x28b   :  { %49318 = vmatprep.subr.mxu1 %v58980_v54 }
 0x28c   :  { %v4928_v34 = vand.u32 4294901760, %v4927_v33 }
 0x28d   :  { %49236 = vmatmul.mubr.f32.vlgmr.msra.gmra.mrb[4].mxu0 %v54390_v26 }
 0x28e   :  { %49239 = vmatpush3.xpose.msra.mxu0 %v54388_v25  ;;  %49240 = vmatprep.mubr.msk.f32.mxu0 %vm54248_vm3, %v58980_v54  ;;  %v5378_v25 = vsub.f32 %v5376_v23, %v5377_v24  ;;  %v4929_v38 = vsub.f32 %v4927_v33, %v4928_v34 }
 0x28f   :  { %49273 = vmatprep.subr.mxu0 %v58980_v54 }
 0x290   :  { %v5379_v27 = vand.u32 4294901760, %v5378_v25  ;;  %v4930_v40 = vand.u32 4294901760, %v4929_v38 }
 0x291   :  { %49316 = vmatmul.mubr.f32.vlgmr.msra.gmra.mrb[4].mxu1 %v54349_v10 }
 0x292   :  { %49319 = vmatpush3.xpose.msra.mxu1 %v54430_v39  ;;  %49320 = vmatprep.mubr.msk.f32.mxu1 %vm54248_vm3, %v58980_v54 }
 0x293   :  { %49323 = vmatprep.subr.mxu1 %v58980_v54 }
 0x295   :  { %49241 = vmatmul.mubr.f32.vlgmr.msra.gmra.mrb[4].mxu0 %v54390_v26 }
 0x296   :  { %49274 = vmatpush3.xpose.msra.mxu0 %v54469_v46  ;;  %49275 = vmatprep.mubr.msk.f32.mxu0 %vm54248_vm3, %v58980_v54 }
 0x297   :  { %49278 = vmatprep.subr.mxu0 %v58980_v54 }
 0x299   :  { %49276 = vmatmul.mubr.f32.vlgmr.msra.gmra.mrb[6].mxu0 %v54424_v37  ;;  %49321 = vmatmul.mubr.f32.vlgmr.msra.gmra.mrb[4].mxu1 %v54358_v13 }
 0x29a   :  { %49279 = vmatpush3.xpose.msra.mxu0 %v2236_v51  ;;  %49324 = vmatpush3.xpose.msra.mxu1 %v2683_v41  ;;  %v54745_v51 = vand.u32 4294901760, %v5745_v50 }
 0x29b   :  { %49280 = vmatprep.mubr.msk.f32.mxu0 %vm54248_vm3, %v58980_v54  ;;  %49325 = vmatprep.mubr.msk.f32.mxu1 %vm54248_vm3, %v58980_v54 }
 0x29c   :  { %49283 = vmatprep.subr.mxu0 %v58980_v54  ;;  %49328 = vmatprep.subr.mxu1 %v58980_v54 }
 0x2a1   :  { %49281 = vmatmul.mubr.f32.vlgmr.msra.gmra.mrb[6].mxu0 %v54390_v26  ;;  %49326 = vmatmul.mubr.f32.vlgmr.msra.gmra.mrb[4].mxu1 %v54346_v8 }
 0x2a2   :  { %49284 = vmatpush3.xpose.msra.mxu0 %v2233_v47  ;;  %49329 = vmatpush3.xpose.msra.mxu1 %v54430_v39  ;;  %v619_v39 = vld [vmem:[%s58976_s2 + $0x60] sm:$0xff] }
 0x2a3   :  { %49285 = vmatprep.mubr.msk.f32.mxu0 %vm54248_vm3, %v58980_v54  ;;  %49330 = vmatprep.mubr.msk.f32.mxu1 %vm54248_vm3, %v58980_v54  ;;  %v6194_v41 = vsel %vm567_vm2, %v619_v39, 0 }
 0x2a4   :  { %49363 = vmatprep.subr.mxu1 %v58980_v54  ;;  %49288 = vmatprep.subr.mxu0 %v58980_v54  ;;  %v54702_v42 = vand.u32 4294901760, %v6194_v41 }
 0x2a6   :  { %v54711_v43 = vsub.f32 %v6194_v41, %v54702_v42 }
 0x2a9   :  { %49286 = vmatmul.mubr.f32.vlgmr.msra.gmra.mrb[6].mxu0 %v54399_v28  ;;  %49331 = vmatmul.mubr.f32.vlgmr.msra.gmra.mrb[4].mxu1 %v54346_v8 }
 0x2aa   :  { %49364 = vmatpush3.xpose.msra.mxu1 %v54498_v53  ;;  %49289 = vmatpush3.xpose.msra.mxu0 %v54469_v46 }
 0x2ab   :  { %49365 = vmatprep.mubr.msk.f32.mxu1 %vm54248_vm3, %v58980_v54  ;;  %49290 = vmatprep.mubr.msk.f32.mxu0 %vm54248_vm3, %v58980_v54 }
 0x2ac   :  { %49368 = vmatprep.subr.mxu1 %v58980_v54  ;;  %49293 = vmatprep.subr.mxu0 %v58980_v54 }
 0x2ad   :  { %49366 = vmatmul.mubr.f32.vlgmr.msra.gmra.mrb[6].mxu1 %v54364_v18 }
 0x2ae   :  { %49369 = vmatpush3.xpose.msra.mxu1 %v3583_v58  ;;  %49370 = vmatprep.mubr.msk.f32.mxu1 %vm54248_vm3, %v58980_v54 }
 0x2af   :  { %49373 = vmatprep.subr.mxu1 %v58980_v54 }
 0x2b1   :  { %49291 = vmatmul.mubr.f32.vlgmr.msra.gmra.mrb[6].mxu0 %v54407_v30 }
 0x2b2   :  { %49294 = vmatpush3.xpose.msra.mxu0 %v2234_v48  ;;  %49295 = vmatprep.mubr.msk.f32.mxu0 %vm54248_vm3, %v58980_v54 }
 0x2b3   :  { %49298 = vmatprep.subr.mxu0 %v58980_v54 }
 0x2b5   :  { %49371 = vmatmul.mubr.f32.vlgmr.msra.gmra.mrb[6].mxu1 %v54346_v8 }
 0x2b6   :  { %49374 = vmatpush3.xpose.msra.mxu1 %v3580_v55  ;;  %49375 = vmatprep.mubr.msk.f32.mxu1 %vm54248_vm3, %v58980_v54 }
 0x2b7   :  { %49378 = vmatprep.subr.mxu1 %v58980_v54 }
 0x2b9   :  { %49296 = vmatmul.mubr.f32.vlgmr.msra.gmra.mrb[6].mxu0 %v54390_v26 }
 0x2ba   :  { %49299 = vmatpush3.xpose.msra.mxu0 %v54469_v46  ;;  %49300 = vmatprep.mubr.msk.f32.mxu0 %vm54248_vm3, %v58980_v54  ;;  %v6275_v46 = vand.u32 4294901760, %v54711_v43 }
 0x2bb   :  { %49333 = vmatprep.subr.mxu0 %v58980_v54 }
 0x2bc   :  { %v6276_v47 = vsub.f32 %v54711_v43, %v6275_v46 }
 0x2bd   :  { %49376 = vmatmul.mubr.f32.vlgmr.msra.gmra.mrb[6].mxu1 %v54349_v10 }
 0x2be   :  { %49379 = vmatpush3.xpose.msra.mxu1 %v54498_v53  ;;  %49380 = vmatprep.mubr.msk.f32.mxu1 %vm54248_vm3, %v58980_v54  ;;  %v6277_v48 = vand.u32 4294901760, %v6276_v47 }
 0x2bf   :  { %49383 = vmatprep.subr.mxu1 %v58980_v54 }
 0x2c1   :  { %49301 = vmatmul.mubr.f32.vlgmr.msra.gmra.mrb[6].mxu0 %v54390_v26 }
 0x2c2   :  { %49334 = vmatpush3.xpose.msra.mxu0 %v54537_v61  ;;  %49335 = vmatprep.mubr.msk.f32.mxu0 %vm54248_vm3, %v58980_v54 }
 0x2c3   :  { %49338 = vmatprep.subr.mxu0 %v58980_v54 }
 0x2c5   :  { %49336 = vmatmul.mubr.f32.vlgmr.msra.gmra.mrb[8].mxu0 %v54424_v37  ;;  %49381 = vmatmul.mubr.f32.vlgmr.msra.gmra.mrb[6].mxu1 %v54358_v13 }
 0x2c6   :  { %49339 = vmatpush3.xpose.msra.mxu0 %v3134_v2  ;;  %49384 = vmatpush3.xpose.msra.mxu1 %v3581_v56 }
 0x2c7   :  { %49340 = vmatprep.mubr.msk.f32.mxu0 %vm54248_vm3, %v58980_v54  ;;  %49385 = vmatprep.mubr.msk.f32.mxu1 %vm54248_vm3, %v58980_v54 }
 0x2c8   :  { %49343 = vmatprep.subr.mxu0 %v58980_v54  ;;  %49388 = vmatprep.subr.mxu1 %v58980_v54 }
 0x2cd   :  { %49341 = vmatmul.mubr.f32.vlgmr.msra.gmra.mrb[8].mxu0 %v54390_v26  ;;  %49386 = vmatmul.mubr.f32.vlgmr.msra.gmra.mrb[6].mxu1 %v54346_v8 }
 0x2ce   :  { %49344 = vmatpush3.xpose.msra.mxu0 %v3131_v62  ;;  %49389 = vmatpush3.xpose.msra.mxu1 %v54498_v53  ;;  %v5825_v53 = vsub.f32 %v5745_v50, %v54745_v51 }
 0x2cf   :  { %49345 = vmatprep.mubr.msk.f32.mxu0 %vm54248_vm3, %v58980_v54  ;;  %49390 = vmatprep.mubr.msk.f32.mxu1 %vm54248_vm3, %v58980_v54 }
 0x2d0   :  { %49423 = vmatprep.subr.mxu1 %v58980_v54  ;;  %49348 = vmatprep.subr.mxu0 %v58980_v54  ;;  %v5826_v58 = vand.u32 4294901760, %v5825_v53 }
 0x2d2   :  { %v5827_v60 = vsub.f32 %v5825_v53, %v5826_v58 }
 0x2d4   :  { %v5828_v62 = vand.u32 4294901760, %v5827_v60 }
 0x2d5   :  { %49346 = vmatmul.mubr.f32.vlgmr.msra.gmra.mrb[8].mxu0 %v54399_v28  ;;  %49391 = vmatmul.mubr.f32.vlgmr.msra.gmra.mrb[6].mxu1 %v54346_v8 }
 0x2d6   :  { %49424 = vmatpush3.xpose.msra.mxu1 %v54566_v4  ;;  %49349 = vmatpush3.xpose.msra.mxu0 %v54537_v61 }
 0x2d7   :  { %49425 = vmatprep.mubr.msk.f32.mxu1 %vm54248_vm3, %v58980_v54  ;;  %49350 = vmatprep.mubr.msk.f32.mxu0 %vm54248_vm3, %v58980_v54 }
 0x2d8   :  { %49428 = vmatprep.subr.mxu1 %v58980_v54  ;;  %49353 = vmatprep.subr.mxu0 %v58980_v54 }
 0x2d9   :  { %49426 = vmatmul.mubr.f32.vlgmr.msra.gmra.mrb[8].mxu1 %v54364_v18 }
 0x2da   :  { %49429 = vmatpush3.xpose.msra.mxu1 %v4481_v9  ;;  %49430 = vmatprep.mubr.msk.f32.mxu1 %vm54248_vm3, %v58980_v54  ;;  %v6643_v9 = vsel %vm567_vm2, %v620_v7, 0 }
 0x2db   :  { %49433 = vmatprep.subr.mxu1 %v58980_v54  ;;  %v54821_v11 = vand.u32 4294901760, %v6643_v9 }
 0x2dd   :  { %49351 = vmatmul.mubr.f32.vlgmr.msra.gmra.mrb[8].mxu0 %v54407_v30  ;;  %v6723_v12 = vsub.f32 %v6643_v9, %v54821_v11 }
 0x2de   :  { %49354 = vmatpush3.xpose.msra.mxu0 %v3132_v63  ;;  %49355 = vmatprep.mubr.msk.f32.mxu0 %vm54248_vm3, %v58980_v54 }
 0x2df   :  { %49358 = vmatprep.subr.mxu0 %v58980_v54 }
 0x2e1   :  { %49431 = vmatmul.mubr.f32.vlgmr.msra.gmra.mrb[8].mxu1 %v54346_v8 }
 0x2e2   :  { %49434 = vmatpush3.xpose.msra.mxu1 %v4478_v5  ;;  %49435 = vmatprep.mubr.msk.f32.mxu1 %vm54248_vm3, %v58980_v54 }
 0x2e3   :  { %49438 = vmatprep.subr.mxu1 %v58980_v54 }
 0x2e5   :  { %49356 = vmatmul.mubr.f32.vlgmr.msra.gmra.mrb[8].mxu0 %v54390_v26 }
 0x2e6   :  { %49359 = vmatpush3.xpose.msra.mxu0 %v54537_v61  ;;  %49360 = vmatprep.mubr.msk.f32.mxu0 %vm54248_vm3, %v58980_v54  ;;  %v621_v61 = vld [vmem:[%s58976_s2 + $0x70] sm:$0xff] }
 0x2e7   :  { %49393 = vmatprep.subr.mxu0 %v58980_v54  ;;  %v7092_v63 = vsel %vm567_vm2, %v621_v61, 0 }
 0x2e8   :  { %v54780_v0 = vand.u32 4294901760, %v7092_v63 }
 0x2e9   :  { %49436 = vmatmul.mubr.f32.vlgmr.msra.gmra.mrb[8].mxu1 %v54349_v10 }
 0x2ea   :  { %49439 = vmatpush3.xpose.msra.mxu1 %v54566_v4  ;;  %49440 = vmatprep.mubr.msk.f32.mxu1 %vm54248_vm3, %v58980_v54  ;;  %v7172_v1 = vsub.f32 %v7092_v63, %v54780_v0  ;;  %v627_v63 = vld [vmem:[%s58976_s2 + $0xa0] sm:$0xff] }
 0x2eb   :  { %49443 = vmatprep.subr.mxu1 %v58980_v54 }
 0x2ed   :  { %49361 = vmatmul.mubr.f32.vlgmr.msra.gmra.mrb[8].mxu0 %v54390_v26 }
 0x2ee   :  { %49394 = vmatpush3.xpose.msra.mxu0 %v54605_v14  ;;  %49395 = vmatprep.mubr.msk.f32.mxu0 %vm54248_vm3, %v58980_v54 }
 0x2ef   :  { %49398 = vmatprep.subr.mxu0 %v58980_v54 }
 0x2f1   :  { %49396 = vmatmul.mubr.f32.vlgmr.msra.gmra.mrb[10].mxu0 %v54424_v37  ;;  %49441 = vmatmul.mubr.f32.vlgmr.msra.gmra.mrb[8].mxu1 %v54358_v13 }
 0x2f2   :  { %49399 = vmatpush3.xpose.msra.mxu0 %v4032_v20  ;;  %49444 = vmatpush3.xpose.msra.mxu1 %v4479_v6 }
 0x2f3   :  { %49400 = vmatprep.mubr.msk.f32.mxu0 %vm54248_vm3, %v58980_v54  ;;  %49445 = vmatprep.mubr.msk.f32.mxu1 %vm54248_vm3, %v58980_v54 }
 0x2f4   :  { %49403 = vmatprep.subr.mxu0 %v58980_v54  ;;  %49448 = vmatprep.subr.mxu1 %v58980_v54 }
 0x2f9   :  { %49401 = vmatmul.mubr.f32.vlgmr.msra.gmra.mrb[10].mxu0 %v54390_v26  ;;  %49446 = vmatmul.mubr.f32.vlgmr.msra.gmra.mrb[8].mxu1 %v54346_v8 }
 0x2fa   :  { %49404 = vmatpush3.xpose.msra.mxu0 %v4029_v15  ;;  %49449 = vmatpush3.xpose.msra.mxu1 %v54566_v4  ;;  %v7173_v4 = vand.u32 4294901760, %v7172_v1 }
 0x2fb   :  { %49405 = vmatprep.mubr.msk.f32.mxu0 %vm54248_vm3, %v58980_v54  ;;  %49450 = vmatprep.mubr.msk.f32.mxu1 %vm54248_vm3, %v58980_v54 }
 0x2fc   :  { %49483 = vmatprep.subr.mxu1 %v58980_v54  ;;  %49408 = vmatprep.subr.mxu0 %v58980_v54  ;;  %v7174_v5 = vsub.f32 %v7172_v1, %v7173_v4 }
 0x2fe   :  { %v7175_v6 = vand.u32 4294901760, %v7174_v5 }
 0x301   :  { %49406 = vmatmul.mubr.f32.vlgmr.msra.gmra.mrb[10].mxu0 %v54399_v28  ;;  %49451 = vmatmul.mubr.f32.vlgmr.msra.gmra.mrb[8].mxu1 %v54346_v8 }
 0x302   :  { %49484 = vmatpush3.xpose.msra.mxu1 %v54634_v22  ;;  %49409 = vmatpush3.xpose.msra.mxu0 %v54605_v14 }
 0x303   :  { %49485 = vmatprep.mubr.msk.f32.mxu1 %vm54248_vm3, %v58980_v54  ;;  %49410 = vmatprep.mubr.msk.f32.mxu0 %vm54248_vm3, %v58980_v54 }
 0x304   :  { %49488 = vmatprep.subr.mxu1 %v58980_v54  ;;  %49413 = vmatprep.subr.mxu0 %v58980_v54 }
 0x305   :  { %49486 = vmatmul.mubr.f32.vlgmr.msra.gmra.mrb[10].mxu1 %v54364_v18 }
 0x306   :  { %49489 = vmatpush3.xpose.msra.mxu1 %v5379_v27  ;;  %49490 = vmatprep.mubr.msk.f32.mxu1 %vm54248_vm3, %v58980_v54 }
 0x307   :  { %49493 = vmatprep.subr.mxu1 %v58980_v54 }
 0x309   :  { %49411 = vmatmul.mubr.f32.vlgmr.msra.gmra.mrb[10].mxu0 %v54407_v30 }
 0x30a   :  { %49414 = vmatpush3.xpose.msra.mxu0 %v4030_v16  ;;  %49415 = vmatprep.mubr.msk.f32.mxu0 %vm54248_vm3, %v58980_v54  ;;  %v6724_v16 = vand.u32 4294901760, %v6723_v12 }
 0x30b   :  { %49418 = vmatprep.subr.mxu0 %v58980_v54 }
 0x30c   :  { %v6725_v17 = vsub.f32 %v6723_v12, %v6724_v16 }
 0x30d   :  { %49491 = vmatmul.mubr.f32.vlgmr.msra.gmra.mrb[10].mxu1 %v54346_v8 }
 0x30e   :  { %49494 = vmatpush3.xpose.msra.mxu1 %v5376_v23  ;;  %49495 = vmatprep.mubr.msk.f32.mxu1 %vm54248_vm3, %v58980_v54  ;;  %v6726_v20 = vand.u32 4294901760, %v6725_v17 }
 0x30f   :  { %49498 = vmatprep.subr.mxu1 %v58980_v54 }
 0x311   :  { %49416 = vmatmul.mubr.f32.vlgmr.msra.gmra.mrb[10].mxu0 %v54390_v26 }
 0x312   :  { %49419 = vmatpush3.xpose.msra.mxu0 %v54605_v14  ;;  %49420 = vmatprep.mubr.msk.f32.mxu0 %vm54248_vm3, %v58980_v54 }
 0x313   :  { %49453 = vmatprep.subr.mxu0 %v58980_v54 }
 0x315   :  { %49496 = vmatmul.mubr.f32.vlgmr.msra.gmra.mrb[10].mxu1 %v54349_v10 }
 0x316   :  { %49499 = vmatpush3.xpose.msra.mxu1 %v54634_v22  ;;  %49500 = vmatprep.mubr.msk.f32.mxu1 %vm54248_vm3, %v58980_v54 }
 0x317   :  { %49503 = vmatprep.subr.mxu1 %v58980_v54 }
 0x319   :  { %49421 = vmatmul.mubr.f32.vlgmr.msra.gmra.mrb[10].mxu0 %v54390_v26 }
 0x31a   :  { %49454 = vmatpush3.xpose.msra.mxu0 %v54673_v32  ;;  %49455 = vmatprep.mubr.msk.f32.mxu0 %vm54248_vm3, %v58980_v54 }
 0x31b   :  { %49458 = vmatprep.subr.mxu0 %v58980_v54 }
 0x31d   :  { %49456 = vmatmul.mubr.f32.vlgmr.msra.gmra.mrb[12].mxu0 %v54424_v37  ;;  %49501 = vmatmul.mubr.f32.vlgmr.msra.gmra.mrb[10].mxu1 %v54358_v13 }
 0x31e   :  { %49459 = vmatpush3.xpose.msra.mxu0 %v4930_v40  ;;  %49504 = vmatpush3.xpose.msra.mxu1 %v5377_v24 }
 0x31f   :  { %49460 = vmatprep.mubr.msk.f32.mxu0 %vm54248_vm3, %v58980_v54  ;;  %49505 = vmatprep.mubr.msk.f32.mxu1 %vm54248_vm3, %v58980_v54 }
 0x320   :  { %49463 = vmatprep.subr.mxu0 %v58980_v54  ;;  %49508 = vmatprep.subr.mxu1 %v58980_v54 }
 0x324   :  { %v1247_v44 = vpop.f32.mrb[0].mxu1 }
 0x325   :  { %v49212_v45 = vpop.f32.mrb[1].mxu1  ;;  %49461 = vmatmul.mubr.f32.vlgmr.msra.gmra.mrb[12].mxu0 %v54390_v26  ;;  %49506 = vmatmul.mubr.f32.vlgmr.msra.gmra.mrb[10].mxu1 %v54346_v8 }
 0x326   :  { %49464 = vmatpush3.xpose.msra.mxu0 %v4927_v33  ;;  %49509 = vmatpush3.xpose.msra.mxu1 %v54634_v22  ;;  %v54852_v22 = vand.u32 4294901760, %v7990_v21 }
 0x327   :  { %49465 = vmatprep.mubr.msk.f32.mxu0 %vm54248_vm3, %v58980_v54  ;;  %49510 = vmatprep.mubr.msk.f32.mxu1 %vm54248_vm3, %v58980_v54 }
 0x328   :  { %49543 = vmatprep.subr.mxu1 %v58980_v54  ;;  %49468 = vmatprep.subr.mxu0 %v58980_v54  ;;  %v8070_v23 = vsub.f32 %v7990_v21, %v54852_v22 }
 0x32a   :  { %v8071_v27 = vand.u32 4294901760, %v8070_v23 }
 0x32c   :  { %v8072_v29 = vsub.f32 %v8070_v23, %v8071_v27 }
 0x32d   :  { %49466 = vmatmul.mubr.f32.vlgmr.msra.gmra.mrb[12].mxu0 %v54399_v28  ;;  %49511 = vmatmul.mubr.f32.vlgmr.msra.gmra.mrb[10].mxu1 %v54346_v8 }
 0x32e   :  { %49544 = vmatpush3.xpose.msra.mxu1 %v54702_v42  ;;  %49469 = vmatpush3.xpose.msra.mxu0 %v54673_v32  ;;  %v8073_v31 = vand.u32 4294901760, %v8072_v29 }
 0x32f   :  { %49545 = vmatprep.mubr.msk.f32.mxu1 %vm54248_vm3, %v58980_v54  ;;  %49470 = vmatprep.mubr.msk.f32.mxu0 %vm54248_vm3, %v58980_v54 }
 0x330   :  { %49548 = vmatprep.subr.mxu1 %v58980_v54  ;;  %49473 = vmatprep.subr.mxu0 %v58980_v54 }
 0x331   :  { %49546 = vmatmul.mubr.f32.vlgmr.msra.gmra.mrb[12].mxu1 %v54364_v18 }
 0x332   :  { %49549 = vmatpush3.xpose.msra.mxu1 %v6277_v48  ;;  %49550 = vmatprep.mubr.msk.f32.mxu1 %vm54248_vm3, %v58980_v54 }
 0x333   :  { %49553 = vmatprep.subr.mxu1 %v58980_v54 }
 0x335   :  { %49471 = vmatmul.mubr.f32.vlgmr.msra.gmra.mrb[12].mxu0 %v54407_v30 }
 0x336   :  { %49474 = vmatpush3.xpose.msra.mxu0 %v4928_v34  ;;  %49475 = vmatprep.mubr.msk.f32.mxu0 %vm54248_vm3, %v58980_v54 }
 0x337   :  { %49478 = vmatprep.subr.mxu0 %v58980_v54 }
 0x339   :  { %49551 = vmatmul.mubr.f32.vlgmr.msra.gmra.mrb[12].mxu1 %v54346_v8 }
 0x33a   :  { %49554 = vmatpush3.xpose.msra.mxu1 %v54711_v43  ;;  %49555 = vmatprep.mubr.msk.f32.mxu1 %vm54248_vm3, %v58980_v54  ;;  %v625_v43 = vld [vmem:[%s58976_s2 + $0x90] sm:$0xff] }
 0x33b   :  { %49558 = vmatprep.subr.mxu1 %v58980_v54  ;;  %v8888_v45 = vsel %vm567_vm2, %v625_v43, 0 }
 0x33c   :  { %v1101_v55 = vpop.f32.mrb[2].mxu0 }
 0x33d   :  { %v53223_v56 = vadd.f32 %v47530_v52, %v1101_v55  ;;  %v49202_v57 = vpop.f32.mrb[3].mxu0  ;;  %49476 = vmatmul.mubr.f32.vlgmr.msra.gmra.mrb[12].mxu0 %v54390_v26 }
 0x33e   :  { %49479 = vmatpush3.xpose.msra.mxu0 %v54673_v32  ;;  %49480 = vmatprep.mubr.msk.f32.mxu0 %vm54248_vm3, %v58980_v54  ;;  %v622_v32 = vld [vmem:[%s58976_s2 + $0x78] sm:$0xff] }
 0x33f   :  { %v54761_v59 = vadd.f32 %v53223_v56, %v1247_v44  ;;  %49513 = vmatprep.subr.mxu0 %v58980_v54  ;;  %v7541_v33 = vsel %vm567_vm2, %v622_v32, 0 }
 0x340   :  { %v54893_v34 = vand.u32 4294901760, %v7541_v33 }
 0x341   :  { %49556 = vmatmul.mubr.f32.vlgmr.msra.gmra.mrb[12].mxu1 %v54349_v10 }
 0x342   :  { %49559 = vmatpush3.xpose.msra.mxu1 %v54702_v42  ;;  %49560 = vmatprep.mubr.msk.f32.mxu1 %vm54248_vm3, %v58980_v54  ;;  %v7621_v38 = vsub.f32 %v7541_v33, %v54893_v34 }
 0x343   :  { %49563 = vmatprep.subr.mxu1 %v58980_v54 }
 0x344   :  { %v7622_v41 = vand.u32 4294901760, %v7621_v38 }
 0x345   :  { %49481 = vmatmul.mubr.f32.vlgmr.msra.gmra.mrb[12].mxu0 %v54390_v26 }
 0x346   :  { %49514 = vmatpush3.xpose.msra.mxu0 %v54745_v51  ;;  %49515 = vmatprep.mubr.msk.f32.mxu0 %vm54248_vm3, %v58980_v54 }
 0x347   :  { %49518 = vmatprep.subr.mxu0 %v58980_v54 }
 0x349   :  { %49516 = vmatmul.mubr.f32.vlgmr.msra.gmra.mrb[14].mxu0 %v54424_v37  ;;  %49561 = vmatmul.mubr.f32.vlgmr.msra.gmra.mrb[12].mxu1 %v54358_v13 }
 0x34a   :  { %49519 = vmatpush3.xpose.msra.mxu0 %v5828_v62  ;;  %49564 = vmatpush3.xpose.msra.mxu1 %v6275_v46  ;;  %v54924_v46 = vand.u32 4294901760, %v8888_v45 }
 0x34b   :  { %49520 = vmatprep.mubr.msk.f32.mxu0 %vm54248_vm3, %v58980_v54  ;;  %49565 = vmatprep.mubr.msk.f32.mxu1 %vm54248_vm3, %v58980_v54 }
 0x34c   :  { %49523 = vmatprep.subr.mxu0 %v58980_v54  ;;  %49568 = vmatprep.subr.mxu1 %v58980_v54  ;;  %v8968_v47 = vsub.f32 %v8888_v45, %v54924_v46 }
 0x34e   :  { %v8969_v50 = vand.u32 4294901760, %v8968_v47 }
 0x350   :  { %v54789_v2 = vpop.f32.mrb[2].mxu1 }
 0x351   :  { %v49272_v3 = vpop.f32.mrb[3].mxu1  ;;  %49521 = vmatmul.mubr.f32.vlgmr.msra.gmra.mrb[14].mxu0 %v54390_v26  ;;  %49566 = vmatmul.mubr.f32.vlgmr.msra.gmra.mrb[12].mxu1 %v54346_v8 }
 0x352   :  { %49524 = vmatpush3.xpose.msra.mxu0 %v5825_v53  ;;  %49569 = vmatpush3.xpose.msra.mxu1 %v54702_v42  ;;  %v7623_v42 = vsub.f32 %v7621_v38, %v7622_v41  ;;  %v624_v53 = vld [vmem:[%s58976_s2 + $0x88] sm:$0xff] }
 0x353   :  { %49525 = vmatprep.mubr.msk.f32.mxu0 %vm54248_vm3, %v58980_v54  ;;  %49570 = vmatprep.mubr.msk.f32.mxu1 %vm54248_vm3, %v58980_v54  ;;  %v8439_v55 = vsel %vm567_vm2, %v624_v53, 0 }
 0x354   :  { %49603 = vmatprep.subr.mxu1 %v58980_v54  ;;  %49528 = vmatprep.subr.mxu0 %v58980_v54  ;;  %v7624_v44 = vand.u32 4294901760, %v7623_v42  ;;  %v54965_v56 = vand.u32 4294901760, %v8439_v55 }
 0x356   :  { %v8519_v57 = vsub.f32 %v8439_v55, %v54965_v56 }
 0x358   :  { %v8520_v61 = vand.u32 4294901760, %v8519_v57 }
 0x359   :  { %49526 = vmatmul.mubr.f32.vlgmr.msra.gmra.mrb[14].mxu0 %v54399_v28  ;;  %49571 = vmatmul.mubr.f32.vlgmr.msra.gmra.mrb[12].mxu1 %v54346_v8 }
 0x35a   :  { %49604 = vmatpush3.xpose.msra.mxu1 %v54780_v0  ;;  %49529 = vmatpush3.xpose.msra.mxu0 %v54745_v51  ;;  %v8521_v62 = vsub.f32 %v8519_v57, %v8520_v61 }
 0x35b   :  { %49605 = vmatprep.mubr.msk.f32.mxu1 %vm54248_vm3, %v58980_v54  ;;  %49530 = vmatprep.mubr.msk.f32.mxu0 %vm54248_vm3, %v58980_v54 }
 0x35c   :  { %49608 = vmatprep.subr.mxu1 %v58980_v54  ;;  %49533 = vmatprep.subr.mxu0 %v58980_v54 }
 0x35d   :  { %49606 = vmatmul.mubr.f32.vlgmr.msra.gmra.mrb[14].mxu1 %v54364_v18 }
 0x35e   :  { %49609 = vmatpush3.xpose.msra.mxu1 %v7175_v6  ;;  %49610 = vmatprep.mubr.msk.f32.mxu1 %vm54248_vm3, %v58980_v54 }
 0x35f   :  { %49613 = vmatprep.subr.mxu1 %v58980_v54 }
 0x361   :  { %49531 = vmatmul.mubr.f32.vlgmr.msra.gmra.mrb[14].mxu0 %v54407_v30 }
 0x362   :  { %49534 = vmatpush3.xpose.msra.mxu0 %v5826_v58  ;;  %49535 = vmatprep.mubr.msk.f32.mxu0 %vm54248_vm3, %v58980_v54 }
 0x363   :  { %49538 = vmatprep.subr.mxu0 %v58980_v54 }
 0x365   :  { %49611 = vmatmul.mubr.f32.vlgmr.msra.gmra.mrb[14].mxu1 %v54346_v8 }
 0x366   :  { %49614 = vmatpush3.xpose.msra.mxu1 %v7172_v1  ;;  %49615 = vmatprep.mubr.msk.f32.mxu1 %vm54248_vm3, %v58980_v54  ;;  %v9786_v1 = vsel %vm567_vm2, %v627_v63, 0 }
 0x367   :  { %49618 = vmatprep.subr.mxu1 %v58980_v54  ;;  %v54996_v3 = vand.u32 4294901760, %v9786_v1 }
 0x368   :  { %v54829_v14 = vpop.f32.mrb[4].mxu0 }
 0x369   :  { %v49242_v15 = vpop.f32.mrb[5].mxu0  ;;  %49536 = vmatmul.mubr.f32.vlgmr.msra.gmra.mrb[14].mxu0 %v54390_v26 }
 0x36a   :  { %49539 = vmatpush3.xpose.msra.mxu0 %v54745_v51  ;;  %49540 = vmatprep.mubr.msk.f32.mxu0 %vm54248_vm3, %v58980_v54  ;;  %v8970_v51 = vsub.f32 %v8968_v47, %v8969_v50 }
 0x36b   :  { %49573 = vmatprep.subr.mxu0 %v58980_v54 }
 0x36c   :  { %v8971_v52 = vand.u32 4294901760, %v8970_v51  ;;  %v11583_v51 = vsel %vm11581_vm4, %v54761_v59, 0 }
 0x36d   :  { %49616 = vmatmul.mubr.f32.vlgmr.msra.gmra.mrb[14].mxu1 %v54349_v10  ;;  %v55152_v53 = vand.u32 4294901760, %v11583_v51 }
 0x36e   :  { %49619 = vmatpush3.xpose.msra.mxu1 %v54780_v0  ;;  %49620 = vmatprep.mubr.msk.f32.mxu1 %vm54248_vm3, %v58980_v54 }
 0x36f   :  { %49623 = vmatprep.subr.mxu1 %v58980_v54  ;;  %v55163_v59 = vsub.f32 %v11583_v51, %v55152_v53  ;;  %v47534_v51 = vld [vmem:[%s58977_s3 + $0x4] ss:$0 sm:$0xff] }
 0x371   :  { %49541 = vmatmul.mubr.f32.vlgmr.msra.gmra.mrb[14].mxu0 %v54390_v26 }
 0x372   :  { %49574 = vmatpush3.xpose.msra.mxu0 %v54821_v11  ;;  %49575 = vmatprep.mubr.msk.f32.mxu0 %vm54248_vm3, %v58980_v54 }
 0x373   :  { %49578 = vmatprep.subr.mxu0 %v58980_v54 }
 0x375   :  { %49576 = vmatmul.mubr.f32.vlgmr.msra.gmra.mrb[16].mxu0 %v54424_v37  ;;  %49621 = vmatmul.mubr.f32.vlgmr.msra.gmra.mrb[14].mxu1 %v54358_v13 }
 0x376   :  { %49579 = vmatpush3.xpose.msra.mxu0 %v6726_v20  ;;  %49624 = vmatpush3.xpose.msra.mxu1 %v7173_v4  ;;  %v9866_v4 = vsub.f32 %v9786_v1, %v54996_v3 }
 0x377   :  { %49580 = vmatprep.mubr.msk.f32.mxu0 %vm54248_vm3, %v58980_v54  ;;  %49625 = vmatprep.mubr.msk.f32.mxu1 %vm54248_vm3, %v58980_v54 }
 0x378   :  { %49583 = vmatprep.subr.mxu0 %v58980_v54  ;;  %49628 = vmatprep.subr.mxu1 %v58980_v54  ;;  %v9867_v7 = vand.u32 4294901760, %v9866_v4 }
 0x37a   :  { %v9868_v9 = vsub.f32 %v9866_v4, %v9867_v7 }
 0x37c   :  { %v54861_v24 = vpop.f32.mrb[4].mxu1 }
 0x37d   :  { %v49332_v25 = vpop.f32.mrb[5].mxu1  ;;  %49581 = vmatmul.mubr.f32.vlgmr.msra.gmra.mrb[16].mxu0 %v54390_v26  ;;  %49626 = vmatmul.mubr.f32.vlgmr.msra.gmra.mrb[14].mxu1 %v54346_v8 }
 0x37e   :  { %49584 = vmatpush3.xpose.msra.mxu0 %v6723_v12  ;;  %49629 = vmatpush3.xpose.msra.mxu1 %v54780_v0  ;;  %v8522_v0 = vand.u32 4294901760, %v8521_v62  ;;  %v626_v12 = vld [vmem:[%s58976_s2 + $0x98] sm:$0xff] }
 0x37f   :  { %49585 = vmatprep.mubr.msk.f32.mxu0 %vm54248_vm3, %v58980_v54  ;;  %49630 = vmatprep.mubr.msk.f32.mxu1 %vm54248_vm3, %v58980_v54  ;;  %v9337_v15 = vsel %vm567_vm2, %v626_v12, 0  ;;  %v47540_v12 = vld [vmem:[%s58977_s3 + $0xa] ss:$0 sm:$0xff] }
 0x380   :  { %49663 = vmatprep.subr.mxu1 %v58980_v54  ;;  %49588 = vmatprep.subr.mxu0 %v58980_v54 }
 0x385   :  { %49586 = vmatmul.mubr.f32.vlgmr.msra.gmra.mrb[16].mxu0 %v54399_v28  ;;  %49631 = vmatmul.mubr.f32.vlgmr.msra.gmra.mrb[14].mxu1 %v54346_v8 }
 0x386   :  { %49664 = vmatpush3.xpose.msra.mxu1 %v54852_v22  ;;  %49589 = vmatpush3.xpose.msra.mxu0 %v54821_v11 }
 0x387   :  { %49665 = vmatprep.mubr.msk.f32.mxu1 %vm54248_vm3, %v58980_v54  ;;  %49590 = vmatprep.mubr.msk.f32.mxu0 %vm54248_vm3, %v58980_v54 }
 0x388   :  { %49668 = vmatprep.subr.mxu1 %v58980_v54  ;;  %49593 = vmatprep.subr.mxu0 %v58980_v54 }
 0x389   :  { %49666 = vmatmul.mubr.f32.vlgmr.msra.gmra.mrb[16].mxu1 %v54364_v18 }
 0x38a   :  { %49669 = vmatpush3.xpose.msra.mxu1 %v8073_v31  ;;  %49670 = vmatprep.mubr.msk.f32.mxu1 %vm54248_vm3, %v58980_v54 }
 0x38b   :  { %49673 = vmatprep.subr.mxu1 %v58980_v54 }
 0x38d   :  { %49591 = vmatmul.mubr.f32.vlgmr.msra.gmra.mrb[16].mxu0 %v54407_v30 }
 0x38e   :  { %49594 = vmatpush3.xpose.msra.mxu0 %v6724_v16  ;;  %49595 = vmatprep.mubr.msk.f32.mxu0 %vm54248_vm3, %v58980_v54  ;;  %v55037_v16 = vand.u32 4294901760, %v9337_v15 }
 0x38f   :  { %49598 = vmatprep.subr.mxu0 %v58980_v54 }
 0x390   :  { %v9417_v17 = vsub.f32 %v9337_v15, %v55037_v16 }
 0x391   :  { %49671 = vmatmul.mubr.f32.vlgmr.msra.gmra.mrb[16].mxu1 %v54346_v8 }
 0x392   :  { %49674 = vmatpush3.xpose.msra.mxu1 %v8070_v23  ;;  %49675 = vmatprep.mubr.msk.f32.mxu1 %vm54248_vm3, %v58980_v54  ;;  %v9418_v21 = vand.u32 4294901760, %v9417_v17  ;;  %v629_v23 = vld [vmem:[%s58976_s2 + $0xb0] sm:$0xff] }
 0x393   :  { %49678 = vmatprep.subr.mxu1 %v58980_v54 }
 0x394   :  { %v54901_v39 = vpop.f32.mrb[6].mxu0 }
 0x395   :  { %v49302_v40 = vpop.f32.mrb[7].mxu0  ;;  %49596 = vmatmul.mubr.f32.vlgmr.msra.gmra.mrb[16].mxu0 %v54390_v26 }
 0x396   :  { %49599 = vmatpush3.xpose.msra.mxu0 %v54821_v11  ;;  %49600 = vmatprep.mubr.msk.f32.mxu0 %vm54248_vm3, %v58980_v54  ;;  %v9869_v11 = vand.u32 4294901760, %v9868_v9 }
 0x397   :  { %49633 = vmatprep.subr.mxu0 %v58980_v54 }
 0x399   :  { %49676 = vmatmul.mubr.f32.vlgmr.msra.gmra.mrb[16].mxu1 %v54349_v10 }
 0x39a   :  { %49679 = vmatpush3.xpose.msra.mxu1 %v54852_v22  ;;  %49680 = vmatprep.mubr.msk.f32.mxu1 %vm54248_vm3, %v58980_v54 }
 0x39b   :  { %49683 = vmatprep.subr.mxu1 %v58980_v54 }
 0x39d   :  { %49601 = vmatmul.mubr.f32.vlgmr.msra.gmra.mrb[16].mxu0 %v54390_v26 }
 0x39e   :  { %49634 = vmatpush3.xpose.msra.mxu0 %v54893_v34  ;;  %49635 = vmatprep.mubr.msk.f32.mxu0 %vm54248_vm3, %v58980_v54 }
 0x39f   :  { %49638 = vmatprep.subr.mxu0 %v58980_v54 }
 0x3a1   :  { %49636 = vmatmul.mubr.f32.vlgmr.msra.gmra.mrb[18].mxu0 %v54424_v37  ;;  %49681 = vmatmul.mubr.f32.vlgmr.msra.gmra.mrb[16].mxu1 %v54358_v13 }
 0x3a2   :  { %49639 = vmatpush3.xpose.msra.mxu0 %v7624_v44  ;;  %49684 = vmatpush3.xpose.msra.mxu1 %v8071_v27  ;;  %v10684_v27 = vsel %vm567_vm2, %v629_v23, 0 }
 0x3a3   :  { %49640 = vmatprep.mubr.msk.f32.mxu0 %vm54248_vm3, %v58980_v54  ;;  %49685 = vmatprep.mubr.msk.f32.mxu1 %vm54248_vm3, %v58980_v54  ;;  %v55068_v29 = vand.u32 4294901760, %v10684_v27 }
 0x3a4   :  { %49643 = vmatprep.subr.mxu0 %v58980_v54  ;;  %49688 = vmatprep.subr.mxu1 %v58980_v54 }
 0x3a5   :  { %v55077_v31 = vsub.f32 %v10684_v27, %v55068_v29 }
 0x3a8   :  { %v54933_v48 = vpop.f32.mrb[6].mxu1 }
 0x3a9   :  { %v49392_v49 = vpop.f32.mrb[7].mxu1  ;;  %49641 = vmatmul.mubr.f32.vlgmr.msra.gmra.mrb[18].mxu0 %v54390_v26  ;;  %49686 = vmatmul.mubr.f32.vlgmr.msra.gmra.mrb[16].mxu1 %v54346_v8 }
 0x3aa   :  { %49644 = vmatpush3.xpose.msra.mxu0 %v7621_v38  ;;  %49689 = vmatpush3.xpose.msra.mxu1 %v54852_v22  ;;  %v9419_v22 = vsub.f32 %v9417_v17, %v9418_v21 }
 0x3ab   :  { %49645 = vmatprep.mubr.msk.f32.mxu0 %vm54248_vm3, %v58980_v54  ;;  %49690 = vmatprep.mubr.msk.f32.mxu1 %vm54248_vm3, %v58980_v54 }
 0x3ac   :  { %49723 = vmatprep.subr.mxu1 %v58980_v54  ;;  %49648 = vmatprep.subr.mxu0 %v58980_v54  ;;  %v9420_v25 = vand.u32 4294901760, %v9419_v22 }
 0x3b1   :  { %49646 = vmatmul.mubr.f32.vlgmr.msra.gmra.mrb[18].mxu0 %v54399_v28  ;;  %49691 = vmatmul.mubr.f32.vlgmr.msra.gmra.mrb[16].mxu1 %v54346_v8 }
 0x3b2   :  { %49724 = vmatpush3.xpose.msra.mxu1 %v54924_v46  ;;  %49649 = vmatpush3.xpose.msra.mxu0 %v54893_v34 }
 0x3b3   :  { %49725 = vmatprep.mubr.msk.f32.mxu1 %vm54248_vm3, %v58980_v54  ;;  %49650 = vmatprep.mubr.msk.f32.mxu0 %vm54248_vm3, %v58980_v54 }
 0x3b4   :  { %49728 = vmatprep.subr.mxu1 %v58980_v54  ;;  %49653 = vmatprep.subr.mxu0 %v58980_v54 }
 0x3b5   :  { %49726 = vmatmul.mubr.f32.vlgmr.msra.gmra.mrb[18].mxu1 %v54364_v18 }
 0x3b6   :  { %49729 = vmatpush3.xpose.msra.mxu1 %v8971_v52  ;;  %49730 = vmatprep.mubr.msk.f32.mxu1 %vm54248_vm3, %v58980_v54 }
 0x3b7   :  { %49733 = vmatprep.subr.mxu1 %v58980_v54 }
 0x3b9   :  { %49651 = vmatmul.mubr.f32.vlgmr.msra.gmra.mrb[18].mxu0 %v54407_v30 }
 0x3ba   :  { %49654 = vmatpush3.xpose.msra.mxu0 %v7622_v41  ;;  %49655 = vmatprep.mubr.msk.f32.mxu0 %vm54248_vm3, %v58980_v54  ;;  %v628_v41 = vld [vmem:[%s58976_s2 + $0xa8] sm:$0xff] }
 0x3bb   :  { %49658 = vmatprep.subr.mxu0 %v58980_v54  ;;  %v10235_v42 = vsel %vm567_vm2, %v628_v41, 0 }
 0x3bc   :  { %v55113_v43 = vand.u32 4294901760, %v10235_v42 }
 0x3bd   :  { %49731 = vmatmul.mubr.f32.vlgmr.msra.gmra.mrb[18].mxu1 %v54346_v8 }
 0x3be   :  { %49734 = vmatpush3.xpose.msra.mxu1 %v8968_v47  ;;  %49735 = vmatprep.mubr.msk.f32.mxu1 %vm54248_vm3, %v58980_v54  ;;  %v47538_v47 = vld [vmem:[%s58977_s3 + $0x8] ss:$0 sm:$0xff] }
 0x3bf   :  { %49738 = vmatprep.subr.mxu1 %v58980_v54 }
 0x3c0   :  { %v54973_v58 = vpop.f32.mrb[8].mxu0 }
 0x3c1   :  { %v49362_v60 = vpop.f32.mrb[9].mxu0  ;;  %49656 = vmatmul.mubr.f32.vlgmr.msra.gmra.mrb[18].mxu0 %v54390_v26 }
 0x3c2   :  { %49659 = vmatpush3.xpose.msra.mxu0 %v54893_v34  ;;  %49660 = vmatprep.mubr.msk.f32.mxu0 %vm54248_vm3, %v58980_v54  ;;  %v10765_v34 = vand.u32 4294901760, %v55077_v31  ;;  %v11656_v60 = vand.u32 4294901760, %v55163_v59 }
 0x3c3   :  { %49693 = vmatprep.subr.mxu0 %v58980_v54 }
 0x3c4   :  { %v10766_v38 = vsub.f32 %v55077_v31, %v10765_v34  ;;  %v11657_v62 = vsub.f32 %v55163_v59, %v11656_v60 }
 0x3c5   :  { %49736 = vmatmul.mubr.f32.vlgmr.msra.gmra.mrb[18].mxu1 %v54349_v10 }
 0x3c6   :  { %49739 = vmatpush3.xpose.msra.mxu1 %v54924_v46  ;;  %49740 = vmatprep.mubr.msk.f32.mxu1 %vm54248_vm3, %v58980_v54  ;;  %v10767_v40 = vand.u32 4294901760, %v10766_v38  ;;  %v47531_v38 = vld [vmem:[%s58977_s3 + $0x1] ss:$0 sm:$0xff] }
 0x3c7   :  { %49743 = vmatprep.subr.mxu1 %v58980_v54 }
 0x3c9   :  { %49661 = vmatmul.mubr.f32.vlgmr.msra.gmra.mrb[18].mxu0 %v54390_v26 }
 0x3ca   :  { %49694 = vmatpush3.xpose.msra.mxu0 %v54965_v56  ;;  %49695 = vmatprep.mubr.msk.f32.mxu0 %vm54248_vm3, %v58980_v54 }
 0x3cb   :  { %49698 = vmatprep.subr.mxu0 %v58980_v54 }
 0x3cd   :  { %49696 = vmatmul.mubr.f32.vlgmr.msra.gmra.mrb[20].mxu0 %v54424_v37  ;;  %49741 = vmatmul.mubr.f32.vlgmr.msra.gmra.mrb[18].mxu1 %v54358_v13 }
 0x3ce   :  { %49699 = vmatpush3.xpose.msra.mxu0 %v8522_v0  ;;  %49744 = vmatpush3.xpose.msra.mxu1 %v8969_v50  ;;  %v11658_v0 = vand.u32 4294901760, %v11657_v62 }
 0x3cf   :  { %49700 = vmatprep.mubr.msk.f32.mxu0 %vm54248_vm3, %v58980_v54  ;;  %49745 = vmatprep.mubr.msk.f32.mxu1 %vm54248_vm3, %v58980_v54 }
 0x3d0   :  { %49703 = vmatprep.subr.mxu0 %v58980_v54  ;;  %49748 = vmatprep.subr.mxu1 %v58980_v54 }
 0x3d4   :  { %v55005_v5 = vpop.f32.mrb[8].mxu1 }
 0x3d5   :  { %v49452_v6 = vpop.f32.mrb[9].mxu1  ;;  %49701 = vmatmul.mubr.f32.vlgmr.msra.gmra.mrb[20].mxu0 %v54390_v26  ;;  %49746 = vmatmul.mubr.f32.vlgmr.msra.gmra.mrb[18].mxu1 %v54346_v8  ;;  %v53232_v50 = vadd.f32 %v47538_v47, %v55005_v5 }
 0x3d6   :  { %49704 = vmatpush3.xpose.msra.mxu0 %v8519_v57  ;;  %49749 = vmatpush3.xpose.msra.mxu1 %v54924_v46 }
 0x3d7   :  { %49705 = vmatprep.mubr.msk.f32.mxu0 %vm54248_vm3, %v58980_v54  ;;  %49750 = vmatprep.mubr.msk.f32.mxu1 %vm54248_vm3, %v58980_v54  ;;  %v11586_v52 = vsel %vm11581_vm4, %v53232_v50, 0 }
 0x3d8   :  { %49783 = vmatprep.subr.mxu1 %v58980_v54  ;;  %49708 = vmatprep.subr.mxu0 %v58980_v54  ;;  %v55158_v55 = vand.u32 4294901760, %v11586_v52 }
 0x3dd   :  { %49706 = vmatmul.mubr.f32.vlgmr.msra.gmra.mrb[20].mxu0 %v54399_v28  ;;  %49751 = vmatmul.mubr.f32.vlgmr.msra.gmra.mrb[18].mxu1 %v54346_v8 }
 0x3de   :  { %49784 = vmatpush3.xpose.msra.mxu1 %v54996_v3  ;;  %49709 = vmatpush3.xpose.msra.mxu0 %v54965_v56 }
 0x3df   :  { %49785 = vmatprep.mubr.msk.f32.mxu1 %vm54248_vm3, %v58980_v54  ;;  %49710 = vmatprep.mubr.msk.f32.mxu0 %vm54248_vm3, %v58980_v54 }
 0x3e0   :  { %49788 = vmatprep.subr.mxu1 %v58980_v54  ;;  %49713 = vmatprep.subr.mxu0 %v58980_v54 }
 0x3e1   :  { %49786 = vmatmul.mubr.f32.vlgmr.msra.gmra.mrb[20].mxu1 %v54364_v18 }
 0x3e2   :  { %49789 = vmatpush3.xpose.msra.mxu1 %v9869_v11  ;;  %49790 = vmatprep.mubr.msk.f32.mxu1 %vm54248_vm3, %v58980_v54  ;;  %v47532_v11 = vld [vmem:[%s58977_s3 + $0x2] ss:$0 sm:$0xff] }
 0x3e3   :  { %49793 = vmatprep.subr.mxu1 %v58980_v54 }
 0x3e5   :  { %49711 = vmatmul.mubr.f32.vlgmr.msra.gmra.mrb[20].mxu0 %v54407_v30 }
 0x3e6   :  { %49714 = vmatpush3.xpose.msra.mxu0 %v8520_v61  ;;  %49715 = vmatprep.mubr.msk.f32.mxu0 %vm54248_vm3, %v58980_v54 }
 0x3e7   :  { %49718 = vmatprep.subr.mxu0 %v58980_v54 }
 0x3e9   :  { %49791 = vmatmul.mubr.f32.vlgmr.msra.gmra.mrb[20].mxu1 %v54346_v8 }
 0x3ea   :  { %49794 = vmatpush3.xpose.msra.mxu1 %v9866_v4  ;;  %49795 = vmatprep.mubr.msk.f32.mxu1 %vm54248_vm3, %v58980_v54 }
 0x3eb   :  { %49798 = vmatprep.subr.mxu1 %v58980_v54 }
 0x3ec   :  { %v55045_v19 = vpop.f32.mrb[10].mxu0 }
 0x3ed   :  { %v49422_v20 = vpop.f32.mrb[11].mxu0  ;;  %49716 = vmatmul.mubr.f32.vlgmr.msra.gmra.mrb[20].mxu0 %v54390_v26 }
 0x3ee   :  { %49719 = vmatpush3.xpose.msra.mxu0 %v54965_v56  ;;  %49720 = vmatprep.mubr.msk.f32.mxu0 %vm54248_vm3, %v58980_v54 }
 0x3ef   :  { %49753 = vmatprep.subr.mxu0 %v58980_v54 }
 0x3f1   :  { %49796 = vmatmul.mubr.f32.vlgmr.msra.gmra.mrb[20].mxu1 %v54349_v10 }
 0x3f2   :  { %49799 = vmatpush3.xpose.msra.mxu1 %v54996_v3  ;;  %49800 = vmatprep.mubr.msk.f32.mxu1 %vm54248_vm3, %v58980_v54 }
 0x3f3   :  { %49803 = vmatprep.subr.mxu1 %v58980_v54 }
 0x3f5   :  { %49721 = vmatmul.mubr.f32.vlgmr.msra.gmra.mrb[20].mxu0 %v54390_v26 }
 0x3f6   :  { %49754 = vmatpush3.xpose.msra.mxu0 %v55037_v16  ;;  %49755 = vmatprep.mubr.msk.f32.mxu0 %vm54248_vm3, %v58980_v54 }
 0x3f7   :  { %49758 = vmatprep.subr.mxu0 %v58980_v54 }
 0x3f9   :  { %49756 = vmatmul.mubr.f32.vlgmr.msra.gmra.mrb[22].mxu0 %v54424_v37  ;;  %49801 = vmatmul.mubr.f32.vlgmr.msra.gmra.mrb[20].mxu1 %v54358_v13 }
 0x3fa   :  { %49759 = vmatpush3.xpose.msra.mxu0 %v9420_v25  ;;  %49804 = vmatpush3.xpose.msra.mxu1 %v9867_v7 }
 0x3fb   :  { %49760 = vmatprep.mubr.msk.f32.mxu0 %vm54248_vm3, %v58980_v54  ;;  %49805 = vmatprep.mubr.msk.f32.mxu1 %vm54248_vm3, %v58980_v54 }
 0x3fc   :  { %49763 = vmatprep.subr.mxu0 %v58980_v54  ;;  %49808 = vmatprep.subr.mxu1 %v58980_v54 }
 0x400   :  { %v55079_v32 = vpop.f32.mrb[10].mxu1 }
 0x401   :  { %v49512_v33 = vpop.f32.mrb[11].mxu1  ;;  %49761 = vmatmul.mubr.f32.vlgmr.msra.gmra.mrb[22].mxu0 %v54390_v26  ;;  %49806 = vmatmul.mubr.f32.vlgmr.msra.gmra.mrb[20].mxu1 %v54346_v8 }
 0x402   :  { %49764 = vmatpush3.xpose.msra.mxu0 %v9417_v17  ;;  %49809 = vmatpush3.xpose.msra.mxu1 %v54996_v3  ;;  %v53234_v17 = vadd.f32 %v47540_v12, %v55079_v32 }
 0x403   :  { %49765 = vmatprep.mubr.msk.f32.mxu0 %vm54248_vm3, %v58980_v54  ;;  %49810 = vmatprep.mubr.msk.f32.mxu1 %vm54248_vm3, %v58980_v54 }
 0x404   :  { %49843 = vmatprep.subr.mxu1 %v58980_v54  ;;  %49768 = vmatprep.subr.mxu0 %v58980_v54  ;;  %v12490_v22 = vsel %vm11581_vm4, %v53234_v17, 0 }
 0x405   :  { %v55253_v23 = vand.u32 4294901760, %v12490_v22 }
 0x409   :  { %49766 = vmatmul.mubr.f32.vlgmr.msra.gmra.mrb[22].mxu0 %v54399_v28  ;;  %49811 = vmatmul.mubr.f32.vlgmr.msra.gmra.mrb[20].mxu1 %v54346_v8 }
 0x40a   :  { %49844 = vmatpush3.xpose.msra.mxu1 %v55068_v29  ;;  %49769 = vmatpush3.xpose.msra.mxu0 %v55037_v16 }
 0x40b   :  { %49845 = vmatprep.mubr.msk.f32.mxu1 %vm54248_vm3, %v58980_v54  ;;  %49770 = vmatprep.mubr.msk.f32.mxu0 %vm54248_vm3, %v58980_v54 }
 0x40c   :  { %49848 = vmatprep.subr.mxu1 %v58980_v54  ;;  %49773 = vmatprep.subr.mxu0 %v58980_v54 }
 0x40d   :  { %49846 = vmatmul.mubr.f32.vlgmr.msra.gmra.mrb[22].mxu1 %v54364_v18  ;;  %v55121_v18 = vsub.f32 %v10235_v42, %v55113_v43  ;;  %v53225_v42 = vadd.f32 %v47531_v38, %v54829_v14 }
 0x40e   :  { %49849 = vmatpush3.xpose.msra.mxu1 %v10767_v40  ;;  %49850 = vmatprep.mubr.msk.f32.mxu1 %vm54248_vm3, %v58980_v54  ;;  %v47539_v40 = vld [vmem:[%s58977_s3 + $0x9] ss:$0 sm:$0xff] }
 0x40f   :  { %49853 = vmatprep.subr.mxu1 %v58980_v54  ;;  %v10316_v46 = vand.u32 4294901760, %v55121_v18 }
 0x411   :  { %49771 = vmatmul.mubr.f32.vlgmr.msra.gmra.mrb[22].mxu0 %v54407_v30  ;;  %v10317_v49 = vsub.f32 %v55121_v18, %v10316_v46 }
 0x412   :  { %49774 = vmatpush3.xpose.msra.mxu0 %v9418_v21  ;;  %49775 = vmatprep.mubr.msk.f32.mxu0 %vm54248_vm3, %v58980_v54 }
 0x413   :  { %49778 = vmatprep.subr.mxu0 %v58980_v54 }
 0x415   :  { %49851 = vmatmul.mubr.f32.vlgmr.msra.gmra.mrb[22].mxu1 %v54346_v8 }
 0x416   :  { %49854 = vmatpush3.xpose.msra.mxu1 %v55077_v31  ;;  %49855 = vmatprep.mubr.msk.f32.mxu1 %vm54248_vm3, %v58980_v54 }
 0x417   :  { %49858 = vmatprep.subr.mxu1 %v58980_v54 }
 0x418   :  { %v55124_v44 = vpop.f32.mrb[12].mxu0 }
 0x419   :  { %v49482_v45 = vpop.f32.mrb[13].mxu0  ;;  %49776 = vmatmul.mubr.f32.vlgmr.msra.gmra.mrb[22].mxu0 %v54390_v26 }
 0x41a   :  { %49779 = vmatpush3.xpose.msra.mxu0 %v55037_v16  ;;  %49780 = vmatprep.mubr.msk.f32.mxu0 %vm54248_vm3, %v58980_v54  ;;  %v53226_v16 = vadd.f32 %v47532_v11, %v54789_v2 }
 0x41b   :  { %49813 = vmatprep.subr.mxu0 %v58980_v54 }
 0x41c   :  { %v12487_v21 = vsel %vm11581_vm4, %v53226_v16, 0 }
 0x41d   :  { %49856 = vmatmul.mubr.f32.vlgmr.msra.gmra.mrb[22].mxu1 %v54349_v10  ;;  %v10318_v10 = vand.u32 4294901760, %v10317_v49  ;;  %v55247_v2 = vand.u32 4294901760, %v12487_v21 }
 0x41e   :  { %49859 = vmatpush3.xpose.msra.mxu1 %v55068_v29  ;;  %49860 = vmatprep.mubr.msk.f32.mxu1 %vm54248_vm3, %v58980_v54 }
 0x41f   :  { %49863 = vmatprep.subr.mxu1 %v58980_v54  ;;  %v55258_v25 = vsub.f32 %v12487_v21, %v55247_v2 }
 0x421   :  { %49781 = vmatmul.mubr.f32.vlgmr.msra.gmra.mrb[22].mxu0 %v54390_v26  ;;  %v12560_v31 = vand.u32 4294901760, %v55258_v25 }
 0x422   :  { %49814 = vmatpush3.xpose.msra.mxu0 %v55113_v43  ;;  %49815 = vmatprep.mubr.msk.f32.mxu0 %vm54248_vm3, %v58980_v54 }
 0x423   :  { %49818 = vmatprep.subr.mxu0 %v58980_v54  ;;  %v12561_v33 = vsub.f32 %v55258_v25, %v12560_v31 }
 0x425   :  { %49816 = vmatmul.mubr.f32.vlgmr.msra.gmra.mrb[24].mxu0 %v54424_v37  ;;  %49861 = vmatmul.mubr.f32.vlgmr.msra.gmra.mrb[22].mxu1 %v54358_v13  ;;  %v55166_v13 = vsub.f32 %v11586_v52, %v55158_v55  ;;  %v12562_v41 = vand.u32 4294901760, %v12561_v33  ;;  %v47542_v52 = vld [vmem:[%s58977_s3 + $0xc] ss:$0 sm:$0xff] }
 0x426   :  { %49819 = vmatpush3.xpose.msra.mxu0 %v10318_v10  ;;  %49864 = vmatpush3.xpose.msra.mxu1 %v10765_v34 }
 0x427   :  { %49820 = vmatprep.mubr.msk.f32.mxu0 %vm54248_vm3, %v58980_v54  ;;  %49865 = vmatprep.mubr.msk.f32.mxu1 %vm54248_vm3, %v58980_v54  ;;  %v11667_v61 = vand.u32 4294901760, %v55166_v13 }
 0x428   :  { %49823 = vmatprep.subr.mxu0 %v58980_v54  ;;  %49868 = vmatprep.subr.mxu1 %v58980_v54 }
 0x429   :  { %v11668_v63 = vsub.f32 %v55166_v13, %v11667_v61 }
 0x42b   :  { %v11669_v1 = vand.u32 4294901760, %v11668_v63 }
 0x42c   :  { %v55168_v56 = vpop.f32.mrb[12].mxu1 }
 0x42d   :  { %v49572_v57 = vpop.f32.mrb[13].mxu1  ;;  %49821 = vmatmul.mubr.f32.vlgmr.msra.gmra.mrb[24].mxu0 %v54390_v26  ;;  %49866 = vmatmul.mubr.f32.vlgmr.msra.gmra.mrb[22].mxu1 %v54346_v8 }
 0x42e   :  { %49824 = vmatpush3.xpose.msra.mxu0 %v55121_v18  ;;  %49869 = vmatpush3.xpose.msra.mxu1 %v55068_v29  ;;  %v12035_v18 = vsel %vm11581_vm4, %v53225_v42, 0 }
 0x42f   :  { %49825 = vmatprep.mubr.msk.f32.mxu0 %vm54248_vm3, %v58980_v54  ;;  %49870 = vmatprep.mubr.msk.f32.mxu1 %vm54248_vm3, %v58980_v54  ;;  %v55311_v14 = vand.u32 4294901760, %v12035_v18 }
 0x430   :  { %49903 = vmatprep.subr.mxu1 %v58980_v54  ;;  %49828 = vmatprep.subr.mxu0 %v58980_v54 }
 0x435   :  { %49826 = vmatmul.mubr.f32.vlgmr.msra.gmra.mrb[24].mxu0 %v54399_v28  ;;  %49871 = vmatmul.mubr.f32.vlgmr.msra.gmra.mrb[22].mxu1 %v54346_v8  ;;  %v630_v8 = vld [vmem:[%s58976_s2 + $0xb8] sm:$0xff] }
 0x436   :  { %49904 = vmatpush3.xpose.msra.mxu1 %v55158_v55  ;;  %49829 = vmatpush3.xpose.msra.mxu0 %v55113_v43  ;;  %v11133_v3 = vsel %vm567_vm2, %v630_v8, 0 }
 0x437   :  { %49905 = vmatprep.mubr.msk.f32.mxu1 %vm54248_vm3, %v58980_v54  ;;  %49908 = vmatprep.subr.mxu1 %v58980_v54  ;;  %v55204_v4 = vand.u32 4294901760, %v11133_v3 }
 0x438   :  { %49830 = vmatprep.mubr.msk.f32.mxu0 %vm54248_vm3, %v58980_v54  ;;  %49833 = vmatprep.subr.mxu0 %v58980_v54 }
 0x439   :  { %49906 = vmatmul.mubr.f32.vlgmr.msra.gmra.mrb[24].mxu1 %v11658_v0  ;;  %v55212_v5 = vsub.f32 %v11133_v3, %v55204_v4 }
 0x43a   :  { %49909 = vmatpush3.xpose.msra.mxu1 %v11669_v1  ;;  %49910 = vmatprep.mubr.msk.f32.mxu1 %vm54248_vm3, %v58980_v54 }
 0x43b   :  { %49913 = vmatprep.subr.mxu1 %v58980_v54  ;;  %v11214_v9 = vand.u32 4294901760, %v55212_v5 }
 0x43d   :  { %49831 = vmatmul.mubr.f32.vlgmr.msra.gmra.mrb[24].mxu0 %v54407_v30  ;;  %v11215_v15 = vsub.f32 %v55212_v5, %v11214_v9 }
 0x43e   :  { %49834 = vmatpush3.xpose.msra.mxu0 %v10316_v46  ;;  %49835 = vmatprep.mubr.msk.f32.mxu0 %vm54248_vm3, %v58980_v54 }
 0x43f   :  { %49838 = vmatprep.subr.mxu0 %v58980_v54  ;;  %v11216_v20 = vand.u32 4294901760, %v11215_v15 }
 0x441   :  { %49911 = vmatmul.mubr.f32.vlgmr.msra.gmra.mrb[24].mxu1 %v55152_v53 }
 0x442   :  { %49914 = vmatpush3.xpose.msra.mxu1 %v55166_v13  ;;  %49915 = vmatprep.mubr.msk.f32.mxu1 %vm54248_vm3, %v58980_v54  ;;  %v53236_v13 = vadd.f32 %v47542_v52, %v55168_v56 }
 0x443   :  { %49918 = vmatprep.subr.mxu1 %v58980_v54 }
 0x444   :  { %v55215_v6 = vpop.f32.mrb[14].mxu0 }
 0x445   :  { %v49542_v7 = vpop.f32.mrb[15].mxu0  ;;  %49836 = vmatmul.mubr.f32.vlgmr.msra.gmra.mrb[24].mxu0 %v54390_v26 }
 0x446   :  { %49839 = vmatpush3.xpose.msra.mxu0 %v55113_v43  ;;  %49840 = vmatprep.mubr.msk.f32.mxu0 %vm54248_vm3, %v58980_v54  ;;  %v47533_v7 = vld [vmem:[%s58977_s3 + $0x3] ss:$0 sm:$0xff] }
 0x447   :  { %49873 = vmatprep.subr.mxu0 %v58980_v54  ;;  %v53227_v12 = vadd.f32 %v47533_v7, %v54901_v39 }
 0x449   :  { %49916 = vmatmul.mubr.f32.vlgmr.msra.gmra.mrb[24].mxu1 %v55163_v59  ;;  %v12939_v17 = vsel %vm11581_vm4, %v53227_v12, 0 }
 0x44a   :  { %49919 = vmatpush3.xpose.msra.mxu1 %v55158_v55  ;;  %49920 = vmatprep.mubr.msk.f32.mxu1 %vm54248_vm3, %v58980_v54  ;;  %v55431_v39 = vand.u32 4294901760, %v12939_v17 }
 0x44b   :  { %49923 = vmatprep.subr.mxu1 %v58980_v54 }
 0x44c   :  { %v55441_v21 = vsub.f32 %v12939_v17, %v55431_v39 }
 0x44d   :  { %49841 = vmatmul.mubr.f32.vlgmr.msra.gmra.mrb[24].mxu0 %v54390_v26 }
 0x44e   :  { %49874 = vmatpush3.xpose.msra.mxu0 %v55204_v4  ;;  %49875 = vmatprep.mubr.msk.f32.mxu0 %vm54248_vm3, %v58980_v54 }
 0x44f   :  { %49878 = vmatprep.subr.mxu0 %v58980_v54 }
 0x451   :  { %49876 = vmatmul.mubr.f32.vlgmr.msra.gmra.mrb[26].mxu0 %v54424_v37  ;;  %49921 = vmatmul.mubr.f32.vlgmr.msra.gmra.mrb[24].mxu1 %v11656_v60  ;;  %v55261_v37 = vsub.f32 %v12490_v22, %v55253_v23 }
 0x452   :  { %49924 = vmatpush3.xpose.msra.mxu1 %v11667_v61  ;;  %49879 = vmatpush3.xpose.msra.mxu0 %v11216_v20 }
 0x453   :  { %49880 = vmatprep.mubr.msk.f32.mxu0 %vm54248_vm3, %v58980_v54  ;;  %49925 = vmatprep.mubr.msk.f32.mxu1 %vm54248_vm3, %v58980_v54  ;;  %v12571_v32 = vand.u32 4294901760, %v55261_v37 }
 0x454   :  { %49928 = vmatprep.subr.mxu1 %v58980_v54  ;;  %49883 = vmatprep.subr.mxu0 %v58980_v54 }
 0x455   :  { %v12572_v34 = vsub.f32 %v55261_v37, %v12571_v32 }
 0x457   :  { %v12573_v43 = vand.u32 4294901760, %v12572_v34 }
 0x458   :  { %v55263_v27 = vpop.f32.mrb[14].mxu1 }
 0x459   :  { %v49632_v29 = vpop.f32.mrb[15].mxu1  ;;  %49881 = vmatmul.mubr.f32.vlgmr.msra.gmra.mrb[26].mxu0 %v54390_v26  ;;  %49926 = vmatmul.mubr.f32.vlgmr.msra.gmra.mrb[24].mxu1 %v55152_v53 }
 0x45a   :  { %49929 = vmatpush3.xpose.msra.mxu1 %v55158_v55  ;;  %49884 = vmatpush3.xpose.msra.mxu0 %v55212_v5  ;;  %v53228_v55 = vadd.f32 %v47534_v51, %v54861_v24  ;;  %v13394_v24 = vsel %vm11581_vm4, %v53236_v13, 0  ;;  %v47536_v29 = vld [vmem:[%s58977_s3 + $0x6] ss:$0 sm:$0xff] }
 0x45b   :  { %49885 = vmatprep.mubr.msk.f32.mxu0 %vm54248_vm3, %v58980_v54  ;;  %49930 = vmatprep.mubr.msk.f32.mxu1 %vm54248_vm3, %v58980_v54  ;;  %v55371_v56 = vand.u32 4294901760, %v13394_v24  ;;  %v53230_v33 = vadd.f32 %v47536_v29, %v54933_v48 }
 0x45c   :  { %49963 = vmatprep.subr.mxu1 %v58980_v54  ;;  %49888 = vmatprep.subr.mxu0 %v58980_v54  ;;  %v13391_v60 = vsel %vm11581_vm4, %v53228_v55, 0 }
 0x45d   :  { %v55380_v63 = vsub.f32 %v13394_v24, %v55371_v56 }
 0x45f   :  { %v13475_v3 = vand.u32 4294901760, %v55380_v63 }
 0x461   :  { %49886 = vmatmul.mubr.f32.vlgmr.msra.gmra.mrb[26].mxu0 %v54399_v28  ;;  %49931 = vmatmul.mubr.f32.vlgmr.msra.gmra.mrb[24].mxu1 %v55152_v53  ;;  %v53233_v28 = vadd.f32 %v47539_v40, %v55124_v44  ;;  %v13476_v5 = vsub.f32 %v55380_v63, %v13475_v3 }
 0x462   :  { %49964 = vmatpush3.xpose.msra.mxu1 %v55253_v23  ;;  %49889 = vmatpush3.xpose.msra.mxu0 %v55204_v4 }
 0x463   :  { %49965 = vmatprep.mubr.msk.f32.mxu1 %vm54248_vm3, %v58980_v54  ;;  %49968 = vmatprep.subr.mxu1 %v58980_v54  ;;  %v12038_v45 = vsel %vm11581_vm4, %v53233_v28, 0  ;;  %v13477_v15 = vand.u32 4294901760, %v13476_v5 }
 0x464   :  { %49890 = vmatprep.mubr.msk.f32.mxu0 %vm54248_vm3, %v58980_v54  ;;  %49893 = vmatprep.subr.mxu0 %v58980_v54  ;;  %v55314_v44 = vand.u32 4294901760, %v12038_v45 }
 0x465   :  { %49966 = vmatmul.mubr.f32.vlgmr.msra.gmra.mrb[26].mxu1 %v12562_v41  ;;  %v14295_v41 = vsel %vm11581_vm4, %v53230_v33, 0 }
 0x466   :  { %49969 = vmatpush3.xpose.msra.mxu1 %v12573_v43  ;;  %49970 = vmatprep.mubr.msk.f32.mxu1 %vm54248_vm3, %v58980_v54  ;;  %v55325_v46 = vsub.f32 %v12038_v45, %v55314_v44 }
 0x467   :  { %49973 = vmatprep.subr.mxu1 %v58980_v54 }
 0x468   :  { %v12119_v10 = vand.u32 4294901760, %v55325_v46 }
 0x469   :  { %49891 = vmatmul.mubr.f32.vlgmr.msra.gmra.mrb[26].mxu0 %v54407_v30  ;;  %v55321_v30 = vsub.f32 %v12035_v18, %v55311_v14 }
 0x46a   :  { %49894 = vmatpush3.xpose.msra.mxu0 %v11214_v9  ;;  %49895 = vmatprep.mubr.msk.f32.mxu0 %vm54248_vm3, %v58980_v54  ;;  %v12120_v59 = vsub.f32 %v55325_v46, %v12119_v10  ;;  %v47541_v9 = vld [vmem:[%s58977_s3 + $0xb] ss:$0 sm:$0xff] }
 0x46b   :  { %49898 = vmatprep.subr.mxu0 %v58980_v54  ;;  %v12108_v50 = vand.u32 4294901760, %v55321_v30  ;;  %v53235_v16 = vadd.f32 %v47541_v9, %v55215_v6 }
 0x46c   :  { %v12121_v61 = vand.u32 4294901760, %v12120_v59 }
 0x46d   :  { %49971 = vmatmul.mubr.f32.vlgmr.msra.gmra.mrb[26].mxu1 %v55247_v2  ;;  %v12109_v53 = vsub.f32 %v55321_v30, %v12108_v50  ;;  %v12942_v20 = vsel %vm11581_vm4, %v53235_v16, 0 }
 0x46e   :  { %49974 = vmatpush3.xpose.msra.mxu1 %v55261_v37  ;;  %49975 = vmatprep.mubr.msk.f32.mxu1 %vm54248_vm3, %v58980_v54  ;;  %v55434_v6 = vand.u32 4294901760, %v12942_v20 }
 0x46f   :  { %49978 = vmatprep.subr.mxu1 %v58980_v54  ;;  %v12110_v57 = vand.u32 4294901760, %v12109_v53 }
 0x470   :  { %v55327_v47 = vpop.f32.mrb[16].mxu0  ;;  %v55445_v22 = vsub.f32 %v12942_v20, %v55434_v6 }
 0x471   :  { %v49602_v49 = vpop.f32.mrb[17].mxu0  ;;  %49896 = vmatmul.mubr.f32.vlgmr.msra.gmra.mrb[26].mxu0 %v54390_v26 }
 0x472   :  { %49899 = vmatpush3.xpose.msra.mxu0 %v55204_v4  ;;  %49900 = vmatprep.mubr.msk.f32.mxu0 %vm54248_vm3, %v58980_v54  ;;  %v13023_v37 = vand.u32 4294901760, %v55445_v22 }
 0x473   :  { %49933 = vmatprep.subr.mxu0 %v58980_v54 }
 0x474   :  { %v13024_v34 = vsub.f32 %v55445_v22, %v13023_v37 }
 0x475   :  { %49976 = vmatmul.mubr.f32.vlgmr.msra.gmra.mrb[26].mxu1 %v55258_v25  ;;  %v13012_v25 = vand.u32 4294901760, %v55441_v21 }
 0x476   :  { %49979 = vmatpush3.xpose.msra.mxu1 %v55253_v23  ;;  %49980 = vmatprep.mubr.msk.f32.mxu1 %vm54248_vm3, %v58980_v54  ;;  %v13025_v42 = vand.u32 4294901760, %v13024_v34 }
 0x477   :  { %49983 = vmatprep.subr.mxu1 %v58980_v54 }
 0x479   :  { %49901 = vmatmul.mubr.f32.vlgmr.msra.gmra.mrb[26].mxu0 %v54390_v26  ;;  %v55366_v26 = vand.u32 4294901760, %v13391_v60 }
 0x47a   :  { %49934 = vmatpush3.xpose.msra.mxu0 %v55314_v44  ;;  %49935 = vmatprep.mubr.msk.f32.mxu0 %vm54248_vm3, %v58980_v54 }
 0x47b   :  { %49938 = vmatprep.subr.mxu0 %v58980_v54  ;;  %v55377_v62 = vsub.f32 %v13391_v60, %v55366_v26 }
 0x47d   :  { %49936 = vmatmul.mubr.f32.vlgmr.msra.gmra.mrb[28].mxu0 %v12110_v57  ;;  %49981 = vmatmul.mubr.f32.vlgmr.msra.gmra.mrb[26].mxu1 %v12560_v31  ;;  %v13464_v8 = vand.u32 4294901760, %v55377_v62  ;;  %v47544_v31 = vld [vmem:[%s58977_s3 + $0xe] ss:$0 sm:$0xff] }
 0x47e   :  { %49939 = vmatpush3.xpose.msra.mxu0 %v12121_v61  ;;  %49984 = vmatpush3.xpose.msra.mxu1 %v12571_v32  ;;  %v13013_v32 = vsub.f32 %v55441_v21, %v13012_v25  ;;  %v53238_v38 = vadd.f32 %v47544_v31, %v55263_v27  ;;  %v55486_v27 = vand.u32 4294901760, %v14295_v41 }
 0x47f   :  { %49940 = vmatprep.mubr.msk.f32.mxu0 %vm54248_vm3, %v58980_v54  ;;  %49943 = vmatprep.subr.mxu0 %v58980_v54  ;;  %v13465_v4 = vsub.f32 %v55377_v62, %v13464_v8 }
 0x480   :  { %49985 = vmatprep.mubr.msk.f32.mxu1 %vm54248_vm3, %v58980_v54  ;;  %49988 = vmatprep.subr.mxu1 %v58980_v54  ;;  %v13014_v40 = vand.u32 4294901760, %v13013_v32  ;;  %v14298_v48 = vsel %vm11581_vm4, %v53238_v38, 0  ;;  %v55497_v28 = vsub.f32 %v14295_v41, %v55486_v27  ;;  %v47547_v38 = vld [vmem:[%s58977_s3 + $0x11] ss:$0 sm:$0xff] }
 0x481   :  { %v13466_v11 = vand.u32 4294901760, %v13465_v4  ;;  %v55491_v43 = vand.u32 4294901760, %v14298_v48  ;;  %v47546_v4 = vld [vmem:[%s58977_s3 + $0x10] ss:$0 sm:$0xff] }
 0x483   :  { %v55500_v18 = vsub.f32 %v14298_v48, %v55491_v43 }
 0x484   :  { %v55382_v0 = vpop.f32.mrb[16].mxu1 }
 0x485   :  { %v49692_v1 = vpop.f32.mrb[17].mxu1  ;;  %49941 = vmatmul.mubr.f32.vlgmr.msra.gmra.mrb[28].mxu0 %v55311_v14  ;;  %49986 = vmatmul.mubr.f32.vlgmr.msra.gmra.mrb[26].mxu1 %v55247_v2  ;;  %v55594_v7 = vadd.f32 %v47546_v4, %v55382_v0  ;;  %v47545_v0 = vld [vmem:[%s58977_s3 + $0xf] ss:$0 sm:$0xff] }
 0x486   :  { %49944 = vmatpush3.xpose.msra.mxu0 %v55325_v46  ;;  %49989 = vmatpush3.xpose.msra.mxu1 %v55253_v23 }
 0x487   :  { %49945 = vmatprep.mubr.msk.f32.mxu0 %vm54248_vm3, %v58980_v54  ;;  %49948 = vmatprep.subr.mxu0 %v58980_v54  ;;  %v55600_v9 = vand.u32 4294901760, %v55594_v7 }
 0x488   :  { %49990 = vmatprep.mubr.msk.f32.mxu1 %vm54248_vm3, %v58980_v54  ;;  %50023 = vmatprep.subr.mxu1 %v58980_v54 }
 0x48d   :  { %49946 = vmatmul.mubr.f32.vlgmr.msra.gmra.mrb[28].mxu0 %v55321_v30  ;;  %49991 = vmatmul.mubr.f32.vlgmr.msra.gmra.mrb[26].mxu1 %v55247_v2  ;;  %v14379_v30 = vand.u32 4294901760, %v55500_v18 }
 0x48e   :  { %49949 = vmatpush3.xpose.msra.mxu0 %v55314_v44  ;;  %50024 = vmatpush3.xpose.msra.mxu1 %v55371_v56 }
 0x48f   :  { %50025 = vmatprep.mubr.msk.f32.mxu1 %vm54248_vm3, %v58980_v54  ;;  %50028 = vmatprep.subr.mxu1 %v58980_v54  ;;  %v14380_v49 = vsub.f32 %v55500_v18, %v14379_v30 }
 0x490   :  { %49950 = vmatprep.mubr.msk.f32.mxu0 %vm54248_vm3, %v58980_v54  ;;  %49953 = vmatprep.subr.mxu0 %v58980_v54 }
 0x491   :  { %50026 = vmatmul.mubr.f32.vlgmr.msra.gmra.mrb[28].mxu1 %v13466_v11  ;;  %v14381_v53 = vand.u32 4294901760, %v14380_v49  ;;  %v47537_v11 = vld [vmem:[%s58977_s3 + $0x7] ss:$0 sm:$0xff] }
 0x492   :  { %50029 = vmatpush3.xpose.msra.mxu1 %v13477_v15  ;;  %50030 = vmatprep.mubr.msk.f32.mxu1 %vm54248_vm3, %v58980_v54  ;;  %v53231_v12 = vadd.f32 %v47537_v11, %v55045_v19 }
 0x493   :  { %50033 = vmatprep.subr.mxu1 %v58980_v54 }
 0x494   :  { %v14747_v16 = vsel %vm11581_vm4, %v53231_v12, 0 }
 0x495   :  { %49951 = vmatmul.mubr.f32.vlgmr.msra.gmra.mrb[28].mxu0 %v12108_v50  ;;  %v47535_v50 = vld [vmem:[%s58977_s3 + $0x5] ss:$0 sm:$0xff]  ;;  %v14818_v20 = vand.u32 4294901760, %v14747_v16 }
 0x496   :  { %49954 = vmatpush3.xpose.msra.mxu0 %v12119_v10  ;;  %49955 = vmatprep.mubr.msk.f32.mxu0 %vm54248_vm3, %v58980_v54  ;;  %v47543_v10 = vld [vmem:[%s58977_s3 + $0xd] ss:$0 sm:$0xff]  ;;  %v53229_v52 = vadd.f32 %v47535_v50, %v54973_v58 }
 0x497   :  { %49958 = vmatprep.subr.mxu0 %v58980_v54  ;;  %v53237_v55 = vadd.f32 %v47543_v10, %v55327_v47 }
 0x498   :  { %v13843_v59 = vsel %vm11581_vm4, %v53229_v52, 0 }
 0x499   :  { %50031 = vmatmul.mubr.f32.vlgmr.msra.gmra.mrb[28].mxu1 %v55366_v26  ;;  %v13846_v13 = vsel %vm11581_vm4, %v53237_v55, 0  ;;  %v55547_v58 = vand.u32 4294901760, %v13843_v59 }
 0x49a   :  { %50034 = vmatpush3.xpose.msra.mxu1 %v55380_v63  ;;  %50035 = vmatprep.mubr.msk.f32.mxu1 %vm54248_vm3, %v58980_v54  ;;  %v55550_v47 = vand.u32 4294901760, %v13846_v13 }
 0x49b   :  { %50038 = vmatprep.subr.mxu1 %v58980_v54  ;;  %v13915_v57 = vsub.f32 %v13843_v59, %v55547_v58 }
 0x49c   :  { %v55447_v2 = vpop.f32.mrb[18].mxu0  ;;  %v13926_v60 = vsub.f32 %v13846_v13, %v55550_v47 }
 0x49d   :  { %v49662_v23 = vpop.f32.mrb[19].mxu0  ;;  %49956 = vmatmul.mubr.f32.vlgmr.msra.gmra.mrb[28].mxu0 %v55311_v14  ;;  %v53239_v15 = vadd.f32 %v47545_v0, %v55447_v2 }
 0x49e   :  { %49959 = vmatpush3.xpose.msra.mxu0 %v55314_v44  ;;  %49960 = vmatprep.mubr.msk.f32.mxu0 %vm54248_vm3, %v58980_v54  ;;  %v14368_v44 = vand.u32 4294901760, %v55497_v28 }
 0x49f   :  { %49993 = vmatprep.subr.mxu0 %v58980_v54  ;;  %v14750_v17 = vsel %vm11581_vm4, %v53239_v15, 0 }
 0x4a0   :  { %v14369_v46 = vsub.f32 %v55497_v28, %v14368_v44  ;;  %v14753_v19 = vand.u32 4294901760, %v14750_v17 }
 0x4a1   :  { %50036 = vmatmul.mubr.f32.vlgmr.msra.gmra.mrb[28].mxu1 %v55377_v62 }
 0x4a2   :  { %50039 = vmatpush3.xpose.msra.mxu1 %v55371_v56  ;;  %50040 = vmatprep.mubr.msk.f32.mxu1 %vm54248_vm3, %v58980_v54  ;;  %v14370_v51 = vand.u32 4294901760, %v14369_v46 }
 0x4a3   :  { %50043 = vmatprep.subr.mxu1 %v58980_v54 }
 0x4a5   :  { %49961 = vmatmul.mubr.f32.vlgmr.msra.gmra.mrb[28].mxu0 %v55311_v14 }
 0x4a6   :  { %49994 = vmatpush3.xpose.msra.mxu0 %v55434_v6  ;;  %49995 = vmatprep.mubr.msk.f32.mxu0 %vm54248_vm3, %v58980_v54 }
 0x4a7   :  { %49998 = vmatprep.subr.mxu0 %v58980_v54 }
 0x4a9   :  { %49996 = vmatmul.mubr.f32.vlgmr.msra.gmra.mrb[30].mxu0 %v13014_v40  ;;  %50041 = vmatmul.mubr.f32.vlgmr.msra.gmra.mrb[28].mxu1 %v13464_v8 }
 0x4aa   :  { %49999 = vmatpush3.xpose.msra.mxu0 %v13025_v42  ;;  %50044 = vmatpush3.xpose.msra.mxu1 %v13475_v3 }
 0x4ab   :  { %50000 = vmatprep.mubr.msk.f32.mxu0 %vm54248_vm3, %v58980_v54  ;;  %50003 = vmatprep.subr.mxu0 %v58980_v54 }
 0x4ac   :  { %50045 = vmatprep.mubr.msk.f32.mxu1 %vm54248_vm3, %v58980_v54  ;;  %50048 = vmatprep.subr.mxu1 %v58980_v54 }
 0x4b0   :  { %v55502_v45 = vpop.f32.mrb[18].mxu1 }
 0x4b1   :  { %v49752_v14 = vpop.f32.mrb[19].mxu1  ;;  %50001 = vmatmul.mubr.f32.vlgmr.msra.gmra.mrb[30].mxu0 %v55431_v39  ;;  %50046 = vmatmul.mubr.f32.vlgmr.msra.gmra.mrb[28].mxu1 %v55366_v26 }
 0x4b2   :  { %50004 = vmatpush3.xpose.msra.mxu0 %v55445_v22  ;;  %50049 = vmatpush3.xpose.msra.mxu1 %v55371_v56  ;;  %v13927_v56 = vand.u32 4294901760, %v13926_v60 }
 0x4b3   :  { %50005 = vmatprep.mubr.msk.f32.mxu0 %vm54248_vm3, %v58980_v54  ;;  %50008 = vmatprep.subr.mxu0 %v58980_v54 }
 0x4b4   :  { %50050 = vmatprep.mubr.msk.f32.mxu1 %vm54248_vm3, %v58980_v54  ;;  %50083 = vmatprep.subr.mxu1 %v58980_v54  ;;  %v13928_v63 = vsub.f32 %v13926_v60, %v13927_v56 }
 0x4b6   :  { %v13929_v8 = vand.u32 4294901760, %v13928_v63 }
 0x4b9   :  { %50006 = vmatmul.mubr.f32.vlgmr.msra.gmra.mrb[30].mxu0 %v55441_v21  ;;  %50051 = vmatmul.mubr.f32.vlgmr.msra.gmra.mrb[28].mxu1 %v55366_v26  ;;  %v13916_v26 = vand.u32 4294901760, %v13915_v57 }
 0x4ba   :  { %50009 = vmatpush3.xpose.msra.mxu0 %v55434_v6  ;;  %50084 = vmatpush3.xpose.msra.mxu1 %v55491_v43 }
 0x4bb   :  { %50085 = vmatprep.mubr.msk.f32.mxu1 %vm54248_vm3, %v58980_v54  ;;  %50088 = vmatprep.subr.mxu1 %v58980_v54  ;;  %v13917_v62 = vsub.f32 %v13915_v57, %v13916_v26 }
 0x4bc   :  { %50010 = vmatprep.mubr.msk.f32.mxu0 %vm54248_vm3, %v58980_v54  ;;  %50013 = vmatprep.subr.mxu0 %v58980_v54 }
 0x4bd   :  { %50086 = vmatmul.mubr.f32.vlgmr.msra.gmra.mrb[30].mxu1 %v14370_v51  ;;  %v13918_v1 = vand.u32 4294901760, %v13917_v62 }
 0x4be   :  { %50089 = vmatpush3.xpose.msra.mxu1 %v14381_v53  ;;  %50090 = vmatprep.mubr.msk.f32.mxu1 %vm54248_vm3, %v58980_v54 }
 0x4bf   :  { %50093 = vmatprep.subr.mxu1 %v58980_v54 }
 0x4c1   :  { %50011 = vmatmul.mubr.f32.vlgmr.msra.gmra.mrb[30].mxu0 %v13012_v25 }
 0x4c2   :  { %50014 = vmatpush3.xpose.msra.mxu0 %v13023_v37  ;;  %50015 = vmatprep.mubr.msk.f32.mxu0 %vm54248_vm3, %v58980_v54 }
 0x4c3   :  { %50018 = vmatprep.subr.mxu0 %v58980_v54 }
 0x4c5   :  { %50091 = vmatmul.mubr.f32.vlgmr.msra.gmra.mrb[30].mxu1 %v55486_v27 }
 0x4c6   :  { %50094 = vmatpush3.xpose.msra.mxu1 %v55500_v18  ;;  %50095 = vmatprep.mubr.msk.f32.mxu1 %vm54248_vm3, %v58980_v54 }
 0x4c7   :  { %50098 = vmatprep.subr.mxu1 %v58980_v54 }
 0x4c8   :  { %v55559_v61 = vpop.f32.mrb[20].mxu0 }
 0x4c9   :  { %v49722_v24 = vpop.f32.mrb[21].mxu0  ;;  %50016 = vmatmul.mubr.f32.vlgmr.msra.gmra.mrb[30].mxu0 %v55431_v39  ;;  %v55658_v41 = vadd.f32 %v47547_v38, %v55559_v61 }
 0x4ca   :  { %50019 = vmatpush3.xpose.msra.mxu0 %v55434_v6  ;;  %50020 = vmatprep.mubr.msk.f32.mxu0 %vm54248_vm3, %v58980_v54  ;;  %v14830_v6 = vsub.f32 %v14750_v17, %v14753_v19 }
 0x4cb   :  { %50053 = vmatprep.subr.mxu0 %v58980_v54  ;;  %v55661_v42 = vand.u32 4294901760, %v55658_v41 }
 0x4cc   :  { %v14831_v23 = vand.u32 4294901760, %v14830_v6 }
 0x4cd   :  { %50096 = vmatmul.mubr.f32.vlgmr.msra.gmra.mrb[30].mxu1 %v55497_v28 }
 0x4ce   :  { %50099 = vmatpush3.xpose.msra.mxu1 %v55491_v43  ;;  %50100 = vmatprep.mubr.msk.f32.mxu1 %vm54248_vm3, %v58980_v54  ;;  %v14832_v37 = vsub.f32 %v14830_v6, %v14831_v23 }
 0x4cf   :  { %50103 = vmatprep.subr.mxu1 %v58980_v54 }
 0x4d0   :  { %v14833_v31 = vand.u32 4294901760, %v14832_v37 }
 0x4d1   :  { %50021 = vmatmul.mubr.f32.vlgmr.msra.gmra.mrb[30].mxu0 %v55431_v39  ;;  %v14819_v39 = vsub.f32 %v14747_v16, %v14818_v20 }
 0x4d2   :  { %50054 = vmatpush3.xpose.msra.mxu0 %v55550_v47  ;;  %50055 = vmatprep.mubr.msk.f32.mxu0 %vm54248_vm3, %v58980_v54 }
 0x4d3   :  { %50058 = vmatprep.subr.mxu0 %v58980_v54  ;;  %v14820_v2 = vand.u32 4294901760, %v14819_v39 }
 0x4d5   :  { %50056 = vmatmul.mubr.f32.vlgmr.msra.gmra.mrb[32].mxu0 %v13918_v1  ;;  %50101 = vmatmul.mubr.f32.vlgmr.msra.gmra.mrb[30].mxu1 %v14368_v44  ;;  %v14821_v25 = vsub.f32 %v14819_v39, %v14820_v2 }
 0x4d6   :  { %50059 = vmatpush3.xpose.msra.mxu0 %v13929_v8  ;;  %50104 = vmatpush3.xpose.msra.mxu1 %v14379_v30 }
 0x4d7   :  { %50060 = vmatprep.mubr.msk.f32.mxu0 %vm54248_vm3, %v58980_v54  ;;  %50063 = vmatprep.subr.mxu0 %v58980_v54  ;;  %v14822_v29 = vand.u32 4294901760, %v14821_v25 }
 0x4d8   :  { %50105 = vmatprep.mubr.msk.f32.mxu1 %vm54248_vm3, %v58980_v54  ;;  %50108 = vmatprep.subr.mxu1 %v58980_v54 }
 0x4dc   :  { %v55582_v3 = vpop.f32.mrb[20].mxu1 }
 0x4dd   :  { %v49812_v5 = vpop.f32.mrb[21].mxu1  ;;  %50061 = vmatmul.mubr.f32.vlgmr.msra.gmra.mrb[32].mxu0 %v55547_v58  ;;  %50106 = vmatmul.mubr.f32.vlgmr.msra.gmra.mrb[30].mxu1 %v55486_v27 }
 0x4de   :  { %50064 = vmatpush3.xpose.msra.mxu0 %v13926_v60  ;;  %50109 = vmatpush3.xpose.msra.mxu1 %v55491_v43 }
 0x4df   :  { %50065 = vmatprep.mubr.msk.f32.mxu0 %vm54248_vm3, %v58980_v54  ;;  %50068 = vmatprep.subr.mxu0 %v58980_v54 }
 0x4e0   :  { %50110 = vmatprep.mubr.msk.f32.mxu1 %vm54248_vm3, %v58980_v54  ;;  %50143 = vmatprep.subr.mxu1 %v58980_v54 }
 0x4e5   :  { %50066 = vmatmul.mubr.f32.vlgmr.msra.gmra.mrb[32].mxu0 %v13915_v57  ;;  %50111 = vmatmul.mubr.f32.vlgmr.msra.gmra.mrb[30].mxu1 %v55486_v27 }
 0x4e6   :  { %50069 = vmatpush3.xpose.msra.mxu0 %v55550_v47  ;;  %50144 = vmatpush3.msra.mxu1 %v55600_v9 }
 0x4e7   :  { %50070 = vmatprep.mubr.msk.f32.mxu0 %vm54248_vm3, %v58980_v54  ;;  %50073 = vmatprep.subr.mxu0 %v58980_v54 }
 0x4e8   :  { %50145 = vmatprep.mubr.msk.f32.mxu1 %vm54248_vm3, %v58980_v54  ;;  %50148 = vmatprep.subr.mxu1 %v58980_v54 }
 0x4ed   :  { %50071 = vmatmul.mubr.f32.vlgmr.msra.gmra.mrb[32].mxu0 %v13916_v26 }
 0x4ee   :  { %50074 = vmatpush3.xpose.msra.mxu0 %v13927_v56  ;;  %50075 = vmatprep.mubr.msk.f32.mxu0 %vm54248_vm3, %v58980_v54 }
 0x4ef   :  { %50078 = vmatprep.subr.mxu0 %v58980_v54 }
 0x4f4   :  { %v55624_v21 = vpop.f32.mrb[22].mxu0 }
 0x4f5   :  { %v49782_v22 = vpop.f32.mrb[23].mxu0  ;;  %50076 = vmatmul.mubr.f32.vlgmr.msra.gmra.mrb[32].mxu0 %v55547_v58 }
 0x4f6   :  { %50079 = vmatpush3.xpose.msra.mxu0 %v55550_v47  ;;  %50080 = vmatprep.mubr.msk.f32.mxu0 %vm54248_vm3, %v58980_v54 }
 0x4f7   :  { %50113 = vmatprep.subr.mxu0 %v58980_v54 }
 0x4fd   :  { %50081 = vmatmul.mubr.f32.vlgmr.msra.gmra.mrb[32].mxu0 %v55547_v58 }
 0x4fe   :  { %50114 = vmatpush3.xpose.msra.mxu0 %v14753_v19  ;;  %50115 = vmatprep.mubr.msk.f32.mxu0 %vm54248_vm3, %v58980_v54 }
 0x4ff   :  { %50118 = vmatprep.subr.mxu0 %v58980_v54 }
 0x501   :  { %50116 = vmatmul.mubr.f32.vlgmr.msra.gmra.mrb[34].mxu0 %v14822_v29 }
 0x502   :  { %50119 = vmatpush3.xpose.msra.mxu0 %v14833_v31  ;;  %50120 = vmatprep.mubr.msk.f32.mxu0 %vm54248_vm3, %v58980_v54 }
 0x503   :  { %50123 = vmatprep.subr.mxu0 %v58980_v54 }
 0x508   :  { %v55638_v32 = vpop.f32.mrb[22].mxu1 }
 0x509   :  { %v49872_v33 = vpop.f32.mrb[23].mxu1  ;;  %50121 = vmatmul.mubr.f32.vlgmr.msra.gmra.mrb[34].mxu0 %v14818_v20 }
 0x50a   :  { %50124 = vmatpush3.xpose.msra.mxu0 %v14830_v6  ;;  %50125 = vmatprep.mubr.msk.f32.mxu0 %vm54248_vm3, %v58980_v54 }
 0x50b   :  { %50128 = vmatprep.subr.mxu0 %v58980_v54 }
 0x511   :  { %50126 = vmatmul.mubr.f32.vlgmr.msra.gmra.mrb[34].mxu0 %v14819_v39 }
 0x512   :  { %50129 = vmatpush3.xpose.msra.mxu0 %v14753_v19  ;;  %50130 = vmatprep.mubr.msk.f32.mxu0 %vm54248_vm3, %v58980_v54 }
 0x513   :  { %50133 = vmatprep.subr.mxu0 %v58980_v54 }
 0x519   :  { %50131 = vmatmul.mubr.f32.vlgmr.msra.gmra.mrb[34].mxu0 %v14820_v2 }
 0x51a   :  { %50134 = vmatpush3.xpose.msra.mxu0 %v14831_v23  ;;  %50135 = vmatprep.mubr.msk.f32.mxu0 %vm54248_vm3, %v58980_v54 }
 0x51b   :  { %50138 = vmatprep.subr.mxu0 %v58980_v54 }
 0x520   :  { %v55649_v34 = vpop.f32.mrb[24].mxu0 }
 0x521   :  { %v49842_v40 = vpop.f32.mrb[25].mxu0  ;;  %50136 = vmatmul.mubr.f32.vlgmr.msra.gmra.mrb[34].mxu0 %v14818_v20 }
 0x522   :  { %50139 = vmatpush3.xpose.msra.mxu0 %v14753_v19  ;;  %50140 = vmatprep.mubr.msk.f32.mxu0 %vm54248_vm3, %v58980_v54 }
 0x523   :  { %50173 = vmatprep.subr.mxu0 %v58980_v54 }
 0x529   :  { %50141 = vmatmul.mubr.f32.vlgmr.msra.gmra.mrb[34].mxu0 %v14818_v20 }
 0x52a   :  { %50174 = vmatpush3.msra.mxu0 %v55661_v42  ;;  %50175 = vmatprep.mubr.msk.f32.mxu0 %vm54248_vm3, %v58980_v54 }
 0x52b   :  { %50178 = vmatprep.subr.mxu0 %v58980_v54 }
 0x534   :  { %v12030_v48 = vpop.f32.mrb[24].mxu1 }
 0x535   :  { %v49932_v27 = vpop.f32.mrb[25].mxu1  ;;  %v15198_v43 = vsel %vm11581_vm4, %v12030_v48, -inf }
 0x536   :  { %15199 = vmax.xlane.f32.xlu0 %v15198_v43 }
 0x54c   :  { %v55668_v28 = vpop.f32.mrb[26].mxu0 }
 0x54d   :  { %v49902_v18 = vpop.f32.mrb[27].mxu0 }
 0x560   :  { %v12934_v14 = vpop.f32.mrb[26].mxu1 }
 0x561   :  { %v49992_v44 = vpop.f32.mrb[27].mxu1  ;;  %v15204_v30 = vsel %vm11581_vm4, %v12934_v14, -inf }
 0x562   :  { %15205 = vmax.xlane.f32.xlu0 %v15204_v30 }
 0x578   :  { %v12482_v46 = vpop.f32.mrb[28].mxu0 }
 0x579   :  { %v49962_v49 = vpop.f32.mrb[29].mxu0  ;;  %v15201_v50 = vsel %vm11581_vm4, %v12482_v46, -inf }
 0x57a   :  { %15202 = vmax.xlane.f32.xlu1 %v15201_v50 }
 0x58c   :  { %v13838_v10 = vpop.f32.mrb[28].mxu1 }
 0x58d   :  { %v50052_v51 = vpop.f32.mrb[29].mxu1  ;;  %v15210_v52 = vsel %vm11581_vm4, %v13838_v10, -inf }
 0x58e   :  { %15211 = vmax.xlane.f32.xlu0 %v15210_v52 }
 0x5a4   :  { %v13386_v53 = vpop.f32.mrb[30].mxu0 }
 0x5a5   :  { %v50022_v55 = vpop.f32.mrb[31].mxu0  ;;  %v15207_v59 = vsel %vm11581_vm4, %v13386_v53, -inf }
 0x5a6   :  { %15208 = vmax.xlane.f32.xlu1 %v15207_v59 }
 0x5b8   :  { %v14742_v13 = vpop.f32.mrb[30].mxu1 }
 0x5b9   :  { %v50112_v58 = vpop.f32.mrb[31].mxu1  ;;  %v15216_v63 = vsel %vm11581_vm4, %v14742_v13, -inf }
 0x5c3   :  { %v15200_v47 = vpop.xlane.xlu0 %15199 }
 0x5c4   :  { %v15222_v57 = vsub.f32 %v12030_v48, %v15200_v47 }
 0x5c6   :  { %v15230_v60 = vmul.f32 1.442695, %v15222_v57 }
 0x5c8   :  { %54147 = vpow2.f32 %v15230_v60 }
 0x5d0   :  { %v14290_v61 = vpop.f32.mrb[32].mxu0 }
 0x5d1   :  { %v50082_v24 = vpop.f32.mrb[33].mxu0  ;;  %v15213_v26 = vsel %vm11581_vm4, %v14290_v61, -inf }
 0x5d2   :  { %v54148_v56 = vpop.eup %54147  ;;  %15214 = vmax.xlane.f32.xlu0 %v15213_v26 }
 0x5d3   :  { %v15246_v62 = vsel %vm11581_vm4, %v54148_v56, 0.0 }
 0x5d4   :  { %15247 = vadd.xlane.f32.xlu1 %v15246_v62  ;;  %v47548_v62 = vld [vmem:[%s58977_s3 + $0x12] ss:$0 sm:$0xff] }
 0x5d6   :  { %15217 = vmax.xlane.f32.xlu0 %v15216_v63 }
 0x5ef   :  { %v15206_v5 = vpop.xlane.xlu0 %15205 }
 0x5f0   :  { %v15224_v11 = vsub.f32 %v12934_v14, %v15206_v5 }
 0x5f2   :  { %v15234_v15 = vmul.f32 1.442695, %v15224_v11  ;;  %v15824_v11 = vsub.f32 %v55658_v41, %v55661_v42 }
 0x5fc   :  { %v55677_v1 = vpop.f32.mrb[34].mxu0 }
 0x5fd   :  { %v50142_v8 = vpop.f32.mrb[35].mxu0  ;;  %v15219_v4 = vsel %vm11581_vm4, %v55677_v1, -inf }
 0x5fe   :  { %15220 = vmax.xlane.f32.xlu0 %v15219_v4 }
 0x607   :  { %v15203_v0 = vpop.xlane.xlu1 %15202 }
 0x608   :  { %v15223_v12 = vsub.f32 %v12482_v46, %v15203_v0  ;;  %v15375_v46 = vsub.f32 %v55594_v7, %v55600_v9 }
 0x60a   :  { %v15232_v16 = vmul.f32 1.442695, %v15223_v12 }
 0x60c   :  { %54149 = vpow2.f32 %v15232_v16 }
 0x60d   :  { %54151 = vpow2.f32 %v15234_v15 }
 0x616   :  { %v55681_v17 = vpop.eup %54149 }
 0x617   :  { %v15249_v20 = vsel %vm11581_vm4, %v55681_v17, 0.0  ;;  %v55685_v19 = vpop.eup %54151 }
 0x618   :  { %15250 = vadd.xlane.f32.xlu1 %v15249_v20  ;;  %v15252_v6 = vsel %vm11581_vm4, %v55685_v19, 0.0  ;;  %v15825_v20 = vand.u32 4294901760, %v15824_v11 }
 0x61b   :  { %v15212_v39 = vpop.xlane.xlu0 %15211 }
 0x61c   :  { %v15226_v22 = vsub.f32 %v13838_v10, %v15212_v39  ;;  %15253 = vadd.xlane.f32.xlu1 %v15252_v6 }
 0x61e   :  { %v15238_v2 = vmul.f32 1.442695, %v15226_v22 }
 0x620   :  { %54153 = vpow2.f32 %v15238_v2 }
 0x62a   :  { %v55689_v23 = vpop.eup %54153 }
 0x62b   :  { %v15258_v25 = vsel %vm11581_vm4, %v55689_v23, 0.0 }
 0x62c   :  { %15259 = vadd.xlane.f32.xlu0 %v15258_v25 }
 0x633   :  { %v15209_v37 = vpop.xlane.xlu1 %15208 }
 0x634   :  { %v15225_v29 = vsub.f32 %v13386_v53, %v15209_v37  ;;  %v15376_v53 = vand.u32 4294901760, %v15375_v46  ;;  %v15826_v37 = vsub.f32 %v15824_v11, %v15825_v20 }
 0x636   :  { %v15236_v31 = vmul.f32 1.442695, %v15225_v29  ;;  %v15377_v7 = vsub.f32 %v15375_v46, %v15376_v53 }
 0x638   :  { %54155 = vpow2.f32 %v15236_v31  ;;  %v15378_v60 = vand.u32 4294901760, %v15377_v7 }
 0x642   :  { %v55693_v33 = vpop.eup %54155 }
 0x643   :  { %v15255_v38 = vsel %vm11581_vm4, %v55693_v33, 0.0 }
 0x644   :  { %15256 = vadd.xlane.f32.xlu1 %v15255_v38 }
 0x65f   :  { %v15215_v40 = vpop.xlane.xlu0 %15214 }
 0x660   :  { %v15227_v48 = vsub.f32 %v14290_v61, %v15215_v40 }
 0x661   :  { %v15248_v27 = vpop.xlane.xlu1 %15247 }
 0x662   :  { %v15240_v43 = vmul.f32 1.442695, %v15227_v48  ;;  %54157 = vrcp.f32 %v15248_v27  ;;  %v15827_v48 = vand.u32 4294901760, %v15826_v37 }
 0x663   :  { %v15218_v18 = vpop.xlane.xlu0 %15217 }
 0x664   :  { %54159 = vpow2.f32 %v15240_v43  ;;  %v15228_v14 = vsub.f32 %v14742_v13, %v15218_v18 }
 0x666   :  { %v15242_v44 = vmul.f32 1.442695, %v15228_v14 }
 0x668   :  { %54161 = vpow2.f32 %v15242_v44 }
 0x66c   :  { %v54158_v30 = vpop.eup %54157 }
 0x66d   :  { %v15286_v49 = vmul.f32 %v54158_v30, %v54148_v56  ;;  %v47549_v30 = vld [vmem:[%s58977_s3 + $0x13] ss:$0 sm:$0xff] }
 0x66e   :  { %v55699_v50 = vpop.eup %54159 }
 0x66f   :  { %v15261_v10 = vsel %vm11581_vm4, %v55699_v50, 0.0  ;;  %v15295_v51 = vsel %vm11581_vm4, %v15286_v49, 0 }
 0x670   :  { %15262 = vadd.xlane.f32.xlu1 %v15261_v10  ;;  %v15363_v52 = vand.u32 4294901760, %v15295_v51  ;;  %v47550_v10 = vld [vmem:[%s58977_s3 + $0x14] ss:$0 sm:$0xff] }
 0x672   :  { %v55704_v55 = vpop.eup %54161  ;;  %v15364_v59 = vsub.f32 %v15295_v51, %v15363_v52  ;;  %v53244_v51 = vadd.f32 %v47550_v10, %v55582_v3  ;;  %v47553_v10 = vld [vmem:[%s58977_s3 + $0x17] ss:$0 sm:$0xff] }
 0x673   :  { %v15264_v13 = vsel %vm11581_vm4, %v55704_v55, 0.0 }
 0x674   :  { %15265 = vadd.xlane.f32.xlu0 %v15264_v13  ;;  %v15365_v58 = vand.u32 4294901760, %v15364_v59 }
 0x676   :  { %v15366_v47 = vsub.f32 %v15364_v59, %v15365_v58 }
 0x678   :  { %v15367_v57 = vand.u32 4294901760, %v15366_v47 }
 0x67a   :  { %50146 = vmatmul.mubr.f32.vlgmr.msra.gmra.mrb[32].mxu1 %v15367_v57 }
 0x67b   :  { %50149 = vmatpush3.msra.mxu1 %v15378_v60  ;;  %50150 = vmatprep.mubr.msk.f32.mxu1 %vm54248_vm3, %v58980_v54 }
 0x67c   :  { %50153 = vmatprep.subr.mxu1 %v58980_v54 }
 0x682   :  { %50151 = vmatmul.mubr.f32.vlgmr.msra.gmra.mrb[32].mxu1 %v15363_v52 }
 0x683   :  { %50154 = vmatpush3.msra.mxu1 %v15375_v46  ;;  %50155 = vmatprep.mubr.msk.f32.mxu1 %vm54248_vm3, %v58980_v54  ;;  %v53243_v46 = vadd.f32 %v47549_v30, %v55624_v21 }
 0x684   :  { %50158 = vmatprep.subr.mxu1 %v58980_v54 }
 0x68a   :  { %50156 = vmatmul.mubr.f32.vlgmr.msra.gmra.mrb[32].mxu1 %v15364_v59  ;;  %v55795_v59 = vand.u32 4294901760, %v53244_v51 }
 0x68b   :  { %50159 = vmatpush3.msra.mxu1 %v55600_v9  ;;  %v15221_v61 = vpop.xlane.xlu0 %15220  ;;  %50160 = vmatprep.mubr.msk.f32.mxu1 %vm54248_vm3, %v58980_v54 }
 0x68c   :  { %v15229_v24 = vsub.f32 %v55677_v1, %v15221_v61  ;;  %50163 = vmatprep.subr.mxu1 %v58980_v54  ;;  %v53242_v1 = vadd.f32 %v47548_v62, %v55502_v45  ;;  %v55813_v57 = vsub.f32 %v53244_v51, %v55795_v59  ;;  %v53247_v51 = vadd.f32 %v47553_v10, %v55668_v28 }
 0x68e   :  { %v15244_v26 = vmul.f32 1.442695, %v15229_v24  ;;  %v55734_v8 = vand.u32 4294901760, %v53242_v1  ;;  %v17172_v24 = vand.u32 4294901760, %v55813_v57 }
 0x690   :  { %54163 = vpow2.f32 %v15244_v26  ;;  %v16273_v16 = vsub.f32 %v53242_v1, %v55734_v8 }
 0x692   :  { %50161 = vmatmul.mubr.f32.vlgmr.msra.gmra.mrb[32].mxu1 %v15365_v58  ;;  %v16274_v41 = vand.u32 4294901760, %v16273_v16 }
 0x693   :  { %50164 = vmatpush3.msra.mxu1 %v15376_v53  ;;  %50165 = vmatprep.mubr.msk.f32.mxu1 %vm54248_vm3, %v58980_v54 }
 0x694   :  { %50168 = vmatprep.subr.mxu1 %v58980_v54  ;;  %v16275_v40 = vsub.f32 %v16273_v16, %v16274_v41 }
 0x696   :  { %v16276_v43 = vand.u32 4294901760, %v16275_v40 }
 0x69a   :  { %v55722_v56 = vpop.eup %54163  ;;  %50166 = vmatmul.mubr.f32.vlgmr.msra.gmra.mrb[32].mxu1 %v15363_v52 }
 0x69b   :  { %50169 = vmatpush3.msra.mxu1 %v55600_v9  ;;  %v15267_v63 = vsel %vm11581_vm4, %v55722_v56, 0.0  ;;  %50170 = vmatprep.mubr.msk.f32.mxu1 %vm54248_vm3, %v58980_v54 }
 0x69c   :  { %15268 = vadd.xlane.f32.xlu1 %v15267_v63  ;;  %50203 = vmatprep.subr.mxu1 %v58980_v54 }
 0x6a2   :  { %50171 = vmatmul.mubr.f32.vlgmr.msra.gmra.mrb[32].mxu1 %v15363_v52  ;;  %v55787_v52 = vand.u32 4294901760, %v53243_v46 }
 0x6a3   :  { %50204 = vmatpush3.msra.mxu1 %v55734_v8  ;;  %50205 = vmatprep.mubr.msk.f32.mxu1 %vm54248_vm3, %v58980_v54 }
 0x6a4   :  { %50208 = vmatprep.subr.mxu1 %v58980_v54  ;;  %v55798_v13 = vsub.f32 %v53243_v46, %v55787_v52 }
 0x6a5   :  { %v15251_v9 = vpop.xlane.xlu1 %15250 }
 0x6a6   :  { %54165 = vrcp.f32 %v15251_v9 }
 0x6a9   :  { %v15254_v4 = vpop.xlane.xlu1 %15253 }
 0x6aa   :  { %54167 = vrcp.f32 %v15254_v4 }
 0x6b0   :  { %v54166_v5 = vpop.eup %54165 }
 0x6b1   :  { %v15287_v45 = vmul.f32 %v54166_v5, %v55681_v17 }
 0x6b3   :  { %v15744_v0 = vsel %vm11581_vm4, %v15287_v45, 0  ;;  %v47551_v45 = vld [vmem:[%s58977_s3 + $0x15] ss:$0 sm:$0xff] }
 0x6b4   :  { %v54168_v12 = vpop.eup %54167  ;;  %v55744_v15 = vand.u32 4294901760, %v15744_v0 }
 0x6b5   :  { %v15288_v39 = vmul.f32 %v54168_v12, %v55685_v19 }
 0x6b6   :  { %v15813_v6 = vsub.f32 %v15744_v0, %v55744_v15  ;;  %v53245_v0 = vadd.f32 %v47551_v45, %v55649_v34 }
 0x6b7   :  { %v16193_v22 = vsel %vm11581_vm4, %v15288_v39, 0 }
 0x6b8   :  { %v15814_v2 = vand.u32 4294901760, %v15813_v6  ;;  %v55750_v25 = vand.u32 4294901760, %v16193_v22 }
 0x6b9   :  { %v15260_v18 = vpop.xlane.xlu0 %15259 }
 0x6ba   :  { %v15815_v17 = vsub.f32 %v15813_v6, %v15814_v2  ;;  %v16262_v29 = vsub.f32 %v16193_v22, %v55750_v25  ;;  %54169 = vrcp.f32 %v15260_v18 }
 0x6bc   :  { %v15816_v31 = vand.u32 4294901760, %v15815_v17  ;;  %v16263_v38 = vand.u32 4294901760, %v16262_v29 }
 0x6be   :  { %50176 = vmatmul.mubr.f32.vlgmr.msra.gmra.mrb[36].mxu0 %v15816_v31  ;;  %v16264_v27 = vsub.f32 %v16262_v29, %v16263_v38 }
 0x6bf   :  { %50179 = vmatpush3.msra.mxu0 %v15827_v48  ;;  %50180 = vmatprep.mubr.msk.f32.mxu0 %vm54248_vm3, %v58980_v54 }
 0x6c0   :  { %v16265_v19 = vand.u32 4294901760, %v16264_v27  ;;  %50183 = vmatprep.subr.mxu0 %v58980_v54 }
 0x6c2   :  { %50206 = vmatmul.mubr.f32.vlgmr.msra.gmra.mrb[34].mxu1 %v16265_v19 }
 0x6c3   :  { %50209 = vmatpush3.msra.mxu1 %v16276_v43  ;;  %50210 = vmatprep.mubr.msk.f32.mxu1 %vm54248_vm3, %v58980_v54 }
 0x6c4   :  { %50213 = vmatprep.subr.mxu1 %v58980_v54  ;;  %v54170_v44 = vpop.eup %54169 }
 0x6c5   :  { %v15290_v49 = vmul.f32 %v54170_v44, %v55689_v23 }
 0x6c6   :  { %50181 = vmatmul.mubr.f32.vlgmr.msra.gmra.mrb[36].mxu0 %v55744_v15 }
 0x6c7   :  { %50184 = vmatpush3.msra.mxu0 %v15824_v11  ;;  %50185 = vmatprep.mubr.msk.f32.mxu0 %vm54248_vm3, %v58980_v54  ;;  %v17091_v53 = vsel %vm11581_vm4, %v15290_v49, 0 }
 0x6c8   :  { %50188 = vmatprep.subr.mxu0 %v58980_v54  ;;  %v55793_v23 = vand.u32 4294901760, %v17091_v53 }
 0x6ca   :  { %50211 = vmatmul.mubr.f32.vlgmr.msra.gmra.mrb[34].mxu1 %v55750_v25  ;;  %v55810_v47 = vsub.f32 %v17091_v53, %v55793_v23 }
 0x6cb   :  { %50214 = vmatpush3.msra.mxu1 %v16273_v16  ;;  %50215 = vmatprep.mubr.msk.f32.mxu1 %vm54248_vm3, %v58980_v54 }
 0x6cc   :  { %50218 = vmatprep.subr.mxu1 %v58980_v54  ;;  %v17161_v61 = vand.u32 4294901760, %v55810_v47 }
 0x6ce   :  { %50186 = vmatmul.mubr.f32.vlgmr.msra.gmra.mrb[36].mxu0 %v15813_v6  ;;  %v17162_v1 = vsub.f32 %v55810_v47, %v17161_v61 }
 0x6cf   :  { %50189 = vmatpush3.msra.mxu0 %v55661_v42  ;;  %50190 = vmatprep.mubr.msk.f32.mxu0 %vm54248_vm3, %v58980_v54 }
 0x6d0   :  { %50193 = vmatprep.subr.mxu0 %v58980_v54  ;;  %v17163_v4 = vand.u32 4294901760, %v17162_v1 }
 0x6d1   :  { %v15257_v14 = vpop.xlane.xlu1 %15256 }
 0x6d2   :  { %54171 = vrcp.f32 %v15257_v14  ;;  %50216 = vmatmul.mubr.f32.vlgmr.msra.gmra.mrb[34].mxu1 %v16262_v29 }
 0x6d3   :  { %50219 = vmatpush3.msra.mxu1 %v55734_v8  ;;  %50220 = vmatprep.mubr.msk.f32.mxu1 %vm54248_vm3, %v58980_v54 }
 0x6d4   :  { %50223 = vmatprep.subr.mxu1 %v58980_v54 }
 0x6d6   :  { %50191 = vmatmul.mubr.f32.vlgmr.msra.gmra.mrb[36].mxu0 %v15814_v2 }
 0x6d7   :  { %50194 = vmatpush3.msra.mxu0 %v15825_v20  ;;  %50195 = vmatprep.mubr.msk.f32.mxu0 %vm54248_vm3, %v58980_v54  ;;  %v55873_v20 = vand.u32 4294901760, %v53245_v0 }
 0x6d8   :  { %50198 = vmatprep.subr.mxu0 %v58980_v54 }
 0x6d9   :  { %v55881_v6 = vsub.f32 %v53245_v0, %v55873_v20 }
 0x6da   :  { %50221 = vmatmul.mubr.f32.vlgmr.msra.gmra.mrb[34].mxu1 %v16263_v38 }
 0x6db   :  { %50224 = vmatpush3.msra.mxu1 %v16274_v41  ;;  %50225 = vmatprep.mubr.msk.f32.mxu1 %vm54248_vm3, %v58980_v54  ;;  %v17621_v37 = vand.u32 4294901760, %v55881_v6 }
 0x6dc   :  { %v54172_v21 = vpop.eup %54171  ;;  %50228 = vmatprep.subr.mxu1 %v58980_v54 }
 0x6dd   :  { %v15289_v3 = vmul.f32 %v54172_v21, %v55693_v33  ;;  %v16723_v33 = vand.u32 4294901760, %v55798_v13 }
 0x6de   :  { %50196 = vmatmul.mubr.f32.vlgmr.msra.gmra.mrb[36].mxu0 %v55744_v15 }
 0x6df   :  { %50199 = vmatpush3.msra.mxu0 %v55661_v42  ;;  %50200 = vmatprep.mubr.msk.f32.mxu0 %vm54248_vm3, %v58980_v54  ;;  %v16642_v58 = vsel %vm11581_vm4, %v15289_v3, 0  ;;  %v16724_v26 = vsub.f32 %v55798_v13, %v16723_v33 }
 0x6e0   :  { %50233 = vmatprep.subr.mxu0 %v58980_v54  ;;  %v55807_v7 = vand.u32 4294901760, %v16642_v58 }
 0x6e1   :  { %v16725_v9 = vand.u32 4294901760, %v16724_v26 }
 0x6e2   :  { %50226 = vmatmul.mubr.f32.vlgmr.msra.gmra.mrb[34].mxu1 %v55750_v25  ;;  %v16711_v42 = vsub.f32 %v16642_v58, %v55807_v7 }
 0x6e3   :  { %50229 = vmatpush3.msra.mxu1 %v55734_v8  ;;  %50230 = vmatprep.mubr.msk.f32.mxu1 %vm54248_vm3, %v58980_v54  ;;  %v17173_v8 = vsub.f32 %v55813_v57, %v17172_v24 }
 0x6e4   :  { %50263 = vmatprep.subr.mxu1 %v58980_v54  ;;  %v16712_v60 = vand.u32 4294901760, %v16711_v42 }
 0x6e5   :  { %v17174_v5 = vand.u32 4294901760, %v17173_v8 }
 0x6e6   :  { %50201 = vmatmul.mubr.f32.vlgmr.msra.gmra.mrb[36].mxu0 %v55744_v15  ;;  %v16713_v62 = vsub.f32 %v16711_v42, %v16712_v60  ;;  %v47552_v15 = vld [vmem:[%s58977_s3 + $0x16] ss:$0 sm:$0xff] }
 0x6e7   :  { %50234 = vmatpush3.msra.mxu0 %v55787_v52  ;;  %50235 = vmatprep.mubr.msk.f32.mxu0 %vm54248_vm3, %v58980_v54  ;;  %v53246_v16 = vadd.f32 %v47552_v15, %v55638_v32 }
 0x6e8   :  { %50238 = vmatprep.subr.mxu0 %v58980_v54  ;;  %v16714_v63 = vand.u32 4294901760, %v16713_v62 }
 0x6e9   :  { %v55878_v39 = vand.u32 4294901760, %v53246_v16 }
 0x6ea   :  { %50231 = vmatmul.mubr.f32.vlgmr.msra.gmra.mrb[34].mxu1 %v55750_v25  ;;  %50236 = vmatmul.mubr.f32.vlgmr.msra.gmra.mrb[38].mxu0 %v16714_v63 }
 0x6eb   :  { %50239 = vmatpush3.msra.mxu0 %v16725_v9  ;;  %50264 = vmatpush3.msra.mxu1 %v55795_v59  ;;  %v55893_v41 = vsub.f32 %v53246_v16, %v55878_v39 }
 0x6ec   :  { %50265 = vmatprep.mubr.msk.f32.mxu1 %vm54248_vm3, %v58980_v54  ;;  %50268 = vmatprep.subr.mxu1 %v58980_v54 }
 0x6ed   :  { %50240 = vmatprep.mubr.msk.f32.mxu0 %vm54248_vm3, %v58980_v54  ;;  %50243 = vmatprep.subr.mxu0 %v58980_v54  ;;  %v18070_v40 = vand.u32 4294901760, %v55893_v41 }
 0x6ee   :  { %50266 = vmatmul.mubr.f32.vlgmr.msra.gmra.mrb[36].mxu1 %v17163_v4 }
 0x6ef   :  { %50269 = vmatpush3.msra.mxu1 %v17174_v5  ;;  %50270 = vmatprep.mubr.msk.f32.mxu1 %vm54248_vm3, %v58980_v54  ;;  %v18071_v18 = vsub.f32 %v55893_v41, %v18070_v40 }
 0x6f0   :  { %50273 = vmatprep.subr.mxu1 %v58980_v54 }
 0x6f1   :  { %v18072_v46 = vand.u32 4294901760, %v18071_v18 }
 0x6f2   :  { %50241 = vmatmul.mubr.f32.vlgmr.msra.gmra.mrb[38].mxu0 %v55807_v7 }
 0x6f3   :  { %50244 = vmatpush3.msra.mxu0 %v55798_v13  ;;  %50245 = vmatprep.mubr.msk.f32.mxu0 %vm54248_vm3, %v58980_v54 }
 0x6f4   :  { %50248 = vmatprep.subr.mxu0 %v58980_v54 }
 0x6f6   :  { %50271 = vmatmul.mubr.f32.vlgmr.msra.gmra.mrb[36].mxu1 %v55793_v23 }
 0x6f7   :  { %50274 = vmatpush3.msra.mxu1 %v55813_v57  ;;  %50275 = vmatprep.mubr.msk.f32.mxu1 %vm54248_vm3, %v58980_v54 }
 0x6f8   :  { %50278 = vmatprep.subr.mxu1 %v58980_v54 }
 0x6fa   :  { %50246 = vmatmul.mubr.f32.vlgmr.msra.gmra.mrb[38].mxu0 %v16711_v42 }
 0x6fb   :  { %50249 = vmatpush3.msra.mxu0 %v55787_v52  ;;  %50250 = vmatprep.mubr.msk.f32.mxu0 %vm54248_vm3, %v58980_v54 }
 0x6fc   :  { %50253 = vmatprep.subr.mxu0 %v58980_v54 }
 0x6fd   :  { %v15263_v11 = vpop.xlane.xlu1 %15262 }
 0x6fe   :  { %54173 = vrcp.f32 %v15263_v11  ;;  %50276 = vmatmul.mubr.f32.vlgmr.msra.gmra.mrb[36].mxu1 %v55810_v47  ;;  %v18886_v47 = vld [vmem:[%s58978_s4] sm:$0xff] }
 0x6ff   :  { %50279 = vmatpush3.msra.mxu1 %v55795_v59  ;;  %50280 = vmatprep.mubr.msk.f32.mxu1 %vm54248_vm3, %v58980_v54  ;;  %v18898_v42 = vand.u32 4294901760, %v18886_v47 }
 0x700   :  { %50283 = vmatprep.subr.mxu1 %v58980_v54 }
 0x701   :  { %v15266_v12 = vpop.xlane.xlu0 %15265 }
 0x702   :  { %54175 = vrcp.f32 %v15266_v12  ;;  %50251 = vmatmul.mubr.f32.vlgmr.msra.gmra.mrb[38].mxu0 %v16712_v60  ;;  %v18887_v60 = vld [vmem:[%s58978_s4 + $0x8] sm:$0xff] }
 0x703   :  { %50254 = vmatpush3.msra.mxu0 %v16723_v33  ;;  %50255 = vmatprep.mubr.msk.f32.mxu0 %vm54248_vm3, %v58980_v54 }
 0x704   :  { %50258 = vmatprep.subr.mxu0 %v58980_v54 }
 0x706   :  { %50281 = vmatmul.mubr.f32.vlgmr.msra.gmra.mrb[36].mxu1 %v17161_v61  ;;  %v55995_v61 = vand.u32 4294901760, %v18887_v60 }
 0x707   :  { %50284 = vmatpush3.msra.mxu1 %v17172_v24  ;;  %50285 = vmatprep.mubr.msk.f32.mxu1 %vm54248_vm3, %v58980_v54  ;;  %v18975_v24 = vsub.f32 %v18886_v47, %v18898_v42 }
 0x708   :  { %v54174_v34 = vpop.eup %54173  ;;  %50288 = vmatprep.subr.mxu1 %v58980_v54  ;;  %v56008_v12 = vsub.f32 %v18887_v60, %v55995_v61 }
 0x709   :  { %v15291_v22 = vmul.f32 %v54174_v34, %v55699_v50  ;;  %v18976_v1 = vand.u32 4294901760, %v18975_v24  ;;  %v18888_v34 = vld [vmem:[%s58978_s4 + $0x10] sm:$0xff] }
 0x70a   :  { %50256 = vmatmul.mubr.f32.vlgmr.msra.gmra.mrb[38].mxu0 %v55807_v7  ;;  %v19425_v15 = vand.u32 4294901760, %v56008_v12 }
 0x70b   :  { %50259 = vmatpush3.msra.mxu0 %v55787_v52  ;;  %50260 = vmatprep.mubr.msk.f32.mxu0 %vm54248_vm3, %v58980_v54  ;;  %v17540_v32 = vsel %vm11581_vm4, %v15291_v22, 0  ;;  %v18441_v52 = vand.u32 4294901760, %v53247_v51  ;;  %v18977_v4 = vsub.f32 %v18975_v24, %v18976_v1 }
 0x70c   :  { %v54176_v2 = vpop.eup %54175  ;;  %50293 = vmatprep.subr.mxu0 %v58980_v54  ;;  %v55890_v25 = vand.u32 4294901760, %v17540_v32  ;;  %v19426_v16 = vsub.f32 %v56008_v12, %v19425_v15 }
 0x70d   :  { %v15292_v50 = vmul.f32 %v54176_v2, %v55704_v55  ;;  %v17622_v55 = vsub.f32 %v55881_v6, %v17621_v37  ;;  %v18518_v21 = vsub.f32 %v53247_v51, %v18441_v52  ;;  %v18978_v45 = vand.u32 4294901760, %v18977_v4 }
 0x70e   :  { %50286 = vmatmul.mubr.f32.vlgmr.msra.gmra.mrb[36].mxu1 %v55793_v23  ;;  %v17609_v17 = vsub.f32 %v17540_v32, %v55890_v25 }
 0x70f   :  { %50289 = vmatpush3.msra.mxu1 %v55795_v59  ;;  %50290 = vmatprep.mubr.msk.f32.mxu1 %vm54248_vm3, %v58980_v54  ;;  %v17989_v29 = vsel %vm11581_vm4, %v15292_v50, 0  ;;  %v17623_v14 = vand.u32 4294901760, %v17622_v55  ;;  %v18519_v13 = vand.u32 4294901760, %v18518_v21 }
 0x710   :  { %50323 = vmatprep.subr.mxu1 %v58980_v54  ;;  %v17610_v31 = vand.u32 4294901760, %v17609_v17  ;;  %v55904_v38 = vand.u32 4294901760, %v17989_v29 }
 0x711   :  { %v18520_v58 = vsub.f32 %v18518_v21, %v18519_v13 }
 0x712   :  { %50261 = vmatmul.mubr.f32.vlgmr.msra.gmra.mrb[38].mxu0 %v55807_v7  ;;  %v17611_v48 = vsub.f32 %v17609_v17, %v17610_v31  ;;  %v18058_v27 = vsub.f32 %v17989_v29, %v55904_v38 }
 0x713   :  { %50294 = vmatpush3.msra.mxu0 %v55873_v20  ;;  %50295 = vmatprep.mubr.msk.f32.mxu0 %vm54248_vm3, %v58980_v54  ;;  %v18521_v33 = vand.u32 4294901760, %v18520_v58 }
 0x714   :  { %50298 = vmatprep.subr.mxu0 %v58980_v54  ;;  %v17612_v19 = vand.u32 4294901760, %v17611_v48  ;;  %v18059_v43 = vand.u32 4294901760, %v18058_v27 }
 0x716   :  { %50291 = vmatmul.mubr.f32.vlgmr.msra.gmra.mrb[36].mxu1 %v55793_v23  ;;  %50296 = vmatmul.mubr.f32.vlgmr.msra.gmra.mrb[40].mxu0 %v17612_v19  ;;  %v18060_v44 = vsub.f32 %v18058_v27, %v18059_v43 }
 0x717   :  { %50299 = vmatpush3.msra.mxu0 %v17623_v14  ;;  %50324 = vmatpush3.msra.mxu1 %v55878_v39 }
 0x718   :  { %50325 = vmatprep.mubr.msk.f32.mxu1 %vm54248_vm3, %v58980_v54  ;;  %50328 = vmatprep.subr.mxu1 %v58980_v54  ;;  %v18061_v30 = vand.u32 4294901760, %v18060_v44 }
 0x719   :  { %50300 = vmatprep.mubr.msk.f32.mxu0 %vm54248_vm3, %v58980_v54  ;;  %50303 = vmatprep.subr.mxu0 %v58980_v54 }
 0x71a   :  { %50326 = vmatmul.mubr.f32.vlgmr.msra.gmra.mrb[38].mxu1 %v18061_v30 }
 0x71b   :  { %50329 = vmatpush3.msra.mxu1 %v18072_v46  ;;  %50330 = vmatprep.mubr.msk.f32.mxu1 %vm54248_vm3, %v58980_v54 }
 0x71c   :  { %50333 = vmatprep.subr.mxu1 %v58980_v54 }
 0x71e   :  { %50301 = vmatmul.mubr.f32.vlgmr.msra.gmra.mrb[40].mxu0 %v55890_v25 }
 0x71f   :  { %50304 = vmatpush3.msra.mxu0 %v55881_v6  ;;  %50305 = vmatprep.mubr.msk.f32.mxu0 %vm54248_vm3, %v58980_v54 }
 0x720   :  { %50308 = vmatprep.subr.mxu0 %v58980_v54 }
 0x722   :  { %50331 = vmatmul.mubr.f32.vlgmr.msra.gmra.mrb[38].mxu1 %v55904_v38 }
 0x723   :  { %50334 = vmatpush3.msra.mxu1 %v55893_v41  ;;  %50335 = vmatprep.mubr.msk.f32.mxu1 %vm54248_vm3, %v58980_v54 }
 0x724   :  { %50338 = vmatprep.subr.mxu1 %v58980_v54 }
 0x726   :  { %50306 = vmatmul.mubr.f32.vlgmr.msra.gmra.mrb[40].mxu0 %v17609_v17 }
 0x727   :  { %50309 = vmatpush3.msra.mxu0 %v55873_v20  ;;  %50310 = vmatprep.mubr.msk.f32.mxu0 %vm54248_vm3, %v58980_v54 }
 0x728   :  { %50313 = vmatprep.subr.mxu0 %v58980_v54 }
 0x729   :  { %v15269_v49 = vpop.xlane.xlu1 %15268 }
 0x72a   :  { %54177 = vrcp.f32 %v15269_v49  ;;  %50336 = vmatmul.mubr.f32.vlgmr.msra.gmra.mrb[38].mxu1 %v18058_v27 }
 0x72b   :  { %50339 = vmatpush3.msra.mxu1 %v55878_v39  ;;  %50340 = vmatprep.mubr.msk.f32.mxu1 %vm54248_vm3, %v58980_v54 }
 0x72c   :  { %50343 = vmatprep.subr.mxu1 %v58980_v54 }
 0x72e   :  { %50311 = vmatmul.mubr.f32.vlgmr.msra.gmra.mrb[40].mxu0 %v17610_v31 }
 0x72f   :  { %50314 = vmatpush3.msra.mxu0 %v17621_v37  ;;  %50315 = vmatprep.mubr.msk.f32.mxu0 %vm54248_vm3, %v58980_v54  ;;  %v18889_v37 = vld [vmem:[%s58978_s4 + $0x18] sm:$0xff] }
 0x730   :  { %50318 = vmatprep.subr.mxu0 %v58980_v54  ;;  %v56041_v48 = vand.u32 4294901760, %v18889_v37 }
 0x732   :  { %50341 = vmatmul.mubr.f32.vlgmr.msra.gmra.mrb[38].mxu1 %v18059_v43  ;;  %v56048_v14 = vsub.f32 %v18889_v37, %v56041_v48 }
 0x733   :  { %50344 = vmatpush3.msra.mxu1 %v18070_v40  ;;  %50345 = vmatprep.mubr.msk.f32.mxu1 %vm54248_vm3, %v58980_v54 }
 0x734   :  { %v54178_v53 = vpop.eup %54177  ;;  %50348 = vmatprep.subr.mxu1 %v58980_v54  ;;  %v20323_v30 = vand.u32 4294901760, %v56048_v14 }
 0x735   :  { %v15293_v23 = vmul.f32 %v54178_v53, %v55722_v56 }
 0x736   :  { %50316 = vmatmul.mubr.f32.vlgmr.msra.gmra.mrb[40].mxu0 %v55890_v25  ;;  %v20324_v49 = vsub.f32 %v56048_v14, %v20323_v30 }
 0x737   :  { %50319 = vmatpush3.msra.mxu0 %v55873_v20  ;;  %50320 = vmatprep.mubr.msk.f32.mxu0 %vm54248_vm3, %v58980_v54  ;;  %v18438_v28 = vsel %vm11581_vm4, %v15293_v23, 0  ;;  %v19427_v20 = vand.u32 4294901760, %v19426_v16 }
 0x738   :  { %50353 = vmatprep.subr.mxu0 %v58980_v54  ;;  %v18506_v59 = vand.u32 4294901760, %v18438_v28  ;;  %v20325_v51 = vand.u32 4294901760, %v20324_v49 }
 0x73a   :  { %50346 = vmatmul.mubr.f32.vlgmr.msra.gmra.mrb[38].mxu1 %v55904_v38  ;;  %v18507_v3 = vsub.f32 %v18438_v28, %v18506_v59 }
 0x73b   :  { %50349 = vmatpush3.msra.mxu1 %v55878_v39  ;;  %50350 = vmatprep.mubr.msk.f32.mxu1 %vm54248_vm3, %v58980_v54  ;;  %v19796_v39 = vand.u32 4294901760, %v18888_v34 }
 0x73c   :  { %v18508_v56 = vand.u32 4294901760, %v18507_v3  ;;  %50383 = vmatprep.subr.mxu1 %v58980_v54 }
 0x73d   :  { %v56028_v6 = vsub.f32 %v18888_v34, %v19796_v39 }
 0x73e   :  { %50321 = vmatmul.mubr.f32.vlgmr.msra.gmra.mrb[40].mxu0 %v55890_v25  ;;  %v18509_v7 = vsub.f32 %v18507_v3, %v18508_v56 }
 0x73f   :  { %50354 = vmatpush3.msra.mxu0 %v18441_v52  ;;  %50355 = vmatprep.mubr.msk.f32.mxu0 %vm54248_vm3, %v58980_v54  ;;  %v19874_v41 = vand.u32 4294901760, %v56028_v6 }
 0x740   :  { %50358 = vmatprep.subr.mxu0 %v58980_v54  ;;  %v18510_v57 = vand.u32 4294901760, %v18509_v7 }
 0x741   :  { %v19875_v55 = vsub.f32 %v56028_v6, %v19874_v41 }
 0x742   :  { %50351 = vmatmul.mubr.f32.vlgmr.msra.gmra.mrb[38].mxu1 %v55904_v38  ;;  %50356 = vmatmul.mubr.f32.vlgmr.msra.gmra.mrb[42].mxu0 %v18510_v57 }
 0x743   :  { %50359 = vmatpush3.msra.mxu0 %v18521_v33  ;;  %50360 = vmatprep.mubr.msk.f32.mxu0 %vm54248_vm3, %v58980_v54  ;;  %v19876_v18 = vand.u32 4294901760, %v19875_v55 }
 0x744   :  { %50363 = vmatprep.subr.mxu0 %v58980_v54  ;;  %50384 = vmatpush3.msra.mxu1 %v18898_v42 }
 0x745   :  { %50385 = vmatprep.mubr.msk.f32.mxu1 %vm54248_vm3, %v58980_v54  ;;  %50388 = vmatprep.subr.mxu1 %v58980_v54 }
 0x74a   :  { %50361 = vmatmul.mubr.f32.vlgmr.msra.gmra.mrb[42].mxu0 %v18506_v59 }
 0x74b   :  { %50364 = vmatpush3.msra.mxu0 %v18518_v21  ;;  %50365 = vmatprep.mubr.msk.f32.mxu0 %vm54248_vm3, %v58980_v54 }
 0x74c   :  { %50368 = vmatprep.subr.mxu0 %v58980_v54 }
 0x752   :  { %50366 = vmatmul.mubr.f32.vlgmr.msra.gmra.mrb[42].mxu0 %v18507_v3 }
 0x753   :  { %50369 = vmatpush3.msra.mxu0 %v18441_v52  ;;  %50370 = vmatprep.mubr.msk.f32.mxu0 %vm54248_vm3, %v58980_v54 }
 0x754   :  { %50373 = vmatprep.subr.mxu0 %v58980_v54 }
 0x75a   :  { %50371 = vmatmul.mubr.f32.vlgmr.msra.gmra.mrb[42].mxu0 %v18508_v56  ;;  %v18891_v56 = vld [vmem:[%s58978_s4 + $0x28] sm:$0xff] }
 0x75b   :  { %50374 = vmatpush3.msra.mxu0 %v18519_v13  ;;  %50375 = vmatprep.mubr.msk.f32.mxu0 %vm54248_vm3, %v58980_v54 }
 0x75c   :  { %50378 = vmatprep.subr.mxu0 %v58980_v54 }
 0x762   :  { %50376 = vmatmul.mubr.f32.vlgmr.msra.gmra.mrb[42].mxu0 %v18506_v59 }
 0x763   :  { %50379 = vmatpush3.msra.mxu0 %v18441_v52  ;;  %50380 = vmatprep.mubr.msk.f32.mxu0 %vm54248_vm3, %v58980_v54  ;;  %v18890_v52 = vld [vmem:[%s58978_s4 + $0x20] sm:$0xff] }
 0x764   :  { %50413 = vmatprep.subr.mxu0 %v58980_v54  ;;  %v20694_v53 = vand.u32 4294901760, %v18890_v52 }
 0x766   :  { %v56090_v21 = vsub.f32 %v18890_v52, %v20694_v53 }
 0x768   :  { %v20772_v3 = vand.u32 4294901760, %v56090_v21 }
 0x76a   :  { %50381 = vmatmul.mubr.f32.vlgmr.msra.gmra.mrb[42].mxu0 %v18506_v59  ;;  %v20773_v60 = vsub.f32 %v56090_v21, %v20772_v3 }
 0x76b   :  { %50414 = vmatpush3.msra.mxu0 %v55995_v61  ;;  %50415 = vmatprep.mubr.msk.f32.mxu0 %vm54248_vm3, %v58980_v54 }
 0x76c   :  { %50423 = vmatprep.subr.mxu0 %v58980_v54 }
 0x775   :  { %v15739_v26 = vpop.f32.mrb[32].mxu1 }
 0x776   :  { %v18895_v62 = vsel %vm11581_vm4, %v15739_v26, 0  ;;  %v50172_v63 = vpop.f32.mrb[33].mxu1 }
 0x777   :  { %v18963_v8 = vand.u32 4294901760, %v18895_v62  ;;  %v20774_v63 = vand.u32 4294901760, %v20773_v60 }
 0x779   :  { %v18964_v9 = vsub.f32 %v18895_v62, %v18963_v8 }
 0x77b   :  { %v18965_v5 = vand.u32 4294901760, %v18964_v9 }
 0x77d   :  { %v18966_v11 = vsub.f32 %v18964_v9, %v18965_v5 }
 0x77f   :  { %v18967_v0 = vand.u32 4294901760, %v18966_v11 }
 0x781   :  { %50386 = vmatmul.mubr.f32.vlgmr.msra.gmra.mrb[40].mxu1 %v18967_v0  ;;  %v18892_v0 = vld [vmem:[%s58978_s4 + $0x30] sm:$0xff] }
 0x782   :  { %50389 = vmatpush3.msra.mxu1 %v18978_v45  ;;  %50390 = vmatprep.mubr.msk.f32.mxu1 %vm54248_vm3, %v58980_v54 }
 0x783   :  { %50393 = vmatprep.subr.mxu1 %v58980_v54 }
 0x785   :  { %50391 = vmatmul.mubr.f32.vlgmr.msra.gmra.mrb[42].mxu1 %v18963_v8 }
 0x786   :  { %50394 = vmatpush3.msra.mxu1 %v18975_v24  ;;  %50395 = vmatprep.mubr.msk.f32.mxu1 %vm54248_vm3, %v58980_v54 }
 0x787   :  { %50398 = vmatprep.subr.mxu1 %v58980_v54 }
 0x789   :  { %50396 = vmatmul.mubr.f32.vlgmr.msra.gmra.mrb[44].mxu1 %v18964_v9 }
 0x78a   :  { %50399 = vmatpush3.msra.mxu1 %v18898_v42  ;;  %50400 = vmatprep.mubr.msk.f32.mxu1 %vm54248_vm3, %v58980_v54 }
 0x78b   :  { %50403 = vmatprep.subr.mxu1 %v58980_v54 }
 0x78d   :  { %50401 = vmatmul.mubr.f32.vlgmr.msra.gmra.mrb[46].mxu1 %v18965_v5 }
 0x78e   :  { %50404 = vmatpush3.msra.mxu1 %v18976_v1  ;;  %50405 = vmatprep.mubr.msk.f32.mxu1 %vm54248_vm3, %v58980_v54 }
 0x78f   :  { %50408 = vmatprep.subr.mxu1 %v58980_v54 }
 0x791   :  { %50406 = vmatmul.mubr.f32.vlgmr.msra.gmra.mrb[48].mxu1 %v18963_v8 }
 0x792   :  { %50409 = vmatpush3.msra.mxu1 %v18898_v42  ;;  %50410 = vmatprep.mubr.msk.f32.mxu1 %vm54248_vm3, %v58980_v54 }
 0x793   :  { %50418 = vmatprep.subr.mxu1 %v58980_v54 }
 0x795   :  { %50411 = vmatmul.mubr.f32.vlgmr.msra.gmra.mrb[50].mxu1 %v18963_v8 }
 0x796   :  { %50419 = vmatpush3.msra.mxu1 %v19427_v20  ;;  %50420 = vmatprep.mubr.msk.f32.mxu1 %vm54248_vm3, %v58980_v54 }
 0x797   :  { %50428 = vmatprep.subr.mxu1 %v58980_v54 }
 0x7b9   :  { %v16188_v22 = vpop.f32.mrb[36].mxu0 }
 0x7ba   :  { %v19344_v32 = vsel %vm11581_vm4, %v16188_v22, 0  ;;  %v50202_v2 = vpop.f32.mrb[37].mxu0  ;;  %v18893_v22 = vld [vmem:[%s58978_s4 + $0x38] sm:$0xff] }
 0x7bb   :  { %v19412_v25 = vand.u32 4294901760, %v19344_v32 }
 0x7bd   :  { %v19413_v50 = vsub.f32 %v19344_v32, %v19412_v25  ;;  %v16637_v17 = vpop.f32.mrb[34].mxu1  ;;  %50421 = vmatmul.mubr.f32.vlgmr.msra.gmra.mrb[52].mxu1 %v19412_v25 }
 0x7be   :  { %v19793_v29 = vsel %vm11581_vm4, %v16637_v17, 0  ;;  %v50232_v31 = vpop.f32.mrb[35].mxu1  ;;  %50429 = vmatpush3.msra.mxu1 %v55995_v61  ;;  %50430 = vmatprep.mubr.msk.f32.mxu1 %vm54248_vm3, %v58980_v54 }
 0x7bf   :  { %v19414_v38 = vand.u32 4294901760, %v19413_v50  ;;  %v19861_v40 = vand.u32 4294901760, %v19793_v29  ;;  %50438 = vmatprep.subr.mxu1 %v58980_v54 }
 0x7c1   :  { %v19415_v27 = vsub.f32 %v19413_v50, %v19414_v38  ;;  %50431 = vmatmul.mubr.f32.vlgmr.msra.gmra.mrb[54].mxu1 %v19414_v38  ;;  %v19862_v43 = vsub.f32 %v19793_v29, %v19861_v40  ;;  %v56167_v29 = vand.u32 4294901760, %v18893_v22 }
 0x7c2   :  { %50439 = vmatpush3.msra.mxu1 %v55995_v61  ;;  %50440 = vmatprep.mubr.msk.f32.mxu1 %vm54248_vm3, %v58980_v54  ;;  %v56103_v61 = vand.u32 4294901760, %v18891_v56 }
 0x7c3   :  { %v19416_v19 = vand.u32 4294901760, %v19415_v27  ;;  %50448 = vmatprep.subr.mxu1 %v58980_v54  ;;  %v19863_v44 = vand.u32 4294901760, %v19862_v43 }
 0x7c4   :  { %v56110_v1 = vsub.f32 %v18891_v56, %v56103_v61 }
 0x7c5   :  { %50416 = vmatmul.mubr.f32.vlgmr.msra.gmra.mrb[44].mxu0 %v19416_v19  ;;  %50441 = vmatmul.mubr.f32.vlgmr.msra.gmra.mrb[56].mxu1 %v19412_v25  ;;  %v19864_v46 = vsub.f32 %v19862_v43, %v19863_v44 }
 0x7c6   :  { %50424 = vmatpush3.msra.mxu0 %v56008_v12  ;;  %50425 = vmatprep.mubr.msk.f32.mxu0 %vm54248_vm3, %v58980_v54  ;;  %v21221_v9 = vand.u32 4294901760, %v56110_v1  ;;  %v21592_v12 = vand.u32 4294901760, %v18892_v0 }
 0x7c7   :  { %50449 = vmatpush3.msra.mxu1 %v19876_v18  ;;  %50450 = vmatprep.mubr.msk.f32.mxu1 %vm54248_vm3, %v58980_v54  ;;  %v19865_v10 = vand.u32 4294901760, %v19864_v46 }
 0x7c8   :  { %50433 = vmatprep.subr.mxu0 %v58980_v54  ;;  %50458 = vmatprep.subr.mxu1 %v58980_v54  ;;  %v21222_v5 = vsub.f32 %v56110_v1, %v21221_v9 }
 0x7c9   :  { %50426 = vmatmul.mubr.f32.vlgmr.msra.gmra.mrb[46].mxu0 %v19413_v50  ;;  %50451 = vmatmul.mubr.f32.vlgmr.msra.gmra.mrb[58].mxu1 %v19861_v40 }
 0x7ca   :  { %50434 = vmatpush3.msra.mxu0 %v19425_v15  ;;  %50435 = vmatprep.mubr.msk.f32.mxu0 %vm54248_vm3, %v58980_v54  ;;  %v21223_v45 = vand.u32 4294901760, %v21222_v5  ;;  %v56154_v15 = vsub.f32 %v18892_v0, %v21592_v12 }
 0x7cb   :  { %50459 = vmatpush3.msra.mxu1 %v19796_v39  ;;  %50460 = vmatprep.mubr.msk.f32.mxu1 %vm54248_vm3, %v58980_v54 }
 0x7cc   :  { %50443 = vmatprep.subr.mxu0 %v58980_v54  ;;  %50468 = vmatprep.subr.mxu1 %v58980_v54 }
 0x7cd   :  { %50436 = vmatmul.mubr.f32.vlgmr.msra.gmra.mrb[48].mxu0 %v19412_v25  ;;  %50461 = vmatmul.mubr.f32.vlgmr.msra.gmra.mrb[60].mxu1 %v19863_v44 }
 0x7ce   :  { %50444 = vmatpush3.msra.mxu0 %v19796_v39  ;;  %50445 = vmatprep.mubr.msk.f32.mxu0 %vm54248_vm3, %v58980_v54 }
 0x7cf   :  { %50469 = vmatpush3.msra.mxu1 %v19796_v39  ;;  %50470 = vmatprep.mubr.msk.f32.mxu1 %vm54248_vm3, %v58980_v54 }
 0x7d0   :  { %50453 = vmatprep.subr.mxu0 %v58980_v54  ;;  %50478 = vmatprep.subr.mxu1 %v58980_v54 }
 0x7d1   :  { %50446 = vmatmul.mubr.f32.vlgmr.msra.gmra.mrb[50].mxu0 %v19865_v10  ;;  %50471 = vmatmul.mubr.f32.vlgmr.msra.gmra.mrb[62].mxu1 %v19861_v40 }
 0x7d2   :  { %50454 = vmatpush3.msra.mxu0 %v56028_v6  ;;  %50455 = vmatprep.mubr.msk.f32.mxu0 %vm54248_vm3, %v58980_v54  ;;  %v21670_v6 = vand.u32 4294901760, %v56154_v15 }
 0x7d3   :  { %50463 = vmatprep.subr.mxu0 %v58980_v54  ;;  %50479 = vmatpush3.msra.mxu1 %v20325_v51 }
 0x7d4   :  { %50480 = vmatprep.mubr.msk.f32.mxu1 %vm54248_vm3, %v58980_v54  ;;  %50488 = vmatprep.subr.mxu1 %v58980_v54  ;;  %v21671_v17 = vsub.f32 %v56154_v15, %v21670_v6 }
 0x7d5   :  { %50456 = vmatmul.mubr.f32.vlgmr.msra.gmra.mrb[52].mxu0 %v19862_v43 }
 0x7d6   :  { %50464 = vmatpush3.msra.mxu0 %v19874_v41  ;;  %50465 = vmatprep.mubr.msk.f32.mxu0 %vm54248_vm3, %v58980_v54  ;;  %v21672_v55 = vand.u32 4294901760, %v21671_v17 }
 0x7d7   :  { %50473 = vmatprep.subr.mxu0 %v58980_v54 }
 0x7d9   :  { %50466 = vmatmul.mubr.f32.vlgmr.msra.gmra.mrb[54].mxu0 %v19861_v40 }
 0x7da   :  { %50474 = vmatpush3.msra.mxu0 %v56041_v48  ;;  %50475 = vmatprep.mubr.msk.f32.mxu0 %vm54248_vm3, %v58980_v54 }
 0x7db   :  { %50483 = vmatprep.subr.mxu0 %v58980_v54 }
 0x7e5   :  { %v17086_v23 = vpop.f32.mrb[38].mxu0 }
 0x7e6   :  { %v20242_v28 = vsel %vm11581_vm4, %v17086_v23, 0  ;;  %v50262_v59 = vpop.f32.mrb[39].mxu0 }
 0x7e7   :  { %v20310_v13 = vand.u32 4294901760, %v20242_v28 }
 0x7e9   :  { %v20311_v58 = vsub.f32 %v20242_v28, %v20310_v13  ;;  %v17535_v7 = vpop.f32.mrb[36].mxu1  ;;  %50481 = vmatmul.mubr.f32.vlgmr.msra.gmra.mrb[64].mxu1 %v20310_v13 }
 0x7ea   :  { %v20691_v47 = vsel %vm11581_vm4, %v17535_v7, 0  ;;  %v50292_v57 = vpop.f32.mrb[37].mxu1  ;;  %50489 = vmatpush3.msra.mxu1 %v56041_v48  ;;  %50490 = vmatprep.mubr.msk.f32.mxu1 %vm54248_vm3, %v58980_v54 }
 0x7eb   :  { %v20312_v33 = vand.u32 4294901760, %v20311_v58  ;;  %v20759_v42 = vand.u32 4294901760, %v20691_v47  ;;  %50498 = vmatprep.subr.mxu1 %v58980_v54 }
 0x7ed   :  { %v20313_v24 = vsub.f32 %v20311_v58, %v20312_v33  ;;  %50491 = vmatmul.mubr.f32.vlgmr.msra.gmra.mrb[66].mxu1 %v20312_v33  ;;  %v20760_v62 = vsub.f32 %v20691_v47, %v20759_v42 }
 0x7ee   :  { %50499 = vmatpush3.msra.mxu1 %v56041_v48  ;;  %50500 = vmatprep.mubr.msk.f32.mxu1 %vm54248_vm3, %v58980_v54  ;;  %v56174_v48 = vsub.f32 %v18893_v22, %v56167_v29 }
 0x7ef   :  { %v20314_v26 = vand.u32 4294901760, %v20313_v24  ;;  %50508 = vmatprep.subr.mxu1 %v58980_v54  ;;  %v20761_v8 = vand.u32 4294901760, %v20760_v62 }
 0x7f0   :  { %v22119_v19 = vand.u32 4294901760, %v56174_v48 }
 0x7f1   :  { %50476 = vmatmul.mubr.f32.vlgmr.msra.gmra.mrb[56].mxu0 %v20314_v26  ;;  %50501 = vmatmul.mubr.f32.vlgmr.msra.gmra.mrb[68].mxu1 %v20310_v13  ;;  %v20762_v4 = vsub.f32 %v20760_v62, %v20761_v8 }
 0x7f2   :  { %50484 = vmatpush3.msra.mxu0 %v56048_v14  ;;  %50485 = vmatprep.mubr.msk.f32.mxu0 %vm54248_vm3, %v58980_v54  ;;  %v22120_v18 = vsub.f32 %v56174_v48, %v22119_v19 }
 0x7f3   :  { %50509 = vmatpush3.msra.mxu1 %v20774_v63  ;;  %50510 = vmatprep.mubr.msk.f32.mxu1 %vm54248_vm3, %v58980_v54  ;;  %v20763_v11 = vand.u32 4294901760, %v20762_v4 }
 0x7f4   :  { %50493 = vmatprep.subr.mxu0 %v58980_v54  ;;  %50518 = vmatprep.subr.mxu1 %v58980_v54  ;;  %v22121_v44 = vand.u32 4294901760, %v22120_v18 }
 0x7f5   :  { %50486 = vmatmul.mubr.f32.vlgmr.msra.gmra.mrb[58].mxu0 %v20311_v58  ;;  %50511 = vmatmul.mubr.f32.vlgmr.msra.gmra.mrb[70].mxu1 %v20759_v42 }
 0x7f6   :  { %50494 = vmatpush3.msra.mxu0 %v20323_v30  ;;  %50495 = vmatprep.mubr.msk.f32.mxu0 %vm54248_vm3, %v58980_v54 }
 0x7f7   :  { %50519 = vmatpush3.msra.mxu1 %v20694_v53  ;;  %50520 = vmatprep.mubr.msk.f32.mxu1 %vm54248_vm3, %v58980_v54 }
 0x7f8   :  { %50503 = vmatprep.subr.mxu0 %v58980_v54  ;;  %50528 = vmatprep.subr.mxu1 %v58980_v54 }
 0x7f9   :  { %50496 = vmatmul.mubr.f32.vlgmr.msra.gmra.mrb[60].mxu0 %v20310_v13  ;;  %50521 = vmatmul.mubr.f32.vlgmr.msra.gmra.mrb[72].mxu1 %v20761_v8 }
 0x7fa   :  { %50504 = vmatpush3.msra.mxu0 %v20694_v53  ;;  %50505 = vmatprep.mubr.msk.f32.mxu0 %vm54248_vm3, %v58980_v54 }
 0x7fb   :  { %50529 = vmatpush3.msra.mxu1 %v20694_v53  ;;  %50530 = vmatprep.mubr.msk.f32.mxu1 %vm54248_vm3, %v58980_v54 }
 0x7fc   :  { %50513 = vmatprep.subr.mxu0 %v58980_v54  ;;  %50538 = vmatprep.subr.mxu1 %v58980_v54 }
 0x7fd   :  { %50506 = vmatmul.mubr.f32.vlgmr.msra.gmra.mrb[62].mxu0 %v20763_v11  ;;  %50531 = vmatmul.mubr.f32.vlgmr.msra.gmra.mrb[74].mxu1 %v20759_v42 }
 0x7fe   :  { %50514 = vmatpush3.msra.mxu0 %v56090_v21  ;;  %50515 = vmatprep.mubr.msk.f32.mxu0 %vm54248_vm3, %v58980_v54 }
 0x7ff   :  { %50523 = vmatprep.subr.mxu0 %v58980_v54  ;;  %50539 = vmatpush3.msra.mxu1 %v21223_v45 }
 0x800   :  { %50540 = vmatprep.mubr.msk.f32.mxu1 %vm54248_vm3, %v58980_v54  ;;  %50548 = vmatprep.subr.mxu1 %v58980_v54 }
 0x801   :  { %50516 = vmatmul.mubr.f32.vlgmr.msra.gmra.mrb[64].mxu0 %v20760_v62 }
 0x802   :  { %50524 = vmatpush3.msra.mxu0 %v20772_v3  ;;  %50525 = vmatprep.mubr.msk.f32.mxu0 %vm54248_vm3, %v58980_v54 }
 0x803   :  { %50533 = vmatprep.subr.mxu0 %v58980_v54 }
 0x805   :  { %50526 = vmatmul.mubr.f32.vlgmr.msra.gmra.mrb[66].mxu0 %v20759_v42 }
 0x806   :  { %50534 = vmatpush3.msra.mxu0 %v56103_v61  ;;  %50535 = vmatprep.mubr.msk.f32.mxu0 %vm54248_vm3, %v58980_v54 }
 0x807   :  { %50543 = vmatprep.subr.mxu0 %v58980_v54 }
 0x811   :  { %v17984_v16 = vpop.f32.mrb[40].mxu0 }
 0x812   :  { %v21140_v20 = vsel %vm11581_vm4, %v17984_v16, 0  ;;  %v50322_v34 = vpop.f32.mrb[41].mxu0 }
 0x813   :  { %v21208_v39 = vand.u32 4294901760, %v21140_v20 }
 0x815   :  { %v21209_v32 = vsub.f32 %v21140_v20, %v21208_v39  ;;  %v18433_v2 = vpop.f32.mrb[38].mxu1  ;;  %50541 = vmatmul.mubr.f32.vlgmr.msra.gmra.mrb[76].mxu1 %v21208_v39 }
 0x816   :  { %v21589_v25 = vsel %vm11581_vm4, %v18433_v2, 0  ;;  %v50352_v41 = vpop.f32.mrb[39].mxu1  ;;  %50549 = vmatpush3.msra.mxu1 %v56103_v61  ;;  %50550 = vmatprep.mubr.msk.f32.mxu1 %vm54248_vm3, %v58980_v54 }
 0x817   :  { %v21210_v37 = vand.u32 4294901760, %v21209_v32  ;;  %v21657_v50 = vand.u32 4294901760, %v21589_v25  ;;  %50558 = vmatprep.subr.mxu1 %v58980_v54 }
 0x819   :  { %v21211_v31 = vsub.f32 %v21209_v32, %v21210_v37  ;;  %50551 = vmatmul.mubr.f32.vlgmr.msra.gmra.mrb[78].mxu1 %v21210_v37  ;;  %v21658_v40 = vsub.f32 %v21589_v25, %v21657_v50 }
 0x81a   :  { %50559 = vmatpush3.msra.mxu1 %v56103_v61  ;;  %50560 = vmatprep.mubr.msk.f32.mxu1 %vm54248_vm3, %v58980_v54 }
 0x81b   :  { %v21212_v38 = vand.u32 4294901760, %v21211_v31  ;;  %50568 = vmatprep.subr.mxu1 %v58980_v54  ;;  %v21659_v27 = vand.u32 4294901760, %v21658_v40 }
 0x81d   :  { %50536 = vmatmul.mubr.f32.vlgmr.msra.gmra.mrb[68].mxu0 %v21212_v38  ;;  %50561 = vmatmul.mubr.f32.vlgmr.msra.gmra.mrb[80].mxu1 %v21208_v39  ;;  %v21660_v43 = vsub.f32 %v21658_v40, %v21659_v27 }
 0x81e   :  { %50544 = vmatpush3.msra.mxu0 %v56110_v1  ;;  %50545 = vmatprep.mubr.msk.f32.mxu0 %vm54248_vm3, %v58980_v54 }
 0x81f   :  { %50569 = vmatpush3.msra.mxu1 %v21672_v55  ;;  %50570 = vmatprep.mubr.msk.f32.mxu1 %vm54248_vm3, %v58980_v54  ;;  %v21661_v14 = vand.u32 4294901760, %v21660_v43 }
 0x820   :  { %50553 = vmatprep.subr.mxu0 %v58980_v54  ;;  %50578 = vmatprep.subr.mxu1 %v58980_v54 }
 0x821   :  { %50546 = vmatmul.mubr.f32.vlgmr.msra.gmra.mrb[70].mxu0 %v21209_v32  ;;  %50571 = vmatmul.mubr.f32.vlgmr.msra.gmra.mrb[82].mxu1 %v21657_v50 }
 0x822   :  { %50554 = vmatpush3.msra.mxu0 %v21221_v9  ;;  %50555 = vmatprep.mubr.msk.f32.mxu0 %vm54248_vm3, %v58980_v54 }
 0x823   :  { %50579 = vmatpush3.msra.mxu1 %v21592_v12  ;;  %50580 = vmatprep.mubr.msk.f32.mxu1 %vm54248_vm3, %v58980_v54 }
 0x824   :  { %50563 = vmatprep.subr.mxu0 %v58980_v54  ;;  %50588 = vmatprep.subr.mxu1 %v58980_v54 }
 0x825   :  { %50556 = vmatmul.mubr.f32.vlgmr.msra.gmra.mrb[72].mxu0 %v21208_v39  ;;  %50581 = vmatmul.mubr.f32.vlgmr.msra.gmra.mrb[84].mxu1 %v21659_v27 }
 0x826   :  { %50564 = vmatpush3.msra.mxu0 %v21592_v12  ;;  %50565 = vmatprep.mubr.msk.f32.mxu0 %vm54248_vm3, %v58980_v54 }
 0x827   :  { %50589 = vmatpush3.msra.mxu1 %v21592_v12  ;;  %50590 = vmatprep.mubr.msk.f32.mxu1 %vm54248_vm3, %v58980_v54 }
 0x828   :  { %50573 = vmatprep.subr.mxu0 %v58980_v54  ;;  %50598 = vmatprep.subr.mxu1 %v58980_v54 }
 0x829   :  { %50566 = vmatmul.mubr.f32.vlgmr.msra.gmra.mrb[74].mxu0 %v21661_v14  ;;  %50591 = vmatmul.mubr.f32.vlgmr.msra.gmra.mrb[86].mxu1 %v21657_v50 }
 0x82a   :  { %50574 = vmatpush3.msra.mxu0 %v56154_v15  ;;  %50575 = vmatprep.mubr.msk.f32.mxu0 %vm54248_vm3, %v58980_v54 }
 0x82b   :  { %50583 = vmatprep.subr.mxu0 %v58980_v54  ;;  %50599 = vmatpush3.msra.mxu1 %v22121_v44 }
 0x82c   :  { %50600 = vmatprep.mubr.msk.f32.mxu1 %vm54248_vm3, %v58980_v54  ;;  %50608 = vmatprep.subr.mxu1 %v58980_v54 }
 0x82d   :  { %50576 = vmatmul.mubr.f32.vlgmr.msra.gmra.mrb[76].mxu0 %v21658_v40 }
 0x82e   :  { %50584 = vmatpush3.msra.mxu0 %v21670_v6  ;;  %50585 = vmatprep.mubr.msk.f32.mxu0 %vm54248_vm3, %v58980_v54 }
 0x82f   :  { %50593 = vmatprep.subr.mxu0 %v58980_v54 }
 0x831   :  { %50586 = vmatmul.mubr.f32.vlgmr.msra.gmra.mrb[78].mxu0 %v21657_v50 }
 0x832   :  { %50594 = vmatpush3.msra.mxu0 %v56167_v29  ;;  %50595 = vmatprep.mubr.msk.f32.mxu0 %vm54248_vm3, %v58980_v54 }
 0x833   :  { %50603 = vmatprep.subr.mxu0 %v58980_v54 }
 0x83d   :  { %v18882_v30 = vpop.f32.mrb[42].mxu0 }
 0x83e   :  { %v22038_v46 = vsel %vm11581_vm4, %v18882_v30, 0  ;;  %v50382_v49 = vpop.f32.mrb[43].mxu0 }
 0x83f   :  { %v22106_v10 = vand.u32 4294901760, %v22038_v46 }
 0x841   :  { %v22107_v51 = vsub.f32 %v22038_v46, %v22106_v10  ;;  %50601 = vmatmul.mubr.f32.vlgmr.msra.gmra.mrb[88].mxu1 %v22106_v10 }
 0x842   :  { %50609 = vmatpush3.msra.mxu1 %v56167_v29  ;;  %50610 = vmatprep.mubr.msk.f32.mxu1 %vm54248_vm3, %v58980_v54 }
 0x843   :  { %v22108_v52 = vand.u32 4294901760, %v22107_v51  ;;  %50618 = vmatprep.subr.mxu1 %v58980_v54 }
 0x845   :  { %v22109_v53 = vsub.f32 %v22107_v51, %v22108_v52  ;;  %50611 = vmatmul.mubr.f32.vlgmr.msra.gmra.mrb[90].mxu1 %v22108_v52 }
 0x846   :  { %50619 = vmatpush3.msra.mxu1 %v56167_v29  ;;  %50620 = vmatprep.mubr.msk.f32.mxu1 %vm54248_vm3, %v58980_v54 }
 0x847   :  { %v22110_v21 = vand.u32 4294901760, %v22109_v53 }
 0x849   :  { %50596 = vmatmul.mubr.f32.vlgmr.msra.gmra.mrb[80].mxu0 %v22110_v21  ;;  %50621 = vmatmul.mubr.f32.vlgmr.msra.gmra.mrb[92].mxu1 %v22106_v10 }
 0x84a   :  { %50604 = vmatpush3.msra.mxu0 %v56174_v48  ;;  %50605 = vmatprep.mubr.msk.f32.mxu0 %vm54248_vm3, %v58980_v54 }
 0x84b   :  { %50613 = vmatprep.subr.mxu0 %v58980_v54 }
 0x84d   :  { %50606 = vmatmul.mubr.f32.vlgmr.msra.gmra.mrb[82].mxu0 %v22107_v51 }
 0x84e   :  { %50614 = vmatpush3.msra.mxu0 %v22119_v19  ;;  %50615 = vmatprep.mubr.msk.f32.mxu0 %vm54248_vm3, %v58980_v54 }
 0x851   :  { %50616 = vmatmul.mubr.f32.vlgmr.msra.gmra.mrb[84].mxu0 %v22106_v10 }
 0x854   :  { %v18969_v23 = vpop.f32.mrb[40].mxu1 }
 0x855   :  { %v50387_v28 = vpop.f32.mrb[41].mxu1 }
 0x858   :  { %v19045_v59 = vpop.f32.mrb[42].mxu1 }
 0x859   :  { %v19046_v13 = vadd.f32 %v19045_v59, %v18969_v23  ;;  %v50392_v3 = vpop.f32.mrb[43].mxu1 }
 0x85c   :  { %v19119_v56 = vpop.f32.mrb[44].mxu1 }
 0x85d   :  { %v19120_v58 = vadd.f32 %v19119_v56, %v19046_v13  ;;  %v50397_v7 = vpop.f32.mrb[45].mxu1 }
 0x860   :  { %v19193_v47 = vpop.f32.mrb[46].mxu1 }
 0x861   :  { %v19194_v57 = vadd.f32 %v19193_v47, %v19120_v58  ;;  %v50402_v33 = vpop.f32.mrb[47].mxu1 }
 0x864   :  { %v19267_v42 = vpop.f32.mrb[48].mxu1 }
 0x865   :  { %v19268_v60 = vadd.f32 %v19267_v42, %v19194_v57  ;;  %v50407_v61 = vpop.f32.mrb[49].mxu1 }
 0x868   :  { %v19339_v24 = vpop.f32.mrb[50].mxu1 }
 0x869   :  { %v19340_v26 = vadd.f32 %v19339_v24, %v19268_v60  ;;  %v50412_v62 = vpop.f32.mrb[51].mxu1 }
 0x890   :  { %v19494_v63 = vpop.f32.mrb[52].mxu1 }
 0x891   :  { %v50422_v1 = vpop.f32.mrb[53].mxu1 }
 0x894   :  { %v19642_v8 = vpop.f32.mrb[54].mxu1 }
 0x895   :  { %v50432_v9 = vpop.f32.mrb[55].mxu1 }
 0x898   :  { %v19418_v4 = vpop.f32.mrb[44].mxu0  ;;  %v19788_v5 = vpop.f32.mrb[56].mxu1 }
 0x899   :  { %v19495_v11 = vadd.f32 %v19494_v63, %v19418_v4  ;;  %v50417_v45 = vpop.f32.mrb[45].mxu0  ;;  %v50442_v0 = vpop.f32.mrb[57].mxu1 }
 0x89c   :  { %v19568_v12 = vpop.f32.mrb[46].mxu0  ;;  %v19943_v15 = vpop.f32.mrb[58].mxu1 }
 0x89d   :  { %v19569_v16 = vadd.f32 %v19568_v12, %v19495_v11  ;;  %v50427_v20 = vpop.f32.mrb[47].mxu0  ;;  %v50452_v34 = vpop.f32.mrb[59].mxu1 }
 0x89f   :  { %v19643_v39 = vadd.f32 %v19642_v8, %v19569_v16 }
 0x8a0   :  { %v19716_v6 = vpop.f32.mrb[48].mxu0  ;;  %v20091_v22 = vpop.f32.mrb[60].mxu1 }
 0x8a1   :  { %v19717_v32 = vadd.f32 %v19716_v6, %v19643_v39  ;;  %v50437_v2 = vpop.f32.mrb[49].mxu0  ;;  %v50462_v25 = vpop.f32.mrb[61].mxu1 }
 0x8a3   :  { %v19789_v41 = vadd.f32 %v19788_v5, %v19717_v32 }
 0x8a4   :  { %v19867_v37 = vpop.f32.mrb[50].mxu0  ;;  %v20237_v50 = vpop.f32.mrb[62].mxu1 }
 0x8a5   :  { %v19944_v17 = vadd.f32 %v19943_v15, %v19867_v37  ;;  %v50447_v29 = vpop.f32.mrb[51].mxu0  ;;  %v50472_v31 = vpop.f32.mrb[63].mxu1 }
 0x8a8   :  { %v20017_v38 = vpop.f32.mrb[52].mxu0 }
 0x8a9   :  { %v20018_v40 = vadd.f32 %v20017_v38, %v19944_v17  ;;  %v50457_v55 = vpop.f32.mrb[53].mxu0 }
 0x8ab   :  { %v20092_v48 = vadd.f32 %v20091_v22, %v20018_v40 }
 0x8ac   :  { %v20165_v27 = vpop.f32.mrb[54].mxu0 }
 0x8ad   :  { %v20166_v19 = vadd.f32 %v20165_v27, %v20092_v48  ;;  %v50467_v43 = vpop.f32.mrb[55].mxu0 }
 0x8af   :  { %v20238_v18 = vadd.f32 %v20237_v50, %v20166_v19 }
 0x8b1   :  { %v22486_v14 = vadd.f32 %v20238_v18, %v19340_v26 }
 0x8bc   :  { %v20392_v44 = vpop.f32.mrb[64].mxu1 }
 0x8bd   :  { %v50482_v30 = vpop.f32.mrb[65].mxu1 }
 0x8c0   :  { %v20540_v46 = vpop.f32.mrb[66].mxu1 }
 0x8c1   :  { %v50492_v49 = vpop.f32.mrb[67].mxu1 }
 0x8c4   :  { %v20316_v10 = vpop.f32.mrb[56].mxu0  ;;  %v20686_v51 = vpop.f32.mrb[68].mxu1 }
 0x8c5   :  { %v20393_v52 = vadd.f32 %v20392_v44, %v20316_v10  ;;  %v50477_v53 = vpop.f32.mrb[57].mxu0  ;;  %v50502_v21 = vpop.f32.mrb[69].mxu1 }
 0x8c8   :  { %v20466_v23 = vpop.f32.mrb[58].mxu0  ;;  %v20841_v28 = vpop.f32.mrb[70].mxu1 }
 0x8c9   :  { %v20467_v59 = vadd.f32 %v20466_v23, %v20393_v52  ;;  %v50487_v13 = vpop.f32.mrb[59].mxu0  ;;  %v50512_v3 = vpop.f32.mrb[71].mxu1 }
 0x8cb   :  { %v20541_v56 = vadd.f32 %v20540_v46, %v20467_v59  ;;  %v47554_v59 = vld [vmem:[%s58975_s1 + $0x4c] ss:$0 sm:$0xff] }
 0x8cc   :  { %v20614_v58 = vpop.f32.mrb[60].mxu0  ;;  %v20989_v7 = vpop.f32.mrb[72].mxu1 }
 0x8cd   :  { %v20615_v47 = vadd.f32 %v20614_v58, %v20541_v56  ;;  %v50497_v57 = vpop.f32.mrb[61].mxu0  ;;  %v50522_v33 = vpop.f32.mrb[73].mxu1 }
 0x8cf   :  { %v20687_v42 = vadd.f32 %v20686_v51, %v20615_v47 }
 0x8d0   :  { %v20765_v60 = vpop.f32.mrb[62].mxu0  ;;  %v21135_v61 = vpop.f32.mrb[74].mxu1 }
 0x8d1   :  { %v22487_v24 = vadd.f32 %v20687_v42, %v19789_v41  ;;  %v20842_v26 = vadd.f32 %v20841_v28, %v20765_v60  ;;  %v50507_v62 = vpop.f32.mrb[63].mxu0  ;;  %v50532_v63 = vpop.f32.mrb[75].mxu1 }
 0x8d4   :  { %v20915_v1 = vpop.f32.mrb[64].mxu0 }
 0x8d5   :  { %v20916_v8 = vadd.f32 %v20915_v1, %v20842_v26  ;;  %v50517_v9 = vpop.f32.mrb[65].mxu0 }
 0x8d7   :  { %v20990_v4 = vadd.f32 %v20989_v7, %v20916_v8 }
 0x8d8   :  { %v21063_v5 = vpop.f32.mrb[66].mxu0 }
 0x8d9   :  { %v21064_v11 = vadd.f32 %v21063_v5, %v20990_v4  ;;  %v50527_v45 = vpop.f32.mrb[67].mxu0 }
 0x8db   :  { %v21136_v0 = vadd.f32 %v21135_v61, %v21064_v11 }
 0x8dd   :  { %v22488_v12 = vadd.f32 %v22486_v14, %v21136_v0 }
 0x8e8   :  { %v21290_v15 = vpop.f32.mrb[76].mxu1 }
 0x8e9   :  { %v50542_v16 = vpop.f32.mrb[77].mxu1 }
 0x8ec   :  { %v21438_v20 = vpop.f32.mrb[78].mxu1 }
 0x8ed   :  { %v50552_v34 = vpop.f32.mrb[79].mxu1 }
 0x8f0   :  { %v21214_v39 = vpop.f32.mrb[68].mxu0  ;;  %v21584_v6 = vpop.f32.mrb[80].mxu1 }
 0x8f1   :  { %v21291_v22 = vadd.f32 %v21290_v15, %v21214_v39  ;;  %v50537_v32 = vpop.f32.mrb[69].mxu0  ;;  %v50562_v2 = vpop.f32.mrb[81].mxu1 }
 0x8f2   :  { %v547_v2 = vld [vmem:[%s58975_s1 + $0x50] sm:$0xff] }
 0x8f4   :  { %v21364_v25 = vpop.f32.mrb[70].mxu0  ;;  %v21739_v41 = vpop.f32.mrb[82].mxu1 }
 0x8f5   :  { %v21365_v37 = vadd.f32 %v21364_v25, %v21291_v22  ;;  %v50547_v50 = vpop.f32.mrb[71].mxu0  ;;  %v50572_v17 = vpop.f32.mrb[83].mxu1  ;;  %v548_v25 = vld [vmem:[%s58975_s1 + $0x58] sm:$0xff] }
 0x8f6   :  { %v22552_v50 = vand.u32 4294901760, %v548_v25  ;;  %v550_v17 = vld [vmem:[%s58975_s1 + $0x68] sm:$0xff] }
 0x8f7   :  { %v21439_v29 = vadd.f32 %v21438_v20, %v21365_v37  ;;  %v22549_v37 = vand.u32 4294901760, %v547_v2 }
 0x8f8   :  { %v21512_v31 = vpop.f32.mrb[72].mxu0  ;;  %v21887_v38 = vpop.f32.mrb[84].mxu1 }
 0x8f9   :  { %v21513_v40 = vadd.f32 %v21512_v31, %v21439_v29  ;;  %v50557_v55 = vpop.f32.mrb[73].mxu0  ;;  %v50582_v48 = vpop.f32.mrb[85].mxu1  ;;  %v22558_v31 = vand.u32 4294901760, %v550_v17 }
 0x8fa   :  { %v22639_v55 = vsub.f32 %v547_v2, %v22549_v37  ;;  %v22646_v48 = vsub.f32 %v548_v25, %v22552_v50 }
 0x8fb   :  { %v21585_v27 = vadd.f32 %v21584_v6, %v21513_v40 }
 0x8fc   :  { %v21663_v19 = vpop.f32.mrb[74].mxu0  ;;  %v22033_v43 = vpop.f32.mrb[86].mxu1 }
 0x8fd   :  { %v22489_v18 = vadd.f32 %v22487_v24, %v21585_v27  ;;  %v21740_v14 = vadd.f32 %v21739_v41, %v21663_v19  ;;  %v50567_v44 = vpop.f32.mrb[75].mxu0  ;;  %v50592_v30 = vpop.f32.mrb[87].mxu1  ;;  %v549_v41 = vld [vmem:[%s58975_s1 + $0x60] sm:$0xff]  ;;  %v22640_v27 = vand.u32 4294901760, %v22639_v55  ;;  %v22647_v19 = vand.u32 4294901760, %v22646_v48 }
 0x8fe   :  { %v22555_v29 = vand.u32 4294901760, %v549_v41  ;;  %v22660_v44 = vsub.f32 %v550_v17, %v22558_v31 }
 0x900   :  { %v21813_v46 = vpop.f32.mrb[76].mxu0  ;;  %v56266_v40 = vpack.c.bf16 %v22558_v31, %v22555_v29 }
 0x901   :  { %v21814_v49 = vadd.f32 %v21813_v46, %v21740_v14  ;;  %v50577_v10 = vpop.f32.mrb[77].mxu0  ;;  %v22653_v14 = vsub.f32 %v549_v41, %v22555_v29 }
 0x902   :  { %v22661_v10 = vand.u32 4294901760, %v22660_v44 }
 0x903   :  { %v21888_v51 = vadd.f32 %v21887_v38, %v21814_v49  ;;  %v56264_v38 = vpack.c.bf16 %v22552_v50, %v22549_v37  ;;  %v22654_v49 = vand.u32 4294901760, %v22653_v14 }
 0x904   :  { %v21961_v52 = vpop.f32.mrb[78].mxu0 }
 0x905   :  { %v21962_v53 = vadd.f32 %v21961_v52, %v21888_v51  ;;  %v50587_v21 = vpop.f32.mrb[79].mxu0  ;;  %52706 = vmatprep.subr.bf16.mxu0 %v56264_v38  ;;  %v22655_v52 = vsub.f32 %v22653_v14, %v22654_v49 }
 0x906   :  { %52708 = vmatpush3.bf16.msra.mxu0 %v56264_v38 }
 0x907   :  { %v22034_v23 = vadd.f32 %v22033_v43, %v21962_v53  ;;  %52710 = vmatprep.subr.bf16.mxu0 %v56266_v40  ;;  %v22641_v43 = vsub.f32 %v22639_v55, %v22640_v27  ;;  %v22662_v53 = vsub.f32 %v22660_v44, %v22661_v10  ;;  %v22656_v21 = vand.u32 4294901760, %v22655_v52 }
 0x909   :  { %v22490_v28 = vadd.f32 %v22488_v12, %v22034_v23  ;;  %v22642_v30 = vand.u32 4294901760, %v22641_v43  ;;  %v22663_v23 = vand.u32 4294901760, %v22662_v53  ;;  %v560_v43 = vld [vmem:[%s58975_s1 + $0xb8] sm:$0xff] }
 0x90a   :  { %52712 = vmatpush3.bf16.msra.mxu0 %v56266_v40 }
 0x90b   :  { %v22492_v13 = vadd.f32 %v54299_v35, %v22490_v28  ;;  %v56275_v28 = vpack.c.bf16 %v22663_v23, %v22656_v21 }
 0x90d   :  { %v56231_v3 = vadd.f32 %v47554_v59, %v22492_v13  ;;  %v56279_v13 = vpack.c.bf16 %v22660_v44, %v22653_v14 }
 0x90f   :  { %v22500_v56 = vsel %vm567_vm2, %v56231_v3, 0.0 }
 0x910   :  { %22501 = vadd.xlane.f32.xlu0 %v22500_v56  ;;  %v56281_v56 = vpack.c.bf16 %v22647_v19, %v22640_v27 }
 0x914   :  { %v22188_v58 = vpop.f32.mrb[88].mxu1 }
 0x915   :  { %v50602_v7 = vpop.f32.mrb[89].mxu1 }
 0x916   :  { %v551_v7 = vld [vmem:[%s58975_s1 + $0x70] sm:$0xff] }
 0x918   :  { %v22336_v47 = vpop.f32.mrb[90].mxu1 }
 0x919   :  { %v50612_v57 = vpop.f32.mrb[91].mxu1 }
 0x91a   :  { %v553_v57 = vld [vmem:[%s58975_s1 + $0x80] sm:$0xff] }
 0x91c   :  { %v22112_v33 = vpop.f32.mrb[80].mxu0  ;;  %v22482_v42 = vpop.f32.mrb[92].mxu1 }
 0x91d   :  { %v22189_v60 = vadd.f32 %v22188_v58, %v22112_v33  ;;  %v50597_v61 = vpop.f32.mrb[81].mxu0  ;;  %v50622_v24 = vpop.f32.mrb[93].mxu1  ;;  %v56283_v58 = vpack.c.bf16 %v22661_v10, %v22654_v49  ;;  %v23083_v33 = vand.u32 4294901760, %v551_v7 }
 0x91e   :  { %v23089_v61 = vand.u32 4294901760, %v553_v57  ;;  %v555_v24 = vld [vmem:[%s58975_s1 + $0x90] sm:$0xff] }
 0x920   :  { %v22262_v26 = vpop.f32.mrb[82].mxu0 }
 0x921   :  { %v22263_v62 = vadd.f32 %v22262_v26, %v22189_v60  ;;  %v50607_v63 = vpop.f32.mrb[83].mxu0  ;;  %v554_v60 = vld [vmem:[%s58975_s1 + $0x88] sm:$0xff]  ;;  %v556_v26 = vld [vmem:[%s58975_s1 + $0x98] sm:$0xff] }
 0x922   :  { %v23095_v63 = vand.u32 4294901760, %v555_v24 }
 0x923   :  { %v22337_v1 = vadd.f32 %v22336_v47, %v22263_v62  ;;  %v552_v47 = vld [vmem:[%s58975_s1 + $0x78] sm:$0xff]  ;;  %v23092_v62 = vand.u32 4294901760, %v554_v60 }
 0x924   :  { %v22410_v35 = vpop.f32.mrb[84].mxu0 }
 0x925   :  { %v22411_v8 = vadd.f32 %v22410_v35, %v22337_v1  ;;  %v50617_v9 = vpop.f32.mrb[85].mxu0  ;;  %v23098_v1 = vand.u32 4294901760, %v556_v26 }
 0x927   :  { %v22483_v4 = vadd.f32 %v22482_v42, %v22411_v8  ;;  %v23086_v42 = vand.u32 4294901760, %v552_v47  ;;  %v56305_v8 = vsub.f32 %v551_v7, %v23083_v33 }
 0x929   :  { %v22491_v5 = vadd.f32 %v22489_v18, %v22483_v4  ;;  %v22648_v18 = vsub.f32 %v22646_v48, %v22647_v19  ;;  %v56303_v35 = vpack.c.bf16 %v23086_v42, %v23083_v33  ;;  %v56307_v9 = vsub.f32 %v552_v47, %v23086_v42  ;;  %v559_v19 = vld [vmem:[%s58975_s1 + $0xb0] sm:$0xff] }
 0x92a   :  { %v56309_v4 = vsub.f32 %v553_v57, %v23089_v61  ;;  %v23107_v7 = vand.u32 4294901760, %v559_v19  ;;  %v23110_v47 = vand.u32 4294901760, %v560_v43  ;;  %v562_v57 = vld [vmem:[%s58975_s1 + $0xc8] sm:$0xff] }
 0x92b   :  { %v22493_v11 = vadd.f32 %v54301_v36, %v22491_v5  ;;  %v22649_v46 = vand.u32 4294901760, %v22648_v18  ;;  %v557_v5 = vld [vmem:[%s58975_s1 + $0xa0] sm:$0xff] }
 0x92c   :  { %v23101_v25 = vand.u32 4294901760, %v557_v5 }
 0x92d   :  { %v56236_v45 = vadd.f32 %v47554_v59, %v22493_v11  ;;  %v56272_v51 = vpack.c.bf16 %v22649_v46, %v22642_v30  ;;  %v56277_v59 = vpack.c.bf16 %v22646_v48, %v22639_v55  ;;  %v558_v11 = vld [vmem:[%s58975_s1 + $0xa8] sm:$0xff]  ;;  %v561_v46 = vld [vmem:[%s58975_s1 + $0xc0] sm:$0xff] }
 0x92e   :  { %v23104_v41 = vand.u32 4294901760, %v558_v11  ;;  %v56350_v27 = vsub.f32 %v557_v5, %v23101_v25 }
 0x92f   :  { %v22503_v0 = vsel %vm567_vm2, %v56236_v45, 0.0  ;;  %52714 = vmatprep.subr.bf16.mxu0 %v56272_v51 }
 0x930   :  { %22504 = vadd.xlane.f32.xlu1 %v22503_v0  ;;  %v56317_v0 = vpack.c.bf16 %v23092_v62, %v23089_v61  ;;  %v56348_v48 = vpack.c.bf16 %v23104_v41, %v23101_v25  ;;  %v23228_v52 = vand.u32 4294901760, %v56350_v27  ;;  %v56365_v53 = vsub.f32 %v558_v11, %v23104_v41 }
 0x931   :  { %v23113_v61 = vand.u32 4294901760, %v561_v46 }
 0x932   :  { %v23229_v42 = vsub.f32 %v56350_v27, %v23228_v52 }
 0x933   :  { %v56383_v5 = vsub.f32 %v561_v46, %v23113_v61 }
 0x934   :  { %v23230_v25 = vand.u32 4294901760, %v23229_v42 }
 0x99d   :  { %v22502_v12 = vpop.xlane.xlu0 %22501 }
 0x99e   :  { %v22506_v15 = vmul.f32 0.03125, %v22502_v12  ;;  %v56319_v12 = vsub.f32 %v554_v60, %v23092_v62  ;;  %v23235_v60 = vand.u32 4294901760, %v56365_v53  ;;  %v56378_v62 = vsub.f32 %v560_v43, %v23110_v47 }
 0x9a0   :  { %v56241_v16 = vsub.f32 %v56231_v3, %v22506_v15  ;;  %v56321_v15 = vpack.c.bf16 %v23098_v1, %v23095_v63 }
 0x9a2   :  { %v22510_v20 = vmul.f32 %v56241_v16, %v56241_v16 }
 0x9a4   :  { %v22512_v34 = vsel %vm567_vm2, %v22510_v20, 0.0  ;;  %v56323_v20 = vsub.f32 %v555_v24, %v23095_v63  ;;  %v56374_v24 = vpack.c.bf16 %v23110_v47, %v23107_v7  ;;  %v23236_v63 = vsub.f32 %v56365_v53, %v23235_v60 }
 0x9a5   :  { %22513 = vadd.xlane.f32.xlu0 %v22512_v34  ;;  %v23186_v34 = vand.u32 4294901760, %v56305_v8 }
 0x9a6   :  { %v23214_v2 = vand.u32 4294901760, %v56323_v20 }
 0x9a7   :  { %v23187_v37 = vsub.f32 %v56305_v8, %v23186_v34 }
 0x9a8   :  { %v23215_v55 = vsub.f32 %v56323_v20, %v23214_v2 }
 0x9a9   :  { %v23188_v18 = vand.u32 4294901760, %v23187_v37  ;;  %v23249_v37 = vand.u32 4294901760, %v56378_v62 }
 0x9aa   :  { %v23216_v10 = vand.u32 4294901760, %v23215_v55 }
 0x9ab   :  { %v23250_v43 = vsub.f32 %v56378_v62, %v23249_v37 }
 0x9bd   :  { %v22505_v39 = vpop.xlane.xlu1 %22504 }
 0x9be   :  { %v22507_v6 = vmul.f32 0.03125, %v22505_v39  ;;  %v23193_v39 = vand.u32 4294901760, %v56307_v9 }
 0x9c0   :  { %v56247_v36 = vsub.f32 %v56236_v45, %v22507_v6  ;;  %v23200_v6 = vand.u32 4294901760, %v56309_v4  ;;  %v23194_v50 = vsub.f32 %v56307_v9, %v23193_v39 }
 0x9c2   :  { %v22511_v22 = vmul.f32 %v56247_v36, %v56247_v36  ;;  %v23201_v17 = vsub.f32 %v56309_v4, %v23200_v6  ;;  %v23195_v14 = vand.u32 4294901760, %v23194_v50  ;;  %v23237_v50 = vand.u32 4294901760, %v23236_v63 }
 0x9c4   :  { %v22515_v32 = vsel %vm567_vm2, %v22511_v22, 0.0  ;;  %v56328_v22 = vsub.f32 %v556_v26, %v23098_v1  ;;  %v23202_v44 = vand.u32 4294901760, %v23201_v17  ;;  %v52785_v21 = vpack.c.bf16 %v23195_v14, %v23188_v18 }
 0x9c5   :  { %22516 = vadd.xlane.f32.xlu1 %v22515_v32  ;;  %v23207_v32 = vand.u32 4294901760, %v56319_v12  ;;  %v56376_v26 = vsub.f32 %v559_v19, %v23107_v7  ;;  %v23116_v1 = vand.u32 4294901760, %v562_v57  ;;  %v52797_v14 = vpack.c.bf16 %v23237_v50, %v23230_v25 }
 0x9c6   :  { %v23221_v29 = vand.u32 4294901760, %v56328_v22  ;;  %52786 = vmatprep.subr.bf16.mxu1 %v52785_v21 }
 0x9c7   :  { %v23208_v31 = vsub.f32 %v56319_v12, %v23207_v32  ;;  %52788 = vmatpush3.bf16.msra.mxu1 %v52785_v21  ;;  %v23242_v41 = vand.u32 4294901760, %v56376_v26  ;;  %v56387_v17 = vpack.c.bf16 %v23116_v1, %v23113_v61  ;;  %v56390_v55 = vsub.f32 %v562_v57, %v23116_v1  ;;  %v47555_v61 = vld [vmem:[%s58975_s1 + $0x4a] ss:$0 sm:$0xff]  ;;  %v47556_v1 = vld [vmem:[%s58975_s1 + $0x4b] ss:$0 sm:$0xff] }
 0x9c8   :  { %v23222_v30 = vsub.f32 %v56328_v22, %v23221_v29 }
 0x9c9   :  { %v23209_v49 = vand.u32 4294901760, %v23208_v31  ;;  %v23256_v31 = vand.u32 4294901760, %v56383_v5  ;;  %v23243_v19 = vsub.f32 %v56376_v26, %v23242_v41  ;;  %v23263_v18 = vand.u32 4294901760, %v56390_v55 }
 0x9ca   :  { %v23223_v23 = vand.u32 4294901760, %v23222_v30  ;;  %v23251_v30 = vand.u32 4294901760, %v23250_v43 }
 0x9cb   :  { %v52789_v33 = vpack.c.bf16 %v23209_v49, %v23202_v44  ;;  %v23244_v44 = vand.u32 4294901760, %v23243_v19  ;;  %v23257_v46 = vsub.f32 %v56383_v5, %v23256_v31  ;;  %v23264_v49 = vsub.f32 %v56390_v55, %v23263_v18 }
 0x9cc   :  { %v52793_v11 = vpack.c.bf16 %v23223_v23, %v23216_v10 }
 0x9cd   :  { %52790 = vmatprep.subr.bf16.mxu1 %v52789_v33  ;;  %v52801_v21 = vpack.c.bf16 %v23251_v30, %v23244_v44  ;;  %v23258_v23 = vand.u32 4294901760, %v23257_v46  ;;  %v23265_v7 = vand.u32 4294901760, %v23264_v49 }
 0x9ce   :  { %52792 = vmatpush3.bf16.msra.mxu1 %v52789_v33 }
 0x9cf   :  { %52794 = vmatprep.subr.bf16.mxu1 %v52793_v11  ;;  %v52805_v33 = vpack.c.bf16 %v23265_v7, %v23258_v23 }
 0x9d2   :  { %52796 = vmatpush3.bf16.msra.mxu1 %v52793_v11 }
 0x9d3   :  { %52798 = vmatprep.subr.bf16.mxu1 %v52797_v14 }
 0x9d6   :  { %52800 = vmatpush3.bf16.msra.mxu1 %v52797_v14 }
 0x9d7   :  { %52802 = vmatprep.subr.bf16.mxu1 %v52801_v21 }
 0x9da   :  { %52804 = vmatpush3.bf16.msra.mxu1 %v52801_v21 }
 0x9db   :  { %52806 = vmatprep.subr.bf16.mxu1 %v52805_v33 }
 0x9de   :  { %52808 = vmatpush3.bf16.msra.mxu1 %v52805_v33 }
 0xa32   :  { %v22514_v10 = vpop.xlane.xlu0 %22513 }
 0xa33   :  { %v22518_v47 = vmul.f32 0.03125, %v22514_v10 }
 0xa35   :  { %v22520_v57 = vadd.f32 1e-05, %v22518_v47 }
 0xa37   :  { %54179 = vrsqrt.f32 %v22520_v57 }
 0xa41   :  { %v54180_v42 = vpop.eup %54179 }
 0xa42   :  { %v22524_v63 = vmul.f32 %v54180_v42, %v56241_v16 }
 0xa44   :  { %v22530_v11 = vmul.f32 %v47555_v61, %v22524_v63 }
 0xa46   :  { %v22536_v25 = vadd.f32 %v47556_v1, %v22530_v11 }
 0xa48   :  { %v22543_v50 = vsel %vm567_vm2, %v22536_v25, 0 }
 0xa49   :  { %v22617_v19 = vand.u32 4294901760, %v22543_v50 }
 0xa4b   :  { %v22618_v43 = vsub.f32 %v22543_v50, %v22617_v19 }
 0xa4d   :  { %v22619_v14 = vand.u32 4294901760, %v22618_v43 }
 0xa4f   :  { %v22620_v44 = vsub.f32 %v22618_v43, %v22619_v14 }
 0xa51   :  { %v22621_v30 = vand.u32 4294901760, %v22620_v44 }
 0xa52   :  { %v22517_v46 = vpop.xlane.xlu1 %22516 }
 0xa53   :  { %v22519_v49 = vmul.f32 0.03125, %v22517_v46  ;;  %50631 = vmatprep.mubr.f32.mxu0 %v22621_v30 }
 0xa55   :  { %v22521_v10 = vadd.f32 1e-05, %v22519_v49 }
 0xa57   :  { %54181 = vrsqrt.f32 %v22521_v10 }
 0xa61   :  { %v54182_v21 = vpop.eup %54181 }
 0xa62   :  { %v22525_v16 = vmul.f32 %v54182_v21, %v56247_v36  ;;  %v563_v36 = vld [vmem:[%s58975_s1 + $0xd0] sm:$0xff] }
 0xa64   :  { %v22531_v23 = vmul.f32 %v47555_v61, %v22525_v16 }
 0xa66   :  { %v22537_v7 = vadd.f32 %v47556_v1, %v22531_v23 }
 0xa68   :  { %v22546_v47 = vsel %vm567_vm2, %v22537_v7, 0 }
 0xa69   :  { %v22627_v57 = vand.u32 4294901760, %v22546_v47 }
 0xa6b   :  { %v22628_v33 = vsub.f32 %v22546_v47, %v22627_v57 }
 0xa6d   :  { %v22629_v42 = vand.u32 4294901760, %v22628_v33 }
 0xa6f   :  { %v22630_v63 = vsub.f32 %v22628_v33, %v22629_v42 }
 0xa71   :  { %v22631_v11 = vand.u32 4294901760, %v22630_v63 }
 0xa73   :  { %50632 = vmatmul.mubr.f32.vlgmr.msra.gmra.mrb[86].mxu0 %v22631_v11 }
 0xa74   :  { %52716 = vmatpush3.bf16.msra.mxu0 %v56272_v51  ;;  %50642 = vmatprep.mubr.f32.mxu0 %v22617_v19 }
 0xa75   :  { %52718 = vmatprep.subr.bf16.mxu0 %v56275_v28 }
 0xa78   :  { %52720 = vmatpush3.bf16.msra.mxu0 %v56275_v28 }
 0xa79   :  { %52722 = vmatprep.subr.bf16.mxu0 %v56277_v59 }
 0xa7b   :  { %50643 = vmatmul.mubr.f32.vlgmr.msra.gmra.mrb[86].mxu0 %v22627_v57 }
 0xa7c   :  { %52724 = vmatpush3.bf16.msra.mxu0 %v56277_v59  ;;  %50653 = vmatprep.mubr.f32.mxu0 %v22618_v43 }
 0xa7d   :  { %52726 = vmatprep.subr.bf16.mxu0 %v56279_v13 }
 0xa80   :  { %52728 = vmatpush3.bf16.msra.mxu0 %v56279_v13  ;;  %v565_v13 = vld [vmem:[%s58975_s1 + $0xe0] sm:$0xff] }
 0xa81   :  { %52730 = vmatprep.subr.bf16.mxu0 %v56264_v38  ;;  %v23125_v1 = vand.u32 4294901760, %v565_v13 }
 0xa83   :  { %50654 = vmatmul.mubr.f32.vlgmr.msra.gmra.mrb[86].mxu0 %v22628_v33  ;;  %v56470_v43 = vsub.f32 %v565_v13, %v23125_v1 }
 0xa84   :  { %52732 = vmatpush3.bf16.msra.mxu0 %v56264_v38  ;;  %50664 = vmatprep.mubr.f32.mxu0 %v22619_v14 }
 0xa85   :  { %52734 = vmatprep.subr.bf16.mxu0 %v56266_v40  ;;  %v23284_v46 = vand.u32 4294901760, %v56470_v43 }
 0xa87   :  { %v23285_v21 = vsub.f32 %v56470_v43, %v23284_v46 }
 0xa88   :  { %52736 = vmatpush3.bf16.msra.mxu0 %v56266_v40 }
 0xa89   :  { %52738 = vmatprep.subr.bf16.mxu0 %v56281_v56  ;;  %v23286_v23 = vand.u32 4294901760, %v23285_v21 }
 0xa8b   :  { %50665 = vmatmul.mubr.f32.vlgmr.msra.gmra.mrb[86].mxu0 %v22629_v42 }
 0xa8c   :  { %52740 = vmatpush3.bf16.msra.mxu0 %v56281_v56  ;;  %50675 = vmatprep.mubr.f32.mxu0 %v22617_v19  ;;  %v566_v56 = vld [vmem:[%s58975_s1 + $0xe8] sm:$0xff] }
 0xa8d   :  { %52742 = vmatprep.subr.bf16.mxu0 %v56283_v58  ;;  %v23128_v25 = vand.u32 4294901760, %v566_v56 }
 0xa8f   :  { %v56472_v14 = vsub.f32 %v566_v56, %v23128_v25  ;;  %v56487_v42 = vpack.c.bf16 %v23128_v25, %v23125_v1 }
 0xa90   :  { %52744 = vmatpush3.bf16.msra.mxu0 %v56283_v58 }
 0xa91   :  { %52746 = vmatprep.subr.bf16.mxu0 %v56264_v38  ;;  %v23291_v49 = vand.u32 4294901760, %v56472_v14  ;;  %v52845_v11 = vpack.c.bf16 %v56472_v14, %v56470_v43 }
 0xa93   :  { %50676 = vmatmul.mubr.f32.vlgmr.msra.gmra.mrb[86].mxu0 %v22627_v57  ;;  %v23292_v16 = vsub.f32 %v56472_v14, %v23291_v49 }
 0xa94   :  { %52748 = vmatpush3.bf16.msra.mxu0 %v56264_v38  ;;  %50686 = vmatprep.mubr.f32.mxu0 %v22617_v19  ;;  %v564_v38 = vld [vmem:[%s58975_s1 + $0xd8] sm:$0xff] }
 0xa95   :  { %52750 = vmatprep.subr.bf16.mxu0 %v56266_v40  ;;  %v23122_v51 = vand.u32 4294901760, %v564_v38  ;;  %v23293_v7 = vand.u32 4294901760, %v23292_v16 }
 0xa97   :  { %v56454_v59 = vsub.f32 %v564_v38, %v23122_v51  ;;  %v52813_v47 = vpack.c.bf16 %v23293_v7, %v23286_v23  ;;  %v52825_v23 = vpack.c.bf16 %v56328_v22, %v56323_v20 }
 0xa98   :  { %52752 = vmatpush3.bf16.msra.mxu0 %v56266_v40  ;;  %v23119_v40 = vand.u32 4294901760, %v563_v36 }
 0xa99   :  { %52754 = vmatprep.subr.bf16.mxu0 %v56303_v35  ;;  %v23277_v61 = vand.u32 4294901760, %v56454_v59 }
 0xa9a   :  { %v56452_v28 = vsub.f32 %v563_v36, %v23119_v40  ;;  %v56484_v33 = vpack.c.bf16 %v23122_v51, %v23119_v40  ;;  %v47557_v36 = vld [vmem:[%s58975_s1 + $0x4e] ss:$0 sm:$0xff] }
 0xa9b   :  { %50687 = vmatmul.mubr.f32.vlgmr.msra.gmra.mrb[86].mxu0 %v22627_v57  ;;  %v23278_v19 = vsub.f32 %v56454_v59, %v23277_v61  ;;  %v52817_v57 = vpack.c.bf16 %v56307_v9, %v56305_v8  ;;  %v52889_v8 = vpack.c.bf16 %v23221_v29, %v23214_v2  ;;  %v52893_v9 = vpack.c.bf16 %v23235_v60, %v23228_v52 }
 0xa9c   :  { %52756 = vmatpush3.bf16.msra.mxu0 %v56303_v35  ;;  %v23270_v58 = vand.u32 4294901760, %v56452_v28  ;;  %v52841_v63 = vpack.c.bf16 %v56454_v59, %v56452_v28 }
 0xa9d   :  { %52758 = vmatprep.subr.bf16.mxu0 %v56317_v0  ;;  %v23279_v30 = vand.u32 4294901760, %v23278_v19 }
 0xa9e   :  { %v23271_v50 = vsub.f32 %v56452_v28, %v23270_v58  ;;  %v52905_v20 = vpack.c.bf16 %v23277_v61, %v23270_v58 }
 0xaa0   :  { %52760 = vmatpush3.bf16.msra.mxu0 %v56317_v0  ;;  %v23272_v44 = vand.u32 4294901760, %v23271_v50 }
 0xaa1   :  { %52762 = vmatprep.subr.bf16.mxu0 %v56321_v15 }
 0xaa2   :  { %v52809_v10 = vpack.c.bf16 %v23279_v30, %v23272_v44  ;;  %v52821_v44 = vpack.c.bf16 %v56319_v12, %v56309_v4  ;;  %v52897_v4 = vpack.c.bf16 %v23249_v37, %v23242_v41  ;;  %v52901_v12 = vpack.c.bf16 %v23263_v18, %v23256_v31  ;;  %v47568_v31 = vld [vmem:[%s58976_s2 + $0xf8] sm:$0xff]  ;;  %v47561_v18 = vld [vmem:[%s58976_s2 + $0xc0] sm:$0xff] }
 0xaa3   :  { %v24031_v59 = vsel %vm567_vm2, %v47561_v18, 0 }
 0xaa4   :  { %52764 = vmatpush3.bf16.msra.mxu0 %v56321_v15  ;;  %52810 = vmatprep.subr.bf16.mxu1 %v52809_v10  ;;  %v56618_v58 = vand.u32 4294901760, %v24031_v59 }
 0xaa5   :  { %52766 = vmatprep.subr.bf16.mxu0 %v56348_v48  ;;  %52812 = vmatpush3.bf16.msra.mxu1 %v52809_v10 }
 0xaa6   :  { %52814 = vmatprep.subr.bf16.mxu1 %v52813_v47 }
 0xaa8   :  { %52768 = vmatpush3.bf16.msra.mxu0 %v56348_v48 }
 0xaa9   :  { %52770 = vmatprep.subr.bf16.mxu0 %v56374_v24  ;;  %52816 = vmatpush3.bf16.msra.mxu1 %v52813_v47 }
 0xaaa   :  { %52818 = vmatprep.subr.bf16.mxu1 %v52817_v57 }
 0xaac   :  { %52772 = vmatpush3.bf16.msra.mxu0 %v56374_v24 }
 0xaad   :  { %52774 = vmatprep.subr.bf16.mxu0 %v56387_v17 }
 0xab0   :  { %52776 = vmatpush3.bf16.msra.mxu0 %v56387_v17 }
 0xab1   :  { %52778 = vmatprep.subr.bf16.mxu0 %v56484_v33 }
 0xab4   :  { %52780 = vmatpush3.bf16.msra.mxu0 %v56484_v33 }
 0xab5   :  { %52782 = vmatprep.subr.bf16.mxu0 %v56487_v42 }
 0xab8   :  { %52784 = vmatpush3.bf16.msra.mxu0 %v56487_v42 }
 0xab9   :  { %50899 = vmatprep.subr.mxu0 %v58980_v54 }
 0xb6e   :  { %v50688_v38 = vpop.f32.mrb[86].mxu0 }
 0xb6f   :  { %v53248_v40 = vadd.f32 %v50688_v38, %v47557_v36  ;;  %v23066_v51 = vpop.f32.mrb[87].mxu0  ;;  %v52829_v38 = vpack.c.bf16 %v56365_v53, %v56350_v27 }
 0xb70   :  { %v53249_v13 = vadd.f32 %v47557_v36, %v23066_v51  ;;  %v47559_v51 = vld [vmem:[%s58975_s1 + $0xf0] ss:$0 sm:$0xff] }
 0xb71   :  { %v23077_v56 = vmax.f32 %v53248_v40, 0.0  ;;  %v52837_v40 = vpack.c.bf16 %v56390_v55, %v56383_v5  ;;  %v27177_v55 = vsel %vm567_vm2, %v47568_v31, 0 }
 0xb72   :  { %v23076_v1 = vmax.f32 %v53249_v13, 0.0  ;;  %v56615_v28 = vand.u32 4294901760, %v27177_v55 }
 0xb73   :  { %v56500_v25 = vand.u32 4294901760, %v23077_v56 }
 0xb74   :  { %v56502_v50 = vand.u32 4294901760, %v23076_v1 }
 0xb75   :  { %v23174_v19 = vsub.f32 %v23077_v56, %v56500_v25 }
 0xb76   :  { %v23164_v30 = vsub.f32 %v23076_v1, %v56502_v50  ;;  %50756 = vmatprep.mubr.f32.mxu1 %v56502_v50  ;;  %v47560_v1 = vld [vmem:[%s58975_s1 + $0xf1] ss:$0 sm:$0xff] }
 0xb77   :  { %v23175_v10 = vand.u32 4294901760, %v23174_v19  ;;  %50757 = vmatmul.mubr.f32.vlgmr.msra.gmra.mrb[94].mxu1 %v56500_v25 }
 0xb78   :  { %52820 = vmatpush3.bf16.msra.mxu1 %v52817_v57  ;;  %50791 = vmatprep.mubr.f32.mxu1 %v23164_v30  ;;  %v23165_v21 = vand.u32 4294901760, %v23164_v30  ;;  %v52833_v57 = vpack.c.bf16 %v56378_v62, %v56376_v26 }
 0xb79   :  { %v23176_v16 = vsub.f32 %v23174_v19, %v23175_v10  ;;  %52822 = vmatprep.subr.bf16.mxu1 %v52821_v44 }
 0xb7a   :  { %v23166_v7 = vsub.f32 %v23164_v30, %v23165_v21  ;;  %v24111_v30 = vsub.f32 %v24031_v59, %v56618_v58 }
 0xb7b   :  { %v23177_v36 = vand.u32 4294901760, %v23176_v16 }
 0xb7c   :  { %52824 = vmatpush3.bf16.msra.mxu1 %v52821_v44  ;;  %v23167_v47 = vand.u32 4294901760, %v23166_v7 }
 0xb7d   :  { %52826 = vmatprep.subr.bf16.mxu1 %v52825_v23 }
 0xb7e   :  { %50721 = vmatprep.mubr.f32.mxu0 %v23167_v47 }
 0xb7f   :  { %50722 = vmatmul.mubr.f32.vlgmr.msra.gmra.mrb[88].mxu0 %v23177_v36  ;;  %v24112_v36 = vand.u32 4294901760, %v24111_v30 }
 0xb80   :  { %52828 = vmatpush3.bf16.msra.mxu1 %v52825_v23  ;;  %50901 = vmatprep.mubr.msk.f32.mxu0 %vm54248_vm3, %v58980_v54 }
 0xb81   :  { %52830 = vmatprep.subr.bf16.mxu1 %v52829_v38  ;;  %50900 = vmatpush3.xpose.msra.mxu0 %v56618_v58 }
 0xb82   :  { %50904 = vmatprep.subr.mxu0 %v58980_v54 }
 0xb84   :  { %52832 = vmatpush3.bf16.msra.mxu1 %v52829_v38 }
 0xb85   :  { %52834 = vmatprep.subr.bf16.mxu1 %v52833_v57 }
 0xb88   :  { %52836 = vmatpush3.bf16.msra.mxu1 %v52833_v57 }
 0xb89   :  { %52838 = vmatprep.subr.bf16.mxu1 %v52837_v40 }
 0xb8c   :  { %52840 = vmatpush3.bf16.msra.mxu1 %v52837_v40 }
 0xb8d   :  { %52842 = vmatprep.subr.bf16.mxu1 %v52841_v63 }
 0xb90   :  { %52844 = vmatpush3.bf16.msra.mxu1 %v52841_v63  ;;  %v52881_v63 = vpack.c.bf16 %v23193_v39, %v23186_v34  ;;  %v52909_v34 = vpack.c.bf16 %v23291_v49, %v23284_v46 }
 0xb91   :  { %52846 = vmatprep.subr.bf16.mxu1 %v52845_v11 }
 0xb94   :  { %52848 = vmatpush3.bf16.msra.mxu1 %v52845_v11  ;;  %v52885_v11 = vpack.c.bf16 %v23207_v32, %v23200_v6 }
 0xb95   :  { %52850 = vmatprep.subr.bf16.mxu1 %v56303_v35 }
 0xb97   :  { %50792 = vmatmul.mubr.f32.vlgmr.msra.gmra.mrb[94].mxu1 %v23174_v19  ;;  %v27257_v19 = vsub.f32 %v27177_v55, %v56615_v28 }
 0xb98   :  { %52852 = vmatpush3.bf16.msra.mxu1 %v56303_v35  ;;  %50826 = vmatprep.mubr.f32.mxu1 %v23165_v21 }
 0xb99   :  { %52854 = vmatprep.subr.bf16.mxu1 %v56317_v0  ;;  %v27258_v23 = vand.u32 4294901760, %v27257_v19 }
 0xb9c   :  { %52856 = vmatpush3.bf16.msra.mxu1 %v56317_v0 }
 0xb9d   :  { %52858 = vmatprep.subr.bf16.mxu1 %v56321_v15 }
 0xba0   :  { %52860 = vmatpush3.bf16.msra.mxu1 %v56321_v15 }
 0xba1   :  { %52862 = vmatprep.subr.bf16.mxu1 %v56348_v48 }
 0xba4   :  { %52864 = vmatpush3.bf16.msra.mxu1 %v56348_v48 }
 0xba5   :  { %52866 = vmatprep.subr.bf16.mxu1 %v56374_v24 }
 0xba8   :  { %52868 = vmatpush3.bf16.msra.mxu1 %v56374_v24 }
 0xba9   :  { %52870 = vmatprep.subr.bf16.mxu1 %v56387_v17 }
 0xbac   :  { %52872 = vmatpush3.bf16.msra.mxu1 %v56387_v17 }
 0xbad   :  { %52874 = vmatprep.subr.bf16.mxu1 %v56484_v33 }
 0xbb0   :  { %52876 = vmatpush3.bf16.msra.mxu1 %v56484_v33 }
 0xbb1   :  { %52878 = vmatprep.subr.bf16.mxu1 %v56487_v42 }
 0xbb4   :  { %52880 = vmatpush3.bf16.msra.mxu1 %v56487_v42 }
 0xbb5   :  { %52882 = vmatprep.subr.bf16.mxu1 %v52881_v63 }
 0xbb7   :  { %50827 = vmatmul.mubr.f32.vlgmr.msra.gmra.mrb[94].mxu1 %v23175_v10 }
 0xbb8   :  { %52884 = vmatpush3.bf16.msra.mxu1 %v52881_v63  ;;  %50861 = vmatprep.mubr.f32.mxu1 %v56502_v50  ;;  %v27259_v63 = vsub.f32 %v27257_v19, %v27258_v23 }
 0xbb9   :  { %52886 = vmatprep.subr.bf16.mxu1 %v52885_v11 }
 0xbbc   :  { %52888 = vmatpush3.bf16.msra.mxu1 %v52885_v11 }
 0xbbd   :  { %52890 = vmatprep.subr.bf16.mxu1 %v52889_v8 }
 0xbc0   :  { %52892 = vmatpush3.bf16.msra.mxu1 %v52889_v8  ;;  %v24113_v8 = vsub.f32 %v24111_v30, %v24112_v36 }
 0xbc1   :  { %52894 = vmatprep.subr.bf16.mxu1 %v52893_v9 }
 0xbc4   :  { %52896 = vmatpush3.bf16.msra.mxu1 %v52893_v9 }
 0xbc5   :  { %52898 = vmatprep.subr.bf16.mxu1 %v52897_v4 }
 0xbc8   :  { %52900 = vmatpush3.bf16.msra.mxu1 %v52897_v4 }
 0xbc9   :  { %52902 = vmatprep.subr.bf16.mxu1 %v52901_v12 }
 0xbcc   :  { %52904 = vmatpush3.bf16.msra.mxu1 %v52901_v12 }
 0xbcd   :  { %52906 = vmatprep.subr.bf16.mxu1 %v52905_v20 }
 0xbd0   :  { %52908 = vmatpush3.bf16.msra.mxu1 %v52905_v20  ;;  %v27260_v20 = vand.u32 4294901760, %v27259_v63 }
 0xbd1   :  { %52910 = vmatprep.subr.bf16.mxu1 %v52909_v34 }
 0xbd4   :  { %52912 = vmatpush3.bf16.msra.mxu1 %v52909_v34 }
 0xbd5   :  { %52914 = vmatprep.subr.bf16.mxu1 %v56303_v35 }
 0xbd7   :  { %50862 = vmatmul.mubr.f32.vlgmr.msra.gmra.mrb[94].mxu1 %v56500_v25 }
 0xbd8   :  { %52916 = vmatpush3.bf16.msra.mxu1 %v56303_v35  ;;  %50896 = vmatprep.mubr.f32.mxu1 %v56502_v50 }
 0xbd9   :  { %52918 = vmatprep.subr.bf16.mxu1 %v56317_v0 }
 0xbdc   :  { %52920 = vmatpush3.bf16.msra.mxu1 %v56317_v0 }
 0xbdd   :  { %52922 = vmatprep.subr.bf16.mxu1 %v56321_v15 }
 0xbe0   :  { %52924 = vmatpush3.bf16.msra.mxu1 %v56321_v15  ;;  %v47558_v15 = vld [vmem:[%s58975_s1 + $0x4d] ss:$0 sm:$0xff] }
 0xbe1   :  { %52926 = vmatprep.subr.bf16.mxu1 %v56348_v48 }
 0xbe4   :  { %52928 = vmatpush3.bf16.msra.mxu1 %v56348_v48 }
 0xbe5   :  { %52930 = vmatprep.subr.bf16.mxu1 %v56374_v24 }
 0xbe8   :  { %52932 = vmatpush3.bf16.msra.mxu1 %v56374_v24 }
 0xbe9   :  { %52934 = vmatprep.subr.bf16.mxu1 %v56387_v17 }
 0xbec   :  { %52936 = vmatpush3.bf16.msra.mxu1 %v56387_v17 }
 0xbed   :  { %52938 = vmatprep.subr.bf16.mxu1 %v56484_v33 }
 0xbf0   :  { %52940 = vmatpush3.bf16.msra.mxu1 %v56484_v33 }
 0xbf1   :  { %52942 = vmatprep.subr.bf16.mxu1 %v56487_v42 }
 0xbf4   :  { %52944 = vmatpush3.bf16.msra.mxu1 %v56487_v42 }
 0xbf5   :  { %51109 = vmatprep.subr.mxu1 %v58980_v54 }
 0xbf7   :  { %50897 = vmatmul.mubr.f32.vlgmr.msra.gmra.mrb[94].mxu1 %v56500_v25 }
 0xbf8   :  { %51111 = vmatprep.mubr.msk.f32.mxu1 %vm54248_vm3, %v58980_v54 }
 0xbfd   :  { %51110 = vmatpush3.xpose.msra.mxu1 %v56615_v28 }
 0xbfe   :  { %51114 = vmatprep.subr.mxu1 %v58980_v54 }
 0xc52   :  { %v50723_v35 = vpop.f32.mrb[88].mxu0 }
 0xc53   :  { %v23169_v0 = vpop.f32.mrb[89].mxu0  ;;  %v23180_v39 = vadd.f32 %v50723_v35, %v47558_v15  ;;  %v24114_v35 = vand.u32 4294901760, %v24113_v8 }
 0xc54   :  { %v23170_v6 = vadd.f32 %v47558_v15, %v23169_v0  ;;  %v47570_v15 = vld [vmem:[%s58976_s2 + $0x108] sm:$0xff] }
 0xcca   :  { %v50898_v22 = vpop.f32.mrb[94].mxu1 }
 0xccb   :  { %v53251_v32 = vadd.f32 %v50898_v22, %v23180_v39  ;;  %v23756_v2 = vpop.f32.mrb[95].mxu1  ;;  %v47562_v39 = vld [vmem:[%s58976_s2 + $0xc8] sm:$0xff] }
 0xccc   :  { %v53253_v29 = vadd.f32 %v23756_v2, %v23170_v6  ;;  %v28075_v6 = vsel %vm567_vm2, %v47570_v15, 0  ;;  %v24483_v22 = vsel %vm567_vm2, %v47562_v39, 0 }
 0xccd   :  { %v56595_v48 = vadd.f32 %v53251_v32, %v56236_v45  ;;  %v56694_v32 = vand.u32 4294901760, %v28075_v6  ;;  %v56698_v2 = vand.u32 4294901760, %v24483_v22 }
 0xcce   :  { %v56598_v27 = vadd.f32 %v53253_v29, %v56231_v3 }
 0xccf   :  { %v23798_v52 = vsel %vm567_vm2, %v56595_v48, 0.0  ;;  %v28155_v29 = vsub.f32 %v28075_v6, %v56694_v32 }
 0xcd0   :  { %23799 = vadd.xlane.f32.xlu1 %v23798_v52  ;;  %v23795_v53 = vsel %vm567_vm2, %v56598_v27, 0.0  ;;  %v24563_v52 = vsub.f32 %v24483_v22, %v56698_v2  ;;  %v47578_v22 = vld [vmem:[%s58976_s2 + $0x148] sm:$0xff] }
 0xcd1   :  { %23796 = vadd.xlane.f32.xlu0 %v23795_v53  ;;  %v28156_v53 = vand.u32 4294901760, %v28155_v29 }
 0xd5d   :  { %v23800_v60 = vpop.xlane.xlu1 %23799 }
 0xd5e   :  { %v23802_v24 = vmul.f32 0.03125, %v23800_v60  ;;  %v23797_v26 = vpop.xlane.xlu0 %23796  ;;  %v24564_v60 = vand.u32 4294901760, %v24563_v52 }
 0xd5f   :  { %v23801_v62 = vmul.f32 0.03125, %v23797_v26 }
 0xd60   :  { %v23804_v5 = vsub.f32 %v56595_v48, %v23802_v24  ;;  %v28157_v24 = vsub.f32 %v28155_v29, %v28156_v53  ;;  %v24565_v26 = vsub.f32 %v24563_v52, %v24564_v60 }
 0xd61   :  { %v23803_v45 = vsub.f32 %v56598_v27, %v23801_v62 }
 0xd62   :  { %v23806_v41 = vmul.f32 %v23804_v5, %v23804_v5  ;;  %v28158_v62 = vand.u32 4294901760, %v28157_v24 }
 0xd63   :  { %v23805_v37 = vmul.f32 %v23803_v45, %v23803_v45 }
 0xd64   :  { %v23810_v3 = vsel %vm567_vm2, %v23806_v41, 0.0  ;;  %v47563_v41 = vld [vmem:[%s58976_s2 + $0xd0] sm:$0xff] }
 0xd65   :  { %23811 = vadd.xlane.f32.xlu1 %v23810_v3  ;;  %v23807_v17 = vsel %vm567_vm2, %v23805_v37, 0.0  ;;  %v24932_v3 = vsel %vm567_vm2, %v47563_v41, 0 }
 0xd66   :  { %23808 = vadd.xlane.f32.xlu0 %v23807_v17  ;;  %v56766_v31 = vand.u32 4294901760, %v24932_v3 }
 0xd68   :  { %v25012_v18 = vsub.f32 %v24932_v3, %v56766_v31  ;;  %v47580_v3 = vld [vmem:[%s58976_s2 + $0x158] sm:$0xff] }
 0xd6a   :  { %v25013_v59 = vand.u32 4294901760, %v25012_v18 }
 0xdf2   :  { %v23812_v61 = vpop.xlane.xlu1 %23811 }
 0xdf3   :  { %v23814_v43 = vmul.f32 0.03125, %v23812_v61  ;;  %v23809_v14 = vpop.xlane.xlu0 %23808  ;;  %v25014_v61 = vsub.f32 %v25012_v18, %v25013_v59 }
 0xdf4   :  { %v23813_v46 = vmul.f32 0.03125, %v23809_v14 }
 0xdf5   :  { %v23816_v49 = vadd.f32 1e-05, %v23814_v43  ;;  %v25015_v14 = vand.u32 4294901760, %v25014_v61 }
 0xdf6   :  { %v23815_v33 = vadd.f32 1e-05, %v23813_v46  ;;  %v47574_v46 = vld [vmem:[%s58976_s2 + $0x128] sm:$0xff] }
 0xdf7   :  { %54183 = vrsqrt.f32 %v23816_v49  ;;  %v47564_v49 = vld [vmem:[%s58976_s2 + $0xd8] sm:$0xff] }
 0xdf8   :  { %54185 = vrsqrt.f32 %v23815_v33  ;;  %v29871_v33 = vsel %vm567_vm2, %v47574_v46, 0 }
 0xe01   :  { %v54184_v42 = vpop.eup %54183 }
 0xe02   :  { %v54186_v13 = vpop.eup %54185  ;;  %v23820_v56 = vmul.f32 %v54184_v42, %v23804_v5  ;;  %v24566_v5 = vand.u32 4294901760, %v24565_v26  ;;  %v25381_v42 = vsel %vm567_vm2, %v47564_v49, 0 }
 0xe03   :  { %v23819_v25 = vmul.f32 %v54186_v13, %v23803_v45  ;;  %v47572_v45 = vld [vmem:[%s58976_s2 + $0x118] sm:$0xff]  ;;  %v56834_v13 = vand.u32 4294901760, %v25381_v42 }
 0xe04   :  { %v23826_v50 = vmul.f32 %v47559_v51, %v23820_v56  ;;  %v28973_v37 = vsel %vm567_vm2, %v47572_v45, 0 }
 0xe05   :  { %v23825_v44 = vmul.f32 %v47559_v51, %v23819_v25  ;;  %v56762_v17 = vand.u32 4294901760, %v28973_v37  ;;  %v56830_v51 = vand.u32 4294901760, %v29871_v33 }
 0xe06   :  { %v23832_v10 = vadd.f32 %v47560_v1, %v23826_v50 }
 0xe07   :  { %v23831_v21 = vadd.f32 %v47560_v1, %v23825_v44  ;;  %v29053_v55 = vsub.f32 %v28973_v37, %v56762_v17  ;;  %v29951_v56 = vsub.f32 %v29871_v33, %v56830_v51  ;;  %v25461_v1 = vsub.f32 %v25381_v42, %v56834_v13 }
 0xe08   :  { %v24480_v16 = vsel %vm567_vm2, %v23832_v10, 0 }
 0xe09   :  { %v56633_v7 = vand.u32 4294901760, %v24480_v16  ;;  %v24028_v47 = vsel %vm567_vm2, %v23831_v21, 0  ;;  %v29952_v25 = vand.u32 4294901760, %v29951_v56  ;;  %v25462_v50 = vand.u32 4294901760, %v25461_v1  ;;  %v47576_v21 = vld [vmem:[%s58976_s2 + $0x138] sm:$0xff] }
 0xe0a   :  { %v56636_v38 = vand.u32 4294901760, %v24028_v47 }
 0xe0b   :  { %v56639_v57 = vsub.f32 %v24480_v16, %v56633_v7  ;;  %v25463_v44 = vsub.f32 %v25461_v1, %v25462_v50  ;;  %v47565_v16 = vld [vmem:[%s58976_s2 + $0xe0] sm:$0xff] }
 0xe0c   :  { %v56642_v40 = vsub.f32 %v24028_v47, %v56636_v38  ;;  %v25830_v47 = vsel %vm567_vm2, %v47565_v16, 0 }
 0xe0d   :  { %v56645_v11 = vand.u32 4294901760, %v56639_v57  ;;  %v25464_v10 = vand.u32 4294901760, %v25463_v44  ;;  %v56902_v63 = vand.u32 4294901760, %v25830_v47 }
 0xe0e   :  { %v56648_v9 = vand.u32 4294901760, %v56642_v40 }
 0xe0f   :  { %v24554_v4 = vsub.f32 %v56639_v57, %v56645_v11 }
 0xe10   :  { %v24102_v12 = vsub.f32 %v56642_v40, %v56648_v9 }
 0xe11   :  { %v56654_v34 = vand.u32 4294901760, %v24554_v4  ;;  %v25910_v4 = vsub.f32 %v25830_v47, %v56902_v63 }
 0xe12   :  { %v56656_v0 = vand.u32 4294901760, %v24102_v12 }
 0xe13   :  { %51112 = vmatmul.mubr.f32.vlgmr.msra.gmra.mrb[96].mxu1 %v56654_v34 }
 0xe14   :  { %50902 = vmatmul.mubr.f32.vlgmr.msra.gmra.mrb[90].mxu0 %v56656_v0  ;;  %51115 = vmatpush3.xpose.msra.mxu1 %v27260_v20  ;;  %v25911_v20 = vand.u32 4294901760, %v25910_v4 }
 0xe15   :  { %50905 = vmatpush3.xpose.msra.mxu0 %v24114_v35  ;;  %51116 = vmatprep.mubr.msk.f32.mxu1 %vm54248_vm3, %v58980_v54 }
 0xe16   :  { %50906 = vmatprep.mubr.msk.f32.mxu0 %vm54248_vm3, %v58980_v54  ;;  %50909 = vmatprep.subr.mxu0 %v58980_v54  ;;  %v25912_v15 = vsub.f32 %v25910_v4, %v25911_v20 }
 0xe17   :  { %51119 = vmatprep.subr.mxu1 %v58980_v54 }
 0xe18   :  { %v25913_v6 = vand.u32 4294901760, %v25912_v15  ;;  %v47584_v15 = vld [vmem:[%s58976_s2 + $0x178] sm:$0xff] }
 0xe1b   :  { %51117 = vmatmul.mubr.f32.vlgmr.msra.gmra.mrb[96].mxu1 %v56633_v7 }
 0xe1c   :  { %50907 = vmatmul.mubr.f32.vlgmr.msra.gmra.mrb[90].mxu0 %v56636_v38  ;;  %51120 = vmatpush3.xpose.msra.mxu1 %v27257_v19  ;;  %v29953_v19 = vsub.f32 %v29951_v56, %v29952_v25 }
 0xe1d   :  { %50910 = vmatpush3.xpose.msra.mxu0 %v24111_v30  ;;  %51121 = vmatprep.mubr.msk.f32.mxu1 %vm54248_vm3, %v58980_v54 }
 0xe1e   :  { %50911 = vmatprep.mubr.msk.f32.mxu0 %vm54248_vm3, %v58980_v54  ;;  %50914 = vmatprep.subr.mxu0 %v58980_v54  ;;  %v29954_v30 = vand.u32 4294901760, %v29953_v19 }
 0xe1f   :  { %51124 = vmatprep.subr.mxu1 %v58980_v54 }
 0xe23   :  { %51122 = vmatmul.mubr.f32.vlgmr.msra.gmra.mrb[96].mxu1 %v56639_v57 }
 0xe24   :  { %50912 = vmatmul.mubr.f32.vlgmr.msra.gmra.mrb[90].mxu0 %v56642_v40  ;;  %51125 = vmatpush3.xpose.msra.mxu1 %v56615_v28 }
 0xe25   :  { %50915 = vmatpush3.xpose.msra.mxu0 %v56618_v58  ;;  %51126 = vmatprep.mubr.msk.f32.mxu1 %vm54248_vm3, %v58980_v54 }
 0xe26   :  { %50916 = vmatprep.mubr.msk.f32.mxu0 %vm54248_vm3, %v58980_v54  ;;  %50919 = vmatprep.subr.mxu0 %v58980_v54 }
 0xe27   :  { %51129 = vmatprep.subr.mxu1 %v58980_v54 }
 0xe2b   :  { %51127 = vmatmul.mubr.f32.vlgmr.msra.gmra.mrb[96].mxu1 %v56645_v11 }
 0xe2c   :  { %50917 = vmatmul.mubr.f32.vlgmr.msra.gmra.mrb[90].mxu0 %v56648_v9  ;;  %51130 = vmatpush3.xpose.msra.mxu1 %v27258_v23  ;;  %v30769_v23 = vsel %vm567_vm2, %v47576_v21, 0 }
 0xe2d   :  { %50920 = vmatpush3.xpose.msra.mxu0 %v24112_v36  ;;  %51131 = vmatprep.mubr.msk.f32.mxu1 %vm54248_vm3, %v58980_v54  ;;  %v56898_v36 = vand.u32 4294901760, %v30769_v23 }
 0xe2e   :  { %50921 = vmatprep.mubr.msk.f32.mxu0 %vm54248_vm3, %v58980_v54  ;;  %50924 = vmatprep.subr.mxu0 %v58980_v54 }
 0xe2f   :  { %51134 = vmatprep.subr.mxu1 %v58980_v54  ;;  %v30849_v8 = vsub.f32 %v30769_v23, %v56898_v36 }
 0xe31   :  { %v30850_v12 = vand.u32 4294901760, %v30849_v8 }
 0xe33   :  { %51132 = vmatmul.mubr.f32.vlgmr.msra.gmra.mrb[96].mxu1 %v56633_v7  ;;  %v30851_v35 = vsub.f32 %v30849_v8, %v30850_v12 }
 0xe34   :  { %50922 = vmatmul.mubr.f32.vlgmr.msra.gmra.mrb[90].mxu0 %v56636_v38  ;;  %51135 = vmatpush3.xpose.msra.mxu1 %v56615_v28  ;;  %v29054_v28 = vand.u32 4294901760, %v29053_v55 }
 0xe35   :  { %50925 = vmatpush3.xpose.msra.mxu0 %v56618_v58  ;;  %51136 = vmatprep.mubr.msk.f32.mxu1 %vm54248_vm3, %v58980_v54  ;;  %v30852_v39 = vand.u32 4294901760, %v30851_v35 }
 0xe36   :  { %50926 = vmatprep.mubr.msk.f32.mxu0 %vm54248_vm3, %v58980_v54  ;;  %51169 = vmatprep.subr.mxu1 %v58980_v54  ;;  %v29055_v58 = vsub.f32 %v29053_v55, %v29054_v28 }
 0xe37   :  { %50929 = vmatprep.subr.mxu0 %v58980_v54 }
 0xe38   :  { %v29056_v43 = vand.u32 4294901760, %v29055_v58 }
 0xe3b   :  { %51137 = vmatmul.mubr.f32.vlgmr.msra.gmra.mrb[96].mxu1 %v56633_v7 }
 0xe3c   :  { %50927 = vmatmul.mubr.f32.vlgmr.msra.gmra.mrb[90].mxu0 %v56636_v38  ;;  %51170 = vmatpush3.xpose.msra.mxu1 %v56694_v32 }
 0xe3d   :  { %50930 = vmatpush3.xpose.msra.mxu0 %v56698_v2  ;;  %51171 = vmatprep.mubr.msk.f32.mxu1 %vm54248_vm3, %v58980_v54 }
 0xe3e   :  { %50931 = vmatprep.mubr.msk.f32.mxu0 %vm54248_vm3, %v58980_v54  ;;  %50934 = vmatprep.subr.mxu0 %v58980_v54 }
 0xe3f   :  { %51172 = vmatmul.mubr.f32.vlgmr.msra.gmra.mrb[98].mxu1 %v56654_v34  ;;  %51174 = vmatprep.subr.mxu1 %v58980_v54 }
 0xe40   :  { %50932 = vmatmul.mubr.f32.vlgmr.msra.gmra.mrb[92].mxu0 %v56654_v34  ;;  %51175 = vmatpush3.xpose.msra.mxu1 %v28158_v62 }
 0xe41   :  { %50935 = vmatpush3.xpose.msra.mxu0 %v24566_v5  ;;  %51176 = vmatprep.mubr.msk.f32.mxu1 %vm54248_vm3, %v58980_v54 }
 0xe42   :  { %50936 = vmatprep.mubr.msk.f32.mxu0 %vm54248_vm3, %v58980_v54  ;;  %50939 = vmatprep.subr.mxu0 %v58980_v54 }
 0xe43   :  { %51179 = vmatprep.subr.mxu1 %v58980_v54 }
 0xe47   :  { %51177 = vmatmul.mubr.f32.vlgmr.msra.gmra.mrb[98].mxu1 %v56633_v7 }
 0xe48   :  { %50937 = vmatmul.mubr.f32.vlgmr.msra.gmra.mrb[92].mxu0 %v56633_v7  ;;  %51180 = vmatpush3.xpose.msra.mxu1 %v28155_v29 }
 0xe49   :  { %50940 = vmatpush3.xpose.msra.mxu0 %v24563_v52  ;;  %51181 = vmatprep.mubr.msk.f32.mxu1 %vm54248_vm3, %v58980_v54 }
 0xe4a   :  { %50941 = vmatprep.mubr.msk.f32.mxu0 %vm54248_vm3, %v58980_v54  ;;  %50944 = vmatprep.subr.mxu0 %v58980_v54 }
 0xe4b   :  { %51184 = vmatprep.subr.mxu1 %v58980_v54 }
 0xe4f   :  { %51182 = vmatmul.mubr.f32.vlgmr.msra.gmra.mrb[98].mxu1 %v56639_v57 }
 0xe50   :  { %50942 = vmatmul.mubr.f32.vlgmr.msra.gmra.mrb[92].mxu0 %v56639_v57  ;;  %51185 = vmatpush3.xpose.msra.mxu1 %v56694_v32 }
 0xe51   :  { %50945 = vmatpush3.xpose.msra.mxu0 %v56698_v2  ;;  %51186 = vmatprep.mubr.msk.f32.mxu1 %vm54248_vm3, %v58980_v54 }
 0xe52   :  { %50946 = vmatprep.mubr.msk.f32.mxu0 %vm54248_vm3, %v58980_v54  ;;  %50949 = vmatprep.subr.mxu0 %v58980_v54 }
 0xe53   :  { %51189 = vmatprep.subr.mxu1 %v58980_v54 }
 0xe57   :  { %51187 = vmatmul.mubr.f32.vlgmr.msra.gmra.mrb[98].mxu1 %v56645_v11 }
 0xe58   :  { %50947 = vmatmul.mubr.f32.vlgmr.msra.gmra.mrb[92].mxu0 %v56645_v11  ;;  %51190 = vmatpush3.xpose.msra.mxu1 %v28156_v53 }
 0xe59   :  { %50950 = vmatpush3.xpose.msra.mxu0 %v24564_v60  ;;  %51191 = vmatprep.mubr.msk.f32.mxu1 %vm54248_vm3, %v58980_v54 }
 0xe5a   :  { %50951 = vmatprep.mubr.msk.f32.mxu0 %vm54248_vm3, %v58980_v54  ;;  %50954 = vmatprep.subr.mxu0 %v58980_v54 }
 0xe5b   :  { %51194 = vmatprep.subr.mxu1 %v58980_v54 }
 0xe5f   :  { %51192 = vmatmul.mubr.f32.vlgmr.msra.gmra.mrb[98].mxu1 %v56633_v7 }
 0xe60   :  { %50952 = vmatmul.mubr.f32.vlgmr.msra.gmra.mrb[92].mxu0 %v56633_v7  ;;  %51195 = vmatpush3.xpose.msra.mxu1 %v56694_v32  ;;  %v47566_v32 = vld [vmem:[%s58976_s2 + $0xe8] sm:$0xff] }
 0xe61   :  { %50955 = vmatpush3.xpose.msra.mxu0 %v56698_v2  ;;  %51196 = vmatprep.mubr.msk.f32.mxu1 %vm54248_vm3, %v58980_v54  ;;  %v31667_v2 = vsel %vm567_vm2, %v47578_v22, 0  ;;  %v26279_v29 = vsel %vm567_vm2, %v47566_v32, 0 }
 0xe62   :  { %50956 = vmatprep.mubr.msk.f32.mxu0 %vm54248_vm3, %v58980_v54  ;;  %51229 = vmatprep.subr.mxu1 %v58980_v54  ;;  %v56966_v52 = vand.u32 4294901760, %v31667_v2  ;;  %v56970_v53 = vand.u32 4294901760, %v26279_v29 }
 0xe63   :  { %50959 = vmatprep.subr.mxu0 %v58980_v54 }
 0xe64   :  { %v31747_v60 = vsub.f32 %v31667_v2, %v56966_v52  ;;  %v26359_v24 = vsub.f32 %v26279_v29, %v56970_v53 }
 0xe66   :  { %v31748_v26 = vand.u32 4294901760, %v31747_v60  ;;  %v26360_v62 = vand.u32 4294901760, %v26359_v24 }
 0xe67   :  { %51197 = vmatmul.mubr.f32.vlgmr.msra.gmra.mrb[98].mxu1 %v56633_v7 }
 0xe68   :  { %50957 = vmatmul.mubr.f32.vlgmr.msra.gmra.mrb[92].mxu0 %v56633_v7  ;;  %51230 = vmatpush3.xpose.msra.mxu1 %v56762_v17  ;;  %v31749_v5 = vsub.f32 %v31747_v60, %v31748_v26  ;;  %v26361_v45 = vsub.f32 %v26359_v24, %v26360_v62 }
 0xe69   :  { %50960 = vmatpush3.xpose.msra.mxu0 %v56766_v31  ;;  %51231 = vmatprep.mubr.msk.f32.mxu1 %vm54248_vm3, %v58980_v54 }
 0xe6a   :  { %50961 = vmatprep.mubr.msk.f32.mxu0 %vm54248_vm3, %v58980_v54  ;;  %50964 = vmatprep.subr.mxu0 %v58980_v54  ;;  %v31750_v41 = vand.u32 4294901760, %v31749_v5  ;;  %v26362_v37 = vand.u32 4294901760, %v26361_v45 }
 0xe6b   :  { %51232 = vmatmul.mubr.f32.vlgmr.msra.gmra.mrb[100].mxu1 %v56654_v34  ;;  %51234 = vmatprep.subr.mxu1 %v58980_v54 }
 0xe6c   :  { %50962 = vmatmul.mubr.f32.vlgmr.msra.gmra.mrb[94].mxu0 %v56656_v0  ;;  %51235 = vmatpush3.xpose.msra.mxu1 %v29056_v43 }
 0xe6d   :  { %50965 = vmatpush3.xpose.msra.mxu0 %v25015_v14  ;;  %51236 = vmatprep.mubr.msk.f32.mxu1 %vm54248_vm3, %v58980_v54 }
 0xe6e   :  { %50966 = vmatprep.mubr.msk.f32.mxu0 %vm54248_vm3, %v58980_v54  ;;  %50969 = vmatprep.subr.mxu0 %v58980_v54 }
 0xe6f   :  { %51239 = vmatprep.subr.mxu1 %v58980_v54 }
 0xe73   :  { %51237 = vmatmul.mubr.f32.vlgmr.msra.gmra.mrb[100].mxu1 %v56633_v7 }
 0xe74   :  { %50967 = vmatmul.mubr.f32.vlgmr.msra.gmra.mrb[94].mxu0 %v56636_v38  ;;  %51240 = vmatpush3.xpose.msra.mxu1 %v29053_v55 }
 0xe75   :  { %50970 = vmatpush3.xpose.msra.mxu0 %v25012_v18  ;;  %51241 = vmatprep.mubr.msk.f32.mxu1 %vm54248_vm3, %v58980_v54 }
 0xe76   :  { %50971 = vmatprep.mubr.msk.f32.mxu0 %vm54248_vm3, %v58980_v54  ;;  %50974 = vmatprep.subr.mxu0 %v58980_v54 }
 0xe77   :  { %51244 = vmatprep.subr.mxu1 %v58980_v54 }
 0xe7b   :  { %51242 = vmatmul.mubr.f32.vlgmr.msra.gmra.mrb[100].mxu1 %v56639_v57 }
 0xe7c   :  { %50972 = vmatmul.mubr.f32.vlgmr.msra.gmra.mrb[94].mxu0 %v56642_v40  ;;  %51245 = vmatpush3.xpose.msra.mxu1 %v56762_v17 }
 0xe7d   :  { %50975 = vmatpush3.xpose.msra.mxu0 %v56766_v31  ;;  %51246 = vmatprep.mubr.msk.f32.mxu1 %vm54248_vm3, %v58980_v54 }
 0xe7e   :  { %50976 = vmatprep.mubr.msk.f32.mxu0 %vm54248_vm3, %v58980_v54  ;;  %50979 = vmatprep.subr.mxu0 %v58980_v54 }
 0xe7f   :  { %51249 = vmatprep.subr.mxu1 %v58980_v54 }
 0xe83   :  { %51247 = vmatmul.mubr.f32.vlgmr.msra.gmra.mrb[100].mxu1 %v56645_v11 }
 0xe84   :  { %50977 = vmatmul.mubr.f32.vlgmr.msra.gmra.mrb[94].mxu0 %v56648_v9  ;;  %51250 = vmatpush3.xpose.msra.mxu1 %v29054_v28 }
 0xe85   :  { %50980 = vmatpush3.xpose.msra.mxu0 %v25013_v59  ;;  %51251 = vmatprep.mubr.msk.f32.mxu1 %vm54248_vm3, %v58980_v54 }
 0xe86   :  { %50981 = vmatprep.mubr.msk.f32.mxu0 %vm54248_vm3, %v58980_v54  ;;  %50984 = vmatprep.subr.mxu0 %v58980_v54 }
 0xe87   :  { %51254 = vmatprep.subr.mxu1 %v58980_v54 }
 0xe8b   :  { %51252 = vmatmul.mubr.f32.vlgmr.msra.gmra.mrb[100].mxu1 %v56633_v7 }
 0xe8c   :  { %50982 = vmatmul.mubr.f32.vlgmr.msra.gmra.mrb[94].mxu0 %v56636_v38  ;;  %51255 = vmatpush3.xpose.msra.mxu1 %v56762_v17  ;;  %v47567_v17 = vld [vmem:[%s58976_s2 + $0xf0] sm:$0xff] }
 0xe8d   :  { %50985 = vmatpush3.xpose.msra.mxu0 %v56766_v31  ;;  %51256 = vmatprep.mubr.msk.f32.mxu1 %vm54248_vm3, %v58980_v54  ;;  %v32565_v31 = vsel %vm567_vm2, %v47580_v3, 0  ;;  %v26728_v55 = vsel %vm567_vm2, %v47567_v17, 0  ;;  %v47618_v17 = vld [vmem:[%s58977_s3 + $0x21] ss:$0 sm:$0xff] }
 0xe8e   :  { %50986 = vmatprep.mubr.msk.f32.mxu0 %vm54248_vm3, %v58980_v54  ;;  %51289 = vmatprep.subr.mxu1 %v58980_v54  ;;  %v57034_v18 = vand.u32 4294901760, %v32565_v31  ;;  %v57038_v28 = vand.u32 4294901760, %v26728_v55 }
 0xe8f   :  { %50989 = vmatprep.subr.mxu0 %v58980_v54 }
 0xe90   :  { %v32645_v59 = vsub.f32 %v32565_v31, %v57034_v18  ;;  %v26808_v58 = vsub.f32 %v26728_v55, %v57038_v28  ;;  %v47573_v55 = vld [vmem:[%s58976_s2 + $0x120] sm:$0xff] }
 0xe92   :  { %v32646_v49 = vand.u32 4294901760, %v32645_v59  ;;  %v26809_v33 = vand.u32 4294901760, %v26808_v58 }
 0xe93   :  { %51257 = vmatmul.mubr.f32.vlgmr.msra.gmra.mrb[100].mxu1 %v56633_v7 }
 0xe94   :  { %50987 = vmatmul.mubr.f32.vlgmr.msra.gmra.mrb[94].mxu0 %v56636_v38  ;;  %51290 = vmatpush3.xpose.msra.mxu1 %v56830_v51  ;;  %v32647_v42 = vsub.f32 %v32645_v59, %v32646_v49 }
 0xe95   :  { %50990 = vmatpush3.xpose.msra.mxu0 %v56834_v13  ;;  %51291 = vmatprep.mubr.msk.f32.mxu1 %vm54248_vm3, %v58980_v54 }
 0xe96   :  { %50991 = vmatprep.mubr.msk.f32.mxu0 %vm54248_vm3, %v58980_v54  ;;  %50994 = vmatprep.subr.mxu0 %v58980_v54 }
 0xe97   :  { %51292 = vmatmul.mubr.f32.vlgmr.msra.gmra.mrb[102].mxu1 %v56654_v34  ;;  %51294 = vmatprep.subr.mxu1 %v58980_v54 }
 0xe98   :  { %50992 = vmatmul.mubr.f32.vlgmr.msra.gmra.mrb[96].mxu0 %v56654_v34  ;;  %51295 = vmatpush3.xpose.msra.mxu1 %v29954_v30 }
 0xe99   :  { %50995 = vmatpush3.xpose.msra.mxu0 %v25464_v10  ;;  %51296 = vmatprep.mubr.msk.f32.mxu1 %vm54248_vm3, %v58980_v54 }
 0xe9a   :  { %50996 = vmatprep.mubr.msk.f32.mxu0 %vm54248_vm3, %v58980_v54  ;;  %50999 = vmatprep.subr.mxu0 %v58980_v54 }
 0xe9b   :  { %51299 = vmatprep.subr.mxu1 %v58980_v54 }
 0xe9f   :  { %51297 = vmatmul.mubr.f32.vlgmr.msra.gmra.mrb[102].mxu1 %v56633_v7 }
 0xea0   :  { %50997 = vmatmul.mubr.f32.vlgmr.msra.gmra.mrb[96].mxu0 %v56633_v7  ;;  %51300 = vmatpush3.xpose.msra.mxu1 %v29951_v56 }
 0xea1   :  { %51000 = vmatpush3.xpose.msra.mxu0 %v25461_v1  ;;  %51301 = vmatprep.mubr.msk.f32.mxu1 %vm54248_vm3, %v58980_v54  ;;  %v47582_v1 = vld [vmem:[%s58976_s2 + $0x168] sm:$0xff] }
 0xea2   :  { %51001 = vmatprep.mubr.msk.f32.mxu0 %vm54248_vm3, %v58980_v54  ;;  %51004 = vmatprep.subr.mxu0 %v58980_v54 }
 0xea3   :  { %51304 = vmatprep.subr.mxu1 %v58980_v54 }
 0xea7   :  { %51302 = vmatmul.mubr.f32.vlgmr.msra.gmra.mrb[102].mxu1 %v56639_v57 }
 0xea8   :  { %51002 = vmatmul.mubr.f32.vlgmr.msra.gmra.mrb[96].mxu0 %v56639_v57  ;;  %51305 = vmatpush3.xpose.msra.mxu1 %v56830_v51 }
 0xea9   :  { %51005 = vmatpush3.xpose.msra.mxu0 %v56834_v13  ;;  %51306 = vmatprep.mubr.msk.f32.mxu1 %vm54248_vm3, %v58980_v54 }
 0xeaa   :  { %51006 = vmatprep.mubr.msk.f32.mxu0 %vm54248_vm3, %v58980_v54  ;;  %51009 = vmatprep.subr.mxu0 %v58980_v54 }
 0xeab   :  { %51309 = vmatprep.subr.mxu1 %v58980_v54 }
 0xeaf   :  { %51307 = vmatmul.mubr.f32.vlgmr.msra.gmra.mrb[102].mxu1 %v56645_v11 }
 0xeb0   :  { %51007 = vmatmul.mubr.f32.vlgmr.msra.gmra.mrb[96].mxu0 %v56645_v11  ;;  %51310 = vmatpush3.xpose.msra.mxu1 %v29952_v25  ;;  %v47569_v25 = vld [vmem:[%s58976_s2 + $0x100] sm:$0xff] }
 0xeb1   :  { %51010 = vmatpush3.xpose.msra.mxu0 %v25462_v50  ;;  %51311 = vmatprep.mubr.msk.f32.mxu1 %vm54248_vm3, %v58980_v54  ;;  %v33463_v50 = vsel %vm567_vm2, %v47582_v1, 0  ;;  %v27626_v19 = vsel %vm567_vm2, %v47569_v25, 0 }
 0xeb2   :  { %51011 = vmatprep.mubr.msk.f32.mxu0 %vm54248_vm3, %v58980_v54  ;;  %51014 = vmatprep.subr.mxu0 %v58980_v54  ;;  %v57106_v44 = vand.u32 4294901760, %v33463_v50  ;;  %v57110_v30 = vand.u32 4294901760, %v27626_v19 }
 0xeb3   :  { %51314 = vmatprep.subr.mxu1 %v58980_v54 }
 0xeb4   :  { %v33543_v10 = vsub.f32 %v33463_v50, %v57106_v44  ;;  %v27706_v21 = vsub.f32 %v27626_v19, %v57110_v30 }
 0xeb7   :  { %51312 = vmatmul.mubr.f32.vlgmr.msra.gmra.mrb[102].mxu1 %v56633_v7 }
 0xeb8   :  { %51012 = vmatmul.mubr.f32.vlgmr.msra.gmra.mrb[96].mxu0 %v56633_v7  ;;  %51315 = vmatpush3.xpose.msra.mxu1 %v56830_v51  ;;  %v26810_v51 = vsub.f32 %v26808_v58, %v26809_v33 }
 0xeb9   :  { %51015 = vmatpush3.xpose.msra.mxu0 %v56834_v13  ;;  %51316 = vmatprep.mubr.msk.f32.mxu1 %vm54248_vm3, %v58980_v54  ;;  %v32648_v13 = vand.u32 4294901760, %v32647_v42 }
 0xeba   :  { %51016 = vmatprep.mubr.msk.f32.mxu0 %vm54248_vm3, %v58980_v54  ;;  %51349 = vmatprep.subr.mxu1 %v58980_v54  ;;  %v26811_v56 = vand.u32 4294901760, %v26810_v51 }
 0xebb   :  { %51019 = vmatprep.subr.mxu0 %v58980_v54 }
 0xebf   :  { %51317 = vmatmul.mubr.f32.vlgmr.msra.gmra.mrb[102].mxu1 %v56633_v7 }
 0xec0   :  { %51017 = vmatmul.mubr.f32.vlgmr.msra.gmra.mrb[96].mxu0 %v56633_v7  ;;  %51350 = vmatpush3.xpose.msra.mxu1 %v56898_v36 }
 0xec1   :  { %51020 = vmatpush3.xpose.msra.mxu0 %v56902_v63  ;;  %51351 = vmatprep.mubr.msk.f32.mxu1 %vm54248_vm3, %v58980_v54 }
 0xec2   :  { %51021 = vmatprep.mubr.msk.f32.mxu0 %vm54248_vm3, %v58980_v54  ;;  %51024 = vmatprep.subr.mxu0 %v58980_v54 }
 0xec3   :  { %51352 = vmatmul.mubr.f32.vlgmr.msra.gmra.mrb[104].mxu1 %v56654_v34  ;;  %51354 = vmatprep.subr.mxu1 %v58980_v54 }
 0xec4   :  { %51022 = vmatmul.mubr.f32.vlgmr.msra.gmra.mrb[98].mxu0 %v56656_v0  ;;  %51355 = vmatpush3.xpose.msra.mxu1 %v30852_v39  ;;  %v47571_v39 = vld [vmem:[%s58976_s2 + $0x110] sm:$0xff] }
 0xec5   :  { %51025 = vmatpush3.xpose.msra.mxu0 %v25913_v6  ;;  %51356 = vmatprep.mubr.msk.f32.mxu1 %vm54248_vm3, %v58980_v54  ;;  %v34361_v6 = vsel %vm567_vm2, %v47584_v15, 0  ;;  %v28524_v22 = vsel %vm567_vm2, %v47571_v39, 0 }
 0xec6   :  { %51026 = vmatprep.mubr.msk.f32.mxu0 %vm54248_vm3, %v58980_v54  ;;  %51029 = vmatprep.subr.mxu0 %v58980_v54  ;;  %v57178_v32 = vand.u32 4294901760, %v34361_v6  ;;  %v57182_v2 = vand.u32 4294901760, %v28524_v22 }
 0xec7   :  { %51359 = vmatprep.subr.mxu1 %v58980_v54 }
 0xec8   :  { %v34441_v29 = vsub.f32 %v34361_v6, %v57178_v32 }
 0xecb   :  { %51357 = vmatmul.mubr.f32.vlgmr.msra.gmra.mrb[104].mxu1 %v56633_v7 }
 0xecc   :  { %51027 = vmatmul.mubr.f32.vlgmr.msra.gmra.mrb[98].mxu0 %v56636_v38  ;;  %51360 = vmatpush3.xpose.msra.mxu1 %v30849_v8  ;;  %v27707_v8 = vand.u32 4294901760, %v27706_v21 }
 0xecd   :  { %51030 = vmatpush3.xpose.msra.mxu0 %v25910_v4  ;;  %51361 = vmatprep.mubr.msk.f32.mxu1 %vm54248_vm3, %v58980_v54 }
 0xece   :  { %51031 = vmatprep.mubr.msk.f32.mxu0 %vm54248_vm3, %v58980_v54  ;;  %51034 = vmatprep.subr.mxu0 %v58980_v54 }
 0xecf   :  { %51364 = vmatprep.subr.mxu1 %v58980_v54 }
 0xed3   :  { %51362 = vmatmul.mubr.f32.vlgmr.msra.gmra.mrb[104].mxu1 %v56639_v57 }
 0xed4   :  { %51032 = vmatmul.mubr.f32.vlgmr.msra.gmra.mrb[98].mxu0 %v56642_v40  ;;  %51365 = vmatpush3.xpose.msra.mxu1 %v56898_v36 }
 0xed5   :  { %51035 = vmatpush3.xpose.msra.mxu0 %v56902_v63  ;;  %51366 = vmatprep.mubr.msk.f32.mxu1 %vm54248_vm3, %v58980_v54 }
 0xed6   :  { %51036 = vmatprep.mubr.msk.f32.mxu0 %vm54248_vm3, %v58980_v54  ;;  %51039 = vmatprep.subr.mxu0 %v58980_v54 }
 0xed7   :  { %51369 = vmatprep.subr.mxu1 %v58980_v54 }
 0xedb   :  { %51367 = vmatmul.mubr.f32.vlgmr.msra.gmra.mrb[104].mxu1 %v56645_v11 }
 0xedc   :  { %51037 = vmatmul.mubr.f32.vlgmr.msra.gmra.mrb[98].mxu0 %v56648_v9  ;;  %51370 = vmatpush3.xpose.msra.mxu1 %v30850_v12  ;;  %v27708_v12 = vsub.f32 %v27706_v21, %v27707_v8 }
 0xedd   :  { %51040 = vmatpush3.xpose.msra.mxu0 %v25911_v20  ;;  %51371 = vmatprep.mubr.msk.f32.mxu1 %vm54248_vm3, %v58980_v54 }
 0xede   :  { %51041 = vmatprep.mubr.msk.f32.mxu0 %vm54248_vm3, %v58980_v54  ;;  %51044 = vmatprep.subr.mxu0 %v58980_v54  ;;  %v27709_v35 = vand.u32 4294901760, %v27708_v12 }
 0xedf   :  { %51374 = vmatprep.subr.mxu1 %v58980_v54 }
 0xee3   :  { %51372 = vmatmul.mubr.f32.vlgmr.msra.gmra.mrb[104].mxu1 %v56633_v7 }
 0xee4   :  { %51042 = vmatmul.mubr.f32.vlgmr.msra.gmra.mrb[98].mxu0 %v56636_v38  ;;  %51375 = vmatpush3.xpose.msra.mxu1 %v56898_v36 }
 0xee5   :  { %51045 = vmatpush3.xpose.msra.mxu0 %v56902_v63  ;;  %51376 = vmatprep.mubr.msk.f32.mxu1 %vm54248_vm3, %v58980_v54  ;;  %v33544_v63 = vand.u32 4294901760, %v33543_v10 }
 0xee6   :  { %51046 = vmatprep.mubr.msk.f32.mxu0 %vm54248_vm3, %v58980_v54  ;;  %51409 = vmatprep.subr.mxu1 %v58980_v54 }
 0xee7   :  { %51049 = vmatprep.subr.mxu0 %v58980_v54  ;;  %v33545_v4 = vsub.f32 %v33543_v10, %v33544_v63 }
 0xee9   :  { %v33546_v20 = vand.u32 4294901760, %v33545_v4 }
 0xeeb   :  { %51377 = vmatmul.mubr.f32.vlgmr.msra.gmra.mrb[104].mxu1 %v56633_v7 }
 0xeec   :  { %51047 = vmatmul.mubr.f32.vlgmr.msra.gmra.mrb[98].mxu0 %v56636_v38  ;;  %51410 = vmatpush3.xpose.msra.mxu1 %v56966_v52 }
 0xeed   :  { %51050 = vmatpush3.xpose.msra.mxu0 %v56970_v53  ;;  %51411 = vmatprep.mubr.msk.f32.mxu1 %vm54248_vm3, %v58980_v54 }
 0xeee   :  { %51051 = vmatprep.mubr.msk.f32.mxu0 %vm54248_vm3, %v58980_v54  ;;  %51054 = vmatprep.subr.mxu0 %v58980_v54 }
 0xeef   :  { %51412 = vmatmul.mubr.f32.vlgmr.msra.gmra.mrb[106].mxu1 %v56654_v34  ;;  %51414 = vmatprep.subr.mxu1 %v58980_v54 }
 0xef0   :  { %51052 = vmatmul.mubr.f32.vlgmr.msra.gmra.mrb[100].mxu0 %v56654_v34  ;;  %51415 = vmatpush3.xpose.msra.mxu1 %v31750_v41 }
 0xef1   :  { %51055 = vmatpush3.xpose.msra.mxu0 %v26362_v37  ;;  %51416 = vmatprep.mubr.msk.f32.mxu1 %vm54248_vm3, %v58980_v54 }
 0xef2   :  { %51056 = vmatprep.mubr.msk.f32.mxu0 %vm54248_vm3, %v58980_v54  ;;  %51059 = vmatprep.subr.mxu0 %v58980_v54 }
 0xef3   :  { %51419 = vmatprep.subr.mxu1 %v58980_v54 }
 0xef7   :  { %51417 = vmatmul.mubr.f32.vlgmr.msra.gmra.mrb[106].mxu1 %v56633_v7 }
 0xef8   :  { %51057 = vmatmul.mubr.f32.vlgmr.msra.gmra.mrb[100].mxu0 %v56633_v7  ;;  %51420 = vmatpush3.xpose.msra.mxu1 %v31747_v60 }
 0xef9   :  { %51060 = vmatpush3.xpose.msra.mxu0 %v26359_v24  ;;  %51421 = vmatprep.mubr.msk.f32.mxu1 %vm54248_vm3, %v58980_v54 }
 0xefa   :  { %51061 = vmatprep.mubr.msk.f32.mxu0 %vm54248_vm3, %v58980_v54  ;;  %51064 = vmatprep.subr.mxu0 %v58980_v54 }
 0xefb   :  { %51424 = vmatprep.subr.mxu1 %v58980_v54 }
 0xeff   :  { %51422 = vmatmul.mubr.f32.vlgmr.msra.gmra.mrb[106].mxu1 %v56639_v57 }
 0xf00   :  { %51062 = vmatmul.mubr.f32.vlgmr.msra.gmra.mrb[100].mxu0 %v56639_v57  ;;  %51425 = vmatpush3.xpose.msra.mxu1 %v56966_v52 }
 0xf01   :  { %51065 = vmatpush3.xpose.msra.mxu0 %v56970_v53  ;;  %51426 = vmatprep.mubr.msk.f32.mxu1 %vm54248_vm3, %v58980_v54 }
 0xf02   :  { %51066 = vmatprep.mubr.msk.f32.mxu0 %vm54248_vm3, %v58980_v54  ;;  %51069 = vmatprep.subr.mxu0 %v58980_v54 }
 0xf03   :  { %51429 = vmatprep.subr.mxu1 %v58980_v54 }
 0xf07   :  { %51427 = vmatmul.mubr.f32.vlgmr.msra.gmra.mrb[106].mxu1 %v56645_v11 }
 0xf08   :  { %51067 = vmatmul.mubr.f32.vlgmr.msra.gmra.mrb[100].mxu0 %v56645_v11  ;;  %51430 = vmatpush3.xpose.msra.mxu1 %v31748_v26 }
 0xf09   :  { %51070 = vmatpush3.xpose.msra.mxu0 %v26360_v62  ;;  %51431 = vmatprep.mubr.msk.f32.mxu1 %vm54248_vm3, %v58980_v54  ;;  %v34442_v62 = vand.u32 4294901760, %v34441_v29 }
 0xf0a   :  { %51071 = vmatprep.mubr.msk.f32.mxu0 %vm54248_vm3, %v58980_v54  ;;  %51074 = vmatprep.subr.mxu0 %v58980_v54 }
 0xf0b   :  { %51434 = vmatprep.subr.mxu1 %v58980_v54  ;;  %v34443_v45 = vsub.f32 %v34441_v29, %v34442_v62 }
 0xf0d   :  { %v34444_v37 = vand.u32 4294901760, %v34443_v45 }
 0xf0e   :  { %v57046_v61 = vpop.f32.mrb[96].mxu1 }
 0xf0f   :  { %v57048_v43 = vpop.f32.mrb[90].mxu0  ;;  %v51138_v14 = vpop.f32.mrb[97].mxu1  ;;  %51432 = vmatmul.mubr.f32.vlgmr.msra.gmra.mrb[106].mxu1 %v56633_v7 }
 0xf10   :  { %v50928_v46 = vpop.f32.mrb[91].mxu0  ;;  %51072 = vmatmul.mubr.f32.vlgmr.msra.gmra.mrb[100].mxu0 %v56633_v7  ;;  %51435 = vmatpush3.xpose.msra.mxu1 %v56966_v52  ;;  %v57190_v52 = vsub.f32 %v28524_v22, %v57182_v2 }
 0xf11   :  { %51075 = vmatpush3.xpose.msra.mxu0 %v56970_v53  ;;  %51436 = vmatprep.mubr.msk.f32.mxu1 %vm54248_vm3, %v58980_v54 }
 0xf12   :  { %51076 = vmatprep.mubr.msk.f32.mxu0 %vm54248_vm3, %v58980_v54  ;;  %51469 = vmatprep.subr.mxu1 %v58980_v54  ;;  %v28605_v5 = vand.u32 4294901760, %v57190_v52 }
 0xf13   :  { %51079 = vmatprep.subr.mxu0 %v58980_v54 }
 0xf14   :  { %v28606_v41 = vsub.f32 %v57190_v52, %v28605_v5 }
 0xf16   :  { %v28607_v3 = vand.u32 4294901760, %v28606_v41 }
 0xf17   :  { %51437 = vmatmul.mubr.f32.vlgmr.msra.gmra.mrb[106].mxu1 %v56633_v7 }
 0xf18   :  { %51077 = vmatmul.mubr.f32.vlgmr.msra.gmra.mrb[100].mxu0 %v56633_v7  ;;  %51470 = vmatpush3.xpose.msra.mxu1 %v57034_v18 }
 0xf19   :  { %51080 = vmatpush3.xpose.msra.mxu0 %v57038_v28  ;;  %51471 = vmatprep.mubr.msk.f32.mxu1 %vm54248_vm3, %v58980_v54 }
 0xf1a   :  { %51081 = vmatprep.mubr.msk.f32.mxu0 %vm54248_vm3, %v58980_v54  ;;  %51084 = vmatprep.subr.mxu0 %v58980_v54 }
 0xf1b   :  { %51472 = vmatmul.mubr.f32.vlgmr.msra.gmra.mrb[108].mxu1 %v56654_v34  ;;  %51474 = vmatprep.subr.mxu1 %v58980_v54 }
 0xf1c   :  { %51082 = vmatmul.mubr.f32.vlgmr.msra.gmra.mrb[102].mxu0 %v56656_v0  ;;  %51475 = vmatpush3.xpose.msra.mxu1 %v32648_v13 }
 0xf1d   :  { %51085 = vmatpush3.xpose.msra.mxu0 %v26811_v56  ;;  %51476 = vmatprep.mubr.msk.f32.mxu1 %vm54248_vm3, %v58980_v54 }
 0xf1e   :  { %51086 = vmatprep.mubr.msk.f32.mxu0 %vm54248_vm3, %v58980_v54  ;;  %51089 = vmatprep.subr.mxu0 %v58980_v54 }
 0xf1f   :  { %51479 = vmatprep.subr.mxu1 %v58980_v54 }
 0xf23   :  { %51477 = vmatmul.mubr.f32.vlgmr.msra.gmra.mrb[108].mxu1 %v56633_v7 }
 0xf24   :  { %51087 = vmatmul.mubr.f32.vlgmr.msra.gmra.mrb[102].mxu0 %v56636_v38  ;;  %51480 = vmatpush3.xpose.msra.mxu1 %v32645_v59 }
 0xf25   :  { %51090 = vmatpush3.xpose.msra.mxu0 %v26808_v58  ;;  %51481 = vmatprep.mubr.msk.f32.mxu1 %vm54248_vm3, %v58980_v54 }
 0xf26   :  { %51091 = vmatprep.mubr.msk.f32.mxu0 %vm54248_vm3, %v58980_v54  ;;  %51094 = vmatprep.subr.mxu0 %v58980_v54 }
 0xf27   :  { %51484 = vmatprep.subr.mxu1 %v58980_v54 }
 0xf2b   :  { %51482 = vmatmul.mubr.f32.vlgmr.msra.gmra.mrb[108].mxu1 %v56639_v57 }
 0xf2c   :  { %51092 = vmatmul.mubr.f32.vlgmr.msra.gmra.mrb[102].mxu0 %v56642_v40  ;;  %51485 = vmatpush3.xpose.msra.mxu1 %v57034_v18 }
 0xf2d   :  { %51095 = vmatpush3.xpose.msra.mxu0 %v57038_v28  ;;  %51486 = vmatprep.mubr.msk.f32.mxu1 %vm54248_vm3, %v58980_v54 }
 0xf2e   :  { %51096 = vmatprep.mubr.msk.f32.mxu0 %vm54248_vm3, %v58980_v54  ;;  %51099 = vmatprep.subr.mxu0 %v58980_v54 }
 0xf2f   :  { %51489 = vmatprep.subr.mxu1 %v58980_v54 }
 0xf33   :  { %51487 = vmatmul.mubr.f32.vlgmr.msra.gmra.mrb[108].mxu1 %v56645_v11 }
 0xf34   :  { %51097 = vmatmul.mubr.f32.vlgmr.msra.gmra.mrb[102].mxu0 %v56648_v9  ;;  %51490 = vmatpush3.xpose.msra.mxu1 %v32646_v49 }
 0xf35   :  { %51100 = vmatpush3.xpose.msra.mxu0 %v26809_v33  ;;  %51491 = vmatprep.mubr.msk.f32.mxu1 %vm54248_vm3, %v58980_v54 }
 0xf36   :  { %51101 = vmatprep.mubr.msk.f32.mxu0 %vm54248_vm3, %v58980_v54  ;;  %51104 = vmatprep.subr.mxu0 %v58980_v54 }
 0xf37   :  { %51494 = vmatprep.subr.mxu1 %v58980_v54 }
 0xf3a   :  { %v57118_v16 = vpop.f32.mrb[98].mxu1 }
 0xf3b   :  { %v57120_v23 = vpop.f32.mrb[92].mxu0  ;;  %v51198_v47 = vpop.f32.mrb[99].mxu1  ;;  %51492 = vmatmul.mubr.f32.vlgmr.msra.gmra.mrb[108].mxu1 %v56633_v7 }
 0xf3c   :  { %v50958_v36 = vpop.f32.mrb[93].mxu0  ;;  %51102 = vmatmul.mubr.f32.vlgmr.msra.gmra.mrb[102].mxu0 %v56636_v38  ;;  %51495 = vmatpush3.xpose.msra.mxu1 %v57034_v18 }
 0xf3d   :  { %51105 = vmatpush3.xpose.msra.mxu0 %v57038_v28  ;;  %51496 = vmatprep.mubr.msk.f32.mxu1 %vm54248_vm3, %v58980_v54  ;;  %v29422_v28 = vsel %vm567_vm2, %v47573_v55, 0 }
 0xf3e   :  { %51106 = vmatprep.mubr.msk.f32.mxu0 %vm54248_vm3, %v58980_v54  ;;  %51529 = vmatprep.subr.mxu1 %v58980_v54  ;;  %v57265_v14 = vand.u32 4294901760, %v29422_v28 }
 0xf3f   :  { %51139 = vmatprep.subr.mxu0 %v58980_v54 }
 0xf40   :  { %v57277_v49 = vsub.f32 %v29422_v28, %v57265_v14 }
 0xf42   :  { %v29503_v25 = vand.u32 4294901760, %v57277_v49 }
 0xf43   :  { %51497 = vmatmul.mubr.f32.vlgmr.msra.gmra.mrb[108].mxu1 %v56633_v7 }
 0xf44   :  { %51107 = vmatmul.mubr.f32.vlgmr.msra.gmra.mrb[102].mxu0 %v56636_v38  ;;  %51530 = vmatpush3.xpose.msra.mxu1 %v57106_v44 }
 0xf45   :  { %51140 = vmatpush3.xpose.msra.mxu0 %v57110_v30  ;;  %51531 = vmatprep.mubr.msk.f32.mxu1 %vm54248_vm3, %v58980_v54 }
 0xf46   :  { %51141 = vmatprep.mubr.msk.f32.mxu0 %vm54248_vm3, %v58980_v54  ;;  %51144 = vmatprep.subr.mxu0 %v58980_v54 }
 0xf47   :  { %51532 = vmatmul.mubr.f32.vlgmr.msra.gmra.mrb[110].mxu1 %v56654_v34  ;;  %51534 = vmatprep.subr.mxu1 %v58980_v54 }
 0xf48   :  { %51142 = vmatmul.mubr.f32.vlgmr.msra.gmra.mrb[104].mxu0 %v56656_v0  ;;  %51535 = vmatpush3.xpose.msra.mxu1 %v33546_v20 }
 0xf49   :  { %51145 = vmatpush3.xpose.msra.mxu0 %v27709_v35  ;;  %51536 = vmatprep.mubr.msk.f32.mxu1 %vm54248_vm3, %v58980_v54 }
 0xf4a   :  { %51146 = vmatprep.mubr.msk.f32.mxu0 %vm54248_vm3, %v58980_v54  ;;  %51149 = vmatprep.subr.mxu0 %v58980_v54 }
 0xf4b   :  { %51539 = vmatprep.subr.mxu1 %v58980_v54 }
 0xf4f   :  { %51537 = vmatmul.mubr.f32.vlgmr.msra.gmra.mrb[110].mxu1 %v56633_v7 }
 0xf50   :  { %51147 = vmatmul.mubr.f32.vlgmr.msra.gmra.mrb[104].mxu0 %v56636_v38  ;;  %51540 = vmatpush3.xpose.msra.mxu1 %v33543_v10 }
 0xf51   :  { %51150 = vmatpush3.xpose.msra.mxu0 %v27706_v21  ;;  %51541 = vmatprep.mubr.msk.f32.mxu1 %vm54248_vm3, %v58980_v54 }
 0xf52   :  { %51151 = vmatprep.mubr.msk.f32.mxu0 %vm54248_vm3, %v58980_v54  ;;  %51154 = vmatprep.subr.mxu0 %v58980_v54 }
 0xf53   :  { %51544 = vmatprep.subr.mxu1 %v58980_v54 }
 0xf57   :  { %51542 = vmatmul.mubr.f32.vlgmr.msra.gmra.mrb[110].mxu1 %v56639_v57 }
 0xf58   :  { %51152 = vmatmul.mubr.f32.vlgmr.msra.gmra.mrb[104].mxu0 %v56642_v40  ;;  %51545 = vmatpush3.xpose.msra.mxu1 %v57106_v44 }
 0xf59   :  { %51155 = vmatpush3.xpose.msra.mxu0 %v57110_v30  ;;  %51546 = vmatprep.mubr.msk.f32.mxu1 %vm54248_vm3, %v58980_v54 }
 0xf5a   :  { %51156 = vmatprep.mubr.msk.f32.mxu0 %vm54248_vm3, %v58980_v54  ;;  %51159 = vmatprep.subr.mxu0 %v58980_v54 }
 0xf5b   :  { %51549 = vmatprep.subr.mxu1 %v58980_v54 }
 0xf5f   :  { %51547 = vmatmul.mubr.f32.vlgmr.msra.gmra.mrb[110].mxu1 %v56645_v11 }
 0xf60   :  { %51157 = vmatmul.mubr.f32.vlgmr.msra.gmra.mrb[104].mxu0 %v56648_v9  ;;  %51550 = vmatpush3.xpose.msra.mxu1 %v33544_v63  ;;  %v47575_v63 = vld [vmem:[%s58976_s2 + $0x130] sm:$0xff] }
 0xf61   :  { %51160 = vmatpush3.xpose.msra.mxu0 %v27707_v8  ;;  %51551 = vmatprep.mubr.msk.f32.mxu1 %vm54248_vm3, %v58980_v54  ;;  %v30320_v4 = vsel %vm567_vm2, %v47575_v63, 0 }
 0xf62   :  { %51161 = vmatprep.mubr.msk.f32.mxu0 %vm54248_vm3, %v58980_v54  ;;  %51164 = vmatprep.subr.mxu0 %v58980_v54  ;;  %v57355_v35 = vand.u32 4294901760, %v30320_v4 }
 0xf63   :  { %51554 = vmatprep.subr.mxu1 %v58980_v54 }
 0xf64   :  { %v57365_v6 = vsub.f32 %v30320_v4, %v57355_v35 }
 0xf66   :  { %v57192_v53 = vpop.f32.mrb[100].mxu1 }
 0xf67   :  { %v57194_v60 = vpop.f32.mrb[94].mxu0  ;;  %v51258_v24 = vpop.f32.mrb[101].mxu1  ;;  %51552 = vmatmul.mubr.f32.vlgmr.msra.gmra.mrb[110].mxu1 %v56633_v7 }
 0xf68   :  { %v50988_v26 = vpop.f32.mrb[95].mxu0  ;;  %51162 = vmatmul.mubr.f32.vlgmr.msra.gmra.mrb[104].mxu0 %v56636_v38  ;;  %51555 = vmatpush3.xpose.msra.mxu1 %v57106_v44  ;;  %v29504_v44 = vsub.f32 %v57277_v49, %v29503_v25  ;;  %v30401_v24 = vand.u32 4294901760, %v57365_v6 }
 0xf69   :  { %51165 = vmatpush3.xpose.msra.mxu0 %v57110_v30  ;;  %51556 = vmatprep.mubr.msk.f32.mxu1 %vm54248_vm3, %v58980_v54 }
 0xf6a   :  { %51166 = vmatprep.mubr.msk.f32.mxu0 %vm54248_vm3, %v58980_v54  ;;  %51589 = vmatprep.subr.mxu1 %v58980_v54  ;;  %v29505_v21 = vand.u32 4294901760, %v29504_v44 }
 0xf6b   :  { %51199 = vmatprep.subr.mxu0 %v58980_v54 }
 0xf6f   :  { %51557 = vmatmul.mubr.f32.vlgmr.msra.gmra.mrb[110].mxu1 %v56633_v7 }
 0xf70   :  { %51167 = vmatmul.mubr.f32.vlgmr.msra.gmra.mrb[104].mxu0 %v56636_v38  ;;  %51590 = vmatpush3.xpose.msra.mxu1 %v57178_v32 }
 0xf71   :  { %51200 = vmatpush3.xpose.msra.mxu0 %v57182_v2  ;;  %51591 = vmatprep.mubr.msk.f32.mxu1 %vm54248_vm3, %v58980_v54 }
 0xf72   :  { %51201 = vmatprep.mubr.msk.f32.mxu0 %vm54248_vm3, %v58980_v54  ;;  %51204 = vmatprep.subr.mxu0 %v58980_v54 }
 0xf73   :  { %51592 = vmatmul.mubr.f32.vlgmr.msra.gmra.mrb[112].mxu1 %v56654_v34  ;;  %51594 = vmatprep.subr.mxu1 %v58980_v54  ;;  %v47610_v34 = vld [vmem:[%s58977_s3 + $0x19] ss:$0 sm:$0xff] }
 0xf74   :  { %51202 = vmatmul.mubr.f32.vlgmr.msra.gmra.mrb[106].mxu0 %v56656_v0  ;;  %51595 = vmatpush3.xpose.msra.mxu1 %v34444_v37  ;;  %v53255_v31 = vadd.f32 %v47610_v34, %v57120_v23  ;;  %v47620_v23 = vld [vmem:[%s58977_s3 + $0x23] ss:$0 sm:$0xff]  ;;  %v47622_v34 = vld [vmem:[%s58977_s3 + $0x25] ss:$0 sm:$0xff] }
 0xf75   :  { %51205 = vmatpush3.xpose.msra.mxu0 %v28607_v3  ;;  %51596 = vmatprep.mubr.msk.f32.mxu1 %vm54248_vm3, %v58980_v54  ;;  %v53265_v36 = vadd.f32 %v47620_v23, %v57192_v53  ;;  %v47624_v23 = vld [vmem:[%s58977_s3 + $0x27] ss:$0 sm:$0xff] }
 0xf76   :  { %51206 = vmatprep.mubr.msk.f32.mxu0 %vm54248_vm3, %v58980_v54  ;;  %51209 = vmatprep.subr.mxu0 %v58980_v54  ;;  %v35262_v18 = vsel %vm11581_vm4, %v53255_v31, 0 }
 0xf77   :  { %51599 = vmatprep.subr.mxu1 %v58980_v54  ;;  %v57261_v58 = vand.u32 4294901760, %v35262_v18  ;;  %v36169_v12 = vsel %vm11581_vm4, %v53265_v36, 0 }
 0xf78   :  { %v57357_v15 = vand.u32 4294901760, %v36169_v12 }
 0xf7a   :  { %v36249_v22 = vsub.f32 %v36169_v12, %v57357_v15 }
 0xf7b   :  { %51597 = vmatmul.mubr.f32.vlgmr.msra.gmra.mrb[112].mxu1 %v56633_v7 }
 0xf7c   :  { %51207 = vmatmul.mubr.f32.vlgmr.msra.gmra.mrb[106].mxu0 %v56636_v38  ;;  %51600 = vmatpush3.xpose.msra.mxu1 %v34441_v29  ;;  %v36250_v26 = vand.u32 4294901760, %v36249_v22 }
 0xf7d   :  { %51210 = vmatpush3.xpose.msra.mxu0 %v57190_v52  ;;  %51601 = vmatprep.mubr.msk.f32.mxu1 %vm54248_vm3, %v58980_v54 }
 0xf7e   :  { %51211 = vmatprep.mubr.msk.f32.mxu0 %vm54248_vm3, %v58980_v54  ;;  %51214 = vmatprep.subr.mxu0 %v58980_v54  ;;  %v36251_v45 = vsub.f32 %v36249_v22, %v36250_v26 }
 0xf7f   :  { %51604 = vmatprep.subr.mxu1 %v58980_v54 }
 0xf80   :  { %v36252_v3 = vand.u32 4294901760, %v36251_v45 }
 0xf83   :  { %51602 = vmatmul.mubr.f32.vlgmr.msra.gmra.mrb[112].mxu1 %v56639_v57  ;;  %v53263_v57 = vadd.f32 %v47618_v17, %v57118_v16  ;;  %v47577_v17 = vld [vmem:[%s58976_s2 + $0x140] sm:$0xff] }
 0xf84   :  { %51212 = vmatmul.mubr.f32.vlgmr.msra.gmra.mrb[106].mxu0 %v56642_v40  ;;  %51605 = vmatpush3.xpose.msra.mxu1 %v57178_v32 }
 0xf85   :  { %51215 = vmatpush3.xpose.msra.mxu0 %v57182_v2  ;;  %51606 = vmatprep.mubr.msk.f32.mxu1 %vm54248_vm3, %v58980_v54  ;;  %v35265_v59 = vsel %vm11581_vm4, %v53263_v57, 0  ;;  %v31218_v57 = vsel %vm567_vm2, %v47577_v17, 0 }
 0xf86   :  { %51216 = vmatprep.mubr.msk.f32.mxu0 %vm54248_vm3, %v58980_v54  ;;  %51219 = vmatprep.subr.mxu0 %v58980_v54  ;;  %v57267_v46 = vand.u32 4294901760, %v35265_v59 }
 0xf87   :  { %51609 = vmatprep.subr.mxu1 %v58980_v54 }
 0xf88   :  { %v57280_v33 = vsub.f32 %v35265_v59, %v57267_v46  ;;  %v47614_v59 = vld [vmem:[%s58977_s3 + $0x1d] ss:$0 sm:$0xff] }
 0xf8a   :  { %v35346_v50 = vand.u32 4294901760, %v57280_v33 }
 0xf8b   :  { %51607 = vmatmul.mubr.f32.vlgmr.msra.gmra.mrb[112].mxu1 %v56645_v11  ;;  %v57274_v11 = vsub.f32 %v35262_v18, %v57261_v58  ;;  %v57431_v18 = vand.u32 4294901760, %v31218_v57 }
 0xf8c   :  { %51217 = vmatmul.mubr.f32.vlgmr.msra.gmra.mrb[106].mxu0 %v56648_v9  ;;  %51610 = vmatpush3.xpose.msra.mxu1 %v34442_v62  ;;  %v35347_v30 = vsub.f32 %v57280_v33, %v35346_v50 }
 0xf8d   :  { %51220 = vmatpush3.xpose.msra.mxu0 %v28605_v5  ;;  %51611 = vmatprep.mubr.msk.f32.mxu1 %vm54248_vm3, %v58980_v54  ;;  %v35335_v1 = vand.u32 4294901760, %v57274_v11  ;;  %v30402_v5 = vsub.f32 %v57365_v6, %v30401_v24 }
 0xf8e   :  { %51221 = vmatprep.mubr.msk.f32.mxu0 %vm54248_vm3, %v58980_v54  ;;  %51224 = vmatprep.subr.mxu0 %v58980_v54  ;;  %v35348_v16 = vand.u32 4294901760, %v35347_v30 }
 0xf8f   :  { %51614 = vmatprep.subr.mxu1 %v58980_v54  ;;  %v35336_v19 = vsub.f32 %v57274_v11, %v35335_v1  ;;  %v30403_v37 = vand.u32 4294901760, %v30402_v5 }
 0xf91   :  { %v35337_v10 = vand.u32 4294901760, %v35336_v19 }
 0xf92   :  { %v57282_v42 = vpop.f32.mrb[102].mxu1 }
 0xf93   :  { %v25825_v51 = vpop.f32.mrb[96].mxu0  ;;  %v51318_v13 = vpop.f32.mrb[103].mxu1  ;;  %51612 = vmatmul.mubr.f32.vlgmr.msra.gmra.mrb[112].mxu1 %v56633_v7  ;;  %v53267_v31 = vadd.f32 %v47622_v34, %v57282_v42  ;;  %v47581_v34 = vld [vmem:[%s58976_s2 + $0x160] sm:$0xff] }
 0xf94   :  { %v51018_v56 = vpop.f32.mrb[97].mxu0  ;;  %51222 = vmatmul.mubr.f32.vlgmr.msra.gmra.mrb[106].mxu0 %v56636_v38  ;;  %51615 = vmatpush3.xpose.msra.mxu1 %v57178_v32  ;;  %v33014_v17 = vsel %vm567_vm2, %v47581_v34, 0 }
 0xf95   :  { %51225 = vmatpush3.xpose.msra.mxu0 %v57182_v2  ;;  %51616 = vmatprep.mubr.msk.f32.mxu1 %vm54248_vm3, %v58980_v54  ;;  %v37073_v55 = vsel %vm11581_vm4, %v53267_v31, 0  ;;  %v33017_v31 = vand.u32 4294901760, %v33014_v17 }
 0xf96   :  { %51649 = vmatprep.subr.mxu1 %v58980_v54  ;;  %51226 = vmatprep.mubr.msk.f32.mxu0 %vm54248_vm3, %v58980_v54  ;;  %v57437_v28 = vand.u32 4294901760, %v37073_v55 }
 0xf97   :  { %51259 = vmatprep.subr.mxu0 %v58980_v54 }
 0xf9b   :  { %51617 = vmatmul.mubr.f32.vlgmr.msra.gmra.mrb[112].mxu1 %v56633_v7  ;;  %v47612_v7 = vld [vmem:[%s58977_s3 + $0x1b] ss:$0 sm:$0xff] }
 0xf9c   :  { %51650 = vmatpush3.xpose.msra.mxu1 %v57267_v46  ;;  %51227 = vmatmul.mubr.f32.vlgmr.msra.gmra.mrb[106].mxu0 %v56636_v38  ;;  %v53257_v47 = vadd.f32 %v47612_v7, %v25825_v51  ;;  %v47616_v7 = vld [vmem:[%s58977_s3 + $0x1f] ss:$0 sm:$0xff] }
 0xf9d   :  { %51260 = vmatpush3.xpose.msra.mxu0 %v57265_v14  ;;  %51651 = vmatprep.mubr.msk.f32.mxu1 %vm54248_vm3, %v58980_v54  ;;  %v53261_v36 = vadd.f32 %v47616_v7, %v57046_v61 }
 0xf9e   :  { %51654 = vmatprep.subr.mxu1 %v58980_v54  ;;  %51261 = vmatprep.mubr.msk.f32.mxu0 %vm54248_vm3, %v58980_v54  ;;  %v36166_v8 = vsel %vm11581_vm4, %v53257_v47, 0  ;;  %v47579_v47 = vld [vmem:[%s58976_s2 + $0x150] sm:$0xff] }
 0xf9f   :  { %51652 = vmatmul.mubr.f32.vlgmr.msra.gmra.mrb[114].mxu1 %v35337_v10  ;;  %51264 = vmatprep.subr.mxu0 %v58980_v54  ;;  %v57351_v20 = vand.u32 4294901760, %v36166_v8  ;;  %v37974_v4 = vsel %vm11581_vm4, %v53261_v36, 0 }
 0xfa0   :  { %51655 = vmatpush3.xpose.msra.mxu1 %v35348_v16  ;;  %51262 = vmatmul.mubr.f32.vlgmr.msra.gmra.mrb[108].mxu0 %v56656_v0  ;;  %v57523_v61 = vand.u32 4294901760, %v37974_v4 }
 0xfa1   :  { %51265 = vmatpush3.xpose.msra.mxu0 %v29505_v21  ;;  %51656 = vmatprep.mubr.msk.f32.mxu1 %vm54248_vm3, %v58980_v54  ;;  %v36238_v39 = vsub.f32 %v36166_v8, %v57351_v20  ;;  %v32116_v8 = vsel %vm567_vm2, %v47579_v47, 0 }
 0xfa2   :  { %51659 = vmatprep.subr.mxu1 %v58980_v54  ;;  %51266 = vmatprep.mubr.msk.f32.mxu0 %vm54248_vm3, %v58980_v54 }
 0xfa3   :  { %51269 = vmatprep.subr.mxu0 %v58980_v54  ;;  %v36239_v53 = vand.u32 4294901760, %v36238_v39 }
 0xfa5   :  { %v36240_v62 = vsub.f32 %v36238_v39, %v36239_v53 }
 0xfa7   :  { %51657 = vmatmul.mubr.f32.vlgmr.msra.gmra.mrb[114].mxu1 %v57261_v58  ;;  %v36241_v41 = vand.u32 4294901760, %v36240_v62 }
 0xfa8   :  { %51660 = vmatpush3.xpose.msra.mxu1 %v57280_v33  ;;  %51267 = vmatmul.mubr.f32.vlgmr.msra.gmra.mrb[108].mxu0 %v56636_v38 }
 0xfa9   :  { %51270 = vmatpush3.xpose.msra.mxu0 %v57277_v49  ;;  %51661 = vmatprep.mubr.msk.f32.mxu1 %vm54248_vm3, %v58980_v54  ;;  %v57449_v49 = vsub.f32 %v37073_v55, %v57437_v28 }
 0xfaa   :  { %51664 = vmatprep.subr.mxu1 %v58980_v54  ;;  %51271 = vmatprep.mubr.msk.f32.mxu0 %vm54248_vm3, %v58980_v54 }
 0xfab   :  { %51274 = vmatprep.subr.mxu0 %v58980_v54 }
 0xfaf   :  { %51662 = vmatmul.mubr.f32.vlgmr.msra.gmra.mrb[114].mxu1 %v57274_v11 }
 0xfb0   :  { %51665 = vmatpush3.xpose.msra.mxu1 %v57267_v46  ;;  %51272 = vmatmul.mubr.f32.vlgmr.msra.gmra.mrb[108].mxu0 %v56642_v40 }
 0xfb1   :  { %51275 = vmatpush3.xpose.msra.mxu0 %v57265_v14  ;;  %51666 = vmatprep.mubr.msk.f32.mxu1 %vm54248_vm3, %v58980_v54 }
 0xfb2   :  { %51669 = vmatprep.subr.mxu1 %v58980_v54  ;;  %51276 = vmatprep.mubr.msk.f32.mxu0 %vm54248_vm3, %v58980_v54 }
 0xfb3   :  { %51279 = vmatprep.subr.mxu0 %v58980_v54 }
 0xfb7   :  { %51667 = vmatmul.mubr.f32.vlgmr.msra.gmra.mrb[114].mxu1 %v35335_v1  ;;  %v37154_v1 = vand.u32 4294901760, %v57449_v49 }
 0xfb8   :  { %51670 = vmatpush3.xpose.msra.mxu1 %v35346_v50  ;;  %51277 = vmatmul.mubr.f32.vlgmr.msra.gmra.mrb[108].mxu0 %v56648_v9 }
 0xfb9   :  { %51280 = vmatpush3.xpose.msra.mxu0 %v29503_v25  ;;  %51671 = vmatprep.mubr.msk.f32.mxu1 %vm54248_vm3, %v58980_v54  ;;  %v37155_v44 = vsub.f32 %v57449_v49, %v37154_v1 }
 0xfba   :  { %51674 = vmatprep.subr.mxu1 %v58980_v54  ;;  %51281 = vmatprep.mubr.msk.f32.mxu0 %vm54248_vm3, %v58980_v54 }
 0xfbb   :  { %51284 = vmatprep.subr.mxu0 %v58980_v54  ;;  %v37156_v16 = vand.u32 4294901760, %v37155_v44 }
 0xfbe   :  { %v57368_v32 = vpop.f32.mrb[104].mxu1 }
 0xfbf   :  { %v57370_v2 = vpop.f32.mrb[98].mxu0  ;;  %v51378_v29 = vpop.f32.mrb[105].mxu1  ;;  %51672 = vmatmul.mubr.f32.vlgmr.msra.gmra.mrb[114].mxu1 %v57261_v58  ;;  %v53269_v63 = vadd.f32 %v47624_v23, %v57368_v32 }
 0xfc0   :  { %51675 = vmatpush3.xpose.msra.mxu1 %v57267_v46  ;;  %v51048_v52 = vpop.f32.mrb[99].mxu0  ;;  %51282 = vmatmul.mubr.f32.vlgmr.msra.gmra.mrb[108].mxu0 %v56636_v38 }
 0xfc1   :  { %51285 = vmatpush3.xpose.msra.mxu0 %v57265_v14  ;;  %51676 = vmatprep.mubr.msk.f32.mxu1 %vm54248_vm3, %v58980_v54  ;;  %v37977_v12 = vsel %vm11581_vm4, %v53269_v63, 0 }
 0xfc2   :  { %51709 = vmatprep.subr.mxu1 %v58980_v54  ;;  %51286 = vmatprep.mubr.msk.f32.mxu0 %vm54248_vm3, %v58980_v54 }
 0xfc3   :  { %51319 = vmatprep.subr.mxu0 %v58980_v54 }
 0xfc7   :  { %51677 = vmatmul.mubr.f32.vlgmr.msra.gmra.mrb[114].mxu1 %v57261_v58  ;;  %v57443_v58 = vsub.f32 %v31218_v57, %v57431_v18  ;;  %v33094_v57 = vsub.f32 %v33014_v17, %v33017_v31 }
 0xfc8   :  { %51710 = vmatpush3.xpose.msra.mxu1 %v57357_v15  ;;  %51287 = vmatmul.mubr.f32.vlgmr.msra.gmra.mrb[108].mxu0 %v56636_v38 }
 0xfc9   :  { %51320 = vmatpush3.xpose.msra.mxu0 %v57355_v35  ;;  %51711 = vmatprep.mubr.msk.f32.mxu1 %vm54248_vm3, %v58980_v54  ;;  %v31299_v51 = vand.u32 4294901760, %v57443_v58 }
 0xfca   :  { %51714 = vmatprep.subr.mxu1 %v58980_v54  ;;  %51321 = vmatprep.mubr.msk.f32.mxu0 %vm54248_vm3, %v58980_v54 }
 0xfcb   :  { %51712 = vmatmul.mubr.f32.vlgmr.msra.gmra.mrb[116].mxu1 %v36241_v41  ;;  %51324 = vmatprep.subr.mxu0 %v58980_v54  ;;  %v31300_v50 = vsub.f32 %v57443_v58, %v31299_v51 }
 0xfcc   :  { %51715 = vmatpush3.xpose.msra.mxu1 %v36252_v3  ;;  %51322 = vmatmul.mubr.f32.vlgmr.msra.gmra.mrb[110].mxu0 %v56656_v0 }
 0xfcd   :  { %51325 = vmatpush3.xpose.msra.mxu0 %v30403_v37  ;;  %51716 = vmatprep.mubr.msk.f32.mxu1 %vm54248_vm3, %v58980_v54  ;;  %v31301_v10 = vand.u32 4294901760, %v31300_v50 }
 0xfce   :  { %51719 = vmatprep.subr.mxu1 %v58980_v54  ;;  %51326 = vmatprep.mubr.msk.f32.mxu0 %vm54248_vm3, %v58980_v54 }
 0xfcf   :  { %51329 = vmatprep.subr.mxu0 %v58980_v54 }
 0xfd3   :  { %51717 = vmatmul.mubr.f32.vlgmr.msra.gmra.mrb[116].mxu1 %v57351_v20 }
 0xfd4   :  { %51720 = vmatpush3.xpose.msra.mxu1 %v36249_v22  ;;  %51327 = vmatmul.mubr.f32.vlgmr.msra.gmra.mrb[110].mxu0 %v56636_v38 }
 0xfd5   :  { %51330 = vmatpush3.xpose.msra.mxu0 %v57365_v6  ;;  %51721 = vmatprep.mubr.msk.f32.mxu1 %vm54248_vm3, %v58980_v54  ;;  %v38046_v6 = vsub.f32 %v37974_v4, %v57523_v61 }
 0xfd6   :  { %51724 = vmatprep.subr.mxu1 %v58980_v54  ;;  %51331 = vmatprep.mubr.msk.f32.mxu0 %vm54248_vm3, %v58980_v54 }
 0xfd7   :  { %51334 = vmatprep.subr.mxu0 %v58980_v54 }
 0xfdb   :  { %51722 = vmatmul.mubr.f32.vlgmr.msra.gmra.mrb[116].mxu1 %v36238_v39 }
 0xfdc   :  { %51725 = vmatpush3.xpose.msra.mxu1 %v57357_v15  ;;  %51332 = vmatmul.mubr.f32.vlgmr.msra.gmra.mrb[110].mxu0 %v56642_v40 }
 0xfdd   :  { %51335 = vmatpush3.xpose.msra.mxu0 %v57355_v35  ;;  %51726 = vmatprep.mubr.msk.f32.mxu1 %vm54248_vm3, %v58980_v54 }
 0xfde   :  { %51729 = vmatprep.subr.mxu1 %v58980_v54  ;;  %51336 = vmatprep.mubr.msk.f32.mxu0 %vm54248_vm3, %v58980_v54 }
 0xfdf   :  { %51339 = vmatprep.subr.mxu0 %v58980_v54 }
 0xfe3   :  { %51727 = vmatmul.mubr.f32.vlgmr.msra.gmra.mrb[116].mxu1 %v36239_v53 }
 0xfe4   :  { %51730 = vmatpush3.xpose.msra.mxu1 %v36250_v26  ;;  %51337 = vmatmul.mubr.f32.vlgmr.msra.gmra.mrb[110].mxu0 %v56648_v9 }
 0xfe5   :  { %51340 = vmatpush3.xpose.msra.mxu0 %v30401_v24  ;;  %51731 = vmatprep.mubr.msk.f32.mxu1 %vm54248_vm3, %v58980_v54  ;;  %v38047_v24 = vand.u32 4294901760, %v38046_v6 }
 0xfe6   :  { %51734 = vmatprep.subr.mxu1 %v58980_v54  ;;  %51341 = vmatprep.mubr.msk.f32.mxu0 %vm54248_vm3, %v58980_v54 }
 0xfe7   :  { %51344 = vmatprep.subr.mxu0 %v58980_v54  ;;  %v38048_v5 = vsub.f32 %v38046_v6, %v38047_v24 }
 0xfe9   :  { %v38049_v37 = vand.u32 4294901760, %v38048_v5 }
 0xfea   :  { %v57445_v14 = vpop.f32.mrb[106].mxu1 }
 0xfeb   :  { %v26723_v46 = vpop.f32.mrb[100].mxu0  ;;  %v51438_v11 = vpop.f32.mrb[107].mxu1  ;;  %51732 = vmatmul.mubr.f32.vlgmr.msra.gmra.mrb[116].mxu1 %v57351_v20 }
 0xfec   :  { %v53259_v33 = vadd.f32 %v47614_v59, %v26723_v46  ;;  %51735 = vmatpush3.xpose.msra.mxu1 %v57357_v15  ;;  %v51078_v42 = vpop.f32.mrb[101].mxu0  ;;  %51342 = vmatmul.mubr.f32.vlgmr.msra.gmra.mrb[110].mxu0 %v56636_v38  ;;  %v33095_v46 = vand.u32 4294901760, %v33094_v57 }
 0xfed   :  { %51345 = vmatpush3.xpose.msra.mxu0 %v57355_v35  ;;  %51736 = vmatprep.mubr.msk.f32.mxu1 %vm54248_vm3, %v58980_v54  ;;  %v57528_v35 = vand.u32 4294901760, %v37977_v12 }
 0xfee   :  { %v37070_v13 = vsel %vm11581_vm4, %v53259_v33, 0  ;;  %51769 = vmatprep.subr.mxu1 %v58980_v54  ;;  %51346 = vmatprep.mubr.msk.f32.mxu0 %vm54248_vm3, %v58980_v54 }
 0xfef   :  { %v57461_v56 = vand.u32 4294901760, %v37070_v13  ;;  %51379 = vmatprep.subr.mxu0 %v58980_v54  ;;  %v38057_v29 = vsub.f32 %v37977_v12, %v57528_v35 }
 0xff1   :  { %v37142_v25 = vsub.f32 %v37070_v13, %v57461_v56  ;;  %v38058_v26 = vand.u32 4294901760, %v38057_v29 }
 0xff3   :  { %v37143_v19 = vand.u32 4294901760, %v37142_v25  ;;  %51737 = vmatmul.mubr.f32.vlgmr.msra.gmra.mrb[116].mxu1 %v57351_v20  ;;  %v57519_v20 = vand.u32 4294901760, %v32116_v8  ;;  %v38059_v45 = vsub.f32 %v38057_v29, %v38058_v26 }
 0xff4   :  { %51770 = vmatpush3.xpose.msra.mxu1 %v57437_v28  ;;  %51347 = vmatmul.mubr.f32.vlgmr.msra.gmra.mrb[110].mxu0 %v56636_v38 }
 0xff5   :  { %51380 = vmatpush3.xpose.msra.mxu0 %v57431_v18  ;;  %51381 = vmatprep.mubr.msk.f32.mxu0 %vm54248_vm3, %v58980_v54  ;;  %v37144_v30 = vsub.f32 %v37142_v25, %v37143_v19  ;;  %v32196_v15 = vsub.f32 %v32116_v8, %v57519_v20  ;;  %v38060_v3 = vand.u32 4294901760, %v38059_v45 }
 0xff6   :  { %51771 = vmatprep.mubr.msk.f32.mxu1 %vm54248_vm3, %v58980_v54  ;;  %51774 = vmatprep.subr.mxu1 %v58980_v54 }
 0xff7   :  { %51384 = vmatprep.subr.mxu0 %v58980_v54  ;;  %v37145_v21 = vand.u32 4294901760, %v37144_v30  ;;  %v32197_v53 = vand.u32 4294901760, %v32196_v15 }
 0xff8   :  { %51382 = vmatmul.mubr.f32.vlgmr.msra.gmra.mrb[112].mxu0 %v56656_v0 }
 0xff9   :  { %51772 = vmatmul.mubr.f32.vlgmr.msra.gmra.mrb[118].mxu1 %v37145_v21  ;;  %51385 = vmatpush3.xpose.msra.mxu0 %v31301_v10  ;;  %v32198_v62 = vsub.f32 %v32196_v15, %v32197_v53  ;;  %v47609_v21 = vld [vmem:[%s58977_s3 + $0x18] ss:$0 sm:$0xff] }
 0xffa   :  { %51775 = vmatpush3.xpose.msra.mxu1 %v37156_v16  ;;  %51386 = vmatprep.mubr.msk.f32.mxu0 %vm54248_vm3, %v58980_v54  ;;  %v53254_v16 = vadd.f32 %v47609_v21, %v57048_v43 }
 0xffb   :  { %51776 = vmatprep.mubr.msk.f32.mxu1 %vm54248_vm3, %v58980_v54  ;;  %51779 = vmatprep.subr.mxu1 %v58980_v54  ;;  %v32199_v41 = vand.u32 4294901760, %v32198_v62 }
 0xffc   :  { %51389 = vmatprep.subr.mxu0 %v58980_v54  ;;  %v34810_v23 = vsel %vm11581_vm4, %v53254_v16, 0 }
0x1000   :  { %51387 = vmatmul.mubr.f32.vlgmr.msra.gmra.mrb[112].mxu0 %v56636_v38 }
0x1001   :  { %51777 = vmatmul.mubr.f32.vlgmr.msra.gmra.mrb[118].mxu1 %v57461_v56  ;;  %51390 = vmatpush3.xpose.msra.mxu0 %v57443_v58  ;;  %v47626_v58 = vld [vmem:[%s58977_s3 + $0x29] ss:$0 sm:$0xff] }
0x1002   :  { %51780 = vmatpush3.xpose.msra.mxu1 %v57449_v49  ;;  %51391 = vmatprep.mubr.msk.f32.mxu0 %vm54248_vm3, %v58980_v54  ;;  %v57610_v11 = vadd.f32 %v47626_v58, %v57445_v14  ;;  %v33096_v49 = vsub.f32 %v33094_v57, %v33095_v46  ;;  %v47583_v14 = vld [vmem:[%s58976_s2 + $0x170] sm:$0xff] }
0x1003   :  { %51781 = vmatprep.mubr.msk.f32.mxu1 %vm54248_vm3, %v58980_v54  ;;  %51784 = vmatprep.subr.mxu1 %v58980_v54 }
0x1004   :  { %51394 = vmatprep.subr.mxu0 %v58980_v54  ;;  %v57614_v33 = vand.u32 4294901760, %v57610_v11  ;;  %v33097_v42 = vand.u32 4294901760, %v33096_v49  ;;  %v47613_v49 = vld [vmem:[%s58977_s3 + $0x1c] ss:$0 sm:$0xff] }
0x1008   :  { %51392 = vmatmul.mubr.f32.vlgmr.msra.gmra.mrb[112].mxu0 %v56642_v40 }
0x1009   :  { %51782 = vmatmul.mubr.f32.vlgmr.msra.gmra.mrb[118].mxu1 %v37142_v25  ;;  %51395 = vmatpush3.xpose.msra.mxu0 %v57431_v18 }
0x100a   :  { %51785 = vmatpush3.xpose.msra.mxu1 %v57437_v28  ;;  %51396 = vmatprep.mubr.msk.f32.mxu0 %vm54248_vm3, %v58980_v54 }
0x100b   :  { %51786 = vmatprep.mubr.msk.f32.mxu1 %vm54248_vm3, %v58980_v54  ;;  %51789 = vmatprep.subr.mxu1 %v58980_v54 }
0x100c   :  { %51399 = vmatprep.subr.mxu0 %v58980_v54 }
0x1010   :  { %51397 = vmatmul.mubr.f32.vlgmr.msra.gmra.mrb[112].mxu0 %v56648_v9 }
0x1011   :  { %51787 = vmatmul.mubr.f32.vlgmr.msra.gmra.mrb[118].mxu1 %v37143_v19  ;;  %51400 = vmatpush3.xpose.msra.mxu0 %v31299_v51  ;;  %v33912_v51 = vsel %vm567_vm2, %v47583_v14, 0  ;;  %v53258_v14 = vadd.f32 %v47613_v49, %v57370_v2 }
0x1012   :  { %51790 = vmatpush3.xpose.msra.mxu1 %v37154_v1  ;;  %51401 = vmatprep.mubr.msk.f32.mxu0 %vm54248_vm3, %v58980_v54  ;;  %v33915_v13 = vand.u32 4294901760, %v33912_v51 }
0x1013   :  { %51791 = vmatprep.mubr.msk.f32.mxu1 %vm54248_vm3, %v58980_v54  ;;  %51794 = vmatprep.subr.mxu1 %v58980_v54 }
0x1014   :  { %51404 = vmatprep.subr.mxu0 %v58980_v54 }
0x1016   :  { %v57532_v39 = vpop.f32.mrb[108].mxu1 }
0x1017   :  { %v57535_v22 = vpop.f32.mrb[102].mxu0  ;;  %v51498_v32 = vpop.f32.mrb[109].mxu1 }
0x1018   :  { %v51108_v52 = vpop.f32.mrb[103].mxu0  ;;  %51402 = vmatmul.mubr.f32.vlgmr.msra.gmra.mrb[112].mxu0 %v56636_v38 }
0x1019   :  { %51792 = vmatmul.mubr.f32.vlgmr.msra.gmra.mrb[118].mxu1 %v57461_v56  ;;  %51405 = vmatpush3.xpose.msra.mxu0 %v57431_v18  ;;  %v47619_v52 = vld [vmem:[%s58977_s3 + $0x22] ss:$0 sm:$0xff] }
0x101a   :  { %51795 = vmatpush3.xpose.msra.mxu1 %v57437_v28  ;;  %51406 = vmatprep.mubr.msk.f32.mxu0 %vm54248_vm3, %v58980_v54 }
0x101b   :  { %51439 = vmatprep.subr.mxu0 %v58980_v54  ;;  %51796 = vmatprep.mubr.msk.f32.mxu1 %vm54248_vm3, %v58980_v54 }
0x101c   :  { %51829 = vmatprep.subr.mxu1 %v58980_v54 }
0x1020   :  { %51407 = vmatmul.mubr.f32.vlgmr.msra.gmra.mrb[112].mxu0 %v56636_v38 }
0x1021   :  { %51440 = vmatpush3.xpose.msra.mxu0 %v57519_v20  ;;  %51797 = vmatmul.mubr.f32.vlgmr.msra.gmra.mrb[118].mxu1 %v57461_v56  ;;  %v33992_v56 = vsub.f32 %v33912_v51, %v33915_v13 }
0x1022   :  { %51830 = vmatpush3.xpose.msra.mxu1 %v57528_v35  ;;  %51441 = vmatprep.mubr.msk.f32.mxu0 %vm54248_vm3, %v58980_v54 }
0x1023   :  { %51831 = vmatprep.mubr.msk.f32.mxu1 %vm54248_vm3, %v58980_v54  ;;  %51834 = vmatprep.subr.mxu1 %v58980_v54  ;;  %v33993_v44 = vand.u32 4294901760, %v33992_v56 }
0x1024   :  { %51442 = vmatmul.mubr.f32.vlgmr.msra.gmra.mrb[114].mxu0 %v56656_v0  ;;  %51444 = vmatprep.subr.mxu0 %v58980_v54 }
0x1025   :  { %51832 = vmatmul.mubr.f32.vlgmr.msra.gmra.mrb[120].mxu1 %v38049_v37  ;;  %51445 = vmatpush3.xpose.msra.mxu0 %v32199_v41  ;;  %v33994_v30 = vsub.f32 %v33992_v56, %v33993_v44 }
0x1026   :  { %51835 = vmatpush3.xpose.msra.mxu1 %v38060_v3  ;;  %51446 = vmatprep.mubr.msk.f32.mxu0 %vm54248_vm3, %v58980_v54 }
0x1027   :  { %51836 = vmatprep.mubr.msk.f32.mxu1 %vm54248_vm3, %v58980_v54  ;;  %51839 = vmatprep.subr.mxu1 %v58980_v54  ;;  %v33995_v10 = vand.u32 4294901760, %v33994_v30 }
0x1028   :  { %51449 = vmatprep.subr.mxu0 %v58980_v54 }
0x102c   :  { %51447 = vmatmul.mubr.f32.vlgmr.msra.gmra.mrb[114].mxu0 %v56636_v38 }
0x102d   :  { %51837 = vmatmul.mubr.f32.vlgmr.msra.gmra.mrb[120].mxu1 %v57523_v61  ;;  %51450 = vmatpush3.xpose.msra.mxu0 %v32196_v15 }
0x102e   :  { %51840 = vmatpush3.xpose.msra.mxu1 %v38057_v29  ;;  %51451 = vmatprep.mubr.msk.f32.mxu0 %vm54248_vm3, %v58980_v54 }
0x102f   :  { %51841 = vmatprep.mubr.msk.f32.mxu1 %vm54248_vm3, %v58980_v54  ;;  %51844 = vmatprep.subr.mxu1 %v58980_v54 }
0x1030   :  { %51454 = vmatprep.subr.mxu0 %v58980_v54 }
0x1034   :  { %51452 = vmatmul.mubr.f32.vlgmr.msra.gmra.mrb[114].mxu0 %v56642_v40 }
0x1035   :  { %51842 = vmatmul.mubr.f32.vlgmr.msra.gmra.mrb[120].mxu1 %v38046_v6  ;;  %51455 = vmatpush3.xpose.msra.mxu0 %v57519_v20 }
0x1036   :  { %51845 = vmatpush3.xpose.msra.mxu1 %v57528_v35  ;;  %51456 = vmatprep.mubr.msk.f32.mxu0 %vm54248_vm3, %v58980_v54 }
0x1037   :  { %51846 = vmatprep.mubr.msk.f32.mxu1 %vm54248_vm3, %v58980_v54  ;;  %51849 = vmatprep.subr.mxu1 %v58980_v54 }
0x1038   :  { %51459 = vmatprep.subr.mxu0 %v58980_v54 }
0x103c   :  { %51457 = vmatmul.mubr.f32.vlgmr.msra.gmra.mrb[114].mxu0 %v56648_v9 }
0x103d   :  { %51847 = vmatmul.mubr.f32.vlgmr.msra.gmra.mrb[120].mxu1 %v38047_v24  ;;  %51460 = vmatpush3.xpose.msra.mxu0 %v32197_v53 }
0x103e   :  { %51850 = vmatpush3.xpose.msra.mxu1 %v38058_v26  ;;  %51461 = vmatprep.mubr.msk.f32.mxu0 %vm54248_vm3, %v58980_v54 }
0x103f   :  { %51851 = vmatprep.mubr.msk.f32.mxu1 %vm54248_vm3, %v58980_v54  ;;  %51854 = vmatprep.subr.mxu1 %v58980_v54 }
0x1040   :  { %51464 = vmatprep.subr.mxu0 %v58980_v54 }
0x1042   :  { %v57593_v55 = vpop.f32.mrb[110].mxu1 }
0x1043   :  { %v57595_v18 = vpop.f32.mrb[104].mxu0  ;;  %v51558_v28 = vpop.f32.mrb[111].mxu1 }
0x1044   :  { %v51168_v59 = vpop.f32.mrb[105].mxu0  ;;  %51462 = vmatmul.mubr.f32.vlgmr.msra.gmra.mrb[114].mxu0 %v56636_v38 }
0x1045   :  { %51852 = vmatmul.mubr.f32.vlgmr.msra.gmra.mrb[120].mxu1 %v57523_v61  ;;  %51465 = vmatpush3.xpose.msra.mxu0 %v57519_v20 }
0x1046   :  { %51855 = vmatpush3.xpose.msra.mxu1 %v57528_v35  ;;  %51466 = vmatprep.mubr.msk.f32.mxu0 %vm54248_vm3, %v58980_v54 }
0x1047   :  { %51499 = vmatprep.subr.mxu0 %v58980_v54  ;;  %51856 = vmatprep.mubr.msk.f32.mxu1 %vm54248_vm3, %v58980_v54 }
0x1048   :  { %51889 = vmatprep.subr.mxu1 %v58980_v54 }
0x104c   :  { %51467 = vmatmul.mubr.f32.vlgmr.msra.gmra.mrb[114].mxu0 %v56636_v38 }
0x104d   :  { %51500 = vmatpush3.xpose.msra.mxu0 %v33017_v31  ;;  %51857 = vmatmul.mubr.f32.vlgmr.msra.gmra.mrb[120].mxu1 %v57523_v61 }
0x104e   :  { %51890 = vmatpush3.msra.mxu1 %v57614_v33  ;;  %51501 = vmatprep.mubr.msk.f32.mxu0 %vm54248_vm3, %v58980_v54 }
0x104f   :  { %51504 = vmatprep.subr.mxu0 %v58980_v54  ;;  %51891 = vmatprep.mubr.msk.f32.mxu1 %vm54248_vm3, %v58980_v54 }
0x1050   :  { %51502 = vmatmul.mubr.f32.vlgmr.msra.gmra.mrb[116].mxu0 %v56656_v0  ;;  %51894 = vmatprep.subr.mxu1 %v58980_v54 }
0x1051   :  { %51505 = vmatpush3.xpose.msra.mxu0 %v33097_v42  ;;  %51506 = vmatprep.mubr.msk.f32.mxu0 %vm54248_vm3, %v58980_v54  ;;  %v47621_v42 = vld [vmem:[%s58977_s3 + $0x24] ss:$0 sm:$0xff] }
0x1052   :  { %51509 = vmatprep.subr.mxu0 %v58980_v54 }
0x1058   :  { %51507 = vmatmul.mubr.f32.vlgmr.msra.gmra.mrb[116].mxu0 %v56636_v38 }
0x1059   :  { %51510 = vmatpush3.xpose.msra.mxu0 %v33094_v57  ;;  %51511 = vmatprep.mubr.msk.f32.mxu0 %vm54248_vm3, %v58980_v54 }
0x105a   :  { %51514 = vmatprep.subr.mxu0 %v58980_v54 }
0x1060   :  { %51512 = vmatmul.mubr.f32.vlgmr.msra.gmra.mrb[116].mxu0 %v56642_v40 }
0x1061   :  { %51515 = vmatpush3.xpose.msra.mxu0 %v33017_v31  ;;  %51516 = vmatprep.mubr.msk.f32.mxu0 %vm54248_vm3, %v58980_v54 }
0x1062   :  { %51519 = vmatprep.subr.mxu0 %v58980_v54 }
0x1068   :  { %51517 = vmatmul.mubr.f32.vlgmr.msra.gmra.mrb[116].mxu0 %v56648_v9 }
0x1069   :  { %51520 = vmatpush3.xpose.msra.mxu0 %v33095_v46  ;;  %51521 = vmatprep.mubr.msk.f32.mxu0 %vm54248_vm3, %v58980_v54 }
0x106a   :  { %51524 = vmatprep.subr.mxu0 %v58980_v54 }
0x106e   :  { %v57645_v1 = vpop.f32.mrb[112].mxu1 }
0x106f   :  { %v57647_v25 = vpop.f32.mrb[106].mxu0  ;;  %v51618_v50 = vpop.f32.mrb[113].mxu1 }
0x1070   :  { %v51228_v19 = vpop.f32.mrb[107].mxu0  ;;  %51522 = vmatmul.mubr.f32.vlgmr.msra.gmra.mrb[116].mxu0 %v56636_v38  ;;  %v53264_v24 = vadd.f32 %v47619_v52, %v57647_v25 }
0x1071   :  { %51525 = vmatpush3.xpose.msra.mxu0 %v33017_v31  ;;  %51526 = vmatprep.mubr.msk.f32.mxu0 %vm54248_vm3, %v58980_v54 }
0x1072   :  { %51559 = vmatprep.subr.mxu0 %v58980_v54  ;;  %v35717_v62 = vsel %vm11581_vm4, %v53264_v24, 0 }
0x1073   :  { %v35720_v45 = vand.u32 4294901760, %v35717_v62 }
0x1078   :  { %51527 = vmatmul.mubr.f32.vlgmr.msra.gmra.mrb[116].mxu0 %v56636_v38 }
0x1079   :  { %51560 = vmatpush3.xpose.msra.mxu0 %v33915_v13  ;;  %51561 = vmatprep.mubr.msk.f32.mxu0 %vm54248_vm3, %v58980_v54 }
0x107a   :  { %51564 = vmatprep.subr.mxu0 %v58980_v54 }
0x107c   :  { %51562 = vmatmul.mubr.f32.vlgmr.msra.gmra.mrb[118].mxu0 %v56656_v0  ;;  %v47617_v0 = vld [vmem:[%s58977_s3 + $0x20] ss:$0 sm:$0xff] }
0x107d   :  { %51565 = vmatpush3.xpose.msra.mxu0 %v33995_v10  ;;  %51566 = vmatprep.mubr.msk.f32.mxu0 %vm54248_vm3, %v58980_v54  ;;  %v53262_v7 = vadd.f32 %v47617_v0, %v57595_v18 }
0x107e   :  { %51569 = vmatprep.subr.mxu0 %v58980_v54 }
0x107f   :  { %v34813_v47 = vsel %vm11581_vm4, %v53262_v7, 0 }
0x1080   :  { %v34816_v36 = vand.u32 4294901760, %v34813_v47 }
0x1082   :  { %v34893_v8 = vsub.f32 %v34813_v47, %v34816_v36 }
0x1084   :  { %51567 = vmatmul.mubr.f32.vlgmr.msra.gmra.mrb[118].mxu0 %v56636_v38  ;;  %v34894_v35 = vand.u32 4294901760, %v34893_v8 }
0x1085   :  { %51570 = vmatpush3.xpose.msra.mxu0 %v33992_v56  ;;  %51571 = vmatprep.mubr.msk.f32.mxu0 %vm54248_vm3, %v58980_v54 }
0x1086   :  { %51574 = vmatprep.subr.mxu0 %v58980_v54  ;;  %v34895_v6 = vsub.f32 %v34893_v8, %v34894_v35 }
0x1088   :  { %v34896_v29 = vand.u32 4294901760, %v34895_v6 }
0x108c   :  { %51572 = vmatmul.mubr.f32.vlgmr.msra.gmra.mrb[118].mxu0 %v56642_v40  ;;  %v57682_v40 = vand.u32 4294901760, %v34810_v23 }
0x108d   :  { %51575 = vmatpush3.xpose.msra.mxu0 %v33915_v13  ;;  %51576 = vmatprep.mubr.msk.f32.mxu0 %vm54248_vm3, %v58980_v54 }
0x108e   :  { %51579 = vmatprep.subr.mxu0 %v58980_v54  ;;  %v34882_v63 = vsub.f32 %v34810_v23, %v57682_v40 }
0x1090   :  { %v34883_v61 = vand.u32 4294901760, %v34882_v63 }
0x1092   :  { %v34884_v15 = vsub.f32 %v34882_v63, %v34883_v61 }
0x1094   :  { %51577 = vmatmul.mubr.f32.vlgmr.msra.gmra.mrb[118].mxu0 %v56648_v9  ;;  %v34885_v32 = vand.u32 4294901760, %v34884_v15 }
0x1095   :  { %51580 = vmatpush3.xpose.msra.mxu0 %v33993_v44  ;;  %51581 = vmatprep.mubr.msk.f32.mxu0 %vm54248_vm3, %v58980_v54 }
0x1096   :  { %51584 = vmatprep.subr.mxu0 %v58980_v54 }
0x109a   :  { %v57686_v43 = vpop.f32.mrb[114].mxu1 }
0x109b   :  { %v57688_v4 = vpop.f32.mrb[108].mxu0  ;;  %v51678_v12 = vpop.f32.mrb[115].mxu1  ;;  %v38428_v9 = vsel %vm11581_vm4, %v57686_v43, -inf }
0x109c   :  { %51582 = vmatmul.mubr.f32.vlgmr.msra.gmra.mrb[118].mxu0 %v56636_v38  ;;  %38429 = vmax.xlane.f32.xlu1 %v38428_v9  ;;  %v51288_v20 = vpop.f32.mrb[109].mxu0  ;;  %v53266_v51 = vadd.f32 %v47621_v42, %v57688_v4 }
0x109d   :  { %51585 = vmatpush3.xpose.msra.mxu0 %v33915_v13  ;;  %51586 = vmatprep.mubr.msk.f32.mxu0 %vm54248_vm3, %v58980_v54  ;;  %v36618_v13 = vsel %vm11581_vm4, %v53258_v14, 0 }
0x109e   :  { %51619 = vmatprep.subr.mxu0 %v58980_v54  ;;  %v36621_v56 = vsel %vm11581_vm4, %v53266_v51, 0  ;;  %v36689_v25 = vand.u32 4294901760, %v36618_v13 }
0x109f   :  { %v36624_v50 = vand.u32 4294901760, %v36621_v56 }
0x10a0   :  { %v36690_v19 = vsub.f32 %v36618_v13, %v36689_v25 }
0x10a1   :  { %v36701_v44 = vsub.f32 %v36621_v56, %v36624_v50 }
0x10a2   :  { %v36691_v0 = vand.u32 4294901760, %v36690_v19 }
0x10a3   :  { %v36702_v16 = vand.u32 4294901760, %v36701_v44 }
0x10a4   :  { %51587 = vmatmul.mubr.f32.vlgmr.msra.gmra.mrb[118].mxu0 %v56636_v38  ;;  %v47611_v38 = vld [vmem:[%s58977_s3 + $0x1a] ss:$0 sm:$0xff]  ;;  %v36692_v7 = vsub.f32 %v36690_v19, %v36691_v0 }
0x10a5   :  { %51620 = vmatpush3.xpose.msra.mxu0 %v34816_v36  ;;  %51621 = vmatprep.mubr.msk.f32.mxu0 %vm54248_vm3, %v58980_v54  ;;  %v53256_v53 = vadd.f32 %v47611_v38, %v57194_v60  ;;  %v35797_v60 = vsub.f32 %v35717_v62, %v35720_v45  ;;  %v36703_v23 = vsub.f32 %v36701_v44, %v36702_v16 }
0x10a6   :  { %51624 = vmatprep.subr.mxu0 %v58980_v54  ;;  %v36693_v47 = vand.u32 4294901760, %v36692_v7 }
0x10a7   :  { %v35714_v26 = vsel %vm11581_vm4, %v53256_v53, 0  ;;  %v35798_v18 = vand.u32 4294901760, %v35797_v60 }
0x10a8   :  { %51622 = vmatmul.mubr.f32.vlgmr.msra.gmra.mrb[120].mxu0 %v34885_v32  ;;  %v57722_v5 = vand.u32 4294901760, %v35714_v26 }
0x10a9   :  { %51625 = vmatpush3.xpose.msra.mxu0 %v34896_v29  ;;  %51626 = vmatprep.mubr.msk.f32.mxu0 %vm54248_vm3, %v58980_v54  ;;  %v35799_v59 = vsub.f32 %v35797_v60, %v35798_v18 }
0x10aa   :  { %51629 = vmatprep.subr.mxu0 %v58980_v54  ;;  %v35786_v41 = vsub.f32 %v35714_v26, %v57722_v5 }
0x10ab   :  { %v35800_v46 = vand.u32 4294901760, %v35799_v59 }
0x10ac   :  { %v35787_v57 = vand.u32 4294901760, %v35786_v41 }
0x10ae   :  { %v35788_v28 = vsub.f32 %v35786_v41, %v35787_v57 }
0x10b0   :  { %51627 = vmatmul.mubr.f32.vlgmr.msra.gmra.mrb[120].mxu0 %v57682_v40  ;;  %v35789_v58 = vand.u32 4294901760, %v35788_v28 }
0x10b1   :  { %51630 = vmatpush3.xpose.msra.mxu0 %v34893_v8  ;;  %51631 = vmatprep.mubr.msk.f32.mxu0 %vm54248_vm3, %v58980_v54 }
0x10b2   :  { %51634 = vmatprep.subr.mxu0 %v58980_v54 }
0x10b8   :  { %51632 = vmatmul.mubr.f32.vlgmr.msra.gmra.mrb[120].mxu0 %v34882_v63  ;;  %v47623_v63 = vld [vmem:[%s58977_s3 + $0x26] ss:$0 sm:$0xff] }
0x10b9   :  { %51635 = vmatpush3.xpose.msra.mxu0 %v34816_v36  ;;  %51636 = vmatprep.mubr.msk.f32.mxu0 %vm54248_vm3, %v58980_v54 }
0x10ba   :  { %51639 = vmatprep.subr.mxu0 %v58980_v54 }
0x10c0   :  { %51637 = vmatmul.mubr.f32.vlgmr.msra.gmra.mrb[120].mxu0 %v34883_v61 }
0x10c1   :  { %51640 = vmatpush3.xpose.msra.mxu0 %v34894_v35  ;;  %51641 = vmatprep.mubr.msk.f32.mxu0 %vm54248_vm3, %v58980_v54 }
0x10c2   :  { %51644 = vmatprep.subr.mxu0 %v58980_v54 }
0x10c6   :  { %v57726_v37 = vpop.f32.mrb[116].mxu1 }
0x10c7   :  { %v57728_v3 = vpop.f32.mrb[110].mxu0  ;;  %v51738_v34 = vpop.f32.mrb[117].mxu1  ;;  %v38434_v17 = vsel %vm11581_vm4, %v57726_v37, -inf }
0x10c8   :  { %38435 = vmax.xlane.f32.xlu1 %v38434_v17  ;;  %v51348_v31 = vpop.f32.mrb[111].mxu0  ;;  %51642 = vmatmul.mubr.f32.vlgmr.msra.gmra.mrb[120].mxu0 %v57682_v40  ;;  %v53268_v4 = vadd.f32 %v47623_v63, %v57728_v3 }
0x10c9   :  { %51645 = vmatpush3.xpose.msra.mxu0 %v34816_v36  ;;  %51646 = vmatprep.mubr.msk.f32.mxu0 %vm54248_vm3, %v58980_v54  ;;  %v47615_v36 = vld [vmem:[%s58977_s3 + $0x1e] ss:$0 sm:$0xff] }
0x10ca   :  { %51679 = vmatprep.subr.mxu0 %v58980_v54  ;;  %v53260_v8 = vadd.f32 %v47615_v36, %v57535_v22  ;;  %v37525_v9 = vsel %vm11581_vm4, %v53268_v4, 0 }
0x10cb   :  { %v37528_v61 = vand.u32 4294901760, %v37525_v9 }
0x10cc   :  { %v37522_v12 = vsel %vm11581_vm4, %v53260_v8, 0 }
0x10cd   :  { %v37593_v20 = vand.u32 4294901760, %v37522_v12  ;;  %v37605_v15 = vsub.f32 %v37525_v9, %v37528_v61 }
0x10cf   :  { %v37594_v35 = vsub.f32 %v37522_v12, %v37593_v20  ;;  %v37606_v52 = vand.u32 4294901760, %v37605_v15 }
0x10d0   :  { %51647 = vmatmul.mubr.f32.vlgmr.msra.gmra.mrb[120].mxu0 %v57682_v40  ;;  %v36704_v40 = vand.u32 4294901760, %v36703_v23 }
0x10d1   :  { %51680 = vmatpush3.xpose.msra.mxu0 %v35720_v45  ;;  %51681 = vmatprep.mubr.msk.f32.mxu0 %vm54248_vm3, %v58980_v54  ;;  %v37595_v38 = vand.u32 4294901760, %v37594_v35  ;;  %v37607_v24 = vsub.f32 %v37605_v15, %v37606_v52 }
0x10d2   :  { %51684 = vmatprep.subr.mxu0 %v58980_v54 }
0x10d3   :  { %v37596_v53 = vsub.f32 %v37594_v35, %v37595_v38  ;;  %v37608_v62 = vand.u32 4294901760, %v37607_v24 }
0x10d4   :  { %51682 = vmatmul.mubr.f32.vlgmr.msra.gmra.mrb[122].mxu0 %v35789_v58 }
0x10d5   :  { %51685 = vmatpush3.xpose.msra.mxu0 %v35800_v46  ;;  %51686 = vmatprep.mubr.msk.f32.mxu0 %vm54248_vm3, %v58980_v54  ;;  %v37597_v26 = vand.u32 4294901760, %v37596_v53 }
0x10d6   :  { %51689 = vmatprep.subr.mxu0 %v58980_v54 }
0x10dc   :  { %51687 = vmatmul.mubr.f32.vlgmr.msra.gmra.mrb[122].mxu0 %v57722_v5 }
0x10dd   :  { %51690 = vmatpush3.xpose.msra.mxu0 %v35797_v60  ;;  %51691 = vmatprep.mubr.msk.f32.mxu0 %vm54248_vm3, %v58980_v54 }
0x10de   :  { %51694 = vmatprep.subr.mxu0 %v58980_v54 }
0x10e4   :  { %51692 = vmatmul.mubr.f32.vlgmr.msra.gmra.mrb[122].mxu0 %v35786_v41 }
0x10e5   :  { %51695 = vmatpush3.xpose.msra.mxu0 %v35720_v45  ;;  %51696 = vmatprep.mubr.msk.f32.mxu0 %vm54248_vm3, %v58980_v54 }
0x10e6   :  { %51699 = vmatprep.subr.mxu0 %v58980_v54 }
0x10ec   :  { %51697 = vmatmul.mubr.f32.vlgmr.msra.gmra.mrb[122].mxu0 %v35787_v57 }
0x10ed   :  { %51700 = vmatpush3.xpose.msra.mxu0 %v35798_v18  ;;  %51701 = vmatprep.mubr.msk.f32.mxu0 %vm54248_vm3, %v58980_v54 }
0x10ee   :  { %51704 = vmatprep.subr.mxu0 %v58980_v54 }
0x10f3   :  { %v57763_v30 = vpop.f32.mrb[112].mxu0 }
0x10f4   :  { %v51408_v2 = vpop.f32.mrb[113].mxu0  ;;  %51702 = vmatmul.mubr.f32.vlgmr.msra.gmra.mrb[122].mxu0 %v57722_v5  ;;  %v57766_v10 = vpop.f32.mrb[118].mxu1 }
0x10f5   :  { %51705 = vmatpush3.xpose.msra.mxu0 %v35720_v45  ;;  %v51798_v21 = vpop.f32.mrb[119].mxu1  ;;  %51706 = vmatprep.mubr.msk.f32.mxu0 %vm54248_vm3, %v58980_v54  ;;  %v47625_v45 = vld [vmem:[%s58977_s3 + $0x28] ss:$0 sm:$0xff]  ;;  %v38440_v14 = vsel %vm11581_vm4, %v57766_v10, -inf }
0x10f6   :  { %51739 = vmatprep.subr.mxu0 %v58980_v54  ;;  %v57828_v60 = vadd.f32 %v47625_v45, %v57763_v30 }
0x10f8   :  { %v57831_v3 = vand.u32 4294901760, %v57828_v60 }
0x10fc   :  { %51707 = vmatmul.mubr.f32.vlgmr.msra.gmra.mrb[122].mxu0 %v57722_v5 }
0x10fd   :  { %51740 = vmatpush3.xpose.msra.mxu0 %v36624_v50  ;;  %51741 = vmatprep.mubr.msk.f32.mxu0 %vm54248_vm3, %v58980_v54 }
0x10fe   :  { %51744 = vmatprep.subr.mxu0 %v58980_v54 }
0x1100   :  { %51742 = vmatmul.mubr.f32.vlgmr.msra.gmra.mrb[124].mxu0 %v36693_v47 }
0x1101   :  { %51745 = vmatpush3.xpose.msra.mxu0 %v36704_v40  ;;  %51746 = vmatprep.mubr.msk.f32.mxu0 %vm54248_vm3, %v58980_v54 }
0x1102   :  { %51749 = vmatprep.subr.mxu0 %v58980_v54 }
0x1108   :  { %51747 = vmatmul.mubr.f32.vlgmr.msra.gmra.mrb[124].mxu0 %v36689_v25 }
0x1109   :  { %51750 = vmatpush3.xpose.msra.mxu0 %v36701_v44  ;;  %51751 = vmatprep.mubr.msk.f32.mxu0 %vm54248_vm3, %v58980_v54 }
0x110a   :  { %51754 = vmatprep.subr.mxu0 %v58980_v54 }
0x1110   :  { %51752 = vmatmul.mubr.f32.vlgmr.msra.gmra.mrb[124].mxu0 %v36690_v19 }
0x1111   :  { %51755 = vmatpush3.xpose.msra.mxu0 %v36624_v50  ;;  %51756 = vmatprep.mubr.msk.f32.mxu0 %vm54248_vm3, %v58980_v54 }
0x1112   :  { %51759 = vmatprep.subr.mxu0 %v58980_v54 }
0x1118   :  { %51757 = vmatmul.mubr.f32.vlgmr.msra.gmra.mrb[124].mxu0 %v36691_v0 }
0x1119   :  { %51760 = vmatpush3.xpose.msra.mxu0 %v36702_v16  ;;  %51761 = vmatprep.mubr.msk.f32.mxu0 %vm54248_vm3, %v58980_v54 }
0x111a   :  { %51764 = vmatprep.subr.mxu0 %v58980_v54 }
0x111f   :  { %v57797_v6 = vpop.f32.mrb[114].mxu0 }
0x1120   :  { %v51468_v22 = vpop.f32.mrb[115].mxu0  ;;  %51762 = vmatmul.mubr.f32.vlgmr.msra.gmra.mrb[124].mxu0 %v36689_v25  ;;  %v57799_v32 = vpop.f32.mrb[120].mxu1 }
0x1121   :  { %51765 = vmatpush3.xpose.msra.mxu0 %v36624_v50  ;;  %v51858_v29 = vpop.f32.mrb[121].mxu1  ;;  %51766 = vmatprep.mubr.msk.f32.mxu0 %vm54248_vm3, %v58980_v54 }
0x1122   :  { %51799 = vmatprep.subr.mxu0 %v58980_v54 }
0x1128   :  { %51767 = vmatmul.mubr.f32.vlgmr.msra.gmra.mrb[124].mxu0 %v36689_v25  ;;  %v38446_v25 = vsel %vm11581_vm4, %v57799_v32, -inf }
0x1129   :  { %51800 = vmatpush3.xpose.msra.mxu0 %v37528_v61  ;;  %51801 = vmatprep.mubr.msk.f32.mxu0 %vm54248_vm3, %v58980_v54  ;;  %v38430_v50 = vpop.xlane.xlu1 %38429 }
0x112a   :  { %51804 = vmatprep.subr.mxu0 %v58980_v54  ;;  %v38450_v19 = vsub.f32 %v57686_v43, %v38430_v50 }
0x112c   :  { %51802 = vmatmul.mubr.f32.vlgmr.msra.gmra.mrb[126].mxu0 %v37597_v26  ;;  %v38459_v2 = vmul.f32 1.442695, %v38450_v19 }
0x112d   :  { %51805 = vmatpush3.xpose.msra.mxu0 %v37608_v62  ;;  %51806 = vmatprep.mubr.msk.f32.mxu0 %vm54248_vm3, %v58980_v54 }
0x112e   :  { %51809 = vmatprep.subr.mxu0 %v58980_v54 }
0x1134   :  { %51807 = vmatmul.mubr.f32.vlgmr.msra.gmra.mrb[126].mxu0 %v37593_v20 }
0x1135   :  { %51810 = vmatpush3.xpose.msra.mxu0 %v37605_v15  ;;  %51811 = vmatprep.mubr.msk.f32.mxu0 %vm54248_vm3, %v58980_v54 }
0x1136   :  { %51814 = vmatprep.subr.mxu0 %v58980_v54 }
0x113c   :  { %51812 = vmatmul.mubr.f32.vlgmr.msra.gmra.mrb[126].mxu0 %v37594_v35 }
0x113d   :  { %51815 = vmatpush3.xpose.msra.mxu0 %v37528_v61  ;;  %51816 = vmatprep.mubr.msk.f32.mxu0 %vm54248_vm3, %v58980_v54 }
0x113e   :  { %51819 = vmatprep.subr.mxu0 %v58980_v54 }
0x1144   :  { %51817 = vmatmul.mubr.f32.vlgmr.msra.gmra.mrb[126].mxu0 %v37595_v38 }
0x1145   :  { %51820 = vmatpush3.xpose.msra.mxu0 %v37606_v52  ;;  %51821 = vmatprep.mubr.msk.f32.mxu0 %vm54248_vm3, %v58980_v54 }
0x1146   :  { %51824 = vmatprep.subr.mxu0 %v58980_v54 }
0x114b   :  { %v57819_v5 = vpop.f32.mrb[116].mxu0 }
0x114c   :  { %v51528_v41 = vpop.f32.mrb[117].mxu0  ;;  %51822 = vmatmul.mubr.f32.vlgmr.msra.gmra.mrb[126].mxu0 %v37593_v20 }
0x114d   :  { %51825 = vmatpush3.xpose.msra.mxu0 %v37528_v61  ;;  %51826 = vmatprep.mubr.msk.f32.mxu0 %vm54248_vm3, %v58980_v54 }
0x114e   :  { %51859 = vmatprep.subr.mxu0 %v58980_v54 }
0x1154   :  { %51827 = vmatmul.mubr.f32.vlgmr.msra.gmra.mrb[126].mxu0 %v37593_v20 }
0x1155   :  { %51860 = vmatpush3.msra.mxu0 %v57831_v3  ;;  %51861 = vmatprep.mubr.msk.f32.mxu0 %vm54248_vm3, %v58980_v54  ;;  %v38436_v47 = vpop.xlane.xlu1 %38435 }
0x1156   :  { %51864 = vmatprep.subr.mxu0 %v58980_v54  ;;  %v38452_v40 = vsub.f32 %v57726_v37, %v38436_v47 }
0x1158   :  { %v38463_v43 = vmul.f32 1.442695, %v38452_v40 }
0x1177   :  { %v57837_v34 = vpop.f32.mrb[118].mxu0 }
0x1178   :  { %v51588_v17 = vpop.f32.mrb[119].mxu0 }
0x11a3   :  { %v35257_v31 = vpop.f32.mrb[120].mxu0 }
0x11a4   :  { %v51648_v57 = vpop.f32.mrb[121].mxu0  ;;  %v38425_v18 = vsel %vm11581_vm4, %v35257_v31, -inf }
0x11a5   :  { %38426 = vmax.xlane.f32.xlu0 %v38425_v18 }
0x11cf   :  { %v36161_v28 = vpop.f32.mrb[122].mxu0 }
0x11d0   :  { %v51708_v59 = vpop.f32.mrb[123].mxu0  ;;  %v38431_v58 = vsel %vm11581_vm4, %v36161_v28, -inf }
0x11d1   :  { %38432 = vmax.xlane.f32.xlu0 %v38431_v58 }
0x11fb   :  { %v37065_v46 = vpop.f32.mrb[124].mxu0 }
0x11fc   :  { %v51768_v49 = vpop.f32.mrb[125].mxu0  ;;  %v38437_v42 = vsel %vm11581_vm4, %v37065_v46, -inf }
0x11fd   :  { %38438 = vmax.xlane.f32.xlu0 %v38437_v42 }
0x1201   :  { %38441 = vmax.xlane.f32.xlu0 %v38440_v14 }
0x1227   :  { %v37969_v51 = vpop.f32.mrb[126].mxu0 }
0x1228   :  { %v51828_v13 = vpop.f32.mrb[127].mxu0  ;;  %v38443_v56 = vsel %vm11581_vm4, %v37969_v51, -inf }
0x1229   :  { %38444 = vmax.xlane.f32.xlu0 %v38443_v56  ;;  %v39051_v13 = vsub.f32 %v57610_v11, %v57614_v33 }
0x122d   :  { %38447 = vmax.xlane.f32.xlu0 %v38446_v25 }
0x1232   :  { %v38427_v44 = vpop.xlane.xlu0 %38426 }
0x1233   :  { %v38449_v30 = vsub.f32 %v35257_v31, %v38427_v44 }
0x1235   :  { %v38457_v21 = vmul.f32 1.442695, %v38449_v30 }
0x1237   :  { %54187 = vpow2.f32 %v38457_v21 }
0x1238   :  { %54189 = vpow2.f32 %v38459_v2  ;;  %v39052_v2 = vand.u32 4294901760, %v39051_v13 }
0x123a   :  { %v39053_v47 = vsub.f32 %v39051_v13, %v39052_v2 }
0x1241   :  { %v54188_v0 = vpop.eup %54187 }
0x1242   :  { %v38473_v16 = vsel %vm11581_vm4, %v54188_v0, 0.0  ;;  %v54190_v7 = vpop.eup %54189 }
0x1243   :  { %38474 = vadd.xlane.f32.xlu1 %v38473_v16  ;;  %v38476_v23 = vsel %vm11581_vm4, %v54190_v7, 0.0 }
0x1247   :  { %38477 = vadd.xlane.f32.xlu1 %v38476_v23 }
0x125e   :  { %v38433_v36 = vpop.xlane.xlu0 %38432 }
0x125f   :  { %v38451_v63 = vsub.f32 %v36161_v28, %v38433_v36  ;;  %v39054_v36 = vand.u32 4294901760, %v39053_v47 }
0x1261   :  { %v38461_v8 = vmul.f32 1.442695, %v38451_v63 }
0x1263   :  { %54191 = vpow2.f32 %v38461_v8 }
0x1264   :  { %54193 = vpow2.f32 %v38463_v43  ;;  %v47627_v43 = vld [vmem:[%s58977_s3 + $0x2a] ss:$0 sm:$0xff] }
0x1265   :  { %v53272_v8 = vadd.f32 %v47627_v43, %v57797_v6 }
0x126d   :  { %v57851_v4 = vpop.eup %54191 }
0x126e   :  { %v38479_v12 = vsel %vm11581_vm4, %v57851_v4, 0.0  ;;  %v57855_v9 = vpop.eup %54193 }
0x126f   :  { %38480 = vadd.xlane.f32.xlu1 %v38479_v12  ;;  %v38482_v20 = vsel %vm11581_vm4, %v57855_v9, 0.0 }
0x1273   :  { %38483 = vadd.xlane.f32.xlu1 %v38482_v20  ;;  %v47628_v20 = vld [vmem:[%s58977_s3 + $0x2b] ss:$0 sm:$0xff] }
0x128a   :  { %v38439_v61 = vpop.xlane.xlu0 %38438 }
0x128b   :  { %v38453_v37 = vsub.f32 %v37065_v46, %v38439_v61  ;;  %v53273_v61 = vadd.f32 %v47628_v20, %v57532_v39 }
0x128d   :  { %v38465_v35 = vmul.f32 1.442695, %v38453_v37  ;;  %v57922_v37 = vand.u32 4294901760, %v53272_v8 }
0x128e   :  { %v38442_v15 = vpop.xlane.xlu0 %38441 }
0x128f   :  { %54195 = vpow2.f32 %v38465_v35  ;;  %v38454_v22 = vsub.f32 %v57766_v10, %v38442_v15  ;;  %v57927_v35 = vand.u32 4294901760, %v53273_v61  ;;  %v57930_v15 = vsub.f32 %v53272_v8, %v57922_v37 }
0x1291   :  { %v38467_v29 = vmul.f32 1.442695, %v38454_v22 }
0x1293   :  { %54197 = vpow2.f32 %v38467_v29 }
0x1299   :  { %v57860_v38 = vpop.eup %54195 }
0x129a   :  { %v38485_v52 = vsel %vm11581_vm4, %v57860_v38, 0.0 }
0x129b   :  { %38486 = vadd.xlane.f32.xlu0 %v38485_v52 }
0x129d   :  { %v57864_v53 = vpop.eup %54197 }
0x129e   :  { %v38488_v24 = vsel %vm11581_vm4, %v57864_v53, 0.0 }
0x129f   :  { %38489 = vadd.xlane.f32.xlu1 %v38488_v24  ;;  %v57942_v24 = vsub.f32 %v53273_v61, %v57927_v35 }
0x12b6   :  { %v38445_v26 = vpop.xlane.xlu0 %38444 }
0x12b7   :  { %v38455_v62 = vsub.f32 %v37969_v51, %v38445_v26  ;;  %v39501_v26 = vand.u32 4294901760, %v57930_v15 }
0x12b9   :  { %v38469_v45 = vmul.f32 1.442695, %v38455_v62 }
0x12ba   :  { %v38448_v41 = vpop.xlane.xlu0 %38447 }
0x12bb   :  { %54199 = vpow2.f32 %v38469_v45  ;;  %v38456_v10 = vsub.f32 %v57799_v32, %v38448_v41  ;;  %v38602_v32 = vsub.f32 %v57828_v60, %v57831_v3 }
0x12bd   :  { %v38471_v17 = vmul.f32 1.442695, %v38456_v10  ;;  %v38603_v56 = vand.u32 4294901760, %v38602_v32  ;;  %v39950_v10 = vand.u32 4294901760, %v57942_v24 }
0x12bf   :  { %54201 = vpow2.f32 %v38471_v17  ;;  %v38604_v60 = vsub.f32 %v38602_v32, %v38603_v56 }
0x12c1   :  { %v38605_v40 = vand.u32 4294901760, %v38604_v60 }
0x12c5   :  { %v57869_v31 = vpop.eup %54199 }
0x12c6   :  { %v38491_v57 = vsel %vm11581_vm4, %v57869_v31, 0.0 }
0x12c7   :  { %38492 = vadd.xlane.f32.xlu0 %v38491_v57 }
0x12c9   :  { %v57873_v18 = vpop.eup %54201 }
0x12ca   :  { %v38494_v28 = vsel %vm11581_vm4, %v57873_v18, 0.0 }
0x12cb   :  { %38495 = vadd.xlane.f32.xlu1 %v38494_v28 }
0x12d0   :  { %v38475_v59 = vpop.xlane.xlu1 %38474 }
0x12d1   :  { %54203 = vrcp.f32 %v38475_v59  ;;  %v39951_v59 = vsub.f32 %v57942_v24, %v39950_v10 }
0x12d4   :  { %v38478_v58 = vpop.xlane.xlu1 %38477 }
0x12d5   :  { %54205 = vrcp.f32 %v38478_v58 }
0x12db   :  { %v54204_v46 = vpop.eup %54203 }
0x12dc   :  { %v38513_v49 = vmul.f32 %v54204_v46, %v54188_v0 }
0x12de   :  { %v38522_v42 = vsel %vm11581_vm4, %v38513_v49, 0  ;;  %v39952_v49 = vand.u32 4294901760, %v39951_v59 }
0x12df   :  { %v54206_v14 = vpop.eup %54205  ;;  %v57880_v51 = vand.u32 4294901760, %v38522_v42 }
0x12e0   :  { %v38514_v25 = vmul.f32 %v54206_v14, %v54190_v7  ;;  %v47629_v14 = vld [vmem:[%s58977_s3 + $0x2c] ss:$0 sm:$0xff] }
0x12e1   :  { %v38591_v50 = vsub.f32 %v38522_v42, %v57880_v51 }
0x12e2   :  { %v38971_v19 = vsel %vm11581_vm4, %v38514_v25, 0 }
0x12e3   :  { %v38592_v44 = vand.u32 4294901760, %v38591_v50  ;;  %v57886_v30 = vand.u32 4294901760, %v38971_v19 }
0x12e5   :  { %v38593_v21 = vsub.f32 %v38591_v50, %v38592_v44  ;;  %v39040_v0 = vsub.f32 %v38971_v19, %v57886_v30 }
0x12e7   :  { %v38594_v16 = vand.u32 4294901760, %v38593_v21  ;;  %v39041_v23 = vand.u32 4294901760, %v39040_v0 }
0x12e9   :  { %51862 = vmatmul.mubr.f32.vlgmr.msra.gmra.mrb[128].mxu0 %v38594_v16  ;;  %v39042_v11 = vsub.f32 %v39040_v0, %v39041_v23 }
0x12ea   :  { %51865 = vmatpush3.msra.mxu0 %v38605_v40  ;;  %51866 = vmatprep.mubr.msk.f32.mxu0 %vm54248_vm3, %v58980_v54 }
0x12eb   :  { %v39043_v7 = vand.u32 4294901760, %v39042_v11  ;;  %51869 = vmatprep.subr.mxu0 %v58980_v54 }
0x12ed   :  { %51892 = vmatmul.mubr.f32.vlgmr.msra.gmra.mrb[122].mxu1 %v39043_v7 }
0x12ee   :  { %51895 = vmatpush3.msra.mxu1 %v39054_v36  ;;  %51896 = vmatprep.mubr.msk.f32.mxu1 %vm54248_vm3, %v58980_v54 }
0x12ef   :  { %51899 = vmatprep.subr.mxu1 %v58980_v54 }
0x12f1   :  { %51867 = vmatmul.mubr.f32.vlgmr.msra.gmra.mrb[128].mxu0 %v57880_v51 }
0x12f2   :  { %51870 = vmatpush3.msra.mxu0 %v38602_v32  ;;  %51871 = vmatprep.mubr.msk.f32.mxu0 %vm54248_vm3, %v58980_v54 }
0x12f3   :  { %51874 = vmatprep.subr.mxu0 %v58980_v54 }
0x12f5   :  { %51897 = vmatmul.mubr.f32.vlgmr.msra.gmra.mrb[122].mxu1 %v57886_v30 }
0x12f6   :  { %51900 = vmatpush3.msra.mxu1 %v39051_v13  ;;  %51901 = vmatprep.mubr.msk.f32.mxu1 %vm54248_vm3, %v58980_v54 }
0x12f7   :  { %51904 = vmatprep.subr.mxu1 %v58980_v54 }
0x12f9   :  { %51872 = vmatmul.mubr.f32.vlgmr.msra.gmra.mrb[128].mxu0 %v38591_v50 }
0x12fa   :  { %51875 = vmatpush3.msra.mxu0 %v57831_v3  ;;  %51876 = vmatprep.mubr.msk.f32.mxu0 %vm54248_vm3, %v58980_v54 }
0x12fb   :  { %51879 = vmatprep.subr.mxu0 %v58980_v54 }
0x12fc   :  { %v38481_v63 = vpop.xlane.xlu1 %38480 }
0x12fd   :  { %54207 = vrcp.f32 %v38481_v63  ;;  %51902 = vmatmul.mubr.f32.vlgmr.msra.gmra.mrb[122].mxu1 %v39040_v0 }
0x12fe   :  { %51905 = vmatpush3.msra.mxu1 %v57614_v33  ;;  %51906 = vmatprep.mubr.msk.f32.mxu1 %vm54248_vm3, %v58980_v54 }
0x12ff   :  { %51909 = vmatprep.subr.mxu1 %v58980_v54 }
0x1300   :  { %v38484_v12 = vpop.xlane.xlu1 %38483 }
0x1301   :  { %54209 = vrcp.f32 %v38484_v12  ;;  %51877 = vmatmul.mubr.f32.vlgmr.msra.gmra.mrb[128].mxu0 %v38592_v44 }
0x1302   :  { %51880 = vmatpush3.msra.mxu0 %v38603_v56  ;;  %51881 = vmatprep.mubr.msk.f32.mxu0 %vm54248_vm3, %v58980_v54  ;;  %v47630_v56 = vld [vmem:[%s58977_s3 + $0x2d] ss:$0 sm:$0xff] }
0x1303   :  { %51884 = vmatprep.subr.mxu0 %v58980_v54  ;;  %v53275_v25 = vadd.f32 %v47630_v56, %v57593_v55 }
0x1305   :  { %51907 = vmatmul.mubr.f32.vlgmr.msra.gmra.mrb[122].mxu1 %v39041_v23  ;;  %v58009_v19 = vand.u32 4294901760, %v53275_v25 }
0x1306   :  { %51910 = vmatpush3.msra.mxu1 %v39052_v2  ;;  %51911 = vmatprep.mubr.msk.f32.mxu1 %vm54248_vm3, %v58980_v54 }
0x1307   :  { %v54208_v6 = vpop.eup %54207  ;;  %51914 = vmatprep.subr.mxu1 %v58980_v54  ;;  %v58024_v21 = vsub.f32 %v53275_v25, %v58009_v19 }
0x1308   :  { %v38515_v22 = vmul.f32 %v54208_v6, %v57851_v4 }
0x1309   :  { %51882 = vmatmul.mubr.f32.vlgmr.msra.gmra.mrb[128].mxu0 %v57880_v51  ;;  %v40848_v11 = vand.u32 4294901760, %v58024_v21 }
0x130a   :  { %51885 = vmatpush3.msra.mxu0 %v57831_v3  ;;  %51886 = vmatprep.mubr.msk.f32.mxu0 %vm54248_vm3, %v58980_v54  ;;  %v39420_v39 = vsel %vm11581_vm4, %v38515_v22, 0 }
0x130b   :  { %v54210_v29 = vpop.eup %54209  ;;  %51919 = vmatprep.subr.mxu0 %v58980_v54  ;;  %v57939_v52 = vand.u32 4294901760, %v39420_v39  ;;  %v40849_v8 = vsub.f32 %v58024_v21, %v40848_v11 }
0x130c   :  { %v38516_v4 = vmul.f32 %v54210_v29, %v57855_v9  ;;  %v39502_v9 = vsub.f32 %v57930_v15, %v39501_v26 }
0x130d   :  { %51912 = vmatmul.mubr.f32.vlgmr.msra.gmra.mrb[122].mxu1 %v57886_v30  ;;  %v39489_v3 = vsub.f32 %v39420_v39, %v57939_v52  ;;  %v47632_v39 = vld [vmem:[%s58977_s3 + $0x2f] ss:$0 sm:$0xff] }
0x130e   :  { %51915 = vmatpush3.msra.mxu1 %v57614_v33  ;;  %51916 = vmatprep.mubr.msk.f32.mxu1 %vm54248_vm3, %v58980_v54  ;;  %v39869_v62 = vsel %vm11581_vm4, %v38516_v4, 0  ;;  %v39503_v58 = vand.u32 4294901760, %v39502_v9  ;;  %v53277_v29 = vadd.f32 %v47632_v39, %v57645_v1 }
0x130f   :  { %51949 = vmatprep.subr.mxu1 %v58980_v54  ;;  %v39490_v45 = vand.u32 4294901760, %v39489_v3  ;;  %v57953_v41 = vand.u32 4294901760, %v39869_v62 }
0x1311   :  { %51887 = vmatmul.mubr.f32.vlgmr.msra.gmra.mrb[128].mxu0 %v57880_v51  ;;  %v39491_v17 = vsub.f32 %v39489_v3, %v39490_v45  ;;  %v39938_v57 = vsub.f32 %v39869_v62, %v57953_v41  ;;  %v53274_v51 = vadd.f32 %v47629_v14, %v57819_v5 }
0x1312   :  { %51920 = vmatpush3.msra.mxu0 %v57922_v37  ;;  %51921 = vmatprep.mubr.msk.f32.mxu0 %vm54248_vm3, %v58980_v54 }
0x1313   :  { %51924 = vmatprep.subr.mxu0 %v58980_v54  ;;  %v39492_v33 = vand.u32 4294901760, %v39491_v17  ;;  %v39939_v28 = vand.u32 4294901760, %v39938_v57  ;;  %v58004_v50 = vand.u32 4294901760, %v53274_v51 }
0x1315   :  { %51917 = vmatmul.mubr.f32.vlgmr.msra.gmra.mrb[122].mxu1 %v57886_v30  ;;  %51922 = vmatmul.mubr.f32.vlgmr.msra.gmra.mrb[130].mxu0 %v39492_v33  ;;  %v39940_v46 = vsub.f32 %v39938_v57, %v39939_v28  ;;  %v58012_v44 = vsub.f32 %v53274_v51, %v58004_v50 }
0x1316   :  { %51925 = vmatpush3.msra.mxu0 %v39503_v58  ;;  %51950 = vmatpush3.msra.mxu1 %v57927_v35 }
0x1317   :  { %51951 = vmatprep.mubr.msk.f32.mxu1 %vm54248_vm3, %v58980_v54  ;;  %51954 = vmatprep.subr.mxu1 %v58980_v54  ;;  %v39941_v32 = vand.u32 4294901760, %v39940_v46  ;;  %v40399_v0 = vand.u32 4294901760, %v58012_v44 }
0x1318   :  { %51926 = vmatprep.mubr.msk.f32.mxu0 %vm54248_vm3, %v58980_v54  ;;  %51929 = vmatprep.subr.mxu0 %v58980_v54 }
0x1319   :  { %51952 = vmatmul.mubr.f32.vlgmr.msra.gmra.mrb[124].mxu1 %v39941_v32 }
0x131a   :  { %51955 = vmatpush3.msra.mxu1 %v39952_v49  ;;  %51956 = vmatprep.mubr.msk.f32.mxu1 %vm54248_vm3, %v58980_v54 }
0x131b   :  { %51959 = vmatprep.subr.mxu1 %v58980_v54 }
0x131d   :  { %51927 = vmatmul.mubr.f32.vlgmr.msra.gmra.mrb[130].mxu0 %v57939_v52 }
0x131e   :  { %51930 = vmatpush3.msra.mxu0 %v57930_v15  ;;  %51931 = vmatprep.mubr.msk.f32.mxu0 %vm54248_vm3, %v58980_v54 }
0x131f   :  { %51934 = vmatprep.subr.mxu0 %v58980_v54 }
0x1321   :  { %51957 = vmatmul.mubr.f32.vlgmr.msra.gmra.mrb[124].mxu1 %v57953_v41 }
0x1322   :  { %51960 = vmatpush3.msra.mxu1 %v57942_v24  ;;  %51961 = vmatprep.mubr.msk.f32.mxu1 %vm54248_vm3, %v58980_v54  ;;  %v58091_v24 = vand.u32 4294901760, %v53277_v29 }
0x1323   :  { %51964 = vmatprep.subr.mxu1 %v58980_v54 }
0x1325   :  { %51932 = vmatmul.mubr.f32.vlgmr.msra.gmra.mrb[130].mxu0 %v39489_v3 }
0x1326   :  { %51935 = vmatpush3.msra.mxu0 %v57922_v37  ;;  %51936 = vmatprep.mubr.msk.f32.mxu0 %vm54248_vm3, %v58980_v54 }
0x1327   :  { %51939 = vmatprep.subr.mxu0 %v58980_v54 }
0x1328   :  { %v38487_v42 = vpop.xlane.xlu0 %38486 }
0x1329   :  { %54211 = vrcp.f32 %v38487_v42  ;;  %51962 = vmatmul.mubr.f32.vlgmr.msra.gmra.mrb[124].mxu1 %v39938_v57 }
0x132a   :  { %51965 = vmatpush3.msra.mxu1 %v57927_v35  ;;  %51966 = vmatprep.mubr.msk.f32.mxu1 %vm54248_vm3, %v58980_v54 }
0x132b   :  { %51969 = vmatprep.subr.mxu1 %v58980_v54 }
0x132c   :  { %v38490_v13 = vpop.xlane.xlu1 %38489 }
0x132d   :  { %54213 = vrcp.f32 %v38490_v13  ;;  %51937 = vmatmul.mubr.f32.vlgmr.msra.gmra.mrb[130].mxu0 %v39490_v45  ;;  %v41745_v45 = vsub.f32 %v53277_v29, %v58091_v24  ;;  %v47633_v13 = vld [vmem:[%s58978_s4 + $0x40] sm:$0xff]  ;;  %v47636_v29 = vld [vmem:[%s58978_s4 + $0x58] sm:$0xff] }
0x132e   :  { %51940 = vmatpush3.msra.mxu0 %v39501_v26  ;;  %51941 = vmatprep.mubr.msk.f32.mxu0 %vm54248_vm3, %v58980_v54  ;;  %v42126_v56 = vand.u32 4294901760, %v47633_v13 }
0x132f   :  { %51944 = vmatprep.subr.mxu0 %v58980_v54  ;;  %v41746_v33 = vand.u32 4294901760, %v41745_v45 }
0x1330   :  { %v58160_v25 = vsub.f32 %v47633_v13, %v42126_v56 }
0x1331   :  { %51967 = vmatmul.mubr.f32.vlgmr.msra.gmra.mrb[124].mxu1 %v39939_v28  ;;  %v41747_v32 = vsub.f32 %v41745_v45, %v41746_v33 }
0x1332   :  { %51970 = vmatpush3.msra.mxu1 %v39950_v10  ;;  %51971 = vmatprep.mubr.msk.f32.mxu1 %vm54248_vm3, %v58980_v54 }
0x1333   :  { %v54212_v5 = vpop.eup %54211  ;;  %51974 = vmatprep.subr.mxu1 %v58980_v54  ;;  %v41748_v51 = vand.u32 4294901760, %v41747_v32 }
0x1334   :  { %v38517_v30 = vmul.f32 %v54212_v5, %v57860_v38 }
0x1335   :  { %51942 = vmatmul.mubr.f32.vlgmr.msra.gmra.mrb[130].mxu0 %v57939_v52 }
0x1336   :  { %51945 = vmatpush3.msra.mxu0 %v57922_v37  ;;  %51946 = vmatprep.mubr.msk.f32.mxu0 %vm54248_vm3, %v58980_v54  ;;  %v40318_v55 = vsel %vm11581_vm4, %v38517_v30, 0  ;;  %v40850_v37 = vand.u32 4294901760, %v40849_v8 }
0x1337   :  { %v54214_v2 = vpop.eup %54213  ;;  %51979 = vmatprep.subr.mxu0 %v58980_v54  ;;  %v58021_v60 = vand.u32 4294901760, %v40318_v55 }
0x1338   :  { %v38518_v38 = vmul.f32 %v54214_v2, %v57864_v53  ;;  %v40400_v53 = vsub.f32 %v58012_v44, %v40399_v0 }
0x1339   :  { %51972 = vmatmul.mubr.f32.vlgmr.msra.gmra.mrb[124].mxu1 %v57953_v41  ;;  %v40387_v16 = vsub.f32 %v40318_v55, %v58021_v60 }
0x133a   :  { %51975 = vmatpush3.msra.mxu1 %v57927_v35  ;;  %51976 = vmatprep.mubr.msk.f32.mxu1 %vm54248_vm3, %v58980_v54  ;;  %v40767_v23 = vsel %vm11581_vm4, %v38518_v38, 0  ;;  %v40401_v12 = vand.u32 4294901760, %v40400_v53  ;;  %v47631_v35 = vld [vmem:[%s58977_s3 + $0x2e] ss:$0 sm:$0xff] }
0x133b   :  { %52009 = vmatprep.subr.mxu1 %v58980_v54  ;;  %v40388_v47 = vand.u32 4294901760, %v40387_v16  ;;  %v58035_v40 = vand.u32 4294901760, %v40767_v23  ;;  %v53276_v15 = vadd.f32 %v47631_v35, %v57837_v34 }
0x133d   :  { %51947 = vmatmul.mubr.f32.vlgmr.msra.gmra.mrb[130].mxu0 %v57939_v52  ;;  %v40389_v7 = vsub.f32 %v40387_v16, %v40388_v47  ;;  %v40836_v36 = vsub.f32 %v40767_v23, %v58035_v40  ;;  %v58086_v52 = vand.u32 4294901760, %v53276_v15 }
0x133e   :  { %51980 = vmatpush3.msra.mxu0 %v58004_v50  ;;  %51981 = vmatprep.mubr.msk.f32.mxu0 %vm54248_vm3, %v58980_v54 }
0x133f   :  { %51984 = vmatprep.subr.mxu0 %v58980_v54  ;;  %v40390_v63 = vand.u32 4294901760, %v40389_v7  ;;  %v40837_v43 = vand.u32 4294901760, %v40836_v36  ;;  %v58094_v26 = vsub.f32 %v53276_v15, %v58086_v52 }
0x1341   :  { %51977 = vmatmul.mubr.f32.vlgmr.msra.gmra.mrb[124].mxu1 %v57953_v41  ;;  %51982 = vmatmul.mubr.f32.vlgmr.msra.gmra.mrb[132].mxu0 %v40390_v63  ;;  %v40838_v20 = vsub.f32 %v40836_v36, %v40837_v43  ;;  %v41297_v41 = vand.u32 4294901760, %v58094_v26 }
0x1342   :  { %51985 = vmatpush3.msra.mxu0 %v40401_v12  ;;  %52010 = vmatpush3.msra.mxu1 %v58009_v19 }
0x1343   :  { %52011 = vmatprep.mubr.msk.f32.mxu1 %vm54248_vm3, %v58980_v54  ;;  %52014 = vmatprep.subr.mxu1 %v58980_v54  ;;  %v40839_v61 = vand.u32 4294901760, %v40838_v20  ;;  %v41298_v28 = vsub.f32 %v58094_v26, %v41297_v41 }
0x1344   :  { %51986 = vmatprep.mubr.msk.f32.mxu0 %vm54248_vm3, %v58980_v54  ;;  %51989 = vmatprep.subr.mxu0 %v58980_v54 }
0x1345   :  { %52012 = vmatmul.mubr.f32.vlgmr.msra.gmra.mrb[126].mxu1 %v40839_v61  ;;  %v41299_v49 = vand.u32 4294901760, %v41298_v28 }
0x1346   :  { %52015 = vmatpush3.msra.mxu1 %v40850_v37  ;;  %52016 = vmatprep.mubr.msk.f32.mxu1 %vm54248_vm3, %v58980_v54 }
0x1347   :  { %52019 = vmatprep.subr.mxu1 %v58980_v54 }
0x1349   :  { %51987 = vmatmul.mubr.f32.vlgmr.msra.gmra.mrb[132].mxu0 %v58021_v60 }
0x134a   :  { %51990 = vmatpush3.msra.mxu0 %v58012_v44  ;;  %51991 = vmatprep.mubr.msk.f32.mxu0 %vm54248_vm3, %v58980_v54  ;;  %v47634_v44 = vld [vmem:[%s58978_s4 + $0x48] sm:$0xff] }
0x134b   :  { %51994 = vmatprep.subr.mxu0 %v58980_v54  ;;  %v42575_v30 = vand.u32 4294901760, %v47634_v44 }
0x134d   :  { %52017 = vmatmul.mubr.f32.vlgmr.msra.gmra.mrb[126].mxu1 %v58035_v40  ;;  %v58186_v55 = vsub.f32 %v47634_v44, %v42575_v30 }
0x134e   :  { %52020 = vmatpush3.msra.mxu1 %v58024_v21  ;;  %52021 = vmatprep.mubr.msk.f32.mxu1 %vm54248_vm3, %v58980_v54 }
0x134f   :  { %52024 = vmatprep.subr.mxu1 %v58980_v54  ;;  %v42653_v38 = vand.u32 4294901760, %v58186_v55 }
0x1351   :  { %51992 = vmatmul.mubr.f32.vlgmr.msra.gmra.mrb[132].mxu0 %v40387_v16  ;;  %v47635_v16 = vld [vmem:[%s58978_s4 + $0x50] sm:$0xff] }
0x1352   :  { %51995 = vmatpush3.msra.mxu0 %v58004_v50  ;;  %51996 = vmatprep.mubr.msk.f32.mxu0 %vm54248_vm3, %v58980_v54  ;;  %v58198_v63 = vand.u32 4294901760, %v47635_v16 }
0x1353   :  { %51999 = vmatprep.subr.mxu0 %v58980_v54 }
0x1354   :  { %v38493_v6 = vpop.xlane.xlu0 %38492  ;;  %v58204_v61 = vsub.f32 %v47635_v16, %v58198_v63 }
0x1355   :  { %54215 = vrcp.f32 %v38493_v6  ;;  %52022 = vmatmul.mubr.f32.vlgmr.msra.gmra.mrb[126].mxu1 %v40836_v36  ;;  %v42654_v36 = vsub.f32 %v58186_v55, %v42653_v38 }
0x1356   :  { %52025 = vmatpush3.msra.mxu1 %v58009_v19  ;;  %52026 = vmatprep.mubr.msk.f32.mxu1 %vm54248_vm3, %v58980_v54  ;;  %v43102_v6 = vand.u32 4294901760, %v58204_v61 }
0x1357   :  { %52029 = vmatprep.subr.mxu1 %v58980_v54  ;;  %v42655_v20 = vand.u32 4294901760, %v42654_v36 }
0x1358   :  { %v38496_v22 = vpop.xlane.xlu1 %38495  ;;  %v43103_v15 = vsub.f32 %v58204_v61, %v43102_v6 }
0x1359   :  { %54217 = vrcp.f32 %v38496_v22  ;;  %51997 = vmatmul.mubr.f32.vlgmr.msra.gmra.mrb[132].mxu0 %v40388_v47 }
0x135a   :  { %52000 = vmatpush3.msra.mxu0 %v40399_v0  ;;  %52001 = vmatprep.mubr.msk.f32.mxu0 %vm54248_vm3, %v58980_v54  ;;  %v43104_v39 = vand.u32 4294901760, %v43103_v15 }
0x135b   :  { %52004 = vmatprep.subr.mxu0 %v58980_v54 }
0x135d   :  { %52027 = vmatmul.mubr.f32.vlgmr.msra.gmra.mrb[126].mxu1 %v40837_v43 }
0x135e   :  { %52030 = vmatpush3.msra.mxu1 %v40848_v11  ;;  %52031 = vmatprep.mubr.msk.f32.mxu1 %vm54248_vm3, %v58980_v54 }
0x135f   :  { %v54216_v34 = vpop.eup %54215  ;;  %52034 = vmatprep.subr.mxu1 %v58980_v54 }
0x1360   :  { %v38519_v4 = vmul.f32 %v54216_v34, %v57869_v31 }
0x1361   :  { %52002 = vmatmul.mubr.f32.vlgmr.msra.gmra.mrb[132].mxu0 %v58021_v60 }
0x1362   :  { %52005 = vmatpush3.msra.mxu0 %v58004_v50  ;;  %52006 = vmatprep.mubr.msk.f32.mxu0 %vm54248_vm3, %v58980_v54  ;;  %v41216_v1 = vsel %vm11581_vm4, %v38519_v4, 0  ;;  %v42204_v50 = vand.u32 4294901760, %v58160_v25 }
0x1363   :  { %v54218_v3 = vpop.eup %54217  ;;  %52039 = vmatprep.subr.mxu0 %v58980_v54  ;;  %v58103_v62 = vand.u32 4294901760, %v41216_v1 }
0x1364   :  { %v38520_v31 = vmul.f32 %v54218_v3, %v57873_v18  ;;  %v42205_v5 = vsub.f32 %v58160_v25, %v42204_v50 }
0x1365   :  { %52032 = vmatmul.mubr.f32.vlgmr.msra.gmra.mrb[126].mxu1 %v58035_v40  ;;  %v41285_v10 = vsub.f32 %v41216_v1, %v58103_v62 }
0x1366   :  { %52035 = vmatpush3.msra.mxu1 %v58009_v19  ;;  %52036 = vmatprep.mubr.msk.f32.mxu1 %vm54248_vm3, %v58980_v54  ;;  %v41665_v9 = vsel %vm11581_vm4, %v38520_v31, 0  ;;  %v42206_v19 = vand.u32 4294901760, %v42205_v5 }
0x1367   :  { %52069 = vmatprep.subr.mxu1 %v58980_v54  ;;  %v41286_v17 = vand.u32 4294901760, %v41285_v10  ;;  %v58115_v57 = vand.u32 4294901760, %v41665_v9 }
0x1369   :  { %52007 = vmatmul.mubr.f32.vlgmr.msra.gmra.mrb[132].mxu0 %v58021_v60  ;;  %v41287_v18 = vsub.f32 %v41285_v10, %v41286_v17  ;;  %v41734_v59 = vsub.f32 %v41665_v9, %v58115_v57 }
0x136a   :  { %52040 = vmatpush3.msra.mxu0 %v58086_v52  ;;  %52041 = vmatprep.mubr.msk.f32.mxu0 %vm54248_vm3, %v58980_v54 }
0x136b   :  { %52044 = vmatprep.subr.mxu0 %v58980_v54  ;;  %v41288_v58 = vand.u32 4294901760, %v41287_v18  ;;  %v41735_v46 = vand.u32 4294901760, %v41734_v59 }
0x136d   :  { %52037 = vmatmul.mubr.f32.vlgmr.msra.gmra.mrb[126].mxu1 %v58035_v40  ;;  %52042 = vmatmul.mubr.f32.vlgmr.msra.gmra.mrb[134].mxu0 %v41288_v58  ;;  %v41736_v42 = vsub.f32 %v41734_v59, %v41735_v46 }
0x136e   :  { %52045 = vmatpush3.msra.mxu0 %v41299_v49  ;;  %52070 = vmatpush3.msra.mxu1 %v58091_v24 }
0x136f   :  { %52071 = vmatprep.mubr.msk.f32.mxu1 %vm54248_vm3, %v58980_v54  ;;  %52074 = vmatprep.subr.mxu1 %v58980_v54  ;;  %v41737_v14 = vand.u32 4294901760, %v41736_v42 }
0x1370   :  { %52046 = vmatprep.mubr.msk.f32.mxu0 %vm54248_vm3, %v58980_v54  ;;  %52049 = vmatprep.subr.mxu0 %v58980_v54 }
0x1371   :  { %52072 = vmatmul.mubr.f32.vlgmr.msra.gmra.mrb[128].mxu1 %v41737_v14 }
0x1372   :  { %52075 = vmatpush3.msra.mxu1 %v41748_v51  ;;  %52076 = vmatprep.mubr.msk.f32.mxu1 %vm54248_vm3, %v58980_v54 }
0x1373   :  { %52079 = vmatprep.subr.mxu1 %v58980_v54 }
0x1375   :  { %52047 = vmatmul.mubr.f32.vlgmr.msra.gmra.mrb[134].mxu0 %v58103_v62 }
0x1376   :  { %52050 = vmatpush3.msra.mxu0 %v58094_v26  ;;  %52051 = vmatprep.mubr.msk.f32.mxu0 %vm54248_vm3, %v58980_v54 }
0x1377   :  { %52054 = vmatprep.subr.mxu0 %v58980_v54 }
0x1379   :  { %52077 = vmatmul.mubr.f32.vlgmr.msra.gmra.mrb[128].mxu1 %v58115_v57 }
0x137a   :  { %52080 = vmatpush3.msra.mxu1 %v41745_v45  ;;  %52081 = vmatprep.mubr.msk.f32.mxu1 %vm54248_vm3, %v58980_v54 }
0x137b   :  { %52084 = vmatprep.subr.mxu1 %v58980_v54 }
0x137d   :  { %52052 = vmatmul.mubr.f32.vlgmr.msra.gmra.mrb[134].mxu0 %v41285_v10 }
0x137e   :  { %52055 = vmatpush3.msra.mxu0 %v58086_v52  ;;  %52056 = vmatprep.mubr.msk.f32.mxu0 %vm54248_vm3, %v58980_v54 }
0x137f   :  { %52059 = vmatprep.subr.mxu0 %v58980_v54 }
0x1381   :  { %52082 = vmatmul.mubr.f32.vlgmr.msra.gmra.mrb[128].mxu1 %v41734_v59 }
0x1382   :  { %52085 = vmatpush3.msra.mxu1 %v58091_v24  ;;  %52086 = vmatprep.mubr.msk.f32.mxu1 %vm54248_vm3, %v58980_v54 }
0x1383   :  { %52089 = vmatprep.subr.mxu1 %v58980_v54 }
0x1385   :  { %52057 = vmatmul.mubr.f32.vlgmr.msra.gmra.mrb[134].mxu0 %v41286_v17 }
0x1386   :  { %52060 = vmatpush3.msra.mxu0 %v41297_v41  ;;  %52061 = vmatprep.mubr.msk.f32.mxu0 %vm54248_vm3, %v58980_v54 }
0x1387   :  { %52064 = vmatprep.subr.mxu0 %v58980_v54 }
0x1389   :  { %52087 = vmatmul.mubr.f32.vlgmr.msra.gmra.mrb[128].mxu1 %v41735_v46 }
0x138a   :  { %52090 = vmatpush3.msra.mxu1 %v41746_v33  ;;  %52091 = vmatprep.mubr.msk.f32.mxu1 %vm54248_vm3, %v58980_v54 }
0x138b   :  { %52094 = vmatprep.subr.mxu1 %v58980_v54 }
0x138d   :  { %52062 = vmatmul.mubr.f32.vlgmr.msra.gmra.mrb[134].mxu0 %v58103_v62 }
0x138e   :  { %52065 = vmatpush3.msra.mxu0 %v58086_v52  ;;  %52066 = vmatprep.mubr.msk.f32.mxu0 %vm54248_vm3, %v58980_v54  ;;  %v43473_v52 = vand.u32 4294901760, %v47636_v29 }
0x138f   :  { %52099 = vmatprep.subr.mxu0 %v58980_v54 }
0x1390   :  { %v58246_v34 = vsub.f32 %v47636_v29, %v43473_v52 }
0x1391   :  { %52092 = vmatmul.mubr.f32.vlgmr.msra.gmra.mrb[128].mxu1 %v58115_v57 }
0x1392   :  { %52095 = vmatpush3.msra.mxu1 %v58091_v24  ;;  %52096 = vmatprep.mubr.msk.f32.mxu1 %vm54248_vm3, %v58980_v54  ;;  %v43551_v3 = vand.u32 4294901760, %v58246_v34 }
0x1393   :  { %52104 = vmatprep.subr.mxu1 %v58980_v54 }
0x1395   :  { %52067 = vmatmul.mubr.f32.vlgmr.msra.gmra.mrb[134].mxu0 %v58103_v62  ;;  %v47637_v62 = vld [vmem:[%s58978_s4 + $0x60] sm:$0xff] }
0x1396   :  { %52100 = vmatpush3.msra.mxu0 %v42126_v56  ;;  %52101 = vmatprep.mubr.msk.f32.mxu0 %vm54248_vm3, %v58980_v54  ;;  %v58259_v33 = vand.u32 4294901760, %v47637_v62 }
0x1397   :  { %52109 = vmatprep.subr.mxu0 %v58980_v54 }
0x1398   :  { %v58266_v46 = vsub.f32 %v47637_v62, %v58259_v33 }
0x1399   :  { %52097 = vmatmul.mubr.f32.vlgmr.msra.gmra.mrb[128].mxu1 %v58115_v57  ;;  %v43552_v57 = vsub.f32 %v58246_v34, %v43551_v3 }
0x139a   :  { %52105 = vmatpush3.msra.mxu1 %v42206_v19  ;;  %52106 = vmatprep.mubr.msk.f32.mxu1 %vm54248_vm3, %v58980_v54  ;;  %v44000_v49 = vand.u32 4294901760, %v58266_v46 }
0x139b   :  { %52114 = vmatprep.subr.mxu1 %v58980_v54  ;;  %v43553_v58 = vand.u32 4294901760, %v43552_v57 }
0x139c   :  { %v44001_v14 = vsub.f32 %v58266_v46, %v44000_v49 }
0x139e   :  { %v44002_v13 = vand.u32 4294901760, %v44001_v14 }
0x13e4   :  { %v38966_v2 = vpop.f32.mrb[128].mxu0 }
0x13e5   :  { %v42123_v60 = vsel %vm11581_vm4, %v38966_v2, 0  ;;  %v51888_v21 = vpop.f32.mrb[129].mxu0  ;;  %v47639_v2 = vld [vmem:[%s58978_s4 + $0x70] sm:$0xff] }
0x13e6   :  { %v42191_v0 = vand.u32 4294901760, %v42123_v60 }
0x13e8   :  { %v42192_v23 = vsub.f32 %v42123_v60, %v42191_v0  ;;  %v39415_v47 = vpop.f32.mrb[122].mxu1  ;;  %52107 = vmatmul.mubr.f32.vlgmr.msra.gmra.mrb[130].mxu1 %v42191_v0 }
0x13e9   :  { %v42572_v40 = vsel %vm11581_vm4, %v39415_v47, 0  ;;  %v51918_v11 = vpop.f32.mrb[123].mxu1  ;;  %52115 = vmatpush3.msra.mxu1 %v42126_v56  ;;  %52116 = vmatprep.mubr.msk.f32.mxu1 %vm54248_vm3, %v58980_v54 }
0x13ea   :  { %v42193_v53 = vand.u32 4294901760, %v42192_v23  ;;  %v42640_v7 = vand.u32 4294901760, %v42572_v40  ;;  %52124 = vmatprep.subr.mxu1 %v58980_v54 }
0x13ec   :  { %v42194_v43 = vsub.f32 %v42192_v23, %v42193_v53  ;;  %52117 = vmatmul.mubr.f32.vlgmr.msra.gmra.mrb[132].mxu1 %v42193_v53  ;;  %v42641_v12 = vsub.f32 %v42572_v40, %v42640_v7  ;;  %v58323_v40 = vand.u32 4294901760, %v47639_v2 }
0x13ed   :  { %52125 = vmatpush3.msra.mxu1 %v42126_v56  ;;  %52126 = vmatprep.mubr.msk.f32.mxu1 %vm54248_vm3, %v58980_v54  ;;  %v47638_v56 = vld [vmem:[%s58978_s4 + $0x68] sm:$0xff] }
0x13ee   :  { %v42195_v8 = vand.u32 4294901760, %v42194_v43  ;;  %52134 = vmatprep.subr.mxu1 %v58980_v54  ;;  %v42642_v37 = vand.u32 4294901760, %v42641_v12 }
0x13f0   :  { %52102 = vmatmul.mubr.f32.vlgmr.msra.gmra.mrb[136].mxu0 %v42195_v8  ;;  %52127 = vmatmul.mubr.f32.vlgmr.msra.gmra.mrb[134].mxu1 %v42191_v0  ;;  %v42643_v35 = vsub.f32 %v42641_v12, %v42642_v37 }
0x13f1   :  { %52110 = vmatpush3.msra.mxu0 %v58160_v25  ;;  %52111 = vmatprep.mubr.msk.f32.mxu0 %vm54248_vm3, %v58980_v54  ;;  %v44371_v25 = vand.u32 4294901760, %v47638_v56 }
0x13f2   :  { %52135 = vmatpush3.msra.mxu1 %v42655_v20  ;;  %52136 = vmatprep.mubr.msk.f32.mxu1 %vm54248_vm3, %v58980_v54  ;;  %v42644_v22 = vand.u32 4294901760, %v42643_v35 }
0x13f3   :  { %52119 = vmatprep.subr.mxu0 %v58980_v54  ;;  %52144 = vmatprep.subr.mxu1 %v58980_v54 }
0x13f4   :  { %52112 = vmatmul.mubr.f32.vlgmr.msra.gmra.mrb[138].mxu0 %v42192_v23  ;;  %52137 = vmatmul.mubr.f32.vlgmr.msra.gmra.mrb[136].mxu1 %v42640_v7 }
0x13f5   :  { %52120 = vmatpush3.msra.mxu0 %v42204_v50  ;;  %52121 = vmatprep.mubr.msk.f32.mxu0 %vm54248_vm3, %v58980_v54  ;;  %v58310_v50 = vsub.f32 %v47638_v56, %v44371_v25 }
0x13f6   :  { %52145 = vmatpush3.msra.mxu1 %v42575_v30  ;;  %52146 = vmatprep.mubr.msk.f32.mxu1 %vm54248_vm3, %v58980_v54 }
0x13f7   :  { %52129 = vmatprep.subr.mxu0 %v58980_v54  ;;  %52154 = vmatprep.subr.mxu1 %v58980_v54 }
0x13f8   :  { %52122 = vmatmul.mubr.f32.vlgmr.msra.gmra.mrb[140].mxu0 %v42191_v0  ;;  %52147 = vmatmul.mubr.f32.vlgmr.msra.gmra.mrb[138].mxu1 %v42642_v37 }
0x13f9   :  { %52130 = vmatpush3.msra.mxu0 %v42575_v30  ;;  %52131 = vmatprep.mubr.msk.f32.mxu0 %vm54248_vm3, %v58980_v54 }
0x13fa   :  { %52155 = vmatpush3.msra.mxu1 %v42575_v30  ;;  %52156 = vmatprep.mubr.msk.f32.mxu1 %vm54248_vm3, %v58980_v54 }
0x13fb   :  { %52139 = vmatprep.subr.mxu0 %v58980_v54  ;;  %52164 = vmatprep.subr.mxu1 %v58980_v54 }
0x13fc   :  { %52132 = vmatmul.mubr.f32.vlgmr.msra.gmra.mrb[142].mxu0 %v42644_v22  ;;  %52157 = vmatmul.mubr.f32.vlgmr.msra.gmra.mrb[140].mxu1 %v42640_v7 }
0x13fd   :  { %52140 = vmatpush3.msra.mxu0 %v58186_v55  ;;  %52141 = vmatprep.mubr.msk.f32.mxu0 %vm54248_vm3, %v58980_v54  ;;  %v44449_v55 = vand.u32 4294901760, %v58310_v50 }
0x13fe   :  { %52149 = vmatprep.subr.mxu0 %v58980_v54  ;;  %52165 = vmatpush3.msra.mxu1 %v43104_v39 }
0x13ff   :  { %52166 = vmatprep.mubr.msk.f32.mxu1 %vm54248_vm3, %v58980_v54  ;;  %52174 = vmatprep.subr.mxu1 %v58980_v54  ;;  %v44450_v47 = vsub.f32 %v58310_v50, %v44449_v55 }
0x1400   :  { %52142 = vmatmul.mubr.f32.vlgmr.msra.gmra.mrb[144].mxu0 %v42641_v12 }
0x1401   :  { %52150 = vmatpush3.msra.mxu0 %v42653_v38  ;;  %52151 = vmatprep.mubr.msk.f32.mxu0 %vm54248_vm3, %v58980_v54  ;;  %v44451_v36 = vand.u32 4294901760, %v44450_v47 }
0x1402   :  { %52159 = vmatprep.subr.mxu0 %v58980_v54 }
0x1404   :  { %52152 = vmatmul.mubr.f32.vlgmr.msra.gmra.mrb[146].mxu0 %v42640_v7 }
0x1405   :  { %52160 = vmatpush3.msra.mxu0 %v58198_v63  ;;  %52161 = vmatprep.mubr.msk.f32.mxu0 %vm54248_vm3, %v58980_v54 }
0x1406   :  { %52169 = vmatprep.subr.mxu0 %v58980_v54 }
0x1410   :  { %v39864_v24 = vpop.f32.mrb[130].mxu0 }
0x1411   :  { %v43021_v26 = vsel %vm11581_vm4, %v39864_v24, 0  ;;  %v51948_v4 = vpop.f32.mrb[131].mxu0 }
0x1412   :  { %v43089_v1 = vand.u32 4294901760, %v43021_v26 }
0x1414   :  { %v43090_v45 = vsub.f32 %v43021_v26, %v43089_v1  ;;  %v40313_v41 = vpop.f32.mrb[124].mxu1  ;;  %52167 = vmatmul.mubr.f32.vlgmr.msra.gmra.mrb[142].mxu1 %v43089_v1 }
0x1415   :  { %v43470_v31 = vsel %vm11581_vm4, %v40313_v41, 0  ;;  %v51978_v10 = vpop.f32.mrb[125].mxu1  ;;  %52175 = vmatpush3.msra.mxu1 %v58198_v63  ;;  %52176 = vmatprep.mubr.msk.f32.mxu1 %vm54248_vm3, %v58980_v54 }
0x1416   :  { %v43091_v9 = vand.u32 4294901760, %v43090_v45  ;;  %v43538_v17 = vand.u32 4294901760, %v43470_v31  ;;  %52184 = vmatprep.subr.mxu1 %v58980_v54 }
0x1418   :  { %v43092_v28 = vsub.f32 %v43090_v45, %v43091_v9  ;;  %52177 = vmatmul.mubr.f32.vlgmr.msra.gmra.mrb[144].mxu1 %v43091_v9  ;;  %v43539_v59 = vsub.f32 %v43470_v31, %v43538_v17 }
0x1419   :  { %52185 = vmatpush3.msra.mxu1 %v58198_v63  ;;  %52186 = vmatprep.mubr.msk.f32.mxu1 %vm54248_vm3, %v58980_v54  ;;  %v58330_v63 = vsub.f32 %v47639_v2, %v58323_v40 }
0x141a   :  { %v43093_v18 = vand.u32 4294901760, %v43092_v28  ;;  %52194 = vmatprep.subr.mxu1 %v58980_v54  ;;  %v43540_v32 = vand.u32 4294901760, %v43539_v59 }
0x141b   :  { %v44898_v8 = vand.u32 4294901760, %v58330_v63 }
0x141c   :  { %52162 = vmatmul.mubr.f32.vlgmr.msra.gmra.mrb[148].mxu0 %v43093_v18  ;;  %52187 = vmatmul.mubr.f32.vlgmr.msra.gmra.mrb[146].mxu1 %v43089_v1  ;;  %v43541_v42 = vsub.f32 %v43539_v59, %v43540_v32 }
0x141d   :  { %52170 = vmatpush3.msra.mxu0 %v58204_v61  ;;  %52171 = vmatprep.mubr.msk.f32.mxu0 %vm54248_vm3, %v58980_v54  ;;  %v44899_v20 = vsub.f32 %v58330_v63, %v44898_v8 }
0x141e   :  { %52195 = vmatpush3.msra.mxu1 %v43553_v58  ;;  %52196 = vmatprep.mubr.msk.f32.mxu1 %vm54248_vm3, %v58980_v54  ;;  %v43542_v51 = vand.u32 4294901760, %v43541_v42 }
0x141f   :  { %52179 = vmatprep.subr.mxu0 %v58980_v54  ;;  %52204 = vmatprep.subr.mxu1 %v58980_v54  ;;  %v44900_v37 = vand.u32 4294901760, %v44899_v20 }
0x1420   :  { %52172 = vmatmul.mubr.f32.vlgmr.msra.gmra.mrb[150].mxu0 %v43090_v45  ;;  %52197 = vmatmul.mubr.f32.vlgmr.msra.gmra.mrb[148].mxu1 %v43538_v17 }
0x1421   :  { %52180 = vmatpush3.msra.mxu0 %v43102_v6  ;;  %52181 = vmatprep.mubr.msk.f32.mxu0 %vm54248_vm3, %v58980_v54  ;;  %v47640_v6 = vld [vmem:[%s58978_s4 + $0x78] sm:$0xff] }
0x1422   :  { %52205 = vmatpush3.msra.mxu1 %v43473_v52  ;;  %52206 = vmatprep.mubr.msk.f32.mxu1 %vm54248_vm3, %v58980_v54  ;;  %v45269_v35 = vand.u32 4294901760, %v47640_v6 }
0x1423   :  { %52189 = vmatprep.subr.mxu0 %v58980_v54  ;;  %52214 = vmatprep.subr.mxu1 %v58980_v54 }
0x1424   :  { %52182 = vmatmul.mubr.f32.vlgmr.msra.gmra.mrb[152].mxu0 %v43089_v1  ;;  %52207 = vmatmul.mubr.f32.vlgmr.msra.gmra.mrb[150].mxu1 %v43540_v32  ;;  %v45346_v15 = vsub.f32 %v47640_v6, %v45269_v35 }
0x1425   :  { %52190 = vmatpush3.msra.mxu0 %v43473_v52  ;;  %52191 = vmatprep.mubr.msk.f32.mxu0 %vm54248_vm3, %v58980_v54 }
0x1426   :  { %52215 = vmatpush3.msra.mxu1 %v43473_v52  ;;  %52216 = vmatprep.mubr.msk.f32.mxu1 %vm54248_vm3, %v58980_v54 }
0x1427   :  { %52199 = vmatprep.subr.mxu0 %v58980_v54  ;;  %52224 = vmatprep.subr.mxu1 %v58980_v54 }
0x1428   :  { %52192 = vmatmul.mubr.f32.vlgmr.msra.gmra.mrb[154].mxu0 %v43542_v51  ;;  %52217 = vmatmul.mubr.f32.vlgmr.msra.gmra.mrb[152].mxu1 %v43538_v17 }
0x1429   :  { %52200 = vmatpush3.msra.mxu0 %v58246_v34  ;;  %52201 = vmatprep.mubr.msk.f32.mxu0 %vm54248_vm3, %v58980_v54  ;;  %v45347_v34 = vand.u32 4294901760, %v45346_v15 }
0x142a   :  { %52209 = vmatprep.subr.mxu0 %v58980_v54  ;;  %52225 = vmatpush3.msra.mxu1 %v44002_v13 }
0x142b   :  { %52226 = vmatprep.mubr.msk.f32.mxu1 %vm54248_vm3, %v58980_v54  ;;  %52234 = vmatprep.subr.mxu1 %v58980_v54  ;;  %v45348_v45 = vsub.f32 %v45346_v15, %v45347_v34 }
0x142c   :  { %52202 = vmatmul.mubr.f32.vlgmr.msra.gmra.mrb[156].mxu0 %v43539_v59 }
0x142d   :  { %52210 = vmatpush3.msra.mxu0 %v43551_v3  ;;  %52211 = vmatprep.mubr.msk.f32.mxu0 %vm54248_vm3, %v58980_v54  ;;  %v45349_v9 = vand.u32 4294901760, %v45348_v45 }
0x142e   :  { %52219 = vmatprep.subr.mxu0 %v58980_v54 }
0x1430   :  { %52212 = vmatmul.mubr.f32.vlgmr.msra.gmra.mrb[158].mxu0 %v43538_v17 }
0x1431   :  { %52220 = vmatpush3.msra.mxu0 %v58259_v33  ;;  %52221 = vmatprep.mubr.msk.f32.mxu0 %vm54248_vm3, %v58980_v54 }
0x1432   :  { %52229 = vmatprep.subr.mxu0 %v58980_v54 }
0x143c   :  { %v40762_v5 = vpop.f32.mrb[132].mxu0 }
0x143d   :  { %v43919_v19 = vsel %vm11581_vm4, %v40762_v5, 0  ;;  %v52008_v44 = vpop.f32.mrb[133].mxu0 }
0x143e   :  { %v43987_v30 = vand.u32 4294901760, %v43919_v19 }
0x1440   :  { %v43988_v60 = vsub.f32 %v43919_v19, %v43987_v30  ;;  %v41211_v21 = vpop.f32.mrb[126].mxu1  ;;  %52227 = vmatmul.mubr.f32.vlgmr.msra.gmra.mrb[154].mxu1 %v43987_v30 }
0x1441   :  { %v44368_v0 = vsel %vm11581_vm4, %v41211_v21, 0  ;;  %v52038_v38 = vpop.f32.mrb[127].mxu1  ;;  %52235 = vmatpush3.msra.mxu1 %v58259_v33  ;;  %52236 = vmatprep.mubr.msk.f32.mxu1 %vm54248_vm3, %v58980_v54 }
0x1442   :  { %v43989_v16 = vand.u32 4294901760, %v43988_v60  ;;  %v44436_v23 = vand.u32 4294901760, %v44368_v0  ;;  %52244 = vmatprep.subr.mxu1 %v58980_v54 }
0x1444   :  { %v43990_v11 = vsub.f32 %v43988_v60, %v43989_v16  ;;  %52237 = vmatmul.mubr.f32.vlgmr.msra.gmra.mrb[156].mxu1 %v43989_v16  ;;  %v44437_v7 = vsub.f32 %v44368_v0, %v44436_v23 }
0x1445   :  { %52245 = vmatpush3.msra.mxu1 %v58259_v33  ;;  %52246 = vmatprep.mubr.msk.f32.mxu1 %vm54248_vm3, %v58980_v54 }
0x1446   :  { %v43991_v53 = vand.u32 4294901760, %v43990_v11  ;;  %52254 = vmatprep.subr.mxu1 %v58980_v54  ;;  %v44438_v43 = vand.u32 4294901760, %v44437_v7 }
0x1448   :  { %52222 = vmatmul.mubr.f32.vlgmr.msra.gmra.mrb[160].mxu0 %v43991_v53  ;;  %52247 = vmatmul.mubr.f32.vlgmr.msra.gmra.mrb[158].mxu1 %v43987_v30  ;;  %v44439_v12 = vsub.f32 %v44437_v7, %v44438_v43 }
0x1449   :  { %52230 = vmatpush3.msra.mxu0 %v58266_v46  ;;  %52231 = vmatprep.mubr.msk.f32.mxu0 %vm54248_vm3, %v58980_v54 }
0x144a   :  { %52255 = vmatpush3.msra.mxu1 %v44451_v36  ;;  %52256 = vmatprep.mubr.msk.f32.mxu1 %vm54248_vm3, %v58980_v54  ;;  %v44440_v61 = vand.u32 4294901760, %v44439_v12 }
0x144b   :  { %52239 = vmatprep.subr.mxu0 %v58980_v54  ;;  %52264 = vmatprep.subr.mxu1 %v58980_v54 }
0x144c   :  { %52232 = vmatmul.mubr.f32.vlgmr.msra.gmra.mrb[162].mxu0 %v43988_v60  ;;  %52257 = vmatmul.mubr.f32.vlgmr.msra.gmra.mrb[160].mxu1 %v44436_v23 }
0x144d   :  { %52240 = vmatpush3.msra.mxu0 %v44000_v49  ;;  %52241 = vmatprep.mubr.msk.f32.mxu0 %vm54248_vm3, %v58980_v54 }
0x144e   :  { %52265 = vmatpush3.msra.mxu1 %v44371_v25  ;;  %52266 = vmatprep.mubr.msk.f32.mxu1 %vm54248_vm3, %v58980_v54 }
0x144f   :  { %52249 = vmatprep.subr.mxu0 %v58980_v54  ;;  %52274 = vmatprep.subr.mxu1 %v58980_v54 }
0x1450   :  { %52242 = vmatmul.mubr.f32.vlgmr.msra.gmra.mrb[164].mxu0 %v43987_v30  ;;  %52267 = vmatmul.mubr.f32.vlgmr.msra.gmra.mrb[162].mxu1 %v44438_v43 }
0x1451   :  { %52250 = vmatpush3.msra.mxu0 %v44371_v25  ;;  %52251 = vmatprep.mubr.msk.f32.mxu0 %vm54248_vm3, %v58980_v54 }
0x1452   :  { %52275 = vmatpush3.msra.mxu1 %v44371_v25  ;;  %52276 = vmatprep.mubr.msk.f32.mxu1 %vm54248_vm3, %v58980_v54 }
0x1453   :  { %52259 = vmatprep.subr.mxu0 %v58980_v54  ;;  %52284 = vmatprep.subr.mxu1 %v58980_v54 }
0x1454   :  { %52252 = vmatmul.mubr.f32.vlgmr.msra.gmra.mrb[166].mxu0 %v44440_v61  ;;  %52277 = vmatmul.mubr.f32.vlgmr.msra.gmra.mrb[164].mxu1 %v44436_v23 }
0x1455   :  { %52260 = vmatpush3.msra.mxu0 %v58310_v50  ;;  %52261 = vmatprep.mubr.msk.f32.mxu0 %vm54248_vm3, %v58980_v54 }
0x1456   :  { %52269 = vmatprep.subr.mxu0 %v58980_v54  ;;  %52285 = vmatpush3.msra.mxu1 %v44900_v37 }
0x1457   :  { %52286 = vmatprep.mubr.msk.f32.mxu1 %vm54248_vm3, %v58980_v54  ;;  %52294 = vmatprep.subr.mxu1 %v58980_v54 }
0x1458   :  { %52262 = vmatmul.mubr.f32.vlgmr.msra.gmra.mrb[168].mxu0 %v44437_v7 }
0x1459   :  { %52270 = vmatpush3.msra.mxu0 %v44449_v55  ;;  %52271 = vmatprep.mubr.msk.f32.mxu0 %vm54248_vm3, %v58980_v54 }
0x145a   :  { %52279 = vmatprep.subr.mxu0 %v58980_v54 }
0x145c   :  { %52272 = vmatmul.mubr.f32.vlgmr.msra.gmra.mrb[170].mxu0 %v44436_v23 }
0x145d   :  { %52280 = vmatpush3.msra.mxu0 %v58323_v40  ;;  %52281 = vmatprep.mubr.msk.f32.mxu0 %vm54248_vm3, %v58980_v54 }
0x145e   :  { %52289 = vmatprep.subr.mxu0 %v58980_v54 }
0x1468   :  { %v41660_v22 = vpop.f32.mrb[134].mxu0 }
0x1469   :  { %v44817_v39 = vsel %vm11581_vm4, %v41660_v22, 0  ;;  %v52068_v29 = vpop.f32.mrb[135].mxu0 }
0x146a   :  { %v44885_v52 = vand.u32 4294901760, %v44817_v39 }
0x146c   :  { %v44886_v24 = vsub.f32 %v44817_v39, %v44885_v52  ;;  %v42109_v26 = vpop.f32.mrb[128].mxu1  ;;  %52287 = vmatmul.mubr.f32.vlgmr.msra.gmra.mrb[166].mxu1 %v44885_v52 }
0x146d   :  { %v45266_v4 = vsel %vm11581_vm4, %v42109_v26, 0  ;;  %v52098_v1 = vpop.f32.mrb[129].mxu1  ;;  %52295 = vmatpush3.msra.mxu1 %v58323_v40  ;;  %52296 = vmatprep.mubr.msk.f32.mxu1 %vm54248_vm3, %v58980_v54 }
0x146e   :  { %v44887_v3 = vand.u32 4294901760, %v44886_v24  ;;  %v45334_v62 = vand.u32 4294901760, %v45266_v4  ;;  %52304 = vmatprep.subr.mxu1 %v58980_v54 }
0x1470   :  { %v44888_v41 = vsub.f32 %v44886_v24, %v44887_v3  ;;  %52297 = vmatmul.mubr.f32.vlgmr.msra.gmra.mrb[168].mxu1 %v44887_v3  ;;  %v45335_v10 = vsub.f32 %v45266_v4, %v45334_v62 }
0x1471   :  { %52305 = vmatpush3.msra.mxu1 %v58323_v40  ;;  %52306 = vmatprep.mubr.msk.f32.mxu1 %vm54248_vm3, %v58980_v54 }
0x1472   :  { %v44889_v31 = vand.u32 4294901760, %v44888_v41  ;;  %52314 = vmatprep.subr.mxu1 %v58980_v54  ;;  %v45336_v17 = vand.u32 4294901760, %v45335_v10 }
0x1474   :  { %52282 = vmatmul.mubr.f32.vlgmr.msra.gmra.mrb[172].mxu0 %v44889_v31  ;;  %52307 = vmatmul.mubr.f32.vlgmr.msra.gmra.mrb[170].mxu1 %v44885_v52  ;;  %v45337_v57 = vsub.f32 %v45335_v10, %v45336_v17 }
0x1475   :  { %52290 = vmatpush3.msra.mxu0 %v58330_v63  ;;  %52291 = vmatprep.mubr.msk.f32.mxu0 %vm54248_vm3, %v58980_v54 }
0x1476   :  { %52315 = vmatpush3.msra.mxu1 %v45349_v9  ;;  %52316 = vmatprep.mubr.msk.f32.mxu1 %vm54248_vm3, %v58980_v54  ;;  %v45338_v33 = vand.u32 4294901760, %v45337_v57 }
0x1477   :  { %52299 = vmatprep.subr.mxu0 %v58980_v54  ;;  %52324 = vmatprep.subr.mxu1 %v58980_v54 }
0x1478   :  { %52292 = vmatmul.mubr.f32.vlgmr.msra.gmra.mrb[174].mxu0 %v44886_v24  ;;  %52317 = vmatmul.mubr.f32.vlgmr.msra.gmra.mrb[172].mxu1 %v45334_v62 }
0x1479   :  { %52300 = vmatpush3.msra.mxu0 %v44898_v8  ;;  %52301 = vmatprep.mubr.msk.f32.mxu0 %vm54248_vm3, %v58980_v54 }
0x147a   :  { %52325 = vmatpush3.msra.mxu1 %v45269_v35  ;;  %52326 = vmatprep.mubr.msk.f32.mxu1 %vm54248_vm3, %v58980_v54 }
0x147b   :  { %52309 = vmatprep.subr.mxu0 %v58980_v54  ;;  %52334 = vmatprep.subr.mxu1 %v58980_v54 }
0x147c   :  { %52302 = vmatmul.mubr.f32.vlgmr.msra.gmra.mrb[176].mxu0 %v44885_v52  ;;  %52327 = vmatmul.mubr.f32.vlgmr.msra.gmra.mrb[174].mxu1 %v45336_v17 }
0x147d   :  { %52310 = vmatpush3.msra.mxu0 %v45269_v35  ;;  %52311 = vmatprep.mubr.msk.f32.mxu0 %vm54248_vm3, %v58980_v54 }
0x147e   :  { %52335 = vmatpush3.msra.mxu1 %v45269_v35  ;;  %52336 = vmatprep.mubr.msk.f32.mxu1 %vm54248_vm3, %v58980_v54 }
0x147f   :  { %52319 = vmatprep.subr.mxu0 %v58980_v54 }
0x1480   :  { %52312 = vmatmul.mubr.f32.vlgmr.msra.gmra.mrb[178].mxu0 %v45338_v33  ;;  %52337 = vmatmul.mubr.f32.vlgmr.msra.gmra.mrb[176].mxu1 %v45334_v62 }
0x1481   :  { %52320 = vmatpush3.msra.mxu0 %v45346_v15  ;;  %52321 = vmatprep.mubr.msk.f32.mxu0 %vm54248_vm3, %v58980_v54 }
0x1482   :  { %52329 = vmatprep.subr.mxu0 %v58980_v54 }
0x1484   :  { %52322 = vmatmul.mubr.f32.vlgmr.msra.gmra.mrb[180].mxu0 %v45335_v10 }
0x1485   :  { %52330 = vmatpush3.msra.mxu0 %v45347_v34  ;;  %52331 = vmatprep.mubr.msk.f32.mxu0 %vm54248_vm3, %v58980_v54 }
0x1488   :  { %52332 = vmatmul.mubr.f32.vlgmr.msra.gmra.mrb[182].mxu0 %v45334_v62 }
0x14bb   :  { %v42273_v28 = vpop.f32.mrb[130].mxu1 }
0x14bc   :  { %v52108_v18 = vpop.f32.mrb[131].mxu1 }
0x14bf   :  { %v42421_v59 = vpop.f32.mrb[132].mxu1 }
0x14c0   :  { %v52118_v58 = vpop.f32.mrb[133].mxu1 }
0x14c3   :  { %v42197_v46 = vpop.f32.mrb[136].mxu0  ;;  %v42567_v32 = vpop.f32.mrb[134].mxu1 }
0x14c4   :  { %v42274_v49 = vadd.f32 %v42273_v28, %v42197_v46  ;;  %v52103_v42 = vpop.f32.mrb[137].mxu0  ;;  %v52128_v14 = vpop.f32.mrb[135].mxu1 }
0x14c7   :  { %v42347_v51 = vpop.f32.mrb[138].mxu0  ;;  %v42722_v13 = vpop.f32.mrb[136].mxu1 }
0x14c8   :  { %v42348_v56 = vadd.f32 %v42347_v51, %v42274_v49  ;;  %v52113_v25 = vpop.f32.mrb[139].mxu0  ;;  %v52138_v50 = vpop.f32.mrb[137].mxu1 }
0x14ca   :  { %v42422_v5 = vadd.f32 %v42421_v59, %v42348_v56 }
0x14cb   :  { %v42495_v19 = vpop.f32.mrb[140].mxu0  ;;  %v42870_v44 = vpop.f32.mrb[138].mxu1 }
0x14cc   :  { %v42496_v30 = vadd.f32 %v42495_v19, %v42422_v5  ;;  %v52123_v55 = vpop.f32.mrb[141].mxu0  ;;  %v52148_v2 = vpop.f32.mrb[139].mxu1 }
0x14ce   :  { %v42568_v60 = vadd.f32 %v42567_v32, %v42496_v30 }
0x14cf   :  { %v42646_v21 = vpop.f32.mrb[142].mxu0  ;;  %v43016_v0 = vpop.f32.mrb[140].mxu1 }
0x14d0   :  { %v42723_v38 = vadd.f32 %v42722_v13, %v42646_v21  ;;  %v52133_v16 = vpop.f32.mrb[143].mxu0  ;;  %v52158_v23 = vpop.f32.mrb[141].mxu1 }
0x14d3   :  { %v42796_v47 = vpop.f32.mrb[144].mxu0 }
0x14d4   :  { %v42797_v40 = vadd.f32 %v42796_v47, %v42723_v38  ;;  %v52143_v11 = vpop.f32.mrb[145].mxu0 }
0x14d6   :  { %v42871_v53 = vadd.f32 %v42870_v44, %v42797_v40 }
0x14d7   :  { %v42944_v7 = vpop.f32.mrb[146].mxu0 }
0x14d8   :  { %v42945_v36 = vadd.f32 %v42944_v7, %v42871_v53  ;;  %v52153_v63 = vpop.f32.mrb[147].mxu0 }
0x14da   :  { %v43017_v43 = vadd.f32 %v43016_v0, %v42945_v36 }
0x14e7   :  { %v43171_v8 = vpop.f32.mrb[142].mxu1 }
0x14e8   :  { %v52168_v12 = vpop.f32.mrb[143].mxu1 }
0x14eb   :  { %v43319_v20 = vpop.f32.mrb[144].mxu1 }
0x14ec   :  { %v52178_v61 = vpop.f32.mrb[145].mxu1 }
0x14ef   :  { %v43095_v37 = vpop.f32.mrb[148].mxu0  ;;  %v43465_v6 = vpop.f32.mrb[146].mxu1 }
0x14f0   :  { %v43172_v35 = vadd.f32 %v43171_v8, %v43095_v37  ;;  %v52163_v15 = vpop.f32.mrb[149].mxu0  ;;  %v52188_v22 = vpop.f32.mrb[147].mxu1 }
0x14f3   :  { %v43245_v39 = vpop.f32.mrb[150].mxu0  ;;  %v43620_v29 = vpop.f32.mrb[148].mxu1 }
0x14f4   :  { %v43246_v52 = vadd.f32 %v43245_v39, %v43172_v35  ;;  %v52173_v34 = vpop.f32.mrb[151].mxu0  ;;  %v52198_v24 = vpop.f32.mrb[149].mxu1 }
0x14f6   :  { %v43320_v26 = vadd.f32 %v43319_v20, %v43246_v52 }
0x14f7   :  { %v43393_v4 = vpop.f32.mrb[152].mxu0  ;;  %v43768_v1 = vpop.f32.mrb[150].mxu1 }
0x14f8   :  { %v43394_v3 = vadd.f32 %v43393_v4, %v43320_v26  ;;  %v52183_v62 = vpop.f32.mrb[153].mxu0  ;;  %v52208_v45 = vpop.f32.mrb[151].mxu1 }
0x14fa   :  { %v43466_v41 = vadd.f32 %v43465_v6, %v43394_v3 }
0x14fb   :  { %v43544_v31 = vpop.f32.mrb[154].mxu0  ;;  %v43914_v10 = vpop.f32.mrb[152].mxu1 }
0x14fc   :  { %v45714_v9 = vadd.f32 %v43466_v41, %v42568_v60  ;;  %v43621_v17 = vadd.f32 %v43620_v29, %v43544_v31  ;;  %v52193_v57 = vpop.f32.mrb[155].mxu0  ;;  %v52218_v33 = vpop.f32.mrb[153].mxu1 }
0x14ff   :  { %v43694_v28 = vpop.f32.mrb[156].mxu0 }
0x1500   :  { %v43695_v18 = vadd.f32 %v43694_v28, %v43621_v17  ;;  %v52203_v59 = vpop.f32.mrb[157].mxu0 }
0x1502   :  { %v43769_v58 = vadd.f32 %v43768_v1, %v43695_v18 }
0x1503   :  { %v43842_v46 = vpop.f32.mrb[158].mxu0 }
0x1504   :  { %v43843_v32 = vadd.f32 %v43842_v46, %v43769_v58  ;;  %v52213_v49 = vpop.f32.mrb[159].mxu0 }
0x1506   :  { %v43915_v42 = vadd.f32 %v43914_v10, %v43843_v32 }
0x1508   :  { %v45715_v14 = vadd.f32 %v43915_v42, %v43017_v43 }
0x1513   :  { %v44069_v51 = vpop.f32.mrb[154].mxu1 }
0x1514   :  { %v52228_v13 = vpop.f32.mrb[155].mxu1 }
0x1517   :  { %v44217_v56 = vpop.f32.mrb[156].mxu1 }
0x1518   :  { %v52238_v25 = vpop.f32.mrb[157].mxu1 }
0x151b   :  { %v43993_v50 = vpop.f32.mrb[160].mxu0  ;;  %v44363_v5 = vpop.f32.mrb[158].mxu1 }
0x151c   :  { %v44070_v19 = vadd.f32 %v44069_v51, %v43993_v50  ;;  %v52223_v44 = vpop.f32.mrb[161].mxu0  ;;  %v52248_v30 = vpop.f32.mrb[159].mxu1 }
0x151f   :  { %v44143_v55 = vpop.f32.mrb[162].mxu0  ;;  %v44518_v2 = vpop.f32.mrb[160].mxu1 }
0x1520   :  { %v44144_v60 = vadd.f32 %v44143_v55, %v44070_v19  ;;  %v52233_v21 = vpop.f32.mrb[163].mxu0  ;;  %v52258_v0 = vpop.f32.mrb[161].mxu1 }
0x1522   :  { %v44218_v38 = vadd.f32 %v44217_v56, %v44144_v60  ;;  %v47641_v56 = vld [vmem:[%s58975_s1 + $0xf4] ss:$0 sm:$0xff] }
0x1523   :  { %v44291_v16 = vpop.f32.mrb[164].mxu0  ;;  %v44666_v23 = vpop.f32.mrb[162].mxu1 }
0x1524   :  { %v44292_v47 = vadd.f32 %v44291_v16, %v44218_v38  ;;  %v52243_v40 = vpop.f32.mrb[165].mxu0  ;;  %v52268_v11 = vpop.f32.mrb[163].mxu1 }
0x1526   :  { %v44364_v53 = vadd.f32 %v44363_v5, %v44292_v47 }
0x1527   :  { %v44442_v7 = vpop.f32.mrb[166].mxu0  ;;  %v44812_v36 = vpop.f32.mrb[164].mxu1 }
0x1528   :  { %v45716_v63 = vadd.f32 %v45714_v9, %v44364_v53  ;;  %v44519_v43 = vadd.f32 %v44518_v2, %v44442_v7  ;;  %v52253_v8 = vpop.f32.mrb[167].mxu0  ;;  %v52278_v12 = vpop.f32.mrb[165].mxu1 }
0x1529   :  { %v23775_v12 = vld [vmem:[%s58975_s1 + $0xf8] sm:$0xff] }
0x152b   :  { %v44592_v20 = vpop.f32.mrb[168].mxu0 }
0x152c   :  { %v44593_v61 = vadd.f32 %v44592_v20, %v44519_v43  ;;  %v52263_v37 = vpop.f32.mrb[169].mxu0  ;;  %v23776_v20 = vld [vmem:[%s58975_s1 + $0x100] sm:$0xff] }
0x152d   :  { %v45777_v37 = vand.u32 4294901760, %v23775_v12 }
0x152e   :  { %v44667_v6 = vadd.f32 %v44666_v23, %v44593_v61  ;;  %v23777_v61 = vld [vmem:[%s58975_s1 + $0x108] sm:$0xff] }
0x152f   :  { %v44740_v35 = vpop.f32.mrb[170].mxu0 }
0x1530   :  { %v44741_v15 = vadd.f32 %v44740_v35, %v44667_v6  ;;  %v52273_v22 = vpop.f32.mrb[171].mxu0  ;;  %v45780_v6 = vand.u32 4294901760, %v23776_v20  ;;  %v23778_v35 = vld [vmem:[%s58975_s1 + $0x110] sm:$0xff] }
0x1531   :  { %v45786_v22 = vand.u32 4294901760, %v23778_v35 }
0x1532   :  { %v44813_v39 = vadd.f32 %v44812_v36, %v44741_v15  ;;  %v45783_v15 = vand.u32 4294901760, %v23777_v61 }
0x1534   :  { %v45717_v29 = vadd.f32 %v45715_v14, %v44813_v39  ;;  %v58446_v39 = vpack.c.bf16 %v45780_v6, %v45777_v37 }
0x1536   :  { %52946 = vmatprep.subr.bf16.mxu0 %v58446_v39 }
0x1537   :  { %52948 = vmatpush3.bf16.msra.mxu0 %v58446_v39 }
0x153f   :  { %v44967_v52 = vpop.f32.mrb[166].mxu1 }
0x1540   :  { %v52288_v34 = vpop.f32.mrb[167].mxu1 }
0x1541   :  { %v58448_v34 = vpack.c.bf16 %v45786_v22, %v45783_v15 }
0x1543   :  { %v45115_v24 = vpop.f32.mrb[168].mxu1  ;;  %52950 = vmatprep.subr.bf16.mxu0 %v58448_v34 }
0x1544   :  { %v52298_v26 = vpop.f32.mrb[169].mxu1  ;;  %52952 = vmatpush3.bf16.msra.mxu0 %v58448_v34 }
0x1547   :  { %v44891_v4 = vpop.f32.mrb[172].mxu0  ;;  %v45261_v1 = vpop.f32.mrb[170].mxu1 }
0x1548   :  { %v44968_v3 = vadd.f32 %v44967_v52, %v44891_v4  ;;  %v52283_v62 = vpop.f32.mrb[173].mxu0  ;;  %v52308_v45 = vpop.f32.mrb[171].mxu1  ;;  %v45874_v52 = vsub.f32 %v23776_v20, %v45780_v6 }
0x1549   :  { %v45888_v62 = vsub.f32 %v23778_v35, %v45786_v22 }
0x154a   :  { %v45875_v26 = vand.u32 4294901760, %v45874_v52 }
0x154b   :  { %v45041_v41 = vpop.f32.mrb[174].mxu0  ;;  %v45416_v31 = vpop.f32.mrb[172].mxu1 }
0x154c   :  { %v45042_v10 = vadd.f32 %v45041_v41, %v44968_v3  ;;  %v52293_v9 = vpop.f32.mrb[175].mxu0  ;;  %v52318_v17 = vpop.f32.mrb[173].mxu1  ;;  %v45881_v3 = vsub.f32 %v23777_v61, %v45783_v15  ;;  %v47643_v61 = vld [vmem:[%s58975_s1 + $0xf3] ss:$0 sm:$0xff] }
0x154e   :  { %v45116_v57 = vadd.f32 %v45115_v24, %v45042_v10  ;;  %v45889_v10 = vand.u32 4294901760, %v45888_v62 }
0x154f   :  { %v45189_v33 = vpop.f32.mrb[176].mxu0  ;;  %v45564_v28 = vpop.f32.mrb[174].mxu1 }
0x1550   :  { %v45190_v18 = vadd.f32 %v45189_v33, %v45116_v57  ;;  %v52303_v59 = vpop.f32.mrb[177].mxu0  ;;  %v52328_v58 = vpop.f32.mrb[175].mxu1  ;;  %v45890_v57 = vsub.f32 %v45888_v62, %v45889_v10 }
0x1551   :  { %v58461_v58 = vpack.c.bf16 %v45888_v62, %v45881_v3 }
0x1552   :  { %v45262_v46 = vadd.f32 %v45261_v1, %v45190_v18  ;;  %v45876_v1 = vsub.f32 %v45874_v52, %v45875_v26 }
0x1553   :  { %v45340_v32 = vpop.f32.mrb[178].mxu0  ;;  %v45710_v49 = vpop.f32.mrb[176].mxu1 }
0x1554   :  { %v45718_v42 = vadd.f32 %v45716_v63, %v45262_v46  ;;  %v45417_v14 = vadd.f32 %v45416_v31, %v45340_v32  ;;  %v52313_v51 = vpop.f32.mrb[179].mxu0  ;;  %v52338_v13 = vpop.f32.mrb[177].mxu1  ;;  %v45877_v41 = vand.u32 4294901760, %v45876_v1  ;;  %v45882_v31 = vand.u32 4294901760, %v45881_v3 }
0x1556   :  { %v45720_v25 = vadd.f32 %v45718_v42, %v56598_v27  ;;  %v45883_v17 = vsub.f32 %v45881_v3, %v45882_v31  ;;  %v58465_v32 = vpack.c.bf16 %v45889_v10, %v45882_v31  ;;  %v58475_v42 = vld [vmem:[%s58975_s1 + $0x120] sm:$0xff] }
0x1557   :  { %v45490_v50 = vpop.f32.mrb[180].mxu0  ;;  %v46314_v13 = vand.u32 4294901760, %v58475_v42 }
0x1558   :  { %v45491_v5 = vadd.f32 %v45490_v50, %v45417_v14  ;;  %v52323_v19 = vpop.f32.mrb[181].mxu0  ;;  %v58413_v44 = vadd.f32 %v47641_v56, %v45720_v25  ;;  %v45884_v33 = vand.u32 4294901760, %v45883_v17  ;;  %v58480_v14 = vld [vmem:[%s58975_s1 + $0x128] sm:$0xff]  ;;  %v58493_v50 = vld [vmem:[%s58975_s1 + $0x138] sm:$0xff] }
0x1559   :  { %v46317_v25 = vand.u32 4294901760, %v58480_v14 }
0x155a   :  { %v45728_v30 = vsel %vm567_vm2, %v58413_v44, 0.0  ;;  %v45565_v55 = vadd.f32 %v45564_v28, %v45491_v5  ;;  %v45891_v28 = vand.u32 4294901760, %v45890_v57  ;;  %v58498_v5 = vld [vmem:[%s58975_s1 + $0x140] sm:$0xff] }
0x155b   :  { %45729 = vadd.xlane.f32.xlu0 %v45728_v30  ;;  %v45638_v2 = vpop.f32.mrb[182].mxu0 }
0x155c   :  { %v45639_v60 = vadd.f32 %v45638_v2, %v45565_v55  ;;  %v52333_v21 = vpop.f32.mrb[183].mxu0  ;;  %v58457_v18 = vpack.c.bf16 %v45891_v28, %v45884_v33  ;;  %v46323_v55 = vand.u32 4294901760, %v58493_v50  ;;  %v46326_v2 = vand.u32 4294901760, %v58498_v5  ;;  %v23790_v33 = vld [vmem:[%s58975_s1 + $0x170] sm:$0xff] }
0x155d   :  { %v58518_v21 = vld [vmem:[%s58975_s1 + $0x148] sm:$0xff] }
0x155e   :  { %v45711_v0 = vadd.f32 %v45710_v49, %v45639_v60  ;;  %v58470_v49 = vld [vmem:[%s58975_s1 + $0x118] sm:$0xff] }
0x155f   :  { %v46311_v51 = vand.u32 4294901760, %v58470_v49 }
0x1560   :  { %v45719_v38 = vadd.f32 %v45717_v29, %v45711_v0  ;;  %v45867_v29 = vsub.f32 %v23775_v12, %v45777_v37  ;;  %v58523_v0 = vld [vmem:[%s58975_s1 + $0x150] sm:$0xff] }
0x1561   :  { %v58505_v30 = vpack.c.bf16 %v46314_v13, %v46311_v51 }
0x1562   :  { %v45721_v16 = vadd.f32 %v45719_v38, %v56595_v48  ;;  %v45868_v24 = vand.u32 4294901760, %v45867_v29  ;;  %v58459_v59 = vpack.c.bf16 %v45874_v52, %v45867_v29  ;;  %v58532_v38 = vpack.c.bf16 %v46326_v2, %v46323_v55 }
0x1563   :  { %52994 = vmatprep.subr.bf16.mxu1 %v58505_v30 }
0x1564   :  { %v58418_v23 = vadd.f32 %v47641_v56, %v45721_v16  ;;  %v45869_v4 = vsub.f32 %v45867_v29, %v45868_v24  ;;  %v58463_v46 = vpack.c.bf16 %v45875_v26, %v45868_v24  ;;  %v58487_v56 = vld [vmem:[%s58975_s1 + $0x130] sm:$0xff]  ;;  %52996 = vmatpush3.bf16.msra.mxu1 %v58505_v30  ;;  %v46329_v16 = vand.u32 4294901760, %v58518_v21 }
0x1565   :  { %v46320_v19 = vand.u32 4294901760, %v58487_v56 }
0x1566   :  { %v45731_v27 = vsel %vm567_vm2, %v58418_v23, 0.0  ;;  %v45870_v45 = vand.u32 4294901760, %v45869_v4 }
0x1567   :  { %45732 = vadd.xlane.f32.xlu1 %v45731_v27  ;;  %v58513_v60 = vpack.c.bf16 %v46320_v19, %v46317_v25  ;;  %v46332_v27 = vand.u32 4294901760, %v58523_v0 }
0x1568   :  { %v58454_v9 = vpack.c.bf16 %v45877_v41, %v45870_v45 }
0x1569   :  { %52998 = vmatprep.subr.bf16.mxu1 %v58513_v60 }
0x156a   :  { %52954 = vmatprep.subr.bf16.mxu0 %v58454_v9  ;;  %53000 = vmatpush3.bf16.msra.mxu1 %v58513_v60 }
0x156b   :  { %53002 = vmatprep.subr.bf16.mxu1 %v58532_v38 }
0x156e   :  { %53004 = vmatpush3.bf16.msra.mxu1 %v58532_v38 }
0x15e8   :  { %v45730_v47 = vpop.xlane.xlu0 %45729 }
0x15e9   :  { %v45734_v40 = vmul.f32 0.03125, %v45730_v47  ;;  %v58542_v47 = vpack.c.bf16 %v46332_v27, %v46329_v16 }
0x15eb   :  { %v58423_v11 = vsub.f32 %v58413_v44, %v45734_v40  ;;  %53006 = vmatprep.subr.bf16.mxu1 %v58542_v47 }
0x15ec   :  { %53008 = vmatpush3.bf16.msra.mxu1 %v58542_v47 }
0x15ed   :  { %v45738_v53 = vmul.f32 %v58423_v11, %v58423_v11 }
0x15ef   :  { %v45740_v7 = vsel %vm567_vm2, %v45738_v53, 0.0 }
0x15f0   :  { %45741 = vadd.xlane.f32.xlu0 %v45740_v7 }
0x15f4   :  { %v45733_v36 = vpop.xlane.xlu1 %45732 }
0x15f5   :  { %v45735_v63 = vmul.f32 0.03125, %v45733_v36 }
0x15f7   :  { %v58429_v48 = vsub.f32 %v58418_v23, %v45735_v63 }
0x15f9   :  { %v45739_v43 = vmul.f32 %v58429_v48, %v58429_v48 }
0x15fb   :  { %v45743_v8 = vsel %vm567_vm2, %v45739_v43, 0.0 }
0x15fc   :  { %45744 = vadd.xlane.f32.xlu1 %v45743_v8  ;;  %v47642_v8 = vld [vmem:[%s58975_s1 + $0xf2] ss:$0 sm:$0xff] }
0x167d   :  { %v45742_v40 = vpop.xlane.xlu0 %45741 }
0x167e   :  { %v45746_v53 = vmul.f32 0.03125, %v45742_v40 }
0x1680   :  { %v45748_v7 = vadd.f32 1e-05, %v45746_v53 }
0x1682   :  { %54219 = vrsqrt.f32 %v45748_v7  ;;  %v58609_v7 = vsub.f32 %v58470_v49, %v46311_v51 }
0x1684   :  { %v46414_v49 = vand.u32 4294901760, %v58609_v7 }
0x1689   :  { %v45745_v36 = vpop.xlane.xlu1 %45744 }
0x168a   :  { %v45747_v63 = vmul.f32 0.03125, %v45745_v36  ;;  %v58614_v36 = vsub.f32 %v58475_v42, %v46314_v13  ;;  %v46415_v13 = vsub.f32 %v58609_v7, %v46414_v49 }
0x168c   :  { %v54220_v43 = vpop.eup %54219  ;;  %v45749_v12 = vadd.f32 1e-05, %v45747_v63  ;;  %v23793_v63 = vld [vmem:[%s58975_s1 + $0x188] sm:$0xff]  ;;  %v46421_v51 = vand.u32 4294901760, %v58614_v36 }
0x168d   :  { %v45752_v20 = vmul.f32 %v54220_v43, %v58423_v11  ;;  %v23794_v43 = vld [vmem:[%s58975_s1 + $0x190] sm:$0xff] }
0x168e   :  { %54221 = vrsqrt.f32 %v45749_v12  ;;  %v46356_v12 = vand.u32 4294901760, %v23794_v43 }
0x168f   :  { %v45758_v37 = vmul.f32 %v47642_v8, %v45752_v20  ;;  %v46422_v20 = vsub.f32 %v58614_v36, %v46421_v51 }
0x1691   :  { %v45764_v6 = vadd.f32 %v47643_v61, %v45758_v37  ;;  %v46423_v37 = vand.u32 4294901760, %v46422_v20 }
0x1693   :  { %v45771_v35 = vsel %vm567_vm2, %v45764_v6, 0 }
0x1694   :  { %v45845_v15 = vand.u32 4294901760, %v45771_v35 }
0x1696   :  { %v45846_v22 = vsub.f32 %v45771_v35, %v45845_v15 }
0x1698   :  { %v54222_v29 = vpop.eup %54221  ;;  %v45847_v52 = vand.u32 4294901760, %v45846_v22 }
0x1699   :  { %v45753_v24 = vmul.f32 %v54222_v29, %v58429_v48  ;;  %v23787_v48 = vld [vmem:[%s58975_s1 + $0x158] sm:$0xff] }
0x169a   :  { %v45848_v26 = vsub.f32 %v45846_v22, %v45847_v52  ;;  %v46335_v17 = vand.u32 4294901760, %v23787_v48 }
0x169b   :  { %v45759_v4 = vmul.f32 %v47642_v8, %v45753_v24  ;;  %v46353_v8 = vand.u32 4294901760, %v23793_v63 }
0x169c   :  { %v45849_v1 = vand.u32 4294901760, %v45848_v26  ;;  %v58639_v35 = vsub.f32 %v23787_v48, %v46335_v17 }
0x169d   :  { %v45765_v3 = vadd.f32 %v47643_v61, %v45759_v4  ;;  %v58626_v42 = vpack.c.bf16 %v46356_v12, %v46353_v8  ;;  %v46416_v61 = vand.u32 4294901760, %v46415_v13 }
0x169e   :  { %52347 = vmatprep.mubr.f32.mxu0 %v45849_v1 }
0x169f   :  { %v45774_v11 = vsel %vm567_vm2, %v45765_v3, 0  ;;  %v58636_v6 = vpack.c.bf16 %v46423_v37, %v46416_v61 }
0x16a0   :  { %v45855_v62 = vand.u32 4294901760, %v45774_v11 }
0x16a2   :  { %v45856_v45 = vsub.f32 %v45774_v11, %v45855_v62 }
0x16a4   :  { %v45857_v41 = vand.u32 4294901760, %v45856_v45 }
0x16a6   :  { %v45858_v31 = vsub.f32 %v45856_v45, %v45857_v41 }
0x16a8   :  { %v45859_v10 = vand.u32 4294901760, %v45858_v31 }
0x16aa   :  { %52348 = vmatmul.mubr.f32.vlgmr.msra.gmra.mrb[184].mxu0 %v45859_v10 }
0x16ab   :  { %52956 = vmatpush3.bf16.msra.mxu0 %v58454_v9  ;;  %52358 = vmatprep.mubr.f32.mxu0 %v45845_v15  ;;  %v23788_v9 = vld [vmem:[%s58975_s1 + $0x160] sm:$0xff] }
0x16ac   :  { %52958 = vmatprep.subr.bf16.mxu0 %v58457_v18  ;;  %v46338_v57 = vand.u32 4294901760, %v23788_v9 }
0x16af   :  { %52960 = vmatpush3.bf16.msra.mxu0 %v58457_v18  ;;  %v46344_v18 = vand.u32 4294901760, %v23790_v33 }
0x16b0   :  { %52962 = vmatprep.subr.bf16.mxu0 %v58459_v59 }
0x16b1   :  { %v58650_v26 = vsub.f32 %v23790_v33, %v46344_v18 }
0x16b2   :  { %52359 = vmatmul.mubr.f32.vlgmr.msra.gmra.mrb[184].mxu0 %v45855_v62 }
0x16b3   :  { %52964 = vmatpush3.bf16.msra.mxu0 %v58459_v59  ;;  %52369 = vmatprep.mubr.f32.mxu0 %v45846_v22  ;;  %v46470_v22 = vand.u32 4294901760, %v58639_v35  ;;  %v58986_v11 = vand.u32 4294901760, %v58650_v26 }
0x16b4   :  { %52966 = vmatprep.subr.bf16.mxu0 %v58461_v58 }
0x16b7   :  { %52968 = vmatpush3.bf16.msra.mxu0 %v58461_v58  ;;  %v23791_v58 = vld [vmem:[%s58975_s1 + $0x178] sm:$0xff] }
0x16b8   :  { %52970 = vmatprep.subr.bf16.mxu0 %v58446_v39 }
0x16ba   :  { %52370 = vmatmul.mubr.f32.vlgmr.msra.gmra.mrb[184].mxu0 %v45856_v45 }
0x16bb   :  { %52972 = vmatpush3.bf16.msra.mxu0 %v58446_v39  ;;  %52380 = vmatprep.mubr.f32.mxu0 %v45847_v52  ;;  %v46471_v52 = vsub.f32 %v58639_v35, %v46470_v22 }
0x16bc   :  { %52974 = vmatprep.subr.bf16.mxu0 %v58448_v34 }
0x16bd   :  { %v46472_v1 = vand.u32 4294901760, %v46471_v52 }
0x16bf   :  { %52976 = vmatpush3.bf16.msra.mxu0 %v58448_v34 }
0x16c0   :  { %52978 = vmatprep.subr.bf16.mxu0 %v58463_v46 }
0x16c2   :  { %52381 = vmatmul.mubr.f32.vlgmr.msra.gmra.mrb[184].mxu0 %v45857_v41  ;;  %v46492_v41 = vsub.f32 %v58650_v26, %v58986_v11 }
0x16c3   :  { %52980 = vmatpush3.bf16.msra.mxu0 %v58463_v46  ;;  %52391 = vmatprep.mubr.f32.mxu0 %v45845_v15  ;;  %v23792_v46 = vld [vmem:[%s58975_s1 + $0x180] sm:$0xff] }
0x16c4   :  { %52982 = vmatprep.subr.bf16.mxu0 %v58465_v32  ;;  %v46350_v40 = vand.u32 4294901760, %v23792_v46 }
0x16c6   :  { %v58665_v10 = vsub.f32 %v23792_v46, %v46350_v40  ;;  %v58681_v46 = vsub.f32 %v23794_v43, %v46356_v12  ;;  %v58697_v12 = vpack.c.bf16 %v58614_v36, %v58609_v7 }
0x16c7   :  { %52984 = vmatpush3.bf16.msra.mxu0 %v58465_v32  ;;  %v46347_v32 = vand.u32 4294901760, %v23791_v58 }
0x16c8   :  { %52986 = vmatprep.subr.bf16.mxu0 %v58446_v39  ;;  %v58982_v20 = vand.u32 4294901760, %v58681_v46 }
0x16c9   :  { %v58604_v53 = vpack.c.bf16 %v46350_v40, %v46347_v32  ;;  %v58663_v31 = vsub.f32 %v23791_v58, %v46347_v32  ;;  %v58679_v58 = vsub.f32 %v23793_v63, %v46353_v8 }
0x16ca   :  { %52392 = vmatmul.mubr.f32.vlgmr.msra.gmra.mrb[184].mxu0 %v45855_v62  ;;  %v46520_v52 = vsub.f32 %v58681_v46, %v58982_v20 }
0x16cb   :  { %52988 = vmatpush3.bf16.msra.mxu0 %v58446_v39  ;;  %52402 = vmatprep.mubr.f32.mxu0 %v45845_v15  ;;  %v58584_v39 = vpack.c.bf16 %v46338_v57, %v46335_v17  ;;  %v58641_v15 = vsub.f32 %v23788_v9, %v46338_v57  ;;  %v46493_v17 = vand.u32 4294901760, %v46492_v41  ;;  %v58985_v57 = vand.u32 4294901760, %v58663_v31  ;;  %v47644_v41 = vld [vmem:[%s58975_s1 + $0xf6] ss:$0 sm:$0xff] }
0x16cc   :  { %52990 = vmatprep.subr.bf16.mxu0 %v58448_v34  ;;  %v58983_v13 = vand.u32 4294901760, %v58679_v58  ;;  %v46521_v8 = vand.u32 4294901760, %v46520_v52 }
0x16cd   :  { %53010 = vmatprep.subr.bf16.mxu1 %v58584_v39  ;;  %v58988_v29 = vand.u32 4294901760, %v58641_v15 }
0x16ce   :  { %53012 = vmatpush3.bf16.msra.mxu1 %v58584_v39  ;;  %v46513_v37 = vsub.f32 %v58679_v58, %v58983_v13 }
0x16cf   :  { %52992 = vmatpush3.bf16.msra.mxu0 %v58448_v34  ;;  %v23789_v34 = vld [vmem:[%s58975_s1 + $0x168] sm:$0xff]  ;;  %v46478_v4 = vsub.f32 %v58641_v15, %v58988_v29 }
0x16d0   :  { %v46341_v28 = vand.u32 4294901760, %v23789_v34  ;;  %v46514_v63 = vand.u32 4294901760, %v46513_v37 }
0x16d2   :  { %52403 = vmatmul.mubr.f32.vlgmr.msra.gmra.mrb[184].mxu0 %v45855_v62  ;;  %v58594_v59 = vpack.c.bf16 %v46344_v18, %v46341_v28  ;;  %v58648_v24 = vsub.f32 %v23789_v34, %v46341_v28  ;;  %v46479_v62 = vand.u32 4294901760, %v46478_v4  ;;  %v58984_v34 = vand.u32 4294901760, %v58665_v10 }
0x16d3   :  { %52623 = vmatprep.mubr.msk.f32.mxu0 %vm54248_vm3, %v58980_v54  ;;  %v46499_v28 = vsub.f32 %v58663_v31, %v58985_v57  ;;  %v58693_v43 = vpack.c.bf16 %v46521_v8, %v46514_v63  ;;  %v58701_v4 = vpack.c.bf16 %v58641_v15, %v58639_v35  ;;  %v58733_v63 = vsub.f32 %v58493_v50, %v46323_v55 }
0x16d4   :  { %53014 = vmatprep.subr.bf16.mxu1 %v58594_v59  ;;  %v58987_v3 = vand.u32 4294901760, %v58648_v24  ;;  %v58667_v48 = vpack.c.bf16 %v46479_v62, %v46472_v1  ;;  %v46506_v18 = vsub.f32 %v58665_v10, %v58984_v34  ;;  %v58705_v1 = vpack.c.bf16 %v58650_v26, %v58648_v24 }
0x16d5   :  { %53016 = vmatpush3.bf16.msra.mxu1 %v58594_v59  ;;  %v46500_v32 = vand.u32 4294901760, %v46499_v28  ;;  %v58709_v62 = vpack.c.bf16 %v58665_v10, %v58663_v31  ;;  %v46442_v55 = vand.u32 4294901760, %v58733_v63  ;;  %v58994_v35 = vand.u32 4294901760, %v58679_v58 }
0x16d6   :  { %53018 = vmatprep.subr.bf16.mxu1 %v58604_v53  ;;  %v46485_v45 = vsub.f32 %v58648_v24, %v58987_v3  ;;  %v46507_v40 = vand.u32 4294901760, %v46506_v18 }
0x16d7   :  { %v46443_v13 = vsub.f32 %v58733_v63, %v46442_v55 }
0x16d8   :  { %v46486_v9 = vand.u32 4294901760, %v46485_v45  ;;  %v58685_v61 = vpack.c.bf16 %v46507_v40, %v46500_v32  ;;  %v58713_v45 = vpack.c.bf16 %v58681_v46, %v58679_v58 }
0x16d9   :  { %53020 = vmatpush3.bf16.msra.mxu1 %v58604_v53  ;;  %v46444_v34 = vand.u32 4294901760, %v46443_v13 }
0x16da   :  { %53022 = vmatprep.subr.bf16.mxu1 %v58626_v42  ;;  %v58671_v33 = vpack.c.bf16 %v46493_v17, %v46486_v9  ;;  %v58721_v9 = vsub.f32 %v58480_v14, %v46317_v25  ;;  %v58726_v17 = vsub.f32 %v58487_v56, %v46320_v19  ;;  %v58738_v25 = vsub.f32 %v58498_v5, %v46326_v2 }
0x16db   :  { %v58758_v2 = vsub.f32 %v58518_v21, %v46329_v16 }
0x16dc   :  { %v46428_v37 = vand.u32 4294901760, %v58721_v9  ;;  %v46435_v52 = vand.u32 4294901760, %v58726_v17  ;;  %v46449_v5 = vand.u32 4294901760, %v58738_v25 }
0x16dd   :  { %53024 = vmatpush3.bf16.msra.mxu1 %v58626_v42  ;;  %v46456_v16 = vand.u32 4294901760, %v58758_v2 }
0x16de   :  { %53026 = vmatprep.subr.bf16.mxu1 %v58636_v6  ;;  %v46436_v50 = vsub.f32 %v58726_v17, %v46435_v52  ;;  %v53129_v7 = vpack.c.bf16 %v46449_v5, %v46442_v55 }
0x16df   :  { %v46457_v3 = vsub.f32 %v58758_v2, %v46456_v16 }
0x16e0   :  { %v46437_v20 = vand.u32 4294901760, %v46436_v50 }
0x17a5   :  { %v52404_v28 = vpop.f32.mrb[184].mxu0 }
0x17a6   :  { %v53278_v18 = vadd.f32 %v52404_v28, %v47644_v41  ;;  %v46294_v32 = vpop.f32.mrb[185].mxu0 }
0x17a7   :  { %v53279_v40 = vadd.f32 %v47644_v41, %v46294_v32  ;;  %v46429_v41 = vsub.f32 %v58721_v9, %v46428_v37 }
0x17a8   :  { %v46305_v14 = vmax.f32 %v53278_v18, 0.0  ;;  %v58763_v18 = vsub.f32 %v58523_v0, %v46332_v27  ;;  %v46450_v0 = vsub.f32 %v58738_v25, %v46449_v5 }
0x17a9   :  { %v46304_v56 = vmax.f32 %v53279_v40, 0.0  ;;  %v46430_v54 = vand.u32 4294901760, %v46429_v41 }
0x17aa   :  { %v58740_v19 = vand.u32 4294901760, %v46305_v14  ;;  %v46463_v27 = vand.u32 4294901760, %v58763_v18  ;;  %v46451_v11 = vand.u32 4294901760, %v46450_v0 }
0x17ab   :  { %v58742_v8 = vand.u32 4294901760, %v46304_v56  ;;  %v53029_v50 = vpack.c.bf16 %v46437_v20, %v46430_v54  ;;  %v46458_v54 = vand.u32 4294901760, %v46457_v3  ;;  %v53069_v3 = vpack.c.bf16 %v58763_v18, %v58758_v2 }
0x17ac   :  { %v58752_v28 = vsub.f32 %v46305_v14, %v58740_v19  ;;  %v46464_v29 = vsub.f32 %v58763_v18, %v46463_v27  ;;  %v53133_v36 = vpack.c.bf16 %v46463_v27, %v46456_v16 }
0x17ad   :  { %v58766_v32 = vsub.f32 %v46304_v56, %v58742_v8 }
0x17ae   :  { %v46403_v40 = vand.u32 4294901760, %v58752_v28  ;;  %v46465_v13 = vand.u32 4294901760, %v46464_v29  ;;  %v53065_v29 = vpack.c.bf16 %v58738_v25, %v58733_v63 }
0x17af   :  { %v46393_v14 = vand.u32 4294901760, %v58766_v32 }
0x17b0   :  { %v46404_v21 = vsub.f32 %v58752_v28, %v46403_v40  ;;  %v53037_v20 = vpack.c.bf16 %v46465_v13, %v46458_v54 }
0x17b1   :  { %v46394_v56 = vsub.f32 %v58766_v32, %v46393_v14 }
0x17b2   :  { %v46405_v57 = vand.u32 4294901760, %v46404_v21 }
0x17b3   :  { %v46395_v41 = vand.u32 4294901760, %v46394_v56  ;;  %v53033_v56 = vpack.c.bf16 %v46451_v11, %v46444_v34  ;;  %v53121_v11 = vpack.c.bf16 %v46421_v51, %v46414_v49  ;;  %v58989_v49 = vand.u32 4294901760, %v58641_v15 }
0x17b4   :  { %v58991_v34 = vand.u32 4294901760, %v58650_v26  ;;  %v58995_v15 = vand.u32 4294901760, %v58681_v46 }
0x17b5   :  { %52437 = vmatprep.mubr.f32.mxu1 %v46395_v41  ;;  %v53137_v51 = vpack.c.bf16 %v58989_v49, %v46470_v22 }
0x17b6   :  { %52438 = vmatmul.mubr.f32.vlgmr.msra.gmra.mrb[178].mxu1 %v46405_v57  ;;  %v58990_v57 = vand.u32 4294901760, %v58648_v24  ;;  %v53149_v22 = vpack.c.bf16 %v58995_v15, %v58994_v35 }
0x17b7   :  { %53028 = vmatpush3.bf16.msra.mxu1 %v58636_v6  ;;  %52472 = vmatprep.mubr.f32.mxu1 %v58742_v8  ;;  %v53061_v6 = vpack.c.bf16 %v58726_v17, %v58721_v9 }
0x17b8   :  { %53030 = vmatprep.subr.bf16.mxu1 %v53029_v50 }
0x17bb   :  { %53032 = vmatpush3.bf16.msra.mxu1 %v53029_v50 }
0x17bc   :  { %53034 = vmatprep.subr.bf16.mxu1 %v53033_v56 }
0x17bf   :  { %53036 = vmatpush3.bf16.msra.mxu1 %v53033_v56 }
0x17c0   :  { %53038 = vmatprep.subr.bf16.mxu1 %v53037_v20 }
0x17c3   :  { %53040 = vmatpush3.bf16.msra.mxu1 %v53037_v20 }
0x17c4   :  { %53042 = vmatprep.subr.bf16.mxu1 %v58667_v48 }
0x17c7   :  { %53044 = vmatpush3.bf16.msra.mxu1 %v58667_v48  ;;  %v53125_v48 = vpack.c.bf16 %v46435_v52, %v46428_v37 }
0x17c8   :  { %53046 = vmatprep.subr.bf16.mxu1 %v58671_v33 }
0x17cb   :  { %53048 = vmatpush3.bf16.msra.mxu1 %v58671_v33  ;;  %v53141_v33 = vpack.c.bf16 %v58991_v34, %v58990_v57 }
0x17cc   :  { %53050 = vmatprep.subr.bf16.mxu1 %v58685_v61 }
0x17cf   :  { %53052 = vmatpush3.bf16.msra.mxu1 %v58685_v61  ;;  %v58992_v61 = vand.u32 4294901760, %v58663_v31 }
0x17d0   :  { %53054 = vmatprep.subr.bf16.mxu1 %v58693_v43 }
0x17d3   :  { %53056 = vmatpush3.bf16.msra.mxu1 %v58693_v43  ;;  %v58993_v43 = vand.u32 4294901760, %v58665_v10 }
0x17d4   :  { %53058 = vmatprep.subr.bf16.mxu1 %v58697_v12 }
0x17d6   :  { %52473 = vmatmul.mubr.f32.vlgmr.msra.gmra.mrb[178].mxu1 %v58740_v19 }
0x17d7   :  { %53060 = vmatpush3.bf16.msra.mxu1 %v58697_v12  ;;  %52507 = vmatprep.mubr.f32.mxu1 %v58766_v32  ;;  %v53145_v12 = vpack.c.bf16 %v58993_v43, %v58992_v61 }
0x17d8   :  { %53062 = vmatprep.subr.bf16.mxu1 %v53061_v6 }
0x17db   :  { %53064 = vmatpush3.bf16.msra.mxu1 %v53061_v6 }
0x17dc   :  { %53066 = vmatprep.subr.bf16.mxu1 %v53065_v29 }
0x17df   :  { %53068 = vmatpush3.bf16.msra.mxu1 %v53065_v29 }
0x17e0   :  { %53070 = vmatprep.subr.bf16.mxu1 %v53069_v3 }
0x17e3   :  { %53072 = vmatpush3.bf16.msra.mxu1 %v53069_v3 }
0x17e4   :  { %53074 = vmatprep.subr.bf16.mxu1 %v58701_v4 }
0x17e7   :  { %53076 = vmatpush3.bf16.msra.mxu1 %v58701_v4 }
0x17e8   :  { %53078 = vmatprep.subr.bf16.mxu1 %v58705_v1 }
0x17eb   :  { %53080 = vmatpush3.bf16.msra.mxu1 %v58705_v1 }
0x17ec   :  { %53082 = vmatprep.subr.bf16.mxu1 %v58709_v62 }
0x17ef   :  { %53084 = vmatpush3.bf16.msra.mxu1 %v58709_v62 }
0x17f0   :  { %53086 = vmatprep.subr.bf16.mxu1 %v58713_v45 }
0x17f3   :  { %53088 = vmatpush3.bf16.msra.mxu1 %v58713_v45 }
0x17f4   :  { %53090 = vmatprep.subr.bf16.mxu1 %v58505_v30 }
0x17f6   :  { %52508 = vmatmul.mubr.f32.vlgmr.msra.gmra.mrb[178].mxu1 %v58752_v28 }
0x17f7   :  { %53092 = vmatpush3.bf16.msra.mxu1 %v58505_v30  ;;  %52542 = vmatprep.mubr.f32.mxu1 %v46393_v14  ;;  %v47645_v14 = vld [vmem:[%s58975_s1 + $0xf5] ss:$0 sm:$0xff] }
0x17f8   :  { %53094 = vmatprep.subr.bf16.mxu1 %v58513_v60 }
0x17fb   :  { %53096 = vmatpush3.bf16.msra.mxu1 %v58513_v60 }
0x17fc   :  { %53098 = vmatprep.subr.bf16.mxu1 %v58532_v38 }
0x17ff   :  { %53100 = vmatpush3.bf16.msra.mxu1 %v58532_v38 }
0x1800   :  { %53102 = vmatprep.subr.bf16.mxu1 %v58542_v47 }
0x1803   :  { %53104 = vmatpush3.bf16.msra.mxu1 %v58542_v47 }
0x1804   :  { %53106 = vmatprep.subr.bf16.mxu1 %v58584_v39 }
0x1807   :  { %53108 = vmatpush3.bf16.msra.mxu1 %v58584_v39 }
0x1808   :  { %53110 = vmatprep.subr.bf16.mxu1 %v58594_v59 }
0x180b   :  { %53112 = vmatpush3.bf16.msra.mxu1 %v58594_v59 }
0x180c   :  { %53114 = vmatprep.subr.bf16.mxu1 %v58604_v53 }
0x180f   :  { %53116 = vmatpush3.bf16.msra.mxu1 %v58604_v53 }
0x1810   :  { %53118 = vmatprep.subr.bf16.mxu1 %v58626_v42 }
0x1813   :  { %53120 = vmatpush3.bf16.msra.mxu1 %v58626_v42 }
0x1814   :  { %53122 = vmatprep.subr.bf16.mxu1 %v53121_v11 }
0x1816   :  { %52543 = vmatmul.mubr.f32.vlgmr.msra.gmra.mrb[178].mxu1 %v46403_v40 }
0x1817   :  { %53124 = vmatpush3.bf16.msra.mxu1 %v53121_v11  ;;  %52577 = vmatprep.mubr.f32.mxu1 %v58742_v8 }
0x1818   :  { %53126 = vmatprep.subr.bf16.mxu1 %v53125_v48 }
0x181b   :  { %53128 = vmatpush3.bf16.msra.mxu1 %v53125_v48 }
0x181c   :  { %53130 = vmatprep.subr.bf16.mxu1 %v53129_v7 }
0x181f   :  { %53132 = vmatpush3.bf16.msra.mxu1 %v53129_v7 }
0x1820   :  { %53134 = vmatprep.subr.bf16.mxu1 %v53133_v36 }
0x1823   :  { %53136 = vmatpush3.bf16.msra.mxu1 %v53133_v36 }
0x1824   :  { %53138 = vmatprep.subr.bf16.mxu1 %v53137_v51 }
0x1827   :  { %53140 = vmatpush3.bf16.msra.mxu1 %v53137_v51 }
0x1828   :  { %53142 = vmatprep.subr.bf16.mxu1 %v53141_v33 }
0x182b   :  { %53144 = vmatpush3.bf16.msra.mxu1 %v53141_v33 }
0x182c   :  { %53146 = vmatprep.subr.bf16.mxu1 %v53145_v12 }
0x182f   :  { %53148 = vmatpush3.bf16.msra.mxu1 %v53145_v12 }
0x1830   :  { %53150 = vmatprep.subr.bf16.mxu1 %v53149_v22 }
0x1833   :  { %53152 = vmatpush3.bf16.msra.mxu1 %v53149_v22  ;;  %v58996_v22 = vmov 0.0  }
0x1834   :  { %53154 = vmatprep.subr.bf16.mxu1 %v58505_v30 }
0x1836   :  { %52578 = vmatmul.mubr.f32.vlgmr.msra.gmra.mrb[178].mxu1 %v58740_v19 }
0x1837   :  { %53156 = vmatpush3.bf16.msra.mxu1 %v58505_v30  ;;  %52612 = vmatprep.mubr.f32.mxu1 %v58742_v8  ;;  %v47013_v30 = vld [vmem:[%s58975_s1 + $0x20] sm:$0xff] }
0x1838   :  { %53158 = vmatprep.subr.bf16.mxu1 %v58513_v60 }
0x183b   :  { %53160 = vmatpush3.bf16.msra.mxu1 %v58513_v60  ;;  %v47014_v60 = vld [vmem:[%s58975_s1 + $0x28] sm:$0xff] }
0x183c   :  { %53162 = vmatprep.subr.bf16.mxu1 %v58532_v38 }
0x183f   :  { %53164 = vmatpush3.bf16.msra.mxu1 %v58532_v38  ;;  %v47015_v38 = vld [vmem:[%s58975_s1 + $0x30] sm:$0xff] }
0x1840   :  { %53166 = vmatprep.subr.bf16.mxu1 %v58542_v47 }
0x1843   :  { %53168 = vmatpush3.bf16.msra.mxu1 %v58542_v47  ;;  %v54249_v47 = vmov 0.0|0.0  }
0x1844   :  { %53170 = vmatprep.subr.bf16.mxu1 %v58584_v39  ;;  %53185 = vmatprep.subr.bf16.mxu0 %v54249_v47 }
0x1847   :  { %53172 = vmatpush3.bf16.msra.mxu1 %v58584_v39  ;;  %v47029_v39 = vand.u32 4294901760, %v47013_v30 }
0x1848   :  { %53174 = vmatprep.subr.bf16.mxu1 %v58594_v59 }
0x1849   :  { %v58902_v31 = vsub.f32 %v47013_v30, %v47029_v39  ;;  %v47646_v30 = vld [vmem:[%s58975_s1 + $0x40] ss:$0 sm:$0xff] }
0x184b   :  { %53176 = vmatpush3.bf16.msra.mxu1 %v58594_v59  ;;  %v47032_v59 = vand.u32 4294901760, %v47014_v60  ;;  %v47110_v1 = vand.u32 4294901760, %v58902_v31 }
0x184c   :  { %53178 = vmatprep.subr.bf16.mxu1 %v58604_v53 }
0x184d   :  { %v58900_v26 = vpack.c.bf16 %v47032_v59, %v47029_v39  ;;  %v58904_v10 = vsub.f32 %v47014_v60, %v47032_v59  ;;  %v47111_v45 = vsub.f32 %v58902_v31, %v47110_v1 }
0x184f   :  { %53180 = vmatpush3.bf16.msra.mxu1 %v58604_v53  ;;  %v47016_v53 = vld [vmem:[%s58975_s1 + $0x38] sm:$0xff]  ;;  %53187 = vmatpush3.bf16.msra.mxu0 %v58900_v26  ;;  %v47117_v62 = vand.u32 4294901760, %v58904_v10  ;;  %v47112_v17 = vand.u32 4294901760, %v47111_v45  ;;  %v53198_v2 = vpack.c.bf16 %v58904_v10, %v58902_v31 }
0x1850   :  { %53182 = vmatprep.subr.bf16.mxu1 %v58626_v42  ;;  %v47038_v24 = vand.u32 4294901760, %v47016_v53  ;;  %53188 = vmatprep.subr.bf16.mxu0 %v54249_v47 }
0x1851   :  { %v47118_v9 = vsub.f32 %v58904_v10, %v47117_v62  ;;  %v53210_v32 = vpack.c.bf16 %v47117_v62, %v47110_v1 }
0x1852   :  { %v58908_v46 = vsub.f32 %v47016_v53, %v47038_v24 }
0x1853   :  { %53184 = vmatpush3.bf16.msra.mxu1 %v58626_v42  ;;  %v47035_v42 = vand.u32 4294901760, %v47015_v38  ;;  %v47119_v37 = vand.u32 4294901760, %v47118_v9 }
0x1854   :  { %v47131_v63 = vand.u32 4294901760, %v58908_v46 }
0x1855   :  { %v58906_v58 = vsub.f32 %v47015_v38, %v47035_v42  ;;  %v58911_v4 = vpack.c.bf16 %v47038_v24, %v47035_v42  ;;  %v53192_v25 = vpack.c.bf16 %v47119_v37, %v47112_v17 }
0x1856   :  { %52613 = vmatmul.mubr.f32.vlgmr.msra.gmra.mrb[178].mxu1 %v58740_v19  ;;  %v47132_v8 = vsub.f32 %v58908_v46, %v47131_v63 }
0x1857   :  { %53190 = vmatpush3.bf16.msra.mxu0 %v58911_v4  ;;  %v47124_v52 = vand.u32 4294901760, %v58906_v58  ;;  %v53201_v18 = vpack.c.bf16 %v58908_v46, %v58906_v58 }
0x1858   :  { %53191 = vmatprep.subr.bf16.mxu0 %v54249_v47  ;;  %v47133_v28 = vand.u32 4294901760, %v47132_v8 }
0x1859   :  { %v47125_v19 = vsub.f32 %v58906_v58, %v47124_v52  ;;  %v53213_v40 = vpack.c.bf16 %v47131_v63, %v47124_v52 }
0x185b   :  { %v47126_v55 = vand.u32 4294901760, %v47125_v19 }
0x185d   :  { %v53195_v5 = vpack.c.bf16 %v47133_v28, %v47126_v55 }
0x1929   :  { %v52614_v21 = vpop.f32.mrb[178].mxu1 }
0x192a   :  { %v53280_v0 = vadd.f32 %v52614_v21, %v47645_v14  ;;  %v46984_v16 = vpop.f32.mrb[179].mxu1 }
0x192b   :  { %v53281_v27 = vadd.f32 %v47645_v14, %v46984_v16 }
0x192c   :  { %v46995_v41 = vadd.f32 %v53280_v0, %v58418_v23 }
0x192d   :  { %v46994_v50 = vadd.f32 %v53281_v27, %v58413_v44 }
0x192e   :  { %v47003_v56 = vsel %vm567_vm2, %v46995_v41, 0.0 }
0x192f   :  { %v47004_v54 = vrot.slane %v47003_v56, 4  ;;  %v46996_v13 = vsel %vm567_vm2, %v46994_v50, 0.0 }
0x1930   :  { %v46997_v20 = vrot.slane %v46996_v13, 4 }
0x1931   :  { %v47005_v6 = vadd.f32 %v47004_v54, %v47003_v56 }
0x1932   :  { %v46998_v29 = vadd.f32 %v46997_v20, %v46996_v13 }
0x1933   :  { %v47006_v3 = vrot.slane %v47005_v6, 2 }
0x1934   :  { %v46999_v11 = vrot.slane %v46998_v29, 2 }
0x1935   :  { %v47007_v48 = vadd.f32 %v47006_v3, %v47005_v6 }
0x1936   :  { %v47000_v7 = vadd.f32 %v46999_v11, %v46998_v29 }
0x1937   :  { %v47008_v36 = vrot.slane %v47007_v48, 1 }
0x1938   :  { %v47001_v49 = vrot.slane %v47000_v7, 1 }
0x1939   :  { %v47009_v51 = vadd.f32 %v47008_v36, %v47007_v48 }
0x193a   :  { %v47002_v57 = vadd.f32 %v47001_v49, %v47000_v7 }
0x193b   :  { %v47012_v34 = vmul.f32 0.125, %v47009_v51 }
0x193c   :  { %v47011_v23 = vmul.f32 0.125, %v47002_v57 }
0x193e   :  { %v47025_v44 = vsel %vm47024_vm5, %v47012_v34, %v47011_v23 }
0x193f   :  { %v47026_v33 = vsel %vm567_vm2, %v47025_v44, 0 }
0x1940   :  { %v47097_v61 = vand.u32 4294901760, %v47026_v33 }
0x1942   :  { %v47098_v43 = vsub.f32 %v47026_v33, %v47097_v61 }
0x1944   :  { %v47099_v12 = vand.u32 4294901760, %v47098_v43 }
0x1946   :  { %v47100_v35 = vsub.f32 %v47098_v43, %v47099_v12 }
0x1948   :  { %v47101_v15 = vand.u32 4294901760, %v47100_v35 }
0x194a   :  { %52624 = vmatmul.mubr.f32.vlgmr.msra.gmra.mrb[186].mxu0 %v47101_v15 }
0x194b   :  { %53193 = vmatpush3.bf16.msra.mxu0 %v53192_v25  ;;  %52634 = vmatprep.mubr.msk.f32.mxu0 %vm54248_vm3, %v58996_v22 }
0x194c   :  { %53194 = vmatprep.subr.bf16.mxu0 %v54249_v47 }
0x194f   :  { %53196 = vmatpush3.bf16.msra.mxu0 %v53195_v5 }
0x1950   :  { %53197 = vmatprep.subr.bf16.mxu0 %v54249_v47 }
0x1952   :  { %52635 = vmatmul.mubr.f32.vlgmr.msra.gmra.mrb[186].mxu0 %v47097_v61 }
0x1953   :  { %53199 = vmatpush3.bf16.msra.mxu0 %v53198_v2  ;;  %52645 = vmatprep.mubr.msk.f32.mxu0 %vm54248_vm3, %v58996_v22 }
0x1954   :  { %53200 = vmatprep.subr.bf16.mxu0 %v54249_v47 }
0x1957   :  { %53202 = vmatpush3.bf16.msra.mxu0 %v53201_v18 }
0x1958   :  { %53203 = vmatprep.subr.bf16.mxu0 %v54249_v47 }
0x195a   :  { %52646 = vmatmul.mubr.f32.vlgmr.msra.gmra.mrb[186].mxu0 %v47098_v43 }
0x195b   :  { %53205 = vmatpush3.bf16.msra.mxu0 %v58900_v26  ;;  %52656 = vmatprep.mubr.msk.f32.mxu0 %vm54248_vm3, %v58996_v22 }
0x195c   :  { %53206 = vmatprep.subr.bf16.mxu0 %v54249_v47 }
0x195f   :  { %53208 = vmatpush3.bf16.msra.mxu0 %v58911_v4 }
0x1960   :  { %53209 = vmatprep.subr.bf16.mxu0 %v54249_v47 }
0x1962   :  { %52657 = vmatmul.mubr.f32.vlgmr.msra.gmra.mrb[186].mxu0 %v47099_v12 }
0x1963   :  { %53211 = vmatpush3.bf16.msra.mxu0 %v53210_v32  ;;  %52667 = vmatprep.mubr.msk.f32.mxu0 %vm54248_vm3, %v58996_v22 }
0x1964   :  { %53212 = vmatprep.subr.bf16.mxu0 %v54249_v47 }
0x1967   :  { %53214 = vmatpush3.bf16.msra.mxu0 %v53213_v40 }
0x1968   :  { %53215 = vmatprep.subr.bf16.mxu0 %v54249_v47 }
0x196a   :  { %52668 = vmatmul.mubr.f32.vlgmr.msra.gmra.mrb[186].mxu0 %v47097_v61 }
0x196b   :  { %53217 = vmatpush3.bf16.msra.mxu0 %v58900_v26  ;;  %52678 = vmatprep.mubr.msk.f32.mxu0 %vm54248_vm3, %v58996_v22 }
0x196c   :  { %53218 = vmatprep.subr.bf16.mxu0 %v54249_v47 }
0x196f   :  { %53220 = vmatpush3.bf16.msra.mxu0 %v58911_v4 }
0x1972   :  { %52679 = vmatmul.mubr.f32.vlgmr.msra.gmra.mrb[186].mxu0 %v47097_v61 }
0x1a45   :  { %v47509_v60 = vpop.f32.mrb[186].mxu0 }
0x1a46   :  { %v53282_v38 = vadd.f32 %v47646_v30, %v47509_v60  ;;  %v52680_v39 = vpop.f32.mrb[187].mxu0 }
0x1a48   :  { %47513 = vst [vmem:[#allocation2] sm:$0x3] %v53282_v38 }
0x1a49   :  { %54234 = shalt.err (!%p54231_p4)
}
0x1a4a   :  { %s54235_s28 = scalar_lea.hbm %s58979_s5, 32 }
0x1a4b   :  { %p54236_p5 = scmp.ne.s32.totalorder %s58979_s5, %s54235_s28  ;;  %p54239_p6 = scmp.lt.u32.totalorder %s54235_s28, %s58979_s5 }
0x1a4d   :  { %p54241_p7 = pnand %p54239_p6, %p54236_p5 }
0x1a4f   :  { %54244 = shalt.err (!%p54241_p7)
}
0x1a50   :  { %47523 = dma.vmem_to_hbm [thread:$0]  %s47521_s25, 32, %s58979_s5, [#allocation3]  }
0x1a51   :  { %54245 = dma.done.wait [#allocation3], 32  }
0x1a52   :  { %54246 = vsyncadd [#allocation3], 4294967264 }
0x1a53   :  { %47527 = vsyncpa [#allocation3], 1 }

</bundles_post_ra>
